<compile_context>
chip_gen: v7x
topology: tpu7x:2x2x1
jax: 0.10.0
libtpu: 0.0.40
codegen_flags: <defaults>
</compile_context>

<pallas_src>
import jax
import jax.numpy as jnp
from jax.experimental import pallas as pl
from jax.experimental.pallas import tpu as pltpu

C1 = 0.01 ** 2
C2 = 0.03 ** 2


def _ssim_kernel(x_ref, y_ref, o_ref):
    # x_ref / y_ref / o_ref: (H, W, T) blocks with NC (image index) on the lane
    # axis.  Reflection padding is built in-kernel, so the refs are un-padded.
    x = x_ref[...]
    y = y_ref[...]
    H, W, _ = o_ref.shape

    def pool3x3(a):
        # Separable 3x3 mean with fused ReflectionPad2d(1).
        # Row direction (axis 0, leading dim): pad with mirrored rows 1 / H-2.
        ap = jnp.concatenate([a[1:2], a, a[H - 2:H - 1]], axis=0)          # (H+2, W, T)
        r = ap[0:H] + ap[1:H + 1] + ap[2:H + 2]                            # (H,   W, T)
        # Column direction (axis 1, sublane dim): pad with mirrored cols 1 / W-2.
        rp = jnp.concatenate([r[:, 1:2], r, r[:, W - 2:W - 1]], axis=1)    # (H, W+2, T)
        c = rp[:, 0:W] + rp[:, 1:W + 1] + rp[:, 2:W + 2]                   # (H,  W,  T)
        return c * (1.0 / 9.0)

    mu_x = pool3x3(x)
    mu_y = pool3x3(y)
    sigma_x = pool3x3(x * x) - mu_x * mu_x
    sigma_y = pool3x3(y * y) - mu_y * mu_y
    sigma_xy = pool3x3(x * y) - mu_x * mu_y

    ssim_n = (2.0 * mu_x * mu_y + C1) * (2.0 * sigma_xy + C2)
    ssim_d = (mu_x * mu_x + mu_y * mu_y + C1) * (sigma_x + sigma_y + C2)
    out = (1.0 - ssim_n / ssim_d) * 0.5          # keep exact divide (EUP slot is free)
    o_ref[...] = jnp.clip(out, 0.0, 1.0)


def _choose_tile_nc(NC, H, W):
    """Pick the NC tile (lane dim of each block).

    Budget ~14 live f32 planes of shape (H, W, T) per block (2 inputs x 2
    pipeline buffers, 2 output buffers, ~8 intermediates) against ~24 MiB so a
    block fits comfortably on every generation (incl. v7x's 64 MiB VMEM).
    """
    budget_elems = (24 << 20) // (14 * 4)
    cap = max(budget_elems // max(H * W, 1), 1)
    if NC <= cap:
        # Whole NC fits in one block.  If it can be split cleanly into lane-
        # aligned halves, prefer >= 2 grid steps so v7x's two TensorCores both
        # get work (dimension_semantics=("parallel",)).
        if NC % 256 == 0:
            return NC // 2
        return NC
    if NC % 128 != 0:
        # Can't tile the lane axis without violating the (8,128) rule unless the
        # block spans the full NC; fall back to the full axis (correctness first).
        return NC
    t = max((cap // 128) * 128, 128)
    while t > 128 and NC % t != 0:
        t -= 128
    return t


def ssim(x, y):
    """SSIM loss matching the PyTorch module's forward. x, y: (N, C, H, W) f32."""
    N, C, H, W = x.shape
    NC = N * C
    T = _choose_tile_nc(NC, H, W)

    # Layout plumbing: put NC on the lane (last) axis -> (H, W, NC).
    xt = jnp.transpose(x.reshape(NC, H, W), (1, 2, 0))
    yt = jnp.transpose(y.reshape(NC, H, W), (1, 2, 0))

    out = pl.pallas_call(
        _ssim_kernel,
        out_shape=jax.ShapeDtypeStruct((H, W, NC), x.dtype),
        grid_spec=pltpu.PrefetchScalarGridSpec(
            num_scalar_prefetch=0,
            grid=(NC // T,),
            in_specs=[
                pl.BlockSpec((H, W, T), lambda i: (0, 0, i)),
                pl.BlockSpec((H, W, T), lambda i: (0, 0, i)),
            ],
            out_specs=pl.BlockSpec((H, W, T), lambda i: (0, 0, i)),
        ),
        compiler_params=pltpu.CompilerParams(
            dimension_semantics=("parallel",),
            vmem_limit_bytes=48 * 1024 * 1024,
        ),
    )(xt, yt)

    return jnp.transpose(out, (2, 0, 1)).reshape(N, C, H, W)


def _ssim_ref(x, y):
    """Pure-JAX reference mirroring the PyTorch module."""
    def pad(a):
        return jnp.pad(a, ((0, 0), (0, 0), (1, 1), (1, 1)), mode="reflect")

    def pool(a):
        _, _, Hp, Wp = a.shape
        H, W = Hp - 2, Wp - 2
        s = jnp.zeros(a.shape[:2] + (H, W), a.dtype)
        for di in range(3):
            for dj in range(3):
                s = s + a[:, :, di:di + H, dj:dj + W]
        return s / 9.0

    xp, yp = pad(x), pad(y)
    mu_x, mu_y = pool(xp), pool(yp)
    sigma_x = pool(xp ** 2) - mu_x ** 2
    sigma_y = pool(yp ** 2) - mu_y ** 2
    sigma_xy = pool(xp * yp) - mu_x * mu_y
    n = (2 * mu_x * mu_y + C1) * (2 * sigma_xy + C2)
    d = (mu_x ** 2 + mu_y ** 2 + C1) * (sigma_x + sigma_y + C2)
    return jnp.clip((1 - n / d) / 2, 0.0, 1.0)


if __name__ == "__main__":
    key = jax.random.PRNGKey(0)
    kx, ky = jax.random.split(key)
    N, C, H, W = 2, 4, 16, 16
    x = jax.random.uniform(kx, (N, C, H, W), dtype=jnp.float32)
    y = jax.random.uniform(ky, (N, C, H, W), dtype=jnp.float32)

    out = jax.block_until_ready(ssim(x, y))
    ref = jax.block_until_ready(_ssim_ref(x, y))

    assert out.shape == (N, C, H, W)
    assert jnp.allclose(out, ref, atol=1e-5, rtol=1e-5), float(
        jnp.max(jnp.abs(out - ref))
    )
    print("KERNEL_OK")
</pallas_src>

<mosaic_0001>
module attributes {stable_mosaic.version = 11 : i64} {
  func.func @_ssim_kernel(%arg0: i32, %arg1: memref<16x16x8xf32, #tpu.memory_space<vmem>>, %arg2: memref<16x16x8xf32, #tpu.memory_space<vmem>>, %arg3: memref<16x16x8xf32, #tpu.memory_space<vmem>>) attributes {dimension_semantics = [#tpu.dimension_semantics<parallel>], iteration_bounds = array<i64: 1>, scalar_prefetch = 0 : i64, scratch_operands = 0 : i64, tpu.core_type = #tpu.core_type<tc>, window_params = [{transform_indices = @transform_0, window_bounds = array<i64: 16, 16, 8>}, {transform_indices = @transform_1, window_bounds = array<i64: 16, 16, 8>}, {transform_indices = @transform_2, window_bounds = array<i64: 16, 16, 8>}]} {
    %c0 = arith.constant 0 : index
    %c0_0 = arith.constant 0 : index
    %c0_1 = arith.constant 0 : index
    %0 = vector.load %arg1[%c0, %c0_0, %c0_1] : memref<16x16x8xf32, #tpu.memory_space<vmem>>, vector<16x16x8xf32>
    %c0_2 = arith.constant 0 : index
    %c0_3 = arith.constant 0 : index
    %c0_4 = arith.constant 0 : index
    %1 = vector.load %arg2[%c0_2, %c0_3, %c0_4] : memref<16x16x8xf32, #tpu.memory_space<vmem>>, vector<16x16x8xf32>
    %2 = vector.extract_strided_slice %0 {offsets = [1, 0, 0], sizes = [1, 16, 8], strides = [1, 1, 1]} : vector<16x16x8xf32> to vector<1x16x8xf32>
    %3 = vector.extract_strided_slice %0 {offsets = [14, 0, 0], sizes = [1, 16, 8], strides = [1, 1, 1]} : vector<16x16x8xf32> to vector<1x16x8xf32>
    %4 = tpu.concatenate %2, %0, %3 in 0 : vector<1x16x8xf32>, vector<16x16x8xf32>, vector<1x16x8xf32> -> vector<18x16x8xf32>
    %5 = vector.extract_strided_slice %4 {offsets = [0, 0, 0], sizes = [16, 16, 8], strides = [1, 1, 1]} : vector<18x16x8xf32> to vector<16x16x8xf32>
    %6 = vector.extract_strided_slice %4 {offsets = [1, 0, 0], sizes = [16, 16, 8], strides = [1, 1, 1]} : vector<18x16x8xf32> to vector<16x16x8xf32>
    %7 = arith.addf %5, %6 : vector<16x16x8xf32>
    %8 = vector.extract_strided_slice %4 {offsets = [2, 0, 0], sizes = [16, 16, 8], strides = [1, 1, 1]} : vector<18x16x8xf32> to vector<16x16x8xf32>
    %9 = arith.addf %7, %8 : vector<16x16x8xf32>
    %10 = vector.extract_strided_slice %9 {offsets = [0, 1, 0], sizes = [16, 1, 8], strides = [1, 1, 1]} : vector<16x16x8xf32> to vector<16x1x8xf32>
    %11 = vector.extract_strided_slice %9 {offsets = [0, 14, 0], sizes = [16, 1, 8], strides = [1, 1, 1]} : vector<16x16x8xf32> to vector<16x1x8xf32>
    %12 = tpu.concatenate %10, %9, %11 in 1 : vector<16x1x8xf32>, vector<16x16x8xf32>, vector<16x1x8xf32> -> vector<16x18x8xf32>
    %13 = vector.extract_strided_slice %12 {offsets = [0, 0, 0], sizes = [16, 16, 8], strides = [1, 1, 1]} : vector<16x18x8xf32> to vector<16x16x8xf32>
    %14 = vector.extract_strided_slice %12 {offsets = [0, 1, 0], sizes = [16, 16, 8], strides = [1, 1, 1]} : vector<16x18x8xf32> to vector<16x16x8xf32>
    %15 = arith.addf %13, %14 : vector<16x16x8xf32>
    %16 = vector.extract_strided_slice %12 {offsets = [0, 2, 0], sizes = [16, 16, 8], strides = [1, 1, 1]} : vector<16x18x8xf32> to vector<16x16x8xf32>
    %17 = arith.addf %15, %16 : vector<16x16x8xf32>
    %cst = arith.constant 0.111111112 : f32
    %18 = vector.broadcast %cst : f32 to vector<16x16x8xf32>
    %19 = arith.mulf %17, %18 : vector<16x16x8xf32>
    %20 = vector.extract_strided_slice %1 {offsets = [1, 0, 0], sizes = [1, 16, 8], strides = [1, 1, 1]} : vector<16x16x8xf32> to vector<1x16x8xf32>
    %21 = vector.extract_strided_slice %1 {offsets = [14, 0, 0], sizes = [1, 16, 8], strides = [1, 1, 1]} : vector<16x16x8xf32> to vector<1x16x8xf32>
    %22 = tpu.concatenate %20, %1, %21 in 0 : vector<1x16x8xf32>, vector<16x16x8xf32>, vector<1x16x8xf32> -> vector<18x16x8xf32>
    %23 = vector.extract_strided_slice %22 {offsets = [0, 0, 0], sizes = [16, 16, 8], strides = [1, 1, 1]} : vector<18x16x8xf32> to vector<16x16x8xf32>
    %24 = vector.extract_strided_slice %22 {offsets = [1, 0, 0], sizes = [16, 16, 8], strides = [1, 1, 1]} : vector<18x16x8xf32> to vector<16x16x8xf32>
    %25 = arith.addf %23, %24 : vector<16x16x8xf32>
    %26 = vector.extract_strided_slice %22 {offsets = [2, 0, 0], sizes = [16, 16, 8], strides = [1, 1, 1]} : vector<18x16x8xf32> to vector<16x16x8xf32>
    %27 = arith.addf %25, %26 : vector<16x16x8xf32>
    %28 = vector.extract_strided_slice %27 {offsets = [0, 1, 0], sizes = [16, 1, 8], strides = [1, 1, 1]} : vector<16x16x8xf32> to vector<16x1x8xf32>
    %29 = vector.extract_strided_slice %27 {offsets = [0, 14, 0], sizes = [16, 1, 8], strides = [1, 1, 1]} : vector<16x16x8xf32> to vector<16x1x8xf32>
    %30 = tpu.concatenate %28, %27, %29 in 1 : vector<16x1x8xf32>, vector<16x16x8xf32>, vector<16x1x8xf32> -> vector<16x18x8xf32>
    %31 = vector.extract_strided_slice %30 {offsets = [0, 0, 0], sizes = [16, 16, 8], strides = [1, 1, 1]} : vector<16x18x8xf32> to vector<16x16x8xf32>
    %32 = vector.extract_strided_slice %30 {offsets = [0, 1, 0], sizes = [16, 16, 8], strides = [1, 1, 1]} : vector<16x18x8xf32> to vector<16x16x8xf32>
    %33 = arith.addf %31, %32 : vector<16x16x8xf32>
    %34 = vector.extract_strided_slice %30 {offsets = [0, 2, 0], sizes = [16, 16, 8], strides = [1, 1, 1]} : vector<16x18x8xf32> to vector<16x16x8xf32>
    %35 = arith.addf %33, %34 : vector<16x16x8xf32>
    %cst_5 = arith.constant 0.111111112 : f32
    %36 = vector.broadcast %cst_5 : f32 to vector<16x16x8xf32>
    %37 = arith.mulf %35, %36 : vector<16x16x8xf32>
    %38 = arith.mulf %0, %0 : vector<16x16x8xf32>
    %39 = vector.extract_strided_slice %38 {offsets = [1, 0, 0], sizes = [1, 16, 8], strides = [1, 1, 1]} : vector<16x16x8xf32> to vector<1x16x8xf32>
    %40 = vector.extract_strided_slice %38 {offsets = [14, 0, 0], sizes = [1, 16, 8], strides = [1, 1, 1]} : vector<16x16x8xf32> to vector<1x16x8xf32>
    %41 = tpu.concatenate %39, %38, %40 in 0 : vector<1x16x8xf32>, vector<16x16x8xf32>, vector<1x16x8xf32> -> vector<18x16x8xf32>
    %42 = vector.extract_strided_slice %41 {offsets = [0, 0, 0], sizes = [16, 16, 8], strides = [1, 1, 1]} : vector<18x16x8xf32> to vector<16x16x8xf32>
    %43 = vector.extract_strided_slice %41 {offsets = [1, 0, 0], sizes = [16, 16, 8], strides = [1, 1, 1]} : vector<18x16x8xf32> to vector<16x16x8xf32>
    %44 = arith.addf %42, %43 : vector<16x16x8xf32>
    %45 = vector.extract_strided_slice %41 {offsets = [2, 0, 0], sizes = [16, 16, 8], strides = [1, 1, 1]} : vector<18x16x8xf32> to vector<16x16x8xf32>
    %46 = arith.addf %44, %45 : vector<16x16x8xf32>
    %47 = vector.extract_strided_slice %46 {offsets = [0, 1, 0], sizes = [16, 1, 8], strides = [1, 1, 1]} : vector<16x16x8xf32> to vector<16x1x8xf32>
    %48 = vector.extract_strided_slice %46 {offsets = [0, 14, 0], sizes = [16, 1, 8], strides = [1, 1, 1]} : vector<16x16x8xf32> to vector<16x1x8xf32>
    %49 = tpu.concatenate %47, %46, %48 in 1 : vector<16x1x8xf32>, vector<16x16x8xf32>, vector<16x1x8xf32> -> vector<16x18x8xf32>
    %50 = vector.extract_strided_slice %49 {offsets = [0, 0, 0], sizes = [16, 16, 8], strides = [1, 1, 1]} : vector<16x18x8xf32> to vector<16x16x8xf32>
    %51 = vector.extract_strided_slice %49 {offsets = [0, 1, 0], sizes = [16, 16, 8], strides = [1, 1, 1]} : vector<16x18x8xf32> to vector<16x16x8xf32>
    %52 = arith.addf %50, %51 : vector<16x16x8xf32>
    %53 = vector.extract_strided_slice %49 {offsets = [0, 2, 0], sizes = [16, 16, 8], strides = [1, 1, 1]} : vector<16x18x8xf32> to vector<16x16x8xf32>
    %54 = arith.addf %52, %53 : vector<16x16x8xf32>
    %cst_6 = arith.constant 0.111111112 : f32
    %55 = vector.broadcast %cst_6 : f32 to vector<16x16x8xf32>
    %56 = arith.mulf %54, %55 : vector<16x16x8xf32>
    %57 = arith.mulf %19, %19 : vector<16x16x8xf32>
    %58 = arith.subf %56, %57 : vector<16x16x8xf32>
    %59 = arith.mulf %1, %1 : vector<16x16x8xf32>
    %60 = vector.extract_strided_slice %59 {offsets = [1, 0, 0], sizes = [1, 16, 8], strides = [1, 1, 1]} : vector<16x16x8xf32> to vector<1x16x8xf32>
    %61 = vector.extract_strided_slice %59 {offsets = [14, 0, 0], sizes = [1, 16, 8], strides = [1, 1, 1]} : vector<16x16x8xf32> to vector<1x16x8xf32>
    %62 = tpu.concatenate %60, %59, %61 in 0 : vector<1x16x8xf32>, vector<16x16x8xf32>, vector<1x16x8xf32> -> vector<18x16x8xf32>
    %63 = vector.extract_strided_slice %62 {offsets = [0, 0, 0], sizes = [16, 16, 8], strides = [1, 1, 1]} : vector<18x16x8xf32> to vector<16x16x8xf32>
    %64 = vector.extract_strided_slice %62 {offsets = [1, 0, 0], sizes = [16, 16, 8], strides = [1, 1, 1]} : vector<18x16x8xf32> to vector<16x16x8xf32>
    %65 = arith.addf %63, %64 : vector<16x16x8xf32>
    %66 = vector.extract_strided_slice %62 {offsets = [2, 0, 0], sizes = [16, 16, 8], strides = [1, 1, 1]} : vector<18x16x8xf32> to vector<16x16x8xf32>
    %67 = arith.addf %65, %66 : vector<16x16x8xf32>
    %68 = vector.extract_strided_slice %67 {offsets = [0, 1, 0], sizes = [16, 1, 8], strides = [1, 1, 1]} : vector<16x16x8xf32> to vector<16x1x8xf32>
    %69 = vector.extract_strided_slice %67 {offsets = [0, 14, 0], sizes = [16, 1, 8], strides = [1, 1, 1]} : vector<16x16x8xf32> to vector<16x1x8xf32>
    %70 = tpu.concatenate %68, %67, %69 in 1 : vector<16x1x8xf32>, vector<16x16x8xf32>, vector<16x1x8xf32> -> vector<16x18x8xf32>
    %71 = vector.extract_strided_slice %70 {offsets = [0, 0, 0], sizes = [16, 16, 8], strides = [1, 1, 1]} : vector<16x18x8xf32> to vector<16x16x8xf32>
    %72 = vector.extract_strided_slice %70 {offsets = [0, 1, 0], sizes = [16, 16, 8], strides = [1, 1, 1]} : vector<16x18x8xf32> to vector<16x16x8xf32>
    %73 = arith.addf %71, %72 : vector<16x16x8xf32>
    %74 = vector.extract_strided_slice %70 {offsets = [0, 2, 0], sizes = [16, 16, 8], strides = [1, 1, 1]} : vector<16x18x8xf32> to vector<16x16x8xf32>
    %75 = arith.addf %73, %74 : vector<16x16x8xf32>
    %cst_7 = arith.constant 0.111111112 : f32
    %76 = vector.broadcast %cst_7 : f32 to vector<16x16x8xf32>
    %77 = arith.mulf %75, %76 : vector<16x16x8xf32>
    %78 = arith.mulf %37, %37 : vector<16x16x8xf32>
    %79 = arith.subf %77, %78 : vector<16x16x8xf32>
    %80 = arith.mulf %0, %1 : vector<16x16x8xf32>
    %81 = vector.extract_strided_slice %80 {offsets = [1, 0, 0], sizes = [1, 16, 8], strides = [1, 1, 1]} : vector<16x16x8xf32> to vector<1x16x8xf32>
    %82 = vector.extract_strided_slice %80 {offsets = [14, 0, 0], sizes = [1, 16, 8], strides = [1, 1, 1]} : vector<16x16x8xf32> to vector<1x16x8xf32>
    %83 = tpu.concatenate %81, %80, %82 in 0 : vector<1x16x8xf32>, vector<16x16x8xf32>, vector<1x16x8xf32> -> vector<18x16x8xf32>
    %84 = vector.extract_strided_slice %83 {offsets = [0, 0, 0], sizes = [16, 16, 8], strides = [1, 1, 1]} : vector<18x16x8xf32> to vector<16x16x8xf32>
    %85 = vector.extract_strided_slice %83 {offsets = [1, 0, 0], sizes = [16, 16, 8], strides = [1, 1, 1]} : vector<18x16x8xf32> to vector<16x16x8xf32>
    %86 = arith.addf %84, %85 : vector<16x16x8xf32>
    %87 = vector.extract_strided_slice %83 {offsets = [2, 0, 0], sizes = [16, 16, 8], strides = [1, 1, 1]} : vector<18x16x8xf32> to vector<16x16x8xf32>
    %88 = arith.addf %86, %87 : vector<16x16x8xf32>
    %89 = vector.extract_strided_slice %88 {offsets = [0, 1, 0], sizes = [16, 1, 8], strides = [1, 1, 1]} : vector<16x16x8xf32> to vector<16x1x8xf32>
    %90 = vector.extract_strided_slice %88 {offsets = [0, 14, 0], sizes = [16, 1, 8], strides = [1, 1, 1]} : vector<16x16x8xf32> to vector<16x1x8xf32>
    %91 = tpu.concatenate %89, %88, %90 in 1 : vector<16x1x8xf32>, vector<16x16x8xf32>, vector<16x1x8xf32> -> vector<16x18x8xf32>
    %92 = vector.extract_strided_slice %91 {offsets = [0, 0, 0], sizes = [16, 16, 8], strides = [1, 1, 1]} : vector<16x18x8xf32> to vector<16x16x8xf32>
    %93 = vector.extract_strided_slice %91 {offsets = [0, 1, 0], sizes = [16, 16, 8], strides = [1, 1, 1]} : vector<16x18x8xf32> to vector<16x16x8xf32>
    %94 = arith.addf %92, %93 : vector<16x16x8xf32>
    %95 = vector.extract_strided_slice %91 {offsets = [0, 2, 0], sizes = [16, 16, 8], strides = [1, 1, 1]} : vector<16x18x8xf32> to vector<16x16x8xf32>
    %96 = arith.addf %94, %95 : vector<16x16x8xf32>
    %cst_8 = arith.constant 0.111111112 : f32
    %97 = vector.broadcast %cst_8 : f32 to vector<16x16x8xf32>
    %98 = arith.mulf %96, %97 : vector<16x16x8xf32>
    %99 = arith.mulf %19, %37 : vector<16x16x8xf32>
    %100 = arith.subf %98, %99 : vector<16x16x8xf32>
    %cst_9 = arith.constant 2.000000e+00 : f32
    %101 = vector.broadcast %cst_9 : f32 to vector<16x16x8xf32>
    %102 = arith.mulf %101, %19 : vector<16x16x8xf32>
    %103 = arith.mulf %102, %37 : vector<16x16x8xf32>
    %cst_10 = arith.constant 9.99999974E-5 : f32
    %104 = vector.broadcast %cst_10 : f32 to vector<16x16x8xf32>
    %105 = arith.addf %103, %104 : vector<16x16x8xf32>
    %cst_11 = arith.constant 2.000000e+00 : f32
    %106 = vector.broadcast %cst_11 : f32 to vector<16x16x8xf32>
    %107 = arith.mulf %106, %100 : vector<16x16x8xf32>
    %cst_12 = arith.constant 8.99999984E-4 : f32
    %108 = vector.broadcast %cst_12 : f32 to vector<16x16x8xf32>
    %109 = arith.addf %107, %108 : vector<16x16x8xf32>
    %110 = arith.mulf %105, %109 : vector<16x16x8xf32>
    %111 = arith.mulf %19, %19 : vector<16x16x8xf32>
    %112 = arith.mulf %37, %37 : vector<16x16x8xf32>
    %113 = arith.addf %111, %112 : vector<16x16x8xf32>
    %cst_13 = arith.constant 9.99999974E-5 : f32
    %114 = vector.broadcast %cst_13 : f32 to vector<16x16x8xf32>
    %115 = arith.addf %113, %114 : vector<16x16x8xf32>
    %116 = arith.addf %58, %79 : vector<16x16x8xf32>
    %cst_14 = arith.constant 8.99999984E-4 : f32
    %117 = vector.broadcast %cst_14 : f32 to vector<16x16x8xf32>
    %118 = arith.addf %116, %117 : vector<16x16x8xf32>
    %119 = arith.mulf %115, %118 : vector<16x16x8xf32>
    %120 = arith.divf %110, %119 : vector<16x16x8xf32>
    %cst_15 = arith.constant 1.000000e+00 : f32
    %121 = vector.broadcast %cst_15 : f32 to vector<16x16x8xf32>
    %122 = arith.subf %121, %120 : vector<16x16x8xf32>
    %cst_16 = arith.constant 5.000000e-01 : f32
    %123 = vector.broadcast %cst_16 : f32 to vector<16x16x8xf32>
    %124 = arith.mulf %122, %123 : vector<16x16x8xf32>
    %cst_17 = arith.constant 0.000000e+00 : f32
    %cst_18 = arith.constant 1.000000e+00 : f32
    %125 = vector.broadcast %cst_17 : f32 to vector<16x16x8xf32>
    %126 = arith.maximumf %125, %124 : vector<16x16x8xf32>
    %127 = vector.broadcast %cst_18 : f32 to vector<16x16x8xf32>
    %128 = arith.minimumf %127, %126 : vector<16x16x8xf32>
    %c0_19 = arith.constant 0 : index
    %c0_20 = arith.constant 0 : index
    %c0_21 = arith.constant 0 : index
    %129 = vector.load %arg3[%c0_19, %c0_20, %c0_21] : memref<16x16x8xf32, #tpu.memory_space<vmem>>, vector<16x16x8xf32>
    tpu.vector_store %arg3[%c0_19, %c0_20, %c0_21], %128 {strides = array<i32>} : memref<16x16x8xf32, #tpu.memory_space<vmem>>, vector<16x16x8xf32>,
    return
  }
  func.func @transform_0(%arg0: i32) -> (i32, i32, i32) {
    %c0_i32 = arith.constant 0 : i32
    %c0_i32_0 = arith.constant 0 : i32
    %c0_i32_1 = arith.constant 0 : i32
    return %c0_i32, %c0_i32_0, %arg0 : i32, i32, i32
  }
  func.func @transform_1(%arg0: i32) -> (i32, i32, i32) {
    %c0_i32 = arith.constant 0 : i32
    %c0_i32_0 = arith.constant 0 : i32
    %c0_i32_1 = arith.constant 0 : i32
    return %c0_i32, %c0_i32_0, %arg0 : i32, i32, i32
  }
  func.func @transform_2(%arg0: i32) -> (i32, i32, i32) {
    %c0_i32 = arith.constant 0 : i32
    %c0_i32_0 = arith.constant 0 : i32
    %c0_i32_1 = arith.constant 0 : i32
    return %c0_i32, %c0_i32_0, %arg0 : i32, i32, i32
  }
}

</mosaic_0001>

<bundles_post_ra>
// kernel: tpu_custom_call.1
= control target key start
LH: loop header
LB: loop body
LE: loop exit
PB: predicated region body
PF: predicated region fallthrough
CT: control target
= control target key end

     0   :  { %vm201_vm0 = vcmask 1040384   ;;  %vm394_vm1 = vcmask 1046528   ;;  %vm539_vm2 = vcmask 1045504   ;;  %vm4100_vm3 = vcmask 64512   ;;  %s10829_s0 = inlined_call_operand.vmem [shape: f32[16,16,8], index: 0, kind: input, shape index: {}]   ;;  %s10830_s1 = inlined_call_operand.vmem [shape: f32[16,16,8], index: 1, kind: input, shape index: {}]   ;;  %s10831_s2 = inlined_call_operand.vmem [shape: f32[16,16,8], index: 2, kind: output, shape index: {}]  }
   0x1   :  { %v11_v0 = vld [vmem:[%s10829_s0] sm:$0xff]  ;;  %v13_v1 = vld [vmem:[%s10829_s0 + $0x10] sm:$0xff]  ;;  %v12_v2 = vld [vmem:[%s10829_s0 + $0x8] sm:$0xff] }
   0x2   :  { %v14_v3 = vld [vmem:[%s10829_s0 + $0x18] sm:$0xff]  ;;  %v15_v4 = vld [vmem:[%s10829_s0 + $0x20] sm:$0xff]  ;;  %v16_v5 = vld [vmem:[%s10829_s0 + $0x28] sm:$0xff]  ;;  %v75_v9 = vadd.f32 %v13_v1, %v11_v0 }
   0x3   :  { %v17_v6 = vld [vmem:[%s10829_s0 + $0x30] sm:$0xff]  ;;  %v18_v7 = vld [vmem:[%s10829_s0 + $0x38] sm:$0xff]  ;;  %v19_v8 = vld [vmem:[%s10829_s0 + $0x40] sm:$0xff]  ;;  %v76_v13 = vadd.f32 %v14_v3, %v12_v2  ;;  %v77_v17 = vadd.f32 %v15_v4, %v13_v1  ;;  %v78_v21 = vadd.f32 %v16_v5, %v14_v3 }
   0x4   :  { %v20_v10 = vld [vmem:[%s10829_s0 + $0x48] sm:$0xff]  ;;  %v21_v11 = vld [vmem:[%s10829_s0 + $0x50] sm:$0xff]  ;;  %v22_v12 = vld [vmem:[%s10829_s0 + $0x58] sm:$0xff]  ;;  %v79_v22 = vadd.f32 %v17_v6, %v15_v4  ;;  %v80_v23 = vadd.f32 %v18_v7, %v16_v5  ;;  %v81_v24 = vadd.f32 %v19_v8, %v17_v6  ;;  %v4407_v31 = vadd.f32 %v75_v9, %v13_v1 }
   0x5   :  { %v23_v14 = vld [vmem:[%s10829_s0 + $0x60] sm:$0xff]  ;;  %v24_v15 = vld [vmem:[%s10829_s0 + $0x68] sm:$0xff]  ;;  %v25_v16 = vld [vmem:[%s10829_s0 + $0x70] sm:$0xff]  ;;  %v82_v28 = vadd.f32 %v20_v10, %v18_v7  ;;  %v83_v29 = vadd.f32 %v21_v11, %v19_v8  ;;  %v84_v30 = vadd.f32 %v22_v12, %v20_v10  ;;  %v4418_v38 = vadd.f32 %v76_v13, %v14_v3 }
   0x6   :  { %v26_v18 = vld [vmem:[%s10829_s0 + $0x78] sm:$0xff]  ;;  %v27_v19 = vld [vmem:[%s10829_s0 + $0x80] sm:$0xff]  ;;  %v28_v20 = vld [vmem:[%s10829_s0 + $0x88] sm:$0xff]  ;;  %v85_v35 = vadd.f32 %v23_v14, %v21_v11  ;;  %v86_v36 = vadd.f32 %v24_v15, %v22_v12  ;;  %v87_v37 = vadd.f32 %v25_v16, %v23_v14  ;;  %v4429_v45 = vadd.f32 %v75_v9, %v15_v4 }
   0x7   :  { %v29_v25 = vld [vmem:[%s10829_s0 + $0x90] sm:$0xff]  ;;  %v30_v26 = vld [vmem:[%s10829_s0 + $0x98] sm:$0xff]  ;;  %v31_v27 = vld [vmem:[%s10829_s0 + $0xa0] sm:$0xff]  ;;  %v88_v42 = vadd.f32 %v26_v18, %v24_v15  ;;  %v89_v43 = vadd.f32 %v27_v19, %v25_v16  ;;  %v90_v44 = vadd.f32 %v28_v20, %v26_v18  ;;  %v4440_v52 = vadd.f32 %v76_v13, %v16_v5 }
   0x8   :  { %v32_v32 = vld [vmem:[%s10829_s0 + $0xa8] sm:$0xff]  ;;  %v33_v33 = vld [vmem:[%s10829_s0 + $0xb0] sm:$0xff]  ;;  %v34_v34 = vld [vmem:[%s10829_s0 + $0xb8] sm:$0xff]  ;;  %v91_v49 = vadd.f32 %v29_v25, %v27_v19  ;;  %v92_v50 = vadd.f32 %v30_v26, %v28_v20  ;;  %v93_v51 = vadd.f32 %v31_v27, %v29_v25  ;;  %v4448_v58 = vadd.f32 %v77_v17, %v17_v6 }
   0x9   :  { %v35_v39 = vld [vmem:[%s10829_s0 + $0xc0] sm:$0xff]  ;;  %v36_v40 = vld [vmem:[%s10829_s0 + $0xc8] sm:$0xff]  ;;  %v37_v41 = vld [vmem:[%s10829_s0 + $0xd0] sm:$0xff]  ;;  %11511 = vst [vmem:[#allocation2_spill] sm:$0xff] %v4440_v52  ;;  %v94_v55 = vadd.f32 %v32_v32, %v30_v26  ;;  %v95_v56 = vadd.f32 %v33_v33, %v31_v27  ;;  %v96_v57 = vadd.f32 %v34_v34, %v32_v32  ;;  %v4450_v62 = vadd.f32 %v78_v21, %v18_v7 }
   0xa   :  { %v38_v46 = vld [vmem:[%s10829_s0 + $0xd8] sm:$0xff]  ;;  %v39_v47 = vld [vmem:[%s10829_s0 + $0xe0] sm:$0xff]  ;;  %v40_v48 = vld [vmem:[%s10829_s0 + $0xe8] sm:$0xff]  ;;  %v97_v59 = vadd.f32 %v35_v39, %v33_v33  ;;  %v98_v60 = vadd.f32 %v36_v40, %v34_v34  ;;  %v99_v61 = vadd.f32 %v37_v41, %v35_v39  ;;  %v4452_v2 = vadd.f32 %v79_v22, %v19_v8 }
   0xb   :  { %v41_v53 = vld [vmem:[%s10829_s0 + $0xf0] sm:$0xff]  ;;  %v42_v54 = vld [vmem:[%s10829_s0 + $0xf8] sm:$0xff]  ;;  %v100_v63 = vadd.f32 %v38_v46, %v36_v40  ;;  %v101_v0 = vadd.f32 %v39_v47, %v37_v41  ;;  %v102_v1 = vadd.f32 %v40_v48, %v38_v46  ;;  %v4454_v5 = vadd.f32 %v80_v23, %v20_v10 }
   0xc   :  { %v103_v3 = vadd.f32 %v41_v53, %v39_v47  ;;  %v104_v4 = vadd.f32 %v42_v54, %v40_v48  ;;  %v4456_v9 = vadd.f32 %v81_v24, %v21_v11  ;;  %v4458_v13 = vadd.f32 %v82_v28, %v22_v12  ;;  %v4496_v23 = vld [vmem:[%s10830_s1 + $0x10] sm:$0xff]  ;;  %v44_v28 = vld [vmem:[%s10830_s1 + $0x8] sm:$0xff] }
   0xd   :  { %v4460_v6 = vadd.f32 %v83_v29, %v23_v14  ;;  %v4462_v17 = vadd.f32 %v84_v30, %v24_v15  ;;  %v4464_v52 = vadd.f32 %v85_v35, %v25_v16  ;;  %v4466_v7 = vadd.f32 %v86_v36, %v26_v18  ;;  %11516 = vst [vmem:[#allocation7_spill] sm:$0xff] %v4496_v23  ;;  %v4512_v29 = vld [vmem:[%s10830_s1 + $0x18] sm:$0xff] }
   0xe   :  { %v4468_v21 = vadd.f32 %v87_v37, %v27_v19  ;;  %v4470_v8 = vadd.f32 %v88_v42, %v28_v20  ;;  %v4472_v22 = vadd.f32 %v89_v43, %v29_v25  ;;  %v4474_v10 = vadd.f32 %v90_v44, %v30_v26  ;;  %v43_v20 = vld [vmem:[%s10830_s1] sm:$0xff]  ;;  %11519 = vst [vmem:[#allocation10_spill] sm:$0xff] %v4512_v29 }
   0xf   :  { %v4476_v11 = vadd.f32 %v91_v49, %v31_v27  ;;  %v4478_v12 = vadd.f32 %v92_v50, %v32_v32  ;;  %v4480_v14 = vadd.f32 %v93_v51, %v33_v33  ;;  %v4482_v15 = vadd.f32 %v94_v55, %v34_v34 }
  0x10   :  { %11512 = vst [vmem:[#allocation3_spill] sm:$0xff] %v4474_v10  ;;  %v4484_v16 = vadd.f32 %v95_v56, %v35_v39  ;;  %v4486_v18 = vadd.f32 %v96_v57, %v36_v40  ;;  %v4488_v19 = vadd.f32 %v97_v59, %v37_v41  ;;  %v4498_v24 = vadd.f32 %v98_v60, %v38_v46  ;;  %v4528_v40 = vld [vmem:[%s10830_s1 + $0x20] sm:$0xff] }
  0x11   :  { %11513 = vst [vmem:[#allocation4_spill] sm:$0xff] %v4478_v12  ;;  %11514 = vst [vmem:[#allocation5_spill] sm:$0xff] %v4482_v15  ;;  %v4500_v25 = vadd.f32 %v99_v61, %v39_v47  ;;  %v4502_v26 = vadd.f32 %v100_v63, %v40_v48  ;;  %v4504_v27 = vadd.f32 %v101_v0, %v41_v53  ;;  %v10835_v53 = vrot.slane %v4429_v45, 7 }
  0x12   :  { %11515 = vst [vmem:[#allocation6_spill] sm:$0xff] %v4486_v18  ;;  %11517 = vst [vmem:[#allocation8_spill] sm:$0xff] %v4498_v24  ;;  %v4514_v30 = vadd.f32 %v102_v1, %v42_v54  ;;  %v4516_v32 = vadd.f32 %v103_v3, %v39_v47  ;;  %v4518_v33 = vadd.f32 %v104_v4, %v40_v48  ;;  %v10836_v47 = vrot.slane %v4407_v31, 7  ;;  %v11525_v54 = vld [vmem:[#allocation2_spill] sm:$0xff] }
  0x13   :  { %11518 = vst [vmem:[#allocation9_spill] sm:$0xff] %v4502_v26  ;;  %11522 = vst [vmem:[#allocation13_spill] sm:$0xff] %v4528_v40  ;;  %v4534_v44 = vadd.f32 %v4496_v23, %v43_v20  ;;  %v10833_v48 = vrot.slane %v4418_v38, 7  ;;  %v4540_v49 = vadd.f32 %v4512_v29, %v44_v28  ;;  %v10834_v55 = vrot.slane %v11525_v54, 7 }
  0x14   :  { %11520 = vst [vmem:[#allocation11_spill] sm:$0xff] %v4514_v30  ;;  %11521 = vst [vmem:[#allocation12_spill] sm:$0xff] %v4518_v33  ;;  %v4551_v60 = vadd.f32 %v4528_v40, %v4496_v23  ;;  %v10838_v0 = vrot.slane %v4448_v58, 7  ;;  %v10837_v1 = vrot.slane %v4450_v62, 7  ;;  %v211_v4 = vrot.slane %v4452_v2, 7 }
  0x15   :  { %11523 = vst [vmem:[#allocation14_spill] sm:$0xff] %v4534_v44  ;;  %11524 = vst [vmem:[#allocation15_spill] sm:$0xff] %v4540_v49  ;;  %v4562_v3 = vsel %vm201_vm0, %v10836_v47, %v10833_v48  ;;  %v10839_v20 = vrot.slane %v4454_v5, 7  ;;  %v214_v28 = vrot.slane %v4456_v9, 7  ;;  %v4572_v63 = vsel %vm201_vm0, %v10835_v53, %v10834_v55 }
  0x16   :  { %11526 = vst [vmem:[#allocation2_spill] sm:$0xff] %v4551_v60  ;;  %11527 = vst [vmem:[#allocation16_spill] sm:$0xff] %v4572_v63  ;;  %v10840_v61 = vrot.slane %v4458_v13, 7  ;;  %v217_v59 = vrot.slane %v4460_v6, 7  ;;  %v10841_v48 = vrot.slane %v4462_v17, 7  ;;  %v220_v57 = vrot.slane %v4464_v52, 7 }
  0x17   :  { %v10843_v56 = vrot.slane %v4466_v7, 7  ;;  %v223_v51 = vrot.slane %v4468_v21, 7  ;;  %v10845_v50 = vrot.slane %v4470_v8, 7  ;;  %v226_v46 = vrot.slane %v4472_v22, 7 }
  0x18   :  { %v229_v55 = vrot.slane %v4476_v11, 7  ;;  %v232_v41 = vrot.slane %v4480_v14, 7  ;;  %v235_v37 = vrot.slane %v4484_v16, 7  ;;  %v238_v35 = vrot.slane %v4488_v19, 7 }
  0x19   :  { %v241_v34 = vrot.slane %v4500_v25, 7  ;;  %v4598_v42 = vsel %vm201_vm0, %v10838_v0, %v10837_v1  ;;  %v4603_v39 = vsel %vm201_vm0, %v211_v4, %v10839_v20  ;;  %v244_v36 = vrot.slane %v4504_v27, 7 }
  0x1a   :  { %11528 = vst [vmem:[#allocation17_spill] sm:$0xff] %v4598_v42  ;;  %11529 = vst [vmem:[#allocation18_spill] sm:$0xff] %v4603_v39  ;;  %v4610_v47 = vsel %vm201_vm0, %v214_v28, %v10840_v61  ;;  %v4615_v43 = vsel %vm201_vm0, %v217_v59, %v10841_v48  ;;  %v247_v1 = vrot.slane %v4516_v32, 7  ;;  %v4622_v20 = vsel %vm201_vm0, %v220_v57, %v10843_v56 }
  0x1b   :  { %11530 = vst [vmem:[#allocation19_spill] sm:$0xff] %v4610_v47  ;;  %11531 = vst [vmem:[#allocation20_spill] sm:$0xff] %v4615_v43  ;;  %v4627_v53 = vsel %vm201_vm0, %v223_v51, %v10845_v50  ;;  %v11534_v61 = vrot.slane %v4474_v10, 7  ;;  %v11536_v48 = vrot.slane %v4478_v12, 7  ;;  %v11538_v0 = vrot.slane %v4482_v15, 7 }
  0x1c   :  { %11532 = vst [vmem:[#allocation21_spill] sm:$0xff] %v4622_v20  ;;  %11533 = vst [vmem:[#allocation22_spill] sm:$0xff] %v4627_v53  ;;  %v11540_v44 = vrot.slane %v4486_v18, 7  ;;  %v11542_v23 = vrot.slane %v4498_v24, 7  ;;  %v11544_v40 = vrot.slane %v4502_v26, 7  ;;  %v11546_v29 = vrot.slane %v4514_v30, 7 }
  0x1d   :  { %v4632_v60 = vsel %vm201_vm0, %v226_v46, %v11534_v61  ;;  %v4637_v49 = vsel %vm201_vm0, %v229_v55, %v11536_v48  ;;  %v4642_v56 = vsel %vm201_vm0, %v232_v41, %v11538_v0  ;;  %v307_v53 = vrot.slane %v4478_v12, 5 }
  0x1e   :  { %11535 = vst [vmem:[#allocation23_spill] sm:$0xff] %v4632_v60  ;;  %11537 = vst [vmem:[#allocation24_spill] sm:$0xff] %v4637_v49  ;;  %v4647_v50 = vsel %vm201_vm0, %v235_v37, %v11540_v44  ;;  %v4652_v61 = vsel %vm201_vm0, %v238_v35, %v11542_v23  ;;  %v4657_v48 = vsel %vm201_vm0, %v241_v34, %v11544_v40  ;;  %v299_v44 = vrot.slane %v11525_v54, 5 }
  0x1f   :  { %11539 = vst [vmem:[#allocation25_spill] sm:$0xff] %v4642_v56  ;;  %11541 = vst [vmem:[#allocation26_spill] sm:$0xff] %v4647_v50  ;;  %v4662_v0 = vsel %vm201_vm0, %v244_v36, %v11546_v29  ;;  %v298_v56 = vrot.slane %v4418_v38, 5  ;;  %v300_v50 = vrot.slane %v4450_v62, 5  ;;  %v11548_v49 = vrot.slane %v4518_v33, 7 }
  0x20   :  { %11543 = vst [vmem:[#allocation27_spill] sm:$0xff] %v4652_v61  ;;  %11545 = vst [vmem:[#allocation28_spill] sm:$0xff] %v4657_v48  ;;  %v301_v61 = vrot.slane %v4454_v5, 5  ;;  %v302_v40 = vrot.slane %v4458_v13, 5  ;;  %v303_v48 = vrot.slane %v4462_v17, 5  ;;  %v304_v29 = vrot.slane %v4466_v7, 5 }
  0x21   :  { %11547 = vst [vmem:[#allocation29_spill] sm:$0xff] %v4662_v0  ;;  %v4670_v23 = vsel %vm201_vm0, %v247_v1, %v11548_v49  ;;  %v305_v0 = vrot.slane %v4470_v8, 5  ;;  %v306_v60 = vrot.slane %v4474_v10, 5  ;;  %v308_v20 = vrot.slane %v4482_v15, 5 }
  0x22   :  { %11549 = vst [vmem:[#allocation30_spill] sm:$0xff] %v4670_v23  ;;  %v309_v43 = vrot.slane %v4486_v18, 5  ;;  %v310_v49 = vrot.slane %v4498_v24, 5  ;;  %v311_v23 = vrot.slane %v4502_v26, 5  ;;  %v312_v47 = vrot.slane %v4514_v30, 5 }
  0x23   :  { %v313_v39 = vrot.slane %v4518_v33, 5  ;;  %v11550_v42 = vrot.slane %v4407_v31, 7  ;;  %v11551_v63 = vrot.slane %v4407_v31, 1  ;;  %v11552_v15 = vrot.slane %v4429_v45, 7 }
  0x24   :  { %v11553_v18 = vrot.slane %v4429_v45, 1  ;;  %v11554_v26 = vrot.slane %v4448_v58, 7  ;;  %v11555_v30 = vrot.slane %v4448_v58, 1  ;;  %v11556_v12 = vrot.slane %v4452_v2, 1 }
  0x25   :  { %v4690_v10 = vsel %vm201_vm0, %v11551_v63, %v11550_v42  ;;  %v11557_v42 = vrot.slane %v4456_v9, 1  ;;  %v11558_v45 = vrot.slane %v4460_v6, 1  ;;  %v11559_v58 = vrot.slane %v4464_v52, 1 }
  0x26   :  { %v4697_v24 = vsel %vm201_vm0, %v11553_v18, %v11552_v15  ;;  %v4704_v33 = vsel %vm201_vm0, %v11555_v30, %v11554_v26  ;;  %v4709_v31 = vsel %vm201_vm0, %v11556_v12, %v211_v4  ;;  %v11560_v2 = vrot.slane %v4468_v21, 1 }
  0x27   :  { %v4714_v63 = vsel %vm201_vm0, %v11557_v42, %v214_v28  ;;  %v4719_v15 = vsel %vm201_vm0, %v11558_v45, %v217_v59  ;;  %v4724_v18 = vsel %vm201_vm0, %v11559_v58, %v220_v57  ;;  %v11562_v9 = vrot.slane %v4472_v22, 1  ;;  %v11597_v42 = vld [vmem:[#allocation4_spill] sm:$0xff] }
  0x28   :  { %v4729_v12 = vsel %vm201_vm0, %v11560_v2, %v223_v51  ;;  %v11564_v6 = vrot.slane %v4476_v11, 1  ;;  %v11566_v52 = vrot.slane %v4480_v14, 1  ;;  %v11568_v21 = vrot.slane %v4484_v16, 1  ;;  %v11600_v2 = vld [vmem:[#allocation5_spill] sm:$0xff] }
  0x29   :  { %11561 = vst [vmem:[#allocation31_spill] sm:$0xff] %v4729_v12  ;;  %v4734_v26 = vsel %vm201_vm0, %v11562_v9, %v226_v46  ;;  %v11570_v22 = vrot.slane %v4488_v19, 1  ;;  %v11572_v11 = vrot.slane %v4418_v38, 7  ;;  %v11574_v14 = vrot.slane %v4500_v25, 1 }
  0x2a   :  { %11563 = vst [vmem:[#allocation32_spill] sm:$0xff] %v4734_v26  ;;  %v4739_v30 = vsel %vm201_vm0, %v11564_v6, %v229_v55  ;;  %v4744_v57 = vsel %vm201_vm0, %v11566_v52, %v232_v41  ;;  %v4749_v51 = vsel %vm201_vm0, %v11568_v21, %v235_v37  ;;  %v11576_v16 = vrot.slane %v4504_v27, 1 }
  0x2b   :  { %11565 = vst [vmem:[#allocation33_spill] sm:$0xff] %v4739_v30  ;;  %11567 = vst [vmem:[#allocation34_spill] sm:$0xff] %v4744_v57  ;;  %v4754_v46 = vsel %vm201_vm0, %v11570_v22, %v238_v35  ;;  %v4759_v55 = vsel %vm201_vm0, %v11572_v11, %v298_v56  ;;  %v4764_v41 = vsel %vm201_vm0, %v11574_v14, %v241_v34  ;;  %v11578_v19 = vrot.slane %v4516_v32, 1  ;;  %v11609_v11 = vld [vmem:[#allocation9_spill] sm:$0xff] }
  0x2c   :  { %11569 = vst [vmem:[#allocation35_spill] sm:$0xff] %v4749_v51  ;;  %11571 = vst [vmem:[#allocation36_spill] sm:$0xff] %v4754_v46  ;;  %v4769_v37 = vsel %vm201_vm0, %v11576_v16, %v244_v36  ;;  %v11579_v38 = vrot.slane %v11525_v54, 7  ;;  %v11581_v25 = vrot.slane %v4450_v62, 7  ;;  %v11583_v27 = vrot.slane %v4454_v5, 7  ;;  %v11612_v16 = vld [vmem:[#allocation11_spill] sm:$0xff] }
  0x2d   :  { %11573 = vst [vmem:[#allocation37_spill] sm:$0xff] %v4759_v55  ;;  %11575 = vst [vmem:[#allocation38_spill] sm:$0xff] %v4764_v41  ;;  %v4774_v35 = vsel %vm201_vm0, %v11578_v19, %v247_v1  ;;  %v11585_v32 = vrot.slane %v4458_v13, 7  ;;  %v11587_v54 = vrot.slane %v4462_v17, 7  ;;  %v11589_v62 = vrot.slane %v4466_v7, 7  ;;  %v11593_v17 = vld [vmem:[#allocation3_spill] sm:$0xff] }
  0x2e   :  { %11577 = vst [vmem:[#allocation39_spill] sm:$0xff] %v4769_v37  ;;  %v4779_v56 = vsel %vm201_vm0, %v11579_v38, %v299_v44  ;;  %v4784_v34 = vsel %vm201_vm0, %v11581_v25, %v300_v50  ;;  %v4789_v36 = vsel %vm201_vm0, %v11583_v27, %v301_v61  ;;  %v395_v5 = vrot.slane %v4690_v10, 1  ;;  %v11615_v38 = vld [vmem:[#allocation12_spill] sm:$0xff] }
  0x2f   :  { %11580 = vst [vmem:[#allocation40_spill] sm:$0xff] %v4779_v56  ;;  %11582 = vst [vmem:[#allocation41_spill] sm:$0xff] %v4784_v34  ;;  %v4794_v59 = vsel %vm201_vm0, %v11585_v32, %v302_v40  ;;  %v4799_v1 = vsel %vm201_vm0, %v11587_v54, %v303_v48  ;;  %v4804_v50 = vsel %vm201_vm0, %v11589_v62, %v304_v29  ;;  %v396_v4 = vrot.slane %v4562_v3, 1  ;;  %v11596_v40 = vld [vmem:[#allocation16_spill] sm:$0xff]  ;;  %v11617_v54 = vld [vmem:[#allocation17_spill] sm:$0xff] }
  0x30   :  { %11584 = vst [vmem:[#allocation42_spill] sm:$0xff] %v4789_v36  ;;  %11586 = vst [vmem:[#allocation43_spill] sm:$0xff] %v4794_v59  ;;  %v398_v28 = vrot.slane %v4759_v55, 1  ;;  %v11591_v13 = vrot.slane %v4470_v8, 7  ;;  %v11594_v44 = vrot.slane %v11593_v17, 7  ;;  %v400_v7 = vrot.slane %v4697_v24, 1 }
  0x31   :  { %11588 = vst [vmem:[#allocation44_spill] sm:$0xff] %v4799_v1  ;;  %11590 = vst [vmem:[#allocation45_spill] sm:$0xff] %v4804_v50  ;;  %v401_v29 = vrot.slane %v11596_v40, 1  ;;  %v11598_v45 = vrot.slane %v11597_v42, 7  ;;  %v11601_v9 = vrot.slane %v11600_v2, 7  ;;  %v11610_v14 = vrot.slane %v11609_v11, 7 }
  0x32   :  { %v4812_v61 = vsel %vm201_vm0, %v11591_v13, %v305_v0  ;;  %v4817_v48 = vsel %vm201_vm0, %v11594_v44, %v306_v60  ;;  %v11603_v0 = vld [vmem:[#allocation6_spill] sm:$0xff]  ;;  %v11606_v60 = vld [vmem:[#allocation8_spill] sm:$0xff]  ;;  %v11613_v19 = vrot.slane %v11612_v16, 7  ;;  %v11616_v25 = vrot.slane %v11615_v38, 7  ;;  %v11623_v55 = vld [vmem:[#allocation23_spill] sm:$0xff] }
  0x33   :  { %11592 = vst [vmem:[#allocation46_spill] sm:$0xff] %v4812_v61  ;;  %11595 = vst [vmem:[#allocation3_spill] sm:$0xff] %v4817_v48  ;;  %v4824_v58 = vsel %vm201_vm0, %v11598_v45, %v307_v53  ;;  %v4829_v8 = vsel %vm201_vm0, %v11601_v9, %v308_v20  ;;  %v11604_v6 = vrot.slane %v11603_v0, 7  ;;  %v11607_v21 = vrot.slane %v11606_v60, 7  ;;  %v11618_v17 = vld [vmem:[#allocation18_spill] sm:$0xff]  ;;  %v11619_v45 = vld [vmem:[#allocation19_spill] sm:$0xff] }
  0x34   :  { %11599 = vst [vmem:[#allocation16_spill] sm:$0xff] %v4824_v58  ;;  %11602 = vst [vmem:[#allocation4_spill] sm:$0xff] %v4829_v8  ;;  %v4844_v53 = vsel %vm201_vm0, %v11610_v14, %v311_v23  ;;  %v4849_v20 = vsel %vm201_vm0, %v11613_v19, %v312_v47  ;;  %v403_v27 = vrot.slane %v4779_v56, 1  ;;  %v4861_v32 = vsel %vm394_vm1, %v396_v4, %v398_v28  ;;  %v11620_v9 = vld [vmem:[#allocation20_spill] sm:$0xff]  ;;  %v11621_v60 = vld [vmem:[#allocation21_spill] sm:$0xff] }
  0x35   :  { %v4834_v52 = vsel %vm201_vm0, %v11604_v6, %v309_v43  ;;  %v4839_v22 = vsel %vm201_vm0, %v11607_v21, %v310_v49  ;;  %11611 = vst [vmem:[#allocation8_spill] sm:$0xff] %v4844_v53  ;;  %11614 = vst [vmem:[#allocation9_spill] sm:$0xff] %v4849_v20  ;;  %v4854_v43 = vsel %vm201_vm0, %v11616_v25, %v313_v39  ;;  %v405_v23 = vrot.slane %v4704_v33, 1  ;;  %v11622_v16 = vld [vmem:[#allocation22_spill] sm:$0xff] }
  0x36   :  { %11605 = vst [vmem:[#allocation5_spill] sm:$0xff] %v4834_v52  ;;  %11608 = vst [vmem:[#allocation6_spill] sm:$0xff] %v4839_v22  ;;  %v4858_v49 = vsel %vm394_vm1, %v395_v5, %v396_v4  ;;  %v406_v62 = vrot.slane %v11617_v54, 1  ;;  %v4866_v47 = vsel %vm394_vm1, %v400_v7, %v401_v29  ;;  %v408_v13 = vrot.slane %v4784_v34, 1 }
  0x37   :  { %v410_v39 = vrot.slane %v4709_v31, 1  ;;  %v411_v44 = vrot.slane %v11618_v17, 1  ;;  %v413_v42 = vrot.slane %v4789_v36, 1  ;;  %v415_v5 = vrot.slane %v4714_v63, 1 }
  0x38   :  { %v416_v4 = vrot.slane %v11619_v45, 1  ;;  %v418_v28 = vrot.slane %v4794_v59, 1  ;;  %v420_v2 = vrot.slane %v4719_v15, 1  ;;  %v421_v0 = vrot.slane %v11620_v9, 1 }
  0x39   :  { %v423_v7 = vrot.slane %v4799_v1, 1  ;;  %v425_v6 = vrot.slane %v4724_v18, 1  ;;  %v426_v21 = vrot.slane %v11621_v60, 1  ;;  %v428_v11 = vrot.slane %v4804_v50, 1 }
  0x3a   :  { %v430_v14 = vrot.slane %v4729_v12, 1  ;;  %v431_v19 = vrot.slane %v11622_v16, 1  ;;  %v404_v38 = vsel %vm394_vm1, %v401_v29, %v403_v27  ;;  %v407_v25 = vsel %vm394_vm1, %v405_v23, %v406_v62 }
  0x3b   :  { %v409_v59 = vsel %vm394_vm1, %v406_v62, %v408_v13  ;;  %v433_v36 = vrot.slane %v4812_v61, 1  ;;  %v412_v1 = vsel %vm394_vm1, %v410_v39, %v411_v44  ;;  %v414_v34 = vsel %vm394_vm1, %v411_v44, %v413_v42  ;;  %v11624_v61 = vld [vmem:[#allocation24_spill] sm:$0xff] }
  0x3c   :  { %v435_v56 = vrot.slane %v4734_v26, 1  ;;  %v436_v50 = vrot.slane %v11623_v55, 1  ;;  %v417_v12 = vsel %vm394_vm1, %v415_v5, %v416_v4  ;;  %v419_v16 = vsel %vm394_vm1, %v416_v4, %v418_v28  ;;  %v11629_v55 = vld [vmem:[#allocation29_spill] sm:$0xff]  ;;  %v11630_v26 = vld [vmem:[#allocation30_spill] sm:$0xff] }
  0x3d   :  { %v422_v29 = vsel %vm394_vm1, %v420_v2, %v421_v0  ;;  %v424_v27 = vsel %vm394_vm1, %v421_v0, %v423_v7  ;;  %v427_v23 = vsel %vm394_vm1, %v425_v6, %v426_v21  ;;  %v429_v62 = vsel %vm394_vm1, %v426_v21, %v428_v11  ;;  %v11625_v0 = vld [vmem:[#allocation25_spill] sm:$0xff]  ;;  %v11626_v11 = vld [vmem:[#allocation26_spill] sm:$0xff] }
  0x3e   :  { %v432_v13 = vsel %vm394_vm1, %v430_v14, %v431_v19  ;;  %v438_v39 = vrot.slane %v4817_v48, 1  ;;  %v434_v44 = vsel %vm394_vm1, %v431_v19, %v433_v36  ;;  %v440_v42 = vrot.slane %v4739_v30, 1  ;;  %v11627_v48 = vld [vmem:[#allocation27_spill] sm:$0xff]  ;;  %v11628_v30 = vld [vmem:[#allocation28_spill] sm:$0xff] }
  0x3f   :  { %v441_v5 = vrot.slane %v11624_v61, 1  ;;  %v443_v4 = vrot.slane %v4824_v58, 1  ;;  %v437_v28 = vsel %vm394_vm1, %v435_v56, %v436_v50  ;;  %v445_v2 = vrot.slane %v4744_v57, 1 }
  0x40   :  { %v446_v7 = vrot.slane %v11625_v0, 1  ;;  %v448_v6 = vrot.slane %v4829_v8, 1  ;;  %v450_v21 = vrot.slane %v4749_v51, 1  ;;  %v451_v14 = vrot.slane %v11626_v11, 1 }
  0x41   :  { %v453_v36 = vrot.slane %v4834_v52, 1  ;;  %v455_v19 = vrot.slane %v4754_v46, 1  ;;  %v456_v61 = vrot.slane %v11627_v48, 1  ;;  %v458_v58 = vrot.slane %v4839_v22, 1 }
  0x42   :  { %v460_v56 = vrot.slane %v4764_v41, 1  ;;  %v461_v57 = vrot.slane %v11628_v30, 1  ;;  %v463_v0 = vrot.slane %v4844_v53, 1  ;;  %v465_v8 = vrot.slane %v4769_v37, 1 }
  0x43   :  { %v466_v51 = vrot.slane %v11629_v55, 1  ;;  %v468_v11 = vrot.slane %v4849_v20, 1  ;;  %v439_v52 = vsel %vm394_vm1, %v436_v50, %v438_v39  ;;  %v442_v46 = vsel %vm394_vm1, %v440_v42, %v441_v5 }
  0x44   :  { %v470_v48 = vrot.slane %v4774_v35, 1  ;;  %v471_v22 = vrot.slane %v11630_v26, 1  ;;  %v444_v41 = vsel %vm394_vm1, %v441_v5, %v443_v4  ;;  %v447_v30 = vsel %vm394_vm1, %v445_v2, %v446_v7 }
  0x45   :  { %v449_v53 = vsel %vm394_vm1, %v446_v7, %v448_v6  ;;  %v473_v37 = vrot.slane %v4854_v43, 1  ;;  %v452_v55 = vsel %vm394_vm1, %v450_v21, %v451_v14  ;;  %v454_v20 = vsel %vm394_vm1, %v451_v14, %v453_v36 }
  0x46   :  { %v457_v50 = vsel %vm394_vm1, %v455_v19, %v456_v61  ;;  %v459_v39 = vsel %vm394_vm1, %v456_v61, %v458_v58  ;;  %v462_v42 = vsel %vm394_vm1, %v460_v56, %v461_v57  ;;  %v464_v26 = vsel %vm394_vm1, %v461_v57, %v463_v0 }
  0x47   :  { %v467_v5 = vsel %vm394_vm1, %v465_v8, %v466_v51  ;;  %v469_v4 = vsel %vm394_vm1, %v466_v51, %v468_v11  ;;  %v472_v2 = vsel %vm394_vm1, %v470_v48, %v471_v22  ;;  %v4938_v7 = vadd.f32 %v4858_v49, %v4690_v10 }
  0x48   :  { %v4942_v6 = vadd.f32 %v4861_v32, %v4562_v3  ;;  %v4946_v61 = vadd.f32 %v4866_v47, %v4697_v24  ;;  %v474_v57 = vsel %vm394_vm1, %v471_v22, %v473_v37  ;;  %v4950_v58 = vadd.f32 %v404_v38, %v11596_v40 }
  0x49   :  { %v4953_v51 = vadd.f32 %v407_v25, %v4704_v33  ;;  %v4956_v48 = vadd.f32 %v409_v59, %v11617_v54  ;;  %v4959_v8 = vadd.f32 %v412_v1, %v4709_v31  ;;  %v4962_v49 = vadd.f32 %v414_v34, %v11618_v17  ;;  %v11631_v34 = vld [vmem:[#allocation31_spill] sm:$0xff] }
  0x4a   :  { %v4965_v32 = vadd.f32 %v417_v12, %v4714_v63  ;;  %v4968_v37 = vadd.f32 %v419_v16, %v11619_v45  ;;  %v4971_v22 = vadd.f32 %v422_v29, %v4719_v15  ;;  %v4974_v47 = vadd.f32 %v424_v27, %v11620_v9  ;;  %v11633_v12 = vld [vmem:[#allocation22_spill] sm:$0xff]  ;;  %v11635_v16 = vld [vmem:[#allocation32_spill] sm:$0xff]  ;;  %v11637_v29 = vld [vmem:[#allocation23_spill] sm:$0xff] }
  0x4b   :  { %v4977_v59 = vadd.f32 %v427_v23, %v4724_v18  ;;  %v4980_v1 = vadd.f32 %v429_v62, %v11621_v60  ;;  %v4983_v38 = vadd.f32 %v432_v13, %v11631_v34  ;;  %v4986_v25 = vadd.f32 %v434_v44, %v11633_v12  ;;  %v11639_v27 = vld [vmem:[#allocation33_spill] sm:$0xff]  ;;  %v11641_v23 = vld [vmem:[#allocation24_spill] sm:$0xff]  ;;  %v11643_v62 = vld [vmem:[#allocation34_spill] sm:$0xff] }
  0x4c   :  { %v4989_v0 = vadd.f32 %v437_v28, %v11635_v16  ;;  %v4992_v21 = vadd.f32 %v439_v52, %v11637_v29  ;;  %v4995_v11 = vadd.f32 %v442_v46, %v11639_v27  ;;  %v4998_v14 = vadd.f32 %v444_v41, %v11641_v23  ;;  %v11645_v13 = vld [vmem:[#allocation25_spill] sm:$0xff]  ;;  %v11647_v44 = vld [vmem:[#allocation35_spill] sm:$0xff]  ;;  %v11650_v46 = vld [vmem:[#allocation26_spill] sm:$0xff] }
  0x4d   :  { %11632 = vst [vmem:[#allocation11_spill] sm:$0xff] %v4983_v38  ;;  %11634 = vst [vmem:[#allocation12_spill] sm:$0xff] %v4986_v25  ;;  %v5001_v36 = vadd.f32 %v447_v30, %v11643_v62  ;;  %v5004_v19 = vadd.f32 %v449_v53, %v11645_v13  ;;  %v5007_v56 = vadd.f32 %v452_v55, %v11647_v44  ;;  %v540_v28 = vrot.slane %v4690_v10, 2  ;;  %v11652_v41 = vld [vmem:[#allocation36_spill] sm:$0xff]  ;;  %v11656_v55 = vld [vmem:[#allocation38_spill] sm:$0xff] }
  0x4e   :  { %11636 = vst [vmem:[#allocation17_spill] sm:$0xff] %v4989_v0  ;;  %11638 = vst [vmem:[#allocation18_spill] sm:$0xff] %v4992_v21  ;;  %v541_v52 = vrot.slane %v4562_v3, 2  ;;  %v11649_v21 = vld [vmem:[#allocation37_spill] sm:$0xff]  ;;  %v545_v30 = vrot.slane %v4697_v24, 2  ;;  %v546_v53 = vrot.slane %v11596_v40, 2 }
  0x4f   :  { %11640 = vst [vmem:[#allocation19_spill] sm:$0xff] %v4995_v11  ;;  %11642 = vst [vmem:[#allocation20_spill] sm:$0xff] %v4998_v14  ;;  %v543_v0 = vrot.slane %v11649_v21, 2  ;;  %v5013_v11 = vadd.f32 %v454_v20, %v11650_v46  ;;  %v5016_v14 = vadd.f32 %v457_v50, %v11652_v41  ;;  %v11658_v10 = vld [vmem:[#allocation28_spill] sm:$0xff]  ;;  %v11660_v21 = vld [vmem:[#allocation39_spill] sm:$0xff]  ;;  %v5036_v50 = vadd.f32 %v472_v2, %v4774_v35 }
  0x50   :  { %11644 = vst [vmem:[#allocation21_spill] sm:$0xff] %v5001_v36  ;;  %11646 = vst [vmem:[#allocation31_spill] sm:$0xff] %v5004_v19  ;;  %v11654_v19 = vld [vmem:[#allocation27_spill] sm:$0xff]  ;;  %v5027_v3 = vadd.f32 %v464_v26, %v11658_v10  ;;  %v5030_v25 = vadd.f32 %v467_v5, %v11660_v21  ;;  %v11662_v20 = vld [vmem:[#allocation29_spill] sm:$0xff]  ;;  %v550_v5 = vrot.slane %v4704_v33, 2  ;;  %v565_v33 = vrot.slane %v4719_v15, 2 }
  0x51   :  { %11648 = vst [vmem:[#allocation22_spill] sm:$0xff] %v5007_v56  ;;  %11651 = vst [vmem:[#allocation32_spill] sm:$0xff] %v5013_v11  ;;  %v5021_v36 = vadd.f32 %v459_v39, %v11654_v19  ;;  %v5024_v56 = vadd.f32 %v462_v42, %v11656_v55  ;;  %v5033_v11 = vadd.f32 %v469_v4, %v11662_v20  ;;  %v11665_v24 = vld [vmem:[#allocation30_spill] sm:$0xff]  ;;  %v11667_v39 = vld [vmem:[#allocation40_spill] sm:$0xff] }
  0x52   :  { %11653 = vst [vmem:[#allocation23_spill] sm:$0xff] %v5016_v14  ;;  %11659 = vst [vmem:[#allocation34_spill] sm:$0xff] %v5027_v3  ;;  %v5039_v40 = vadd.f32 %v474_v57, %v11665_v24  ;;  %v5043_v42 = vsel %vm539_vm2, %v540_v28, %v541_v52  ;;  %v5046_v26 = vsel %vm539_vm2, %v541_v52, %v543_v0  ;;  %v11668_v2 = vld [vmem:[#allocation41_spill] sm:$0xff]  ;;  %v555_v57 = vrot.slane %v4709_v31, 2  ;;  %v11670_v52 = vld [vmem:[#allocation43_spill] sm:$0xff] }
  0x53   :  { %11655 = vst [vmem:[#allocation33_spill] sm:$0xff] %v5021_v36  ;;  %11657 = vst [vmem:[#allocation24_spill] sm:$0xff] %v5024_v56  ;;  %v548_v36 = vrot.slane %v11667_v39, 2  ;;  %v5051_v4 = vsel %vm539_vm2, %v545_v30, %v546_v53  ;;  %v11669_v39 = vld [vmem:[#allocation42_spill] sm:$0xff]  ;;  %v560_v28 = vrot.slane %v4714_v63, 2  ;;  %v561_v0 = vrot.slane %v11619_v45, 2 }
  0x54   :  { %11661 = vst [vmem:[#allocation25_spill] sm:$0xff] %v5030_v25  ;;  %11663 = vst [vmem:[#allocation35_spill] sm:$0xff] %v5033_v11  ;;  %v551_v25 = vrot.slane %v11617_v54, 2  ;;  %v558_v11 = vrot.slane %v11669_v39, 2  ;;  %v563_v3 = vrot.slane %v11670_v52, 2  ;;  %v566_v54 = vrot.slane %v11620_v9, 2 }
  0x55   :  { %11664 = vst [vmem:[#allocation37_spill] sm:$0xff] %v5036_v50  ;;  %11666 = vst [vmem:[#allocation26_spill] sm:$0xff] %v5039_v40  ;;  %v553_v50 = vrot.slane %v11668_v2, 2  ;;  %v556_v40 = vrot.slane %v11618_v17, 2  ;;  %v11671_v30 = vld [vmem:[#allocation44_spill] sm:$0xff]  ;;  %v570_v2 = vrot.slane %v4724_v18, 2  ;;  %v549_v45 = vsel %vm539_vm2, %v546_v53, %v548_v36 }
  0x56   :  { %v568_v56 = vrot.slane %v11671_v30, 2  ;;  %v571_v31 = vrot.slane %v11621_v60, 2  ;;  %v11672_v14 = vld [vmem:[#allocation45_spill] sm:$0xff]  ;;  %v575_v39 = vrot.slane %v11631_v34, 2  ;;  %v576_v63 = vrot.slane %v11633_v12, 2  ;;  %v11673_v38 = vld [vmem:[#allocation46_spill] sm:$0xff] }
  0x57   :  { %v573_v17 = vrot.slane %v11672_v14, 2  ;;  %v552_v52 = vsel %vm539_vm2, %v550_v5, %v551_v25  ;;  %v554_v15 = vsel %vm539_vm2, %v551_v25, %v553_v50  ;;  %v578_v9 = vrot.slane %v11673_v38, 2  ;;  %v11674_v5 = vld [vmem:[#allocation3_spill] sm:$0xff] }
  0x58   :  { %v557_v30 = vsel %vm539_vm2, %v555_v57, %v556_v40  ;;  %v559_v18 = vsel %vm539_vm2, %v556_v40, %v558_v11  ;;  %v580_v60 = vrot.slane %v11635_v16, 2  ;;  %v581_v14 = vrot.slane %v11637_v29, 2  ;;  %v11675_v57 = vld [vmem:[#allocation16_spill] sm:$0xff] }
  0x59   :  { %v562_v34 = vsel %vm539_vm2, %v560_v28, %v561_v0  ;;  %v564_v12 = vsel %vm539_vm2, %v561_v0, %v563_v3  ;;  %v567_v36 = vsel %vm539_vm2, %v565_v33, %v566_v54  ;;  %v569_v53 = vsel %vm539_vm2, %v566_v54, %v568_v56  ;;  %v11676_v33 = vld [vmem:[#allocation4_spill] sm:$0xff] }
  0x5a   :  { %v572_v25 = vsel %vm539_vm2, %v570_v2, %v571_v31  ;;  %v574_v38 = vsel %vm539_vm2, %v571_v31, %v573_v17  ;;  %v577_v50 = vsel %vm539_vm2, %v575_v39, %v576_v63  ;;  %v583_v11 = vrot.slane %v11674_v5, 2  ;;  %v11677_v17 = vld [vmem:[#allocation5_spill] sm:$0xff]  ;;  %v11679_v5 = vld [vmem:[#allocation8_spill] sm:$0xff] }
  0x5b   :  { %v579_v16 = vsel %vm539_vm2, %v576_v63, %v578_v9  ;;  %v585_v29 = vrot.slane %v11639_v27, 2  ;;  %v586_v40 = vrot.slane %v11641_v23, 2  ;;  %v588_v3 = vrot.slane %v11675_v57, 2  ;;  %v11678_v63 = vld [vmem:[#allocation6_spill] sm:$0xff] }
  0x5c   :  { %v582_v28 = vsel %vm539_vm2, %v580_v60, %v581_v14  ;;  %v590_v56 = vrot.slane %v11643_v62, 2  ;;  %v591_v0 = vrot.slane %v11645_v13, 2  ;;  %v593_v54 = vrot.slane %v11676_v33, 2  ;;  %v11680_v33 = vld [vmem:[#allocation9_spill] sm:$0xff] }
  0x5d   :  { %v595_v2 = vrot.slane %v11647_v44, 2  ;;  %v596_v31 = vrot.slane %v11650_v46, 2  ;;  %v598_v39 = vrot.slane %v11677_v17, 2  ;;  %v600_v27 = vrot.slane %v11652_v41, 2 }
  0x5e   :  { %v601_v23 = vrot.slane %v11654_v19, 2  ;;  %v603_v9 = vrot.slane %v11678_v63, 2  ;;  %v605_v60 = vrot.slane %v11656_v55, 2  ;;  %v606_v62 = vrot.slane %v11658_v10, 2 }
  0x5f   :  { %v608_v13 = vrot.slane %v11679_v5, 2  ;;  %v610_v57 = vrot.slane %v11660_v21, 2  ;;  %v611_v44 = vrot.slane %v11662_v20, 2  ;;  %v613_v46 = vrot.slane %v11680_v33, 2 }
  0x60   :  { %v584_v17 = vsel %vm539_vm2, %v581_v14, %v583_v11  ;;  %v587_v41 = vsel %vm539_vm2, %v585_v29, %v586_v40  ;;  %v615_v19 = vrot.slane %v4774_v35, 2  ;;  %v616_v63 = vrot.slane %v11665_v24, 2 }
  0x61   :  { %v589_v55 = vsel %vm539_vm2, %v586_v40, %v588_v3  ;;  %v592_v10 = vsel %vm539_vm2, %v590_v56, %v591_v0  ;;  %v594_v5 = vsel %vm539_vm2, %v591_v0, %v593_v54  ;;  %v618_v21 = vrot.slane %v4854_v43, 2 }
  0x62   :  { %v597_v20 = vsel %vm539_vm2, %v595_v2, %v596_v31  ;;  %v599_v33 = vsel %vm539_vm2, %v596_v31, %v598_v39  ;;  %v602_v14 = vsel %vm539_vm2, %v600_v27, %v601_v23  ;;  %v604_v11 = vsel %vm539_vm2, %v601_v23, %v603_v9  ;;  %v5159_v9 = vld [vmem:[%s10830_s1 + $0x30] sm:$0xff] }
  0x63   :  { %v607_v35 = vsel %vm539_vm2, %v605_v60, %v606_v62  ;;  %v609_v24 = vsel %vm539_vm2, %v606_v62, %v608_v13  ;;  %v612_v29 = vsel %vm539_vm2, %v610_v57, %v611_v44  ;;  %v614_v40 = vsel %vm539_vm2, %v611_v44, %v613_v46  ;;  %v5164_v60 = vld [vmem:[%s10830_s1 + $0x38] sm:$0xff]  ;;  %v11693_v62 = vld [vmem:[#allocation24_spill] sm:$0xff]  ;;  %v11694_v57 = vld [vmem:[#allocation34_spill] sm:$0xff] }
  0x64   :  { %v617_v3 = vsel %vm539_vm2, %v615_v19, %v616_v63  ;;  %v652_v43 = vadd.f32 %v5043_v42, %v4938_v7  ;;  %v653_v56 = vadd.f32 %v5046_v26, %v4942_v6  ;;  %v654_v0 = vadd.f32 %v5051_v4, %v4946_v61  ;;  %v11681_v4 = vld [vmem:[#allocation11_spill] sm:$0xff]  ;;  %v11695_v46 = vld [vmem:[#allocation25_spill] sm:$0xff] }
  0x65   :  { %v619_v54 = vsel %vm539_vm2, %v616_v63, %v618_v21  ;;  %v655_v2 = vadd.f32 %v549_v45, %v4950_v58  ;;  %v656_v31 = vadd.f32 %v552_v52, %v4953_v51  ;;  %v657_v39 = vadd.f32 %v554_v15, %v4956_v48  ;;  %v11682_v45 = vld [vmem:[#allocation12_spill] sm:$0xff]  ;;  %v11683_v52 = vld [vmem:[#allocation17_spill] sm:$0xff]  ;;  %v11684_v15 = vld [vmem:[#allocation18_spill] sm:$0xff] }
  0x66   :  { %v658_v27 = vadd.f32 %v557_v30, %v4959_v8  ;;  %v659_v23 = vadd.f32 %v559_v18, %v4962_v49  ;;  %v660_v7 = vadd.f32 %v562_v34, %v4965_v32  ;;  %v661_v42 = vadd.f32 %v564_v12, %v4968_v37  ;;  %v11685_v30 = vld [vmem:[#allocation19_spill] sm:$0xff]  ;;  %v11686_v18 = vld [vmem:[#allocation20_spill] sm:$0xff]  ;;  %v11687_v34 = vld [vmem:[#allocation21_spill] sm:$0xff] }
  0x67   :  { %v662_v6 = vadd.f32 %v567_v36, %v4971_v22  ;;  %v663_v61 = vadd.f32 %v569_v53, %v4974_v47  ;;  %v664_v26 = vadd.f32 %v572_v25, %v4977_v59  ;;  %v665_v58 = vadd.f32 %v574_v38, %v4980_v1  ;;  %v11688_v12 = vld [vmem:[#allocation31_spill] sm:$0xff]  ;;  %v11689_v36 = vld [vmem:[#allocation22_spill] sm:$0xff]  ;;  %v11690_v53 = vld [vmem:[#allocation32_spill] sm:$0xff] }
  0x68   :  { %v666_v51 = vadd.f32 %v577_v50, %v11681_v4  ;;  %v667_v48 = vadd.f32 %v579_v16, %v11682_v45  ;;  %v668_v8 = vadd.f32 %v582_v28, %v11683_v52  ;;  %v669_v49 = vadd.f32 %v584_v17, %v11684_v15  ;;  %v11691_v25 = vld [vmem:[#allocation23_spill] sm:$0xff]  ;;  %v11692_v50 = vld [vmem:[#allocation33_spill] sm:$0xff]  ;;  %v5173_v63 = vld [vmem:[%s10830_s1 + $0x40] sm:$0xff] }
  0x69   :  { %v670_v32 = vadd.f32 %v587_v41, %v11685_v30  ;;  %v671_v37 = vadd.f32 %v589_v55, %v11686_v18  ;;  %v672_v22 = vadd.f32 %v592_v10, %v11687_v34  ;;  %v673_v47 = vadd.f32 %v594_v5, %v11688_v12  ;;  %v5154_v28 = vld [vmem:[%s10830_s1 + $0x28] sm:$0xff]  ;;  %v11697_v55 = vld [vmem:[#allocation37_spill] sm:$0xff]  ;;  %v5267_v34 = vld [vmem:[%s10830_s1 + $0x80] sm:$0xff] }
  0x6a   :  { %v674_v59 = vadd.f32 %v597_v20, %v11689_v36  ;;  %v675_v1 = vadd.f32 %v599_v33, %v11690_v53  ;;  %v676_v38 = vadd.f32 %v602_v14, %v11691_v25  ;;  %v677_v16 = vadd.f32 %v604_v11, %v11692_v50  ;;  %v11696_v41 = vld [vmem:[#allocation35_spill] sm:$0xff]  ;;  %v11701_v14 = vld [vmem:[#allocation26_spill] sm:$0xff]  ;;  %v5262_v18 = vld [vmem:[%s10830_s1 + $0x78] sm:$0xff] }
  0x6b   :  { %v678_v13 = vadd.f32 %v607_v35, %v11693_v62  ;;  %v679_v44 = vadd.f32 %v609_v24, %v11694_v57  ;;  %v680_v17 = vadd.f32 %v612_v29, %v11695_v46  ;;  %v681_v19 = vadd.f32 %v614_v40, %v11696_v41  ;;  %v5185_v33 = vld [vmem:[%s10830_s1 + $0x48] sm:$0xff]  ;;  %v5197_v40 = vld [vmem:[%s10830_s1 + $0x50] sm:$0xff]  ;;  %v5290_v25 = vld [vmem:[%s10830_s1 + $0x98] sm:$0xff] }
  0x6c   :  { %v682_v10 = vadd.f32 %v617_v3, %v11697_v55  ;;  %v5176_v5 = vmul.f32 0.11111111, %v652_v43  ;;  %v5178_v21 = vmul.f32 0.11111111, %v653_v56  ;;  %v5180_v20 = vmul.f32 0.11111111, %v654_v0 }
  0x6d   :  { %v683_v11 = vadd.f32 %v619_v54, %v11701_v14  ;;  %v5188_v35 = vmul.f32 0.11111111, %v655_v2  ;;  %v5190_v24 = vmul.f32 0.11111111, %v656_v31  ;;  %v5192_v29 = vmul.f32 0.11111111, %v657_v39 }
  0x6e   :  { %11698 = vst [vmem:[#allocation36_spill] sm:$0xff] %v5176_v5  ;;  %11699 = vst [vmem:[#allocation27_spill] sm:$0xff] %v5178_v21  ;;  %v5199_v3 = vmul.f32 0.11111111, %v658_v27  ;;  %v5201_v43 = vmul.f32 0.11111111, %v659_v23  ;;  %v5257_v30 = vadd.f32 %v5173_v63, %v5159_v9  ;;  %v723_v53 = vadd.f32 %v5185_v33, %v5164_v60 }
  0x6f   :  { %11700 = vst [vmem:[#allocation38_spill] sm:$0xff] %v5180_v20  ;;  %11702 = vst [vmem:[#allocation28_spill] sm:$0xff] %v5188_v35  ;;  %v5203_v56 = vmul.f32 0.11111111, %v660_v7  ;;  %v11708_v0 = vld [vmem:[#allocation10_spill] sm:$0xff]  ;;  %v5212_v2 = vld [vmem:[%s10830_s1 + $0x58] sm:$0xff]  ;;  %v724_v46 = vadd.f32 %v5197_v40, %v5173_v63 }
  0x70   :  { %11703 = vst [vmem:[#allocation39_spill] sm:$0xff] %v5190_v24  ;;  %11704 = vst [vmem:[#allocation29_spill] sm:$0xff] %v5192_v29  ;;  %v5207_v54 = vadd.f32 %v5154_v28, %v11708_v0  ;;  %v5214_v31 = vmul.f32 0.11111111, %v661_v42  ;;  %v5216_v39 = vmul.f32 0.11111111, %v662_v6  ;;  %v5237_v42 = vadd.f32 %v5164_v60, %v5154_v28 }
  0x71   :  { %11705 = vst [vmem:[#allocation30_spill] sm:$0xff] %v5199_v3  ;;  %11706 = vst [vmem:[#allocation40_spill] sm:$0xff] %v5201_v43  ;;  %v5218_v4 = vmul.f32 0.11111111, %v663_v61  ;;  %v11712_v27 = vld [vmem:[#allocation13_spill] sm:$0xff]  ;;  %v5227_v7 = vld [vmem:[%s10830_s1 + $0x60] sm:$0xff] }
  0x72   :  { %11707 = vst [vmem:[#allocation41_spill] sm:$0xff] %v5203_v56  ;;  %11709 = vst [vmem:[#allocation42_spill] sm:$0xff] %v5214_v31  ;;  %v5222_v23 = vadd.f32 %v5159_v9, %v11712_v27  ;;  %v5229_v45 = vmul.f32 0.11111111, %v664_v26  ;;  %v5231_v52 = vmul.f32 0.11111111, %v665_v58 }
  0x73   :  { %11710 = vst [vmem:[#allocation43_spill] sm:$0xff] %v5216_v39  ;;  %11711 = vst [vmem:[#allocation44_spill] sm:$0xff] %v5218_v4  ;;  %v5233_v15 = vmul.f32 0.11111111, %v666_v51  ;;  %v5242_v6 = vld [vmem:[%s10830_s1 + $0x68] sm:$0xff]  ;;  %v5247_v61 = vld [vmem:[%s10830_s1 + $0x70] sm:$0xff] }
  0x74   :  { %11713 = vst [vmem:[#allocation45_spill] sm:$0xff] %v5229_v45  ;;  %11714 = vst [vmem:[#allocation46_spill] sm:$0xff] %v5231_v52  ;;  %v5249_v26 = vmul.f32 0.11111111, %v667_v48  ;;  %v5251_v58 = vmul.f32 0.11111111, %v668_v8 }
  0x75   :  { %11715 = vst [vmem:[#allocation3_spill] sm:$0xff] %v5233_v15  ;;  %v5253_v51 = vmul.f32 0.11111111, %v669_v49  ;;  %v5272_v48 = vld [vmem:[%s10830_s1 + $0x88] sm:$0xff]  ;;  %v5277_v8 = vld [vmem:[%s10830_s1 + $0x90] sm:$0xff]  ;;  %v5295_v50 = vld [vmem:[%s10830_s1 + $0xa0] sm:$0xff] }
  0x76   :  { %11716 = vst [vmem:[#allocation16_spill] sm:$0xff] %v5249_v26  ;;  %11717 = vst [vmem:[#allocation4_spill] sm:$0xff] %v5251_v58  ;;  %v5279_v49 = vmul.f32 0.11111111, %v670_v32  ;;  %v5281_v12 = vmul.f32 0.11111111, %v671_v37 }
  0x77   :  { %11718 = vst [vmem:[#allocation5_spill] sm:$0xff] %v5253_v51  ;;  %v5283_v36 = vmul.f32 0.11111111, %v672_v22  ;;  %v5300_v32 = vld [vmem:[%s10830_s1 + $0xa8] sm:$0xff]  ;;  %v5305_v37 = vld [vmem:[%s10830_s1 + $0xb0] sm:$0xff]  ;;  %v66_v41 = vld [vmem:[%s10830_s1 + $0xb8] sm:$0xff] }
  0x78   :  { %11719 = vst [vmem:[#allocation6_spill] sm:$0xff] %v5279_v49  ;;  %11720 = vst [vmem:[#allocation8_spill] sm:$0xff] %v5281_v12  ;;  %v5307_v22 = vmul.f32 0.11111111, %v673_v47  ;;  %v5309_v62 = vmul.f32 0.11111111, %v674_v59  ;;  %v726_v12 = vadd.f32 %v5227_v7, %v5197_v40  ;;  %v735_v49 = vadd.f32 %v5300_v32, %v5290_v25 }
  0x79   :  { %11721 = vst [vmem:[#allocation9_spill] sm:$0xff] %v5283_v36  ;;  %11722 = vst [vmem:[#allocation11_spill] sm:$0xff] %v5305_v37  ;;  %v5311_v57 = vmul.f32 0.11111111, %v675_v1  ;;  %v67_v55 = vld [vmem:[%s10830_s1 + $0xc0] sm:$0xff]  ;;  %v68_v47 = vld [vmem:[%s10830_s1 + $0xc8] sm:$0xff]  ;;  %v736_v51 = vadd.f32 %v5305_v37, %v5295_v50  ;;  %v737_v58 = vadd.f32 %v66_v41, %v5300_v32 }
  0x7a   :  { %11723 = vst [vmem:[#allocation12_spill] sm:$0xff] %v5307_v22  ;;  %11724 = vst [vmem:[#allocation17_spill] sm:$0xff] %v5309_v62  ;;  %v5324_v14 = vmul.f32 0.11111111, %v676_v38  ;;  %v5326_v59 = vmul.f32 0.11111111, %v677_v16  ;;  %v738_v26 = vadd.f32 %v67_v55, %v5305_v37  ;;  %v739_v15 = vadd.f32 %v68_v47, %v66_v41 }
  0x7b   :  { %11725 = vst [vmem:[#allocation18_spill] sm:$0xff] %v5311_v57  ;;  %v5328_v1 = vmul.f32 0.11111111, %v678_v13  ;;  %v725_v57 = vadd.f32 %v5212_v2, %v5185_v33  ;;  %v5332_v62 = vmul.f32 0.11111111, %v679_v44  ;;  %v69_v38 = vld [vmem:[%s10830_s1 + $0xd0] sm:$0xff]  ;;  %v727_v44 = vadd.f32 %v5242_v6, %v5212_v2 }
  0x7c   :  { %11726 = vst [vmem:[#allocation19_spill] sm:$0xff] %v5324_v14  ;;  %11727 = vst [vmem:[#allocation20_spill] sm:$0xff] %v5326_v59  ;;  %v5334_v22 = vmul.f32 0.11111111, %v680_v17  ;;  %v5336_v36 = vmul.f32 0.11111111, %v681_v19  ;;  %v728_v17 = vadd.f32 %v5247_v61, %v5227_v7  ;;  %v733_v59 = vadd.f32 %v5290_v25, %v5272_v48 }
  0x7d   :  { %11728 = vst [vmem:[#allocation21_spill] sm:$0xff] %v5328_v1  ;;  %11729 = vst [vmem:[#allocation31_spill] sm:$0xff] %v5332_v62  ;;  %v70_v16 = vld [vmem:[%s10830_s1 + $0xd8] sm:$0xff]  ;;  %v5346_v13 = vmul.f32 0.11111111, %v682_v10  ;;  %v71_v19 = vld [vmem:[%s10830_s1 + $0xe0] sm:$0xff]  ;;  %v734_v14 = vadd.f32 %v5295_v50, %v5277_v8  ;;  %v740_v52 = vadd.f32 %v69_v38, %v67_v55 }
  0x7e   :  { %11730 = vst [vmem:[#allocation22_spill] sm:$0xff] %v5334_v22  ;;  %11731 = vst [vmem:[#allocation32_spill] sm:$0xff] %v5336_v36  ;;  %v5348_v1 = vmul.f32 0.11111111, %v683_v11  ;;  %v72_v36 = vld [vmem:[%s10830_s1 + $0xe8] sm:$0xff]  ;;  %v73_v10 = vld [vmem:[%s10830_s1 + $0xf0] sm:$0xff]  ;;  %v729_v11 = vadd.f32 %v5262_v18, %v5242_v6  ;;  %v732_v22 = vadd.f32 %v5277_v8, %v5267_v34  ;;  %v741_v45 = vadd.f32 %v70_v16, %v68_v47 }
  0x7f   :  { %11732 = vst [vmem:[#allocation23_spill] sm:$0xff] %v5346_v13  ;;  %v731_v13 = vadd.f32 %v5272_v48, %v5262_v18  ;;  %v74_v62 = vld [vmem:[%s10830_s1 + $0xf8] sm:$0xff]  ;;  %v742_v4 = vadd.f32 %v71_v19, %v69_v38  ;;  %v743_v39 = vadd.f32 %v72_v36, %v70_v16  ;;  %v744_v31 = vadd.f32 %v73_v10, %v71_v19  ;;  %v11734_v43 = vld [vmem:[#allocation7_spill] sm:$0xff]  ;;  %v11735_v3 = vld [vmem:[#allocation14_spill] sm:$0xff] }
  0x80   :  { %11733 = vst [vmem:[#allocation33_spill] sm:$0xff] %v5348_v1  ;;  %v730_v1 = vadd.f32 %v5267_v34, %v5247_v61  ;;  %v745_v56 = vadd.f32 %v74_v62, %v72_v36  ;;  %v5386_v29 = vadd.f32 %v11735_v3, %v11734_v43  ;;  %v11736_v24 = vld [vmem:[#allocation15_spill] sm:$0xff]  ;;  %v5394_v20 = vadd.f32 %v11735_v3, %v11712_v27  ;;  %v11737_v5 = vld [vmem:[#allocation2_spill] sm:$0xff] }
  0x81   :  { %v5390_v35 = vadd.f32 %v11736_v24, %v11708_v0  ;;  %v5398_v21 = vadd.f32 %v11736_v24, %v5154_v28  ;;  %v5402_v37 = vadd.f32 %v11737_v5, %v5159_v9  ;;  %v5406_v43 = vadd.f32 %v5207_v54, %v5164_v60 }
  0x82   :  { %v5410_v0 = vadd.f32 %v5222_v23, %v5173_v63  ;;  %v5414_v3 = vadd.f32 %v5237_v42, %v5185_v33  ;;  %v5418_v28 = vadd.f32 %v5257_v30, %v5197_v40  ;;  %v5421_v24 = vadd.f32 %v723_v53, %v5212_v2 }
  0x83   :  { %v5424_v9 = vadd.f32 %v724_v46, %v5227_v7  ;;  %v5427_v60 = vadd.f32 %v725_v57, %v5242_v6  ;;  %v5430_v63 = vadd.f32 %v726_v12, %v5247_v61  ;;  %v5433_v5 = vadd.f32 %v727_v44, %v5262_v18  ;;  %v11740_v7 = vld [vmem:[#allocation11_spill] sm:$0xff] }
  0x84   :  { %v5436_v33 = vadd.f32 %v728_v17, %v5267_v34  ;;  %v5439_v40 = vadd.f32 %v729_v11, %v5272_v48  ;;  %v5442_v54 = vadd.f32 %v730_v1, %v5277_v8  ;;  %v5445_v2 = vadd.f32 %v731_v13, %v5290_v25 }
  0x85   :  { %v5448_v27 = vadd.f32 %v732_v22, %v5295_v50  ;;  %v5451_v23 = vadd.f32 %v733_v59, %v5300_v32  ;;  %v5454_v42 = vadd.f32 %v734_v14, %v11740_v7  ;;  %v5456_v6 = vadd.f32 %v735_v49, %v66_v41 }
  0x86   :  { %11738 = vst [vmem:[#allocation24_spill] sm:$0xff] %v5445_v2  ;;  %v5458_v61 = vadd.f32 %v736_v51, %v67_v55  ;;  %v5460_v30 = vadd.f32 %v737_v58, %v68_v47  ;;  %v5462_v18 = vadd.f32 %v738_v26, %v69_v38  ;;  %v5464_v34 = vadd.f32 %v739_v15, %v70_v16 }
  0x87   :  { %11739 = vst [vmem:[#allocation34_spill] sm:$0xff] %v5451_v23  ;;  %11741 = vst [vmem:[#allocation25_spill] sm:$0xff] %v5456_v6  ;;  %v5466_v48 = vadd.f32 %v740_v52, %v71_v19  ;;  %v5468_v8 = vadd.f32 %v741_v45, %v72_v36  ;;  %v5470_v12 = vadd.f32 %v742_v4, %v73_v10  ;;  %v10941_v22 = vrot.slane %v5402_v37, 7 }
  0x88   :  { %11742 = vst [vmem:[#allocation35_spill] sm:$0xff] %v5460_v30  ;;  %11743 = vst [vmem:[#allocation37_spill] sm:$0xff] %v5464_v34  ;;  %v5472_v53 = vadd.f32 %v743_v39, %v74_v62  ;;  %v5474_v25 = vadd.f32 %v744_v31, %v71_v19  ;;  %v5476_v49 = vadd.f32 %v745_v56, %v72_v36  ;;  %v10944_v39 = vrot.slane %v5386_v29, 7 }
  0x89   :  { %11744 = vst [vmem:[#allocation26_spill] sm:$0xff] %v5468_v8  ;;  %v10939_v31 = vrot.slane %v5390_v35, 7  ;;  %v10942_v56 = vrot.slane %v5394_v20, 7  ;;  %v10938_v36 = vrot.slane %v5398_v21, 7  ;;  %v10940_v62 = vrot.slane %v5406_v43, 7 }
  0x8a   :  { %11745 = vst [vmem:[#allocation10_spill] sm:$0xff] %v5472_v53  ;;  %11746 = vst [vmem:[#allocation13_spill] sm:$0xff] %v5476_v49  ;;  %v851_v1 = vrot.slane %v5410_v0, 7  ;;  %v10943_v13 = vrot.slane %v5414_v3, 7  ;;  %v854_v44 = vrot.slane %v5418_v28, 7  ;;  %v10945_v19 = vrot.slane %v5421_v24, 7 }
  0x8b   :  { %v5506_v38 = vsel %vm201_vm0, %v10944_v39, %v10939_v31  ;;  %v5513_v16 = vsel %vm201_vm0, %v10942_v56, %v10938_v36  ;;  %v5522_v17 = vsel %vm201_vm0, %v10941_v22, %v10940_v62  ;;  %v857_v10 = vrot.slane %v5424_v9, 7 }
  0x8c   :  { %11747 = vst [vmem:[#allocation7_spill] sm:$0xff] %v5513_v16  ;;  %11748 = vst [vmem:[#allocation14_spill] sm:$0xff] %v5522_v17  ;;  %v10946_v11 = vrot.slane %v5427_v60, 7  ;;  %v860_v7 = vrot.slane %v5430_v63, 7  ;;  %v10947_v36 = vrot.slane %v5433_v5, 7  ;;  %v863_v59 = vrot.slane %v5436_v33, 7 }
  0x8d   :  { %v10948_v14 = vrot.slane %v5439_v40, 7  ;;  %v866_v31 = vrot.slane %v5442_v54, 7  ;;  %v10949_v47 = vrot.slane %v5445_v2, 7  ;;  %v869_v62 = vrot.slane %v5448_v27, 7 }
  0x8e   :  { %v10950_v55 = vrot.slane %v5451_v23, 7  ;;  %v872_v41 = vrot.slane %v5454_v42, 7  ;;  %v10951_v46 = vrot.slane %v5456_v6, 7  ;;  %v875_v57 = vrot.slane %v5458_v61, 7 }
  0x8f   :  { %v10953_v32 = vrot.slane %v5460_v30, 7  ;;  %v878_v50 = vrot.slane %v5462_v18, 7  ;;  %v10956_v4 = vrot.slane %v5464_v34, 7  ;;  %v881_v45 = vrot.slane %v5466_v48, 7 }
  0x90   :  { %v10958_v52 = vrot.slane %v5468_v8, 7  ;;  %v5546_v15 = vsel %vm201_vm0, %v851_v1, %v10943_v13  ;;  %v5551_v26 = vsel %vm201_vm0, %v854_v44, %v10945_v19  ;;  %v884_v22 = vrot.slane %v5470_v12, 7 }
  0x91   :  { %11749 = vst [vmem:[#allocation15_spill] sm:$0xff] %v5546_v15  ;;  %11750 = vst [vmem:[#allocation2_spill] sm:$0xff] %v5551_v26  ;;  %v5558_v56 = vsel %vm201_vm0, %v857_v10, %v10946_v11  ;;  %v5563_v51 = vsel %vm201_vm0, %v860_v7, %v10947_v36  ;;  %v887_v13 = vrot.slane %v5474_v25, 7  ;;  %v5570_v19 = vsel %vm201_vm0, %v863_v59, %v10948_v14 }
  0x92   :  { %11751 = vst [vmem:[#allocation11_spill] sm:$0xff] %v5558_v56  ;;  %11752 = vst [vmem:[#allocation47_spill] sm:$0xff] %v5563_v51  ;;  %v5575_v58 = vsel %vm201_vm0, %v866_v31, %v10949_v47  ;;  %v5580_v11 = vsel %vm201_vm0, %v869_v62, %v10950_v55  ;;  %v5585_v36 = vsel %vm201_vm0, %v872_v41, %v10951_v46  ;;  %v938_v39 = vrot.slane %v5390_v35, 5 }
  0x93   :  { %11753 = vst [vmem:[#allocation48_spill] sm:$0xff] %v5570_v19  ;;  %11754 = vst [vmem:[#allocation49_spill] sm:$0xff] %v5575_v58  ;;  %v5590_v14 = vsel %vm201_vm0, %v875_v57, %v10953_v32  ;;  %v5595_v47 = vsel %vm201_vm0, %v878_v50, %v10956_v4  ;;  %v5600_v55 = vsel %vm201_vm0, %v881_v45, %v10958_v52  ;;  %v11760_v46 = vrot.slane %v5472_v53, 7 }
  0x94   :  { %11755 = vst [vmem:[#allocation50_spill] sm:$0xff] %v5580_v11  ;;  %11756 = vst [vmem:[#allocation51_spill] sm:$0xff] %v5585_v36  ;;  %v939_v32 = vrot.slane %v5398_v21, 5  ;;  %v941_v11 = vrot.slane %v5414_v3, 5  ;;  %v11762_v4 = vrot.slane %v5476_v49, 7  ;;  %v942_v52 = vrot.slane %v5421_v24, 5 }
  0x95   :  { %11757 = vst [vmem:[#allocation52_spill] sm:$0xff] %v5590_v14  ;;  %11758 = vst [vmem:[#allocation53_spill] sm:$0xff] %v5595_v47  ;;  %v5606_v36 = vsel %vm201_vm0, %v884_v22, %v11760_v46  ;;  %v940_v14 = vrot.slane %v5406_v43, 5  ;;  %v944_v58 = vrot.slane %v5433_v5, 5  ;;  %v945_v46 = vrot.slane %v5439_v40, 5 }
  0x96   :  { %11759 = vst [vmem:[#allocation54_spill] sm:$0xff] %v5600_v55  ;;  %11761 = vst [vmem:[#allocation55_spill] sm:$0xff] %v5606_v36  ;;  %v5614_v47 = vsel %vm201_vm0, %v887_v13, %v11762_v4  ;;  %v943_v55 = vrot.slane %v5427_v60, 5  ;;  %v946_v36 = vrot.slane %v5445_v2, 5  ;;  %v947_v19 = vrot.slane %v5451_v23, 5 }
  0x97   :  { %11763 = vst [vmem:[#allocation56_spill] sm:$0xff] %v5614_v47  ;;  %v948_v51 = vrot.slane %v5456_v6, 5  ;;  %v949_v56 = vrot.slane %v5460_v30, 5  ;;  %v950_v26 = vrot.slane %v5464_v34, 5  ;;  %v951_v4 = vrot.slane %v5468_v8, 5 }
  0x98   :  { %v952_v47 = vrot.slane %v5472_v53, 5  ;;  %v953_v15 = vrot.slane %v5476_v49, 5  ;;  %v11764_v17 = vrot.slane %v5386_v29, 7  ;;  %v11765_v16 = vrot.slane %v5386_v29, 1 }
  0x99   :  { %v11766_v23 = vrot.slane %v5394_v20, 7  ;;  %v11767_v6 = vrot.slane %v5394_v20, 1  ;;  %v11768_v8 = vrot.slane %v5402_v37, 7  ;;  %v11769_v53 = vrot.slane %v5402_v37, 1 }
  0x9a   :  { %v5633_v2 = vsel %vm201_vm0, %v11765_v16, %v11764_v17  ;;  %v11770_v34 = vrot.slane %v5410_v0, 1  ;;  %v11771_v16 = vrot.slane %v5418_v28, 1  ;;  %v11772_v20 = vrot.slane %v5424_v9, 1 }
  0x9b   :  { %v5640_v30 = vsel %vm201_vm0, %v11767_v6, %v11766_v23  ;;  %v5647_v49 = vsel %vm201_vm0, %v11769_v53, %v11768_v8  ;;  %v11773_v37 = vrot.slane %v5430_v63, 1  ;;  %v11774_v0 = vrot.slane %v5436_v33, 1 }
  0x9c   :  { %v5652_v29 = vsel %vm201_vm0, %v11770_v34, %v851_v1  ;;  %v5657_v17 = vsel %vm201_vm0, %v11771_v16, %v854_v44  ;;  %v5662_v23 = vsel %vm201_vm0, %v11772_v20, %v857_v10  ;;  %v11776_v28 = vrot.slane %v5442_v54, 1  ;;  %v11814_v20 = vld [vmem:[#allocation25_spill] sm:$0xff] }
  0x9d   :  { %v5667_v6 = vsel %vm201_vm0, %v11773_v37, %v860_v7  ;;  %v5672_v34 = vsel %vm201_vm0, %v11774_v0, %v863_v59  ;;  %v11777_v9 = vrot.slane %v5448_v27, 1  ;;  %v11779_v63 = vrot.slane %v5454_v42, 1 }
  0x9e   :  { %11775 = vst [vmem:[#allocation57_spill] sm:$0xff] %v5672_v34  ;;  %v5677_v8 = vsel %vm201_vm0, %v11776_v28, %v866_v31  ;;  %v11781_v33 = vrot.slane %v5458_v61, 1  ;;  %v11783_v54 = vrot.slane %v5462_v18, 1  ;;  %v11785_v27 = vrot.slane %v5466_v48, 1  ;;  %v11817_v28 = vld [vmem:[#allocation35_spill] sm:$0xff] }
  0x9f   :  { %v5682_v53 = vsel %vm201_vm0, %v11777_v9, %v869_v62  ;;  %v5687_v1 = vsel %vm201_vm0, %v11779_v63, %v872_v41  ;;  %v11787_v42 = vrot.slane %v5390_v35, 7  ;;  %v11789_v61 = vrot.slane %v5470_v12, 1 }
  0xa0   :  { %11778 = vst [vmem:[#allocation58_spill] sm:$0xff] %v5682_v53  ;;  %11780 = vst [vmem:[#allocation59_spill] sm:$0xff] %v5687_v1  ;;  %v5692_v59 = vsel %vm201_vm0, %v11781_v33, %v875_v57  ;;  %v5697_v31 = vsel %vm201_vm0, %v11783_v54, %v878_v50  ;;  %v5702_v62 = vsel %vm201_vm0, %v11785_v27, %v881_v45  ;;  %v11791_v18 = vrot.slane %v5474_v25, 1 }
  0xa1   :  { %11782 = vst [vmem:[#allocation60_spill] sm:$0xff] %v5692_v59  ;;  %11784 = vst [vmem:[#allocation61_spill] sm:$0xff] %v5697_v31  ;;  %v5707_v41 = vsel %vm201_vm0, %v11787_v42, %v938_v39  ;;  %v5712_v57 = vsel %vm201_vm0, %v11789_v61, %v884_v22  ;;  %v11793_v48 = vrot.slane %v5398_v21, 7  ;;  %v11795_v35 = vrot.slane %v5406_v43, 7  ;;  %v11826_v61 = vld [vmem:[#allocation10_spill] sm:$0xff] }
  0xa2   :  { %11786 = vst [vmem:[#allocation62_spill] sm:$0xff] %v5702_v62  ;;  %11788 = vst [vmem:[#allocation63_spill] sm:$0xff] %v5707_v41  ;;  %v5717_v50 = vsel %vm201_vm0, %v11791_v18, %v887_v13  ;;  %v11797_v12 = vrot.slane %v5414_v3, 7  ;;  %v11799_v25 = vrot.slane %v5421_v24, 7  ;;  %v11801_v21 = vrot.slane %v5427_v60, 7  ;;  %v11807_v60 = vld [vmem:[#allocation24_spill] sm:$0xff] }
  0xa3   :  { %11790 = vst [vmem:[#allocation64_spill] sm:$0xff] %v5712_v57  ;;  %11792 = vst [vmem:[#allocation65_spill] sm:$0xff] %v5717_v50  ;;  %v5722_v45 = vsel %vm201_vm0, %v11793_v48, %v939_v32  ;;  %v5727_v39 = vsel %vm201_vm0, %v11795_v35, %v940_v14  ;;  %v11803_v43 = vrot.slane %v5433_v5, 7  ;;  %v11805_v3 = vrot.slane %v5439_v40, 7  ;;  %v11810_v5 = vld [vmem:[#allocation34_spill] sm:$0xff]  ;;  %v11829_v48 = vld [vmem:[#allocation13_spill] sm:$0xff] }
  0xa4   :  { %11794 = vst [vmem:[#allocation66_spill] sm:$0xff] %v5722_v45  ;;  %11796 = vst [vmem:[#allocation67_spill] sm:$0xff] %v5727_v39  ;;  %v5732_v22 = vsel %vm201_vm0, %v11797_v12, %v941_v11  ;;  %v5737_v13 = vsel %vm201_vm0, %v11799_v25, %v942_v52  ;;  %v5742_v32 = vsel %vm201_vm0, %v11801_v21, %v943_v55  ;;  %v1034_v24 = vrot.slane %v5633_v2, 1  ;;  %v11832_v21 = vld [vmem:[#allocation14_spill] sm:$0xff] }
  0xa5   :  { %11798 = vst [vmem:[#allocation68_spill] sm:$0xff] %v5732_v22  ;;  %11800 = vst [vmem:[#allocation69_spill] sm:$0xff] %v5737_v13  ;;  %v5747_v14 = vsel %vm201_vm0, %v11803_v43, %v944_v58  ;;  %v5752_v44 = vsel %vm201_vm0, %v11805_v3, %v945_v46  ;;  %v1035_v52 = vrot.slane %v5506_v38, 1  ;;  %v1037_v10 = vrot.slane %v5707_v41, 1  ;;  %v11813_v46 = vld [vmem:[#allocation7_spill] sm:$0xff] }
  0xa6   :  { %11802 = vst [vmem:[#allocation70_spill] sm:$0xff] %v5742_v32  ;;  %11804 = vst [vmem:[#allocation71_spill] sm:$0xff] %v5747_v14  ;;  %v11808_v11 = vrot.slane %v11807_v60, 7  ;;  %v11811_v7 = vrot.slane %v11810_v5, 7  ;;  %v1039_v40 = vrot.slane %v5640_v30, 1  ;;  %v1040_v16 = vrot.slane %v11813_v46, 1 }
  0xa7   :  { %11806 = vst [vmem:[#allocation72_spill] sm:$0xff] %v5752_v44  ;;  %v11815_v37 = vrot.slane %v11814_v20, 7  ;;  %v11818_v9 = vrot.slane %v11817_v28, 7  ;;  %v11827_v18 = vrot.slane %v11826_v61, 7  ;;  %v11830_v35 = vrot.slane %v11829_v48, 7  ;;  %v11833_v60 = vld [vmem:[#allocation15_spill] sm:$0xff] }
  0xa8   :  { %v5760_v55 = vsel %vm201_vm0, %v11808_v11, %v946_v36  ;;  %v5765_v58 = vsel %vm201_vm0, %v11811_v7, %v947_v19  ;;  %v11820_v36 = vld [vmem:[#allocation37_spill] sm:$0xff]  ;;  %v11823_v19 = vld [vmem:[#allocation26_spill] sm:$0xff]  ;;  %v1042_v12 = vrot.slane %v5722_v45, 1  ;;  %v5802_v25 = vsel %vm394_vm1, %v1034_v24, %v1035_v52  ;;  %v11837_v61 = vld [vmem:[#allocation48_spill] sm:$0xff] }
  0xa9   :  { %11809 = vst [vmem:[#allocation24_spill] sm:$0xff] %v5760_v55  ;;  %11812 = vst [vmem:[#allocation34_spill] sm:$0xff] %v5765_v58  ;;  %v5772_v0 = vsel %vm201_vm0, %v11815_v37, %v948_v51  ;;  %v5777_v63 = vsel %vm201_vm0, %v11818_v9, %v949_v56  ;;  %v11821_v33 = vrot.slane %v11820_v36, 7  ;;  %v11824_v27 = vrot.slane %v11823_v19, 7  ;;  %v11834_v24 = vld [vmem:[#allocation2_spill] sm:$0xff]  ;;  %v11835_v37 = vld [vmem:[#allocation11_spill] sm:$0xff] }
  0xaa   :  { %11816 = vst [vmem:[#allocation7_spill] sm:$0xff] %v5772_v0  ;;  %11819 = vst [vmem:[#allocation25_spill] sm:$0xff] %v5777_v63  ;;  %v5792_v51 = vsel %vm201_vm0, %v11827_v18, %v952_v47  ;;  %v5797_v56 = vsel %vm201_vm0, %v11830_v35, %v953_v15  ;;  %v1045_v43 = vrot.slane %v11832_v21, 1  ;;  %v1047_v47 = vrot.slane %v5727_v39, 1  ;;  %v11836_v36 = vld [vmem:[#allocation47_spill] sm:$0xff]  ;;  %v11838_v39 = vld [vmem:[#allocation49_spill] sm:$0xff] }
  0xab   :  { %v5782_v54 = vsel %vm201_vm0, %v11821_v33, %v950_v26  ;;  %v5787_v42 = vsel %vm201_vm0, %v11824_v27, %v951_v4  ;;  %11828 = vst [vmem:[#allocation26_spill] sm:$0xff] %v5792_v51  ;;  %11831 = vst [vmem:[#allocation10_spill] sm:$0xff] %v5797_v56  ;;  %v1044_v26 = vrot.slane %v5647_v49, 1  ;;  %v5805_v4 = vsel %vm394_vm1, %v1035_v52, %v1037_v10 }
  0xac   :  { %11822 = vst [vmem:[#allocation35_spill] sm:$0xff] %v5782_v54  ;;  %11825 = vst [vmem:[#allocation37_spill] sm:$0xff] %v5787_v42  ;;  %v5810_v3 = vsel %vm394_vm1, %v1039_v40, %v1040_v16  ;;  %v1049_v15 = vrot.slane %v5652_v29, 1  ;;  %v1050_v11 = vrot.slane %v11833_v60, 1  ;;  %v1052_v5 = vrot.slane %v5732_v22, 1 }
  0xad   :  { %v1054_v7 = vrot.slane %v5657_v17, 1  ;;  %v1055_v20 = vrot.slane %v11834_v24, 1  ;;  %v1057_v52 = vrot.slane %v5737_v13, 1  ;;  %v1059_v10 = vrot.slane %v5662_v23, 1 }
  0xae   :  { %v1060_v28 = vrot.slane %v11835_v37, 1  ;;  %v1062_v9 = vrot.slane %v5742_v32, 1  ;;  %v1064_v40 = vrot.slane %v5667_v6, 1  ;;  %v1065_v33 = vrot.slane %v11836_v36, 1 }
  0xaf   :  { %v1067_v19 = vrot.slane %v5747_v14, 1  ;;  %v1069_v27 = vrot.slane %v5672_v34, 1  ;;  %v1070_v18 = vrot.slane %v11837_v61, 1  ;;  %v1072_v48 = vrot.slane %v5752_v44, 1 }
  0xb0   :  { %v1043_v35 = vsel %vm394_vm1, %v1040_v16, %v1042_v12  ;;  %v1046_v13 = vsel %vm394_vm1, %v1044_v26, %v1045_v43  ;;  %v1074_v22 = vrot.slane %v5677_v8, 1  ;;  %v1075_v32 = vrot.slane %v11838_v39, 1 }
  0xb1   :  { %v1048_v45 = vsel %vm394_vm1, %v1045_v43, %v1047_v47  ;;  %v1051_v41 = vsel %vm394_vm1, %v1049_v15, %v1050_v11  ;;  %v1053_v14 = vsel %vm394_vm1, %v1050_v11, %v1052_v5  ;;  %v1077_v34 = vrot.slane %v5760_v55, 1  ;;  %v11839_v5 = vld [vmem:[#allocation50_spill] sm:$0xff] }
  0xb2   :  { %v1056_v61 = vsel %vm394_vm1, %v1054_v7, %v1055_v20  ;;  %v1058_v44 = vsel %vm394_vm1, %v1055_v20, %v1057_v52  ;;  %v1061_v16 = vsel %vm394_vm1, %v1059_v10, %v1060_v28  ;;  %v1063_v12 = vsel %vm394_vm1, %v1060_v28, %v1062_v9  ;;  %v11840_v28 = vld [vmem:[#allocation51_spill] sm:$0xff] }
  0xb3   :  { %v1066_v26 = vsel %vm394_vm1, %v1064_v40, %v1065_v33  ;;  %v1068_v39 = vsel %vm394_vm1, %v1065_v33, %v1067_v19  ;;  %v1071_v43 = vsel %vm394_vm1, %v1069_v27, %v1070_v18  ;;  %v1073_v47 = vsel %vm394_vm1, %v1070_v18, %v1072_v48  ;;  %v11841_v19 = vld [vmem:[#allocation52_spill] sm:$0xff]  ;;  %v11842_v48 = vld [vmem:[#allocation53_spill] sm:$0xff] }
  0xb4   :  { %v1076_v15 = vsel %vm394_vm1, %v1074_v22, %v1075_v32  ;;  %v1079_v11 = vrot.slane %v5682_v53, 1  ;;  %v1080_v7 = vrot.slane %v11839_v5, 1  ;;  %v1082_v20 = vrot.slane %v5765_v58, 1  ;;  %v11844_v5 = vld [vmem:[#allocation55_spill] sm:$0xff]  ;;  %v11845_v53 = vld [vmem:[#allocation56_spill] sm:$0xff] }
  0xb5   :  { %v1078_v52 = vsel %vm394_vm1, %v1075_v32, %v1077_v34  ;;  %v1084_v10 = vrot.slane %v5687_v1, 1  ;;  %v1085_v9 = vrot.slane %v11840_v28, 1  ;;  %v1087_v40 = vrot.slane %v5772_v0, 1  ;;  %v11843_v32 = vld [vmem:[#allocation54_spill] sm:$0xff] }
  0xb6   :  { %v1089_v33 = vrot.slane %v5692_v59, 1  ;;  %v1090_v27 = vrot.slane %v11841_v19, 1  ;;  %v1092_v22 = vrot.slane %v5777_v63, 1  ;;  %v1094_v18 = vrot.slane %v5697_v31, 1 }
  0xb7   :  { %v1095_v55 = vrot.slane %v11842_v48, 1  ;;  %v1097_v58 = vrot.slane %v5782_v54, 1  ;;  %v1099_v34 = vrot.slane %v5702_v62, 1  ;;  %v1100_v1 = vrot.slane %v11843_v32, 1 }
  0xb8   :  { %v1102_v28 = vrot.slane %v5787_v42, 1  ;;  %v1104_v0 = vrot.slane %v5712_v57, 1  ;;  %v1105_v59 = vrot.slane %v11844_v5, 1  ;;  %v1107_v19 = vrot.slane %v5792_v51, 1 }
  0xb9   :  { %v1081_v63 = vsel %vm394_vm1, %v1079_v11, %v1080_v7  ;;  %v1109_v31 = vrot.slane %v5717_v50, 1  ;;  %v1110_v48 = vrot.slane %v11845_v53, 1  ;;  %v1112_v54 = vrot.slane %v5797_v56, 1 }
  0xba   :  { %v1083_v62 = vsel %vm394_vm1, %v1080_v7, %v1082_v20  ;;  %v1086_v32 = vsel %vm394_vm1, %v1084_v10, %v1085_v9  ;;  %v1088_v42 = vsel %vm394_vm1, %v1085_v9, %v1087_v40  ;;  %v1091_v57 = vsel %vm394_vm1, %v1089_v33, %v1090_v27 }
  0xbb   :  { %v1093_v5 = vsel %vm394_vm1, %v1090_v27, %v1092_v22  ;;  %v1096_v51 = vsel %vm394_vm1, %v1094_v18, %v1095_v55  ;;  %v1098_v11 = vsel %vm394_vm1, %v1095_v55, %v1097_v58  ;;  %v1101_v50 = vsel %vm394_vm1, %v1099_v34, %v1100_v1  ;;  %v11865_v34 = vld [vmem:[#allocation63_spill] sm:$0xff] }
  0xbc   :  { %v1103_v53 = vsel %vm394_vm1, %v1100_v1, %v1102_v28  ;;  %v1106_v56 = vsel %vm394_vm1, %v1104_v0, %v1105_v59  ;;  %v1108_v7 = vsel %vm394_vm1, %v1105_v59, %v1107_v19  ;;  %v5880_v20 = vadd.f32 %v5802_v25, %v5633_v2 }
  0xbd   :  { %v1111_v10 = vsel %vm394_vm1, %v1109_v31, %v1110_v48  ;;  %v1113_v9 = vsel %vm394_vm1, %v1110_v48, %v1112_v54  ;;  %v5886_v40 = vadd.f32 %v5805_v4, %v5506_v38  ;;  %v5890_v55 = vadd.f32 %v5810_v3, %v5640_v30 }
  0xbe   :  { %v5893_v1 = vadd.f32 %v1043_v35, %v11813_v46  ;;  %v5896_v59 = vadd.f32 %v1046_v13, %v5647_v49  ;;  %v5899_v58 = vadd.f32 %v1048_v45, %v11832_v21  ;;  %v5902_v31 = vadd.f32 %v1051_v41, %v5652_v29 }
  0xbf   :  { %v5905_v0 = vadd.f32 %v1053_v14, %v11833_v60  ;;  %v5908_v54 = vadd.f32 %v1056_v61, %v5657_v17  ;;  %v5911_v25 = vadd.f32 %v1058_v44, %v11834_v24  ;;  %v5914_v4 = vadd.f32 %v1061_v16, %v5662_v23  ;;  %v11846_v14 = vld [vmem:[#allocation57_spill] sm:$0xff]  ;;  %v11848_v61 = vld [vmem:[#allocation48_spill] sm:$0xff] }
  0xc0   :  { %v5917_v13 = vadd.f32 %v1063_v12, %v11835_v37  ;;  %v5920_v45 = vadd.f32 %v1066_v26, %v5667_v6  ;;  %v5923_v41 = vadd.f32 %v1068_v39, %v11836_v36  ;;  %v5926_v3 = vadd.f32 %v1071_v43, %v11846_v14  ;;  %v11851_v16 = vld [vmem:[#allocation49_spill] sm:$0xff]  ;;  %v11853_v12 = vld [vmem:[#allocation58_spill] sm:$0xff]  ;;  %v11857_v39 = vld [vmem:[#allocation59_spill] sm:$0xff] }
  0xc1   :  { %v5929_v35 = vadd.f32 %v1073_v47, %v11848_v61  ;;  %v5932_v44 = vadd.f32 %v1076_v15, %v5677_v8  ;;  %v5935_v28 = vadd.f32 %v1078_v52, %v11851_v16  ;;  %v5938_v33 = vadd.f32 %v1081_v63, %v11853_v12  ;;  %v11855_v26 = vld [vmem:[#allocation50_spill] sm:$0xff]  ;;  %v11859_v43 = vld [vmem:[#allocation51_spill] sm:$0xff]  ;;  %v11861_v47 = vld [vmem:[#allocation60_spill] sm:$0xff] }
  0xc2   :  { %11847 = vst [vmem:[#allocation13_spill] sm:$0xff] %v5926_v3  ;;  %v5941_v19 = vadd.f32 %v1083_v62, %v11855_v26  ;;  %v5944_v27 = vadd.f32 %v1086_v32, %v11857_v39  ;;  %v5947_v22 = vadd.f32 %v1088_v42, %v11859_v43  ;;  %v5950_v18 = vadd.f32 %v1091_v57, %v11861_v47  ;;  %v11863_v15 = vld [vmem:[#allocation52_spill] sm:$0xff]  ;;  %v11866_v62 = vld [vmem:[#allocation61_spill] sm:$0xff] }
  0xc3   :  { %11849 = vst [vmem:[#allocation14_spill] sm:$0xff] %v5929_v35  ;;  %11850 = vst [vmem:[#allocation15_spill] sm:$0xff] %v5932_v44  ;;  %v5953_v48 = vadd.f32 %v1093_v5, %v11863_v15  ;;  %v1178_v52 = vrot.slane %v5633_v2, 2  ;;  %v1179_v63 = vrot.slane %v5506_v38, 2  ;;  %v11868_v32 = vld [vmem:[#allocation53_spill] sm:$0xff]  ;;  %v1183_v42 = vrot.slane %v5640_v30, 2 }
  0xc4   :  { %11852 = vst [vmem:[#allocation2_spill] sm:$0xff] %v5935_v28  ;;  %11854 = vst [vmem:[#allocation11_spill] sm:$0xff] %v5938_v33  ;;  %v1181_v33 = vrot.slane %v11865_v34, 2  ;;  %v1184_v57 = vrot.slane %v11813_v46, 2  ;;  %v11872_v5 = vld [vmem:[#allocation54_spill] sm:$0xff]  ;;  %v11874_v2 = vld [vmem:[#allocation64_spill] sm:$0xff] }
  0xc5   :  { %11856 = vst [vmem:[#allocation47_spill] sm:$0xff] %v5941_v19  ;;  %11858 = vst [vmem:[#allocation57_spill] sm:$0xff] %v5944_v27  ;;  %v5959_v19 = vadd.f32 %v1096_v51, %v11866_v62  ;;  %v5962_v27 = vadd.f32 %v1098_v11, %v11868_v32  ;;  %v5973_v38 = vadd.f32 %v1106_v56, %v11874_v2  ;;  %v11876_v34 = vld [vmem:[#allocation55_spill] sm:$0xff]  ;;  %v11878_v51 = vld [vmem:[#allocation65_spill] sm:$0xff]  ;;  %v1189_v56 = vrot.slane %v11832_v21, 2 }
  0xc6   :  { %11860 = vst [vmem:[#allocation48_spill] sm:$0xff] %v5947_v22  ;;  %11862 = vst [vmem:[#allocation49_spill] sm:$0xff] %v5950_v18  ;;  %v11870_v18 = vld [vmem:[#allocation62_spill] sm:$0xff]  ;;  %v5976_v28 = vadd.f32 %v1108_v7, %v11876_v34  ;;  %v11880_v11 = vld [vmem:[#allocation56_spill] sm:$0xff]  ;;  %v1204_v21 = vrot.slane %v11835_v37, 2  ;;  %v1218_v37 = vrot.slane %v5677_v8, 2 }
  0xc7   :  { %11864 = vst [vmem:[#allocation58_spill] sm:$0xff] %v5953_v48  ;;  %11867 = vst [vmem:[#allocation50_spill] sm:$0xff] %v5959_v19  ;;  %v5967_v22 = vadd.f32 %v1101_v50, %v11870_v18  ;;  %v5970_v48 = vadd.f32 %v1103_v53, %v11872_v5  ;;  %v5979_v19 = vadd.f32 %v1111_v10, %v11878_v51  ;;  %v11882_v30 = vld [vmem:[#allocation66_spill] sm:$0xff]  ;;  %v1188_v50 = vrot.slane %v5647_v49, 2  ;;  %v11883_v7 = vld [vmem:[#allocation67_spill] sm:$0xff] }
  0xc8   :  { %11869 = vst [vmem:[#allocation59_spill] sm:$0xff] %v5962_v27  ;;  %11875 = vst [vmem:[#allocation52_spill] sm:$0xff] %v5973_v38  ;;  %v5982_v27 = vadd.f32 %v1113_v9, %v11880_v11  ;;  %v1186_v46 = vrot.slane %v11882_v30, 2  ;;  %v5990_v53 = vsel %vm539_vm2, %v1179_v63, %v1181_v33  ;;  %v5995_v10 = vsel %vm539_vm2, %v1183_v42, %v1184_v57  ;;  %v11884_v30 = vld [vmem:[#allocation68_spill] sm:$0xff]  ;;  %v11885_v38 = vld [vmem:[#allocation69_spill] sm:$0xff] }
  0xc9   :  { %11871 = vst [vmem:[#allocation51_spill] sm:$0xff] %v5967_v22  ;;  %11873 = vst [vmem:[#allocation60_spill] sm:$0xff] %v5970_v48  ;;  %v5987_v22 = vsel %vm539_vm2, %v1178_v52, %v1179_v63  ;;  %v1193_v9 = vrot.slane %v5652_v29, 2  ;;  %v1198_v49 = vrot.slane %v5657_v17, 2  ;;  %v1199_v52 = vrot.slane %v11834_v24, 2  ;;  %v11887_v44 = vld [vmem:[#allocation71_spill] sm:$0xff] }
  0xca   :  { %11877 = vst [vmem:[#allocation63_spill] sm:$0xff] %v5976_v28  ;;  %11879 = vst [vmem:[#allocation61_spill] sm:$0xff] %v5979_v19  ;;  %v1191_v28 = vrot.slane %v11883_v7, 2  ;;  %v1196_v19 = vrot.slane %v11884_v30, 2  ;;  %v1201_v33 = vrot.slane %v11885_v38, 2  ;;  %v1203_v63 = vrot.slane %v5662_v23, 2 }
  0xcb   :  { %11881 = vst [vmem:[#allocation53_spill] sm:$0xff] %v5982_v27  ;;  %v1194_v27 = vrot.slane %v11833_v60, 2  ;;  %v11886_v7 = vld [vmem:[#allocation70_spill] sm:$0xff]  ;;  %v1208_v42 = vrot.slane %v5667_v6, 2  ;;  %v1209_v29 = vrot.slane %v11836_v36, 2  ;;  %v1211_v60 = vrot.slane %v11887_v44, 2 }
  0xcc   :  { %v1206_v48 = vrot.slane %v11886_v7, 2  ;;  %v1213_v30 = vrot.slane %v11846_v14, 2  ;;  %v1214_v17 = vrot.slane %v11848_v61, 2  ;;  %v11888_v35 = vld [vmem:[#allocation72_spill] sm:$0xff]  ;;  %v1187_v38 = vsel %vm539_vm2, %v1184_v57, %v1186_v46 }
  0xcd   :  { %v1216_v24 = vrot.slane %v11888_v35, 2  ;;  %v1190_v23 = vsel %vm539_vm2, %v1188_v50, %v1189_v56  ;;  %v1219_v7 = vrot.slane %v11851_v16, 2  ;;  %v1192_v6 = vsel %vm539_vm2, %v1189_v56, %v1191_v28  ;;  %v11889_v3 = vld [vmem:[#allocation24_spill] sm:$0xff]  ;;  %v11890_v56 = vld [vmem:[#allocation34_spill] sm:$0xff] }
  0xce   :  { %v1195_v36 = vsel %vm539_vm2, %v1193_v9, %v1194_v27  ;;  %v1197_v44 = vsel %vm539_vm2, %v1194_v27, %v1196_v19  ;;  %v1221_v14 = vrot.slane %v11889_v3, 2  ;;  %v1200_v61 = vsel %vm539_vm2, %v1198_v49, %v1199_v52 }
  0xcf   :  { %v1202_v35 = vsel %vm539_vm2, %v1199_v52, %v1201_v33  ;;  %v1205_v57 = vsel %vm539_vm2, %v1203_v63, %v1204_v21  ;;  %v1207_v46 = vsel %vm539_vm2, %v1204_v21, %v1206_v48  ;;  %v1210_v8 = vsel %vm539_vm2, %v1208_v42, %v1209_v29  ;;  %v11891_v33 = vld [vmem:[#allocation7_spill] sm:$0xff] }
  0xd0   :  { %v1212_v16 = vsel %vm539_vm2, %v1209_v29, %v1211_v60  ;;  %v1215_v28 = vsel %vm539_vm2, %v1213_v30, %v1214_v17  ;;  %v1217_v50 = vsel %vm539_vm2, %v1214_v17, %v1216_v24  ;;  %v1220_v19 = vsel %vm539_vm2, %v1218_v37, %v1219_v7  ;;  %v11892_v29 = vld [vmem:[#allocation25_spill] sm:$0xff]  ;;  %v11893_v30 = vld [vmem:[#allocation35_spill] sm:$0xff] }
  0xd1   :  { %v1223_v3 = vrot.slane %v11853_v12, 2  ;;  %v1224_v27 = vrot.slane %v11855_v26, 2  ;;  %v1226_v9 = vrot.slane %v11890_v56, 2  ;;  %v1222_v49 = vsel %vm539_vm2, %v1219_v7, %v1221_v14  ;;  %v11894_v37 = vld [vmem:[#allocation37_spill] sm:$0xff]  ;;  %v11895_v14 = vld [vmem:[#allocation26_spill] sm:$0xff] }
  0xd2   :  { %v1228_v48 = vrot.slane %v11857_v39, 2  ;;  %v1229_v52 = vrot.slane %v11859_v43, 2  ;;  %v1231_v63 = vrot.slane %v11891_v33, 2  ;;  %v1233_v21 = vrot.slane %v11861_v47, 2  ;;  %v11896_v33 = vld [vmem:[#allocation10_spill] sm:$0xff] }
  0xd3   :  { %v1234_v42 = vrot.slane %v11863_v15, 2  ;;  %v1236_v60 = vrot.slane %v11892_v29, 2  ;;  %v1238_v12 = vrot.slane %v11866_v62, 2  ;;  %v1239_v26 = vrot.slane %v11868_v32, 2 }
  0xd4   :  { %v1241_v17 = vrot.slane %v11893_v30, 2  ;;  %v1243_v24 = vrot.slane %v11870_v18, 2  ;;  %v1244_v39 = vrot.slane %v11872_v5, 2  ;;  %v1246_v43 = vrot.slane %v11894_v37, 2 }
  0xd5   :  { %v1248_v7 = vrot.slane %v11874_v2, 2  ;;  %v1249_v47 = vrot.slane %v11876_v34, 2  ;;  %v1251_v15 = vrot.slane %v11895_v14, 2  ;;  %v1225_v56 = vsel %vm539_vm2, %v1223_v3, %v1224_v27 }
  0xd6   :  { %v1253_v62 = vrot.slane %v11878_v51, 2  ;;  %v1254_v32 = vrot.slane %v11880_v11, 2  ;;  %v1256_v29 = vrot.slane %v11896_v33, 2  ;;  %v1227_v18 = vsel %vm539_vm2, %v1224_v27, %v1226_v9 }
  0xd7   :  { %v1230_v5 = vsel %vm539_vm2, %v1228_v48, %v1229_v52  ;;  %v1232_v30 = vsel %vm539_vm2, %v1229_v52, %v1231_v63  ;;  %v1235_v2 = vsel %vm539_vm2, %v1233_v21, %v1234_v42  ;;  %v1237_v34 = vsel %vm539_vm2, %v1234_v42, %v1236_v60 }
  0xd8   :  { %v1240_v37 = vsel %vm539_vm2, %v1238_v12, %v1239_v26  ;;  %v1242_v3 = vsel %vm539_vm2, %v1239_v26, %v1241_v17  ;;  %v1245_v51 = vsel %vm539_vm2, %v1243_v24, %v1244_v39  ;;  %v1247_v11 = vsel %vm539_vm2, %v1244_v39, %v1246_v43  ;;  %v11910_v39 = vld [vmem:[#allocation60_spill] sm:$0xff] }
  0xd9   :  { %v1250_v14 = vsel %vm539_vm2, %v1248_v7, %v1249_v47  ;;  %v1252_v27 = vsel %vm539_vm2, %v1249_v47, %v1251_v15  ;;  %v1290_v9 = vadd.f32 %v5987_v22, %v5880_v20  ;;  %v1255_v48 = vsel %vm539_vm2, %v1253_v62, %v1254_v32  ;;  %v11911_v43 = vld [vmem:[#allocation52_spill] sm:$0xff]  ;;  %v11912_v47 = vld [vmem:[#allocation63_spill] sm:$0xff] }
  0xda   :  { %v1257_v52 = vsel %vm539_vm2, %v1254_v32, %v1256_v29  ;;  %v1291_v63 = vadd.f32 %v5990_v53, %v5886_v40  ;;  %v1292_v21 = vadd.f32 %v5995_v10, %v5890_v55  ;;  %v1293_v42 = vadd.f32 %v1187_v38, %v5893_v1  ;;  %v11897_v53 = vld [vmem:[#allocation13_spill] sm:$0xff]  ;;  %v11898_v10 = vld [vmem:[#allocation14_spill] sm:$0xff]  ;;  %v11899_v38 = vld [vmem:[#allocation15_spill] sm:$0xff] }
  0xdb   :  { %v1294_v60 = vadd.f32 %v1190_v23, %v5896_v59  ;;  %v1295_v12 = vadd.f32 %v1192_v6, %v5899_v58  ;;  %v1296_v26 = vadd.f32 %v1195_v36, %v5902_v31  ;;  %v1297_v20 = vadd.f32 %v1197_v44, %v5905_v0  ;;  %v11900_v23 = vld [vmem:[#allocation2_spill] sm:$0xff]  ;;  %v11901_v6 = vld [vmem:[#allocation11_spill] sm:$0xff]  ;;  %v11903_v44 = vld [vmem:[#allocation57_spill] sm:$0xff] }
  0xdc   :  { %v1298_v22 = vadd.f32 %v1200_v61, %v5908_v54  ;;  %v1299_v17 = vadd.f32 %v1202_v35, %v5911_v25  ;;  %v1300_v24 = vadd.f32 %v1205_v57, %v5914_v4  ;;  %v1301_v40 = vadd.f32 %v1207_v46, %v5917_v13  ;;  %v11902_v36 = vld [vmem:[#allocation47_spill] sm:$0xff]  ;;  %v11904_v61 = vld [vmem:[#allocation48_spill] sm:$0xff]  ;;  %v11905_v35 = vld [vmem:[#allocation49_spill] sm:$0xff] }
  0xdd   :  { %v1302_v55 = vadd.f32 %v1210_v8, %v5920_v45  ;;  %v1303_v1 = vadd.f32 %v1212_v16, %v5923_v41  ;;  %v1304_v59 = vadd.f32 %v1215_v28, %v11897_v53  ;;  %v1305_v58 = vadd.f32 %v1217_v50, %v11898_v10  ;;  %v11906_v57 = vld [vmem:[#allocation58_spill] sm:$0xff]  ;;  %v11908_v16 = vld [vmem:[#allocation59_spill] sm:$0xff]  ;;  %v11914_v32 = vld [vmem:[#allocation53_spill] sm:$0xff] }
  0xde   :  { %v1306_v31 = vadd.f32 %v1220_v19, %v11899_v38  ;;  %v1307_v0 = vadd.f32 %v1222_v49, %v11900_v23  ;;  %v1308_v54 = vadd.f32 %v1225_v56, %v11901_v6  ;;  %v1309_v25 = vadd.f32 %v1227_v18, %v11902_v36  ;;  %v11907_v46 = vld [vmem:[#allocation50_spill] sm:$0xff]  ;;  %v11909_v50 = vld [vmem:[#allocation51_spill] sm:$0xff]  ;;  %v11913_v56 = vld [vmem:[#allocation61_spill] sm:$0xff] }
  0xdf   :  { %v1310_v4 = vadd.f32 %v1230_v5, %v11903_v44  ;;  %v1311_v13 = vadd.f32 %v1232_v30, %v11904_v61  ;;  %v1312_v45 = vadd.f32 %v1235_v2, %v11905_v35  ;;  %v1313_v41 = vadd.f32 %v1237_v34, %v11906_v57  ;;  %v4207_v6 = vld [vmem:[%s10829_s0 + $0x30] sm:$0xff]  ;;  %v4209_v57 = vld [vmem:[%s10829_s0 + $0x40] sm:$0xff] }
  0xe0   :  { %v1314_v8 = vadd.f32 %v1240_v37, %v11907_v46  ;;  %v1315_v28 = vadd.f32 %v1242_v3, %v11908_v16  ;;  %v1316_v19 = vadd.f32 %v1245_v51, %v11909_v50  ;;  %v1317_v49 = vadd.f32 %v1247_v11, %v11910_v39  ;;  %v4201_v37 = vld [vmem:[%s10829_s0] sm:$0xff]  ;;  %v4210_v16 = vld [vmem:[%s10829_s0 + $0x48] sm:$0xff]  ;;  %v4211_v50 = vld [vmem:[%s10829_s0 + $0x50] sm:$0xff] }
  0xe1   :  { %v1318_v7 = vadd.f32 %v1250_v14, %v11911_v43  ;;  %v1319_v15 = vadd.f32 %v1252_v27, %v11912_v47  ;;  %v1320_v62 = vadd.f32 %v1255_v48, %v11913_v56  ;;  %v1321_v33 = vadd.f32 %v1257_v52, %v11914_v32  ;;  %v4202_v27 = vld [vmem:[%s10829_s0 + $0x8] sm:$0xff]  ;;  %v4212_v39 = vld [vmem:[%s10829_s0 + $0x58] sm:$0xff]  ;;  %v4213_v43 = vld [vmem:[%s10829_s0 + $0x60] sm:$0xff] }
  0xe2   :  { %v6100_v29 = vmul.f32 0.11111111, %v1290_v9  ;;  %v6102_v18 = vmul.f32 0.11111111, %v1291_v63  ;;  %v6104_v5 = vmul.f32 0.11111111, %v1292_v21  ;;  %v6115_v3 = vmul.f32 %v4201_v37, %v4201_v37 }
  0xe3   :  { %v6106_v30 = vmul.f32 0.11111111, %v1293_v42  ;;  %v6108_v2 = vmul.f32 0.11111111, %v1294_v60  ;;  %v6110_v34 = vmul.f32 0.11111111, %v1295_v12  ;;  %v6126_v9 = vmul.f32 %v4202_v27, %v4202_v27 }
  0xe4   :  { %11915 = vst [vmem:[#allocation62_spill] sm:$0xff] %v6100_v29  ;;  %11916 = vst [vmem:[#allocation54_spill] sm:$0xff] %v6102_v18  ;;  %v6117_v51 = vmul.f32 0.11111111, %v1296_v26  ;;  %v6119_v11 = vmul.f32 0.11111111, %v1297_v20 }
  0xe5   :  { %11917 = vst [vmem:[#allocation64_spill] sm:$0xff] %v6104_v5  ;;  %11918 = vst [vmem:[#allocation55_spill] sm:$0xff] %v6106_v30  ;;  %v6121_v14 = vmul.f32 0.11111111, %v1298_v22  ;;  %v6128_v48 = vmul.f32 0.11111111, %v1299_v17 }
  0xe6   :  { %11919 = vst [vmem:[#allocation65_spill] sm:$0xff] %v6108_v2  ;;  %11920 = vst [vmem:[#allocation56_spill] sm:$0xff] %v6110_v34  ;;  %v6130_v52 = vmul.f32 0.11111111, %v1300_v24  ;;  %v6132_v63 = vmul.f32 0.11111111, %v1301_v40 }
  0xe7   :  { %11921 = vst [vmem:[#allocation66_spill] sm:$0xff] %v6117_v51  ;;  %11922 = vst [vmem:[#allocation67_spill] sm:$0xff] %v6119_v11  ;;  %v4203_v21 = vld [vmem:[%s10829_s0 + $0x10] sm:$0xff]  ;;  %v6139_v60 = vmul.f32 0.11111111, %v1302_v55  ;;  %v4204_v20 = vld [vmem:[%s10829_s0 + $0x18] sm:$0xff] }
  0xe8   :  { %11923 = vst [vmem:[#allocation68_spill] sm:$0xff] %v6121_v14  ;;  %11924 = vst [vmem:[#allocation69_spill] sm:$0xff] %v6128_v48  ;;  %v6137_v42 = vmul.f32 %v4203_v21, %v4203_v21  ;;  %v6141_v12 = vmul.f32 0.11111111, %v1303_v1  ;;  %v6143_v26 = vmul.f32 0.11111111, %v1304_v59  ;;  %v6148_v22 = vmul.f32 %v4204_v20, %v4204_v20 }
  0xe9   :  { %11925 = vst [vmem:[#allocation70_spill] sm:$0xff] %v6130_v52  ;;  %11926 = vst [vmem:[#allocation71_spill] sm:$0xff] %v6132_v63  ;;  %v6150_v17 = vmul.f32 0.11111111, %v1305_v58  ;;  %v6152_v24 = vmul.f32 0.11111111, %v1306_v31 }
  0xea   :  { %11927 = vst [vmem:[#allocation72_spill] sm:$0xff] %v6139_v60  ;;  %11928 = vst [vmem:[#allocation24_spill] sm:$0xff] %v6141_v12  ;;  %v6154_v40 = vmul.f32 0.11111111, %v1307_v0  ;;  %v4205_v55 = vld [vmem:[%s10829_s0 + $0x20] sm:$0xff]  ;;  %v4206_v58 = vld [vmem:[%s10829_s0 + $0x28] sm:$0xff] }
  0xeb   :  { %11929 = vst [vmem:[#allocation34_spill] sm:$0xff] %v6143_v26  ;;  %11930 = vst [vmem:[#allocation7_spill] sm:$0xff] %v6150_v17  ;;  %v6159_v1 = vmul.f32 %v4205_v55, %v4205_v55  ;;  %v6161_v53 = vmul.f32 0.11111111, %v1308_v54  ;;  %v6163_v59 = vmul.f32 0.11111111, %v1309_v25  ;;  %v6170_v38 = vmul.f32 %v4206_v58, %v4206_v58 }
  0xec   :  { %11931 = vst [vmem:[#allocation25_spill] sm:$0xff] %v6152_v24  ;;  %11932 = vst [vmem:[#allocation35_spill] sm:$0xff] %v6154_v40  ;;  %v6165_v10 = vmul.f32 0.11111111, %v1310_v4  ;;  %v6172_v31 = vmul.f32 0.11111111, %v1311_v13  ;;  %v6181_v54 = vmul.f32 %v4207_v6, %v4207_v6 }
  0xed   :  { %11933 = vst [vmem:[#allocation37_spill] sm:$0xff] %v6161_v53  ;;  %11934 = vst [vmem:[#allocation26_spill] sm:$0xff] %v6163_v59  ;;  %v6174_v23 = vmul.f32 0.11111111, %v1312_v45  ;;  %v6176_v0 = vmul.f32 0.11111111, %v1313_v41  ;;  %v6203_v41 = vmul.f32 %v4209_v57, %v4209_v57 }
  0xee   :  { %11935 = vst [vmem:[#allocation10_spill] sm:$0xff] %v6165_v10  ;;  %11936 = vst [vmem:[#allocation13_spill] sm:$0xff] %v6172_v31  ;;  %v6183_v36 = vmul.f32 0.11111111, %v1314_v8  ;;  %v6185_v25 = vmul.f32 0.11111111, %v1315_v28  ;;  %v6212_v28 = vmul.f32 %v4210_v16, %v4210_v16 }
  0xef   :  { %11937 = vst [vmem:[#allocation14_spill] sm:$0xff] %v6174_v23  ;;  %11938 = vst [vmem:[#allocation15_spill] sm:$0xff] %v6176_v0  ;;  %v6187_v44 = vmul.f32 0.11111111, %v1316_v19  ;;  %v4208_v4 = vld [vmem:[%s10829_s0 + $0x38] sm:$0xff]  ;;  %v6217_v19 = vmul.f32 %v4211_v50, %v4211_v50  ;;  %v4214_v47 = vld [vmem:[%s10829_s0 + $0x68] sm:$0xff] }
  0xf0   :  { %11939 = vst [vmem:[#allocation2_spill] sm:$0xff] %v6183_v36  ;;  %11940 = vst [vmem:[#allocation11_spill] sm:$0xff] %v6185_v25  ;;  %v6192_v61 = vmul.f32 %v4208_v4, %v4208_v4  ;;  %v6194_v13 = vmul.f32 0.11111111, %v1317_v49  ;;  %v6196_v35 = vmul.f32 0.11111111, %v1318_v7  ;;  %v6222_v49 = vmul.f32 %v4212_v39, %v4212_v39 }
  0xf1   :  { %11941 = vst [vmem:[#allocation47_spill] sm:$0xff] %v6187_v44  ;;  %v6198_v45 = vmul.f32 0.11111111, %v1319_v15  ;;  %v6205_v46 = vmul.f32 0.11111111, %v1320_v62  ;;  %v6227_v7 = vmul.f32 %v4213_v43, %v4213_v43  ;;  %v6232_v15 = vmul.f32 %v4214_v47, %v4214_v47  ;;  %v4215_v56 = vld [vmem:[%s10829_s0 + $0x70] sm:$0xff] }
  0xf2   :  { %11942 = vst [vmem:[#allocation57_spill] sm:$0xff] %v6194_v13  ;;  %11943 = vst [vmem:[#allocation48_spill] sm:$0xff] %v6196_v35  ;;  %v6207_v8 = vmul.f32 0.11111111, %v1321_v33  ;;  %v6237_v62 = vmul.f32 %v4215_v56, %v4215_v56  ;;  %v4216_v32 = vld [vmem:[%s10829_s0 + $0x78] sm:$0xff]  ;;  %v4217_v37 = vld [vmem:[%s10829_s0 + $0x80] sm:$0xff]  ;;  %v1387_v13 = vadd.f32 %v6148_v22, %v6126_v9  ;;  %v1389_v44 = vadd.f32 %v6170_v38, %v6148_v22 }
  0xf3   :  { %11944 = vst [vmem:[#allocation49_spill] sm:$0xff] %v6198_v45  ;;  %11945 = vst [vmem:[#allocation58_spill] sm:$0xff] %v6205_v46  ;;  %v6242_v33 = vmul.f32 %v4216_v32, %v4216_v32  ;;  %v6247_v27 = vmul.f32 %v4217_v37, %v4217_v37  ;;  %v4218_v21 = vld [vmem:[%s10829_s0 + $0x88] sm:$0xff]  ;;  %v4219_v55 = vld [vmem:[%s10829_s0 + $0x90] sm:$0xff]  ;;  %v1391_v25 = vadd.f32 %v6192_v61, %v6170_v38 }
  0xf4   :  { %11946 = vst [vmem:[#allocation50_spill] sm:$0xff] %v6207_v8  ;;  %v6252_v20 = vmul.f32 %v4218_v21, %v4218_v21  ;;  %v6257_v58 = vmul.f32 %v4219_v55, %v4219_v55  ;;  %v4220_v6 = vld [vmem:[%s10829_s0 + $0x98] sm:$0xff]  ;;  %v4221_v57 = vld [vmem:[%s10829_s0 + $0xa0] sm:$0xff]  ;;  %v4222_v50 = vld [vmem:[%s10829_s0 + $0xa8] sm:$0xff]  ;;  %v1394_v9 = vadd.f32 %v6217_v19, %v6203_v41  ;;  %v1395_v36 = vadd.f32 %v6222_v49, %v6212_v28 }
  0xf5   :  { %v6262_v4 = vmul.f32 %v4220_v6, %v4220_v6  ;;  %v6267_v16 = vmul.f32 %v4221_v57, %v4221_v57  ;;  %v6272_v39 = vmul.f32 %v4222_v50, %v4222_v50  ;;  %v4223_v43 = vld [vmem:[%s10829_s0 + $0xb0] sm:$0xff]  ;;  %v4224_v56 = vld [vmem:[%s10829_s0 + $0xb8] sm:$0xff]  ;;  %v4225_v37 = vld [vmem:[%s10829_s0 + $0xc0] sm:$0xff]  ;;  %v1396_v0 = vadd.f32 %v6227_v7, %v6217_v19 }
  0xf6   :  { %v6277_v47 = vmul.f32 %v4223_v43, %v4223_v43  ;;  %v6282_v32 = vmul.f32 %v4224_v56, %v4224_v56  ;;  %v6287_v21 = vmul.f32 %v4225_v37, %v4225_v37  ;;  %v4226_v55 = vld [vmem:[%s10829_s0 + $0xc8] sm:$0xff]  ;;  %v4227_v57 = vld [vmem:[%s10829_s0 + $0xd0] sm:$0xff]  ;;  %v4228_v43 = vld [vmem:[%s10829_s0 + $0xd8] sm:$0xff]  ;;  %v1397_v23 = vadd.f32 %v6232_v15, %v6222_v49 }
  0xf7   :  { %v6292_v6 = vmul.f32 %v4226_v55, %v4226_v55  ;;  %v6297_v50 = vmul.f32 %v4227_v57, %v4227_v57  ;;  %v6302_v56 = vmul.f32 %v4228_v43, %v4228_v43  ;;  %v4229_v37 = vld [vmem:[%s10829_s0 + $0xe0] sm:$0xff]  ;;  %v4230_v55 = vld [vmem:[%s10829_s0 + $0xe8] sm:$0xff]  ;;  %v4231_v57 = vld [vmem:[%s10829_s0 + $0xf0] sm:$0xff]  ;;  %v1398_v31 = vadd.f32 %v6237_v62, %v6227_v7 }
  0xf8   :  { %v6307_v8 = vmul.f32 %v4229_v37, %v4229_v37  ;;  %v6312_v46 = vmul.f32 %v4230_v55, %v4230_v55  ;;  %v1384_v45 = vmul.f32 %v4231_v57, %v4231_v57  ;;  %v4232_v43 = vld [vmem:[%s10829_s0 + $0xf8] sm:$0xff]  ;;  %v1386_v37 = vadd.f32 %v6137_v42, %v6115_v3 }
  0xf9   :  { %11947 = vst [vmem:[#allocation59_spill] sm:$0xff] %v6297_v50  ;;  %11948 = vst [vmem:[#allocation51_spill] sm:$0xff] %v6302_v56  ;;  %v1385_v35 = vmul.f32 %v4232_v43, %v4232_v43  ;;  %v1388_v55 = vadd.f32 %v6159_v1, %v6137_v42  ;;  %v1390_v57 = vadd.f32 %v6181_v54, %v6159_v1 }
  0xfa   :  { %11949 = vst [vmem:[#allocation60_spill] sm:$0xff] %v6312_v46  ;;  %v1392_v43 = vadd.f32 %v6203_v41, %v6181_v54  ;;  %v1393_v3 = vadd.f32 %v6212_v28, %v6192_v61  ;;  %v1399_v10 = vadd.f32 %v6242_v33, %v6232_v15  ;;  %v1400_v59 = vadd.f32 %v6247_v27, %v6237_v62 }
  0xfb   :  { %v1401_v53 = vadd.f32 %v6252_v20, %v6242_v33  ;;  %v1402_v40 = vadd.f32 %v6257_v58, %v6247_v27  ;;  %v1403_v24 = vadd.f32 %v6262_v4, %v6252_v20  ;;  %v1404_v17 = vadd.f32 %v6267_v16, %v6257_v58 }
  0xfc   :  { %v1405_v26 = vadd.f32 %v6272_v39, %v6262_v4  ;;  %v1406_v12 = vadd.f32 %v6277_v47, %v6267_v16  ;;  %v1407_v60 = vadd.f32 %v6282_v32, %v6272_v39  ;;  %v1408_v63 = vadd.f32 %v6287_v21, %v6277_v47 }
  0xfd   :  { %v1409_v52 = vadd.f32 %v6292_v6, %v6282_v32  ;;  %v1410_v48 = vadd.f32 %v6297_v50, %v6287_v21  ;;  %v1411_v14 = vadd.f32 %v6302_v56, %v6292_v6  ;;  %v1412_v11 = vadd.f32 %v6307_v8, %v6297_v50 }
  0xfe   :  { %v1413_v51 = vadd.f32 %v6312_v46, %v6302_v56  ;;  %v1414_v34 = vadd.f32 %v1384_v45, %v6307_v8  ;;  %v1415_v2 = vadd.f32 %v1385_v35, %v6312_v46  ;;  %v6379_v30 = vadd.f32 %v1386_v37, %v6137_v42 }
  0xff   :  { %v6382_v5 = vadd.f32 %v1387_v13, %v6148_v22  ;;  %v6385_v18 = vadd.f32 %v1386_v37, %v6159_v1  ;;  %v6388_v29 = vadd.f32 %v1387_v13, %v6170_v38  ;;  %v6391_v50 = vadd.f32 %v1388_v55, %v6181_v54 }
 0x100   :  { %v6394_v56 = vadd.f32 %v1389_v44, %v6192_v61  ;;  %v6397_v46 = vadd.f32 %v1390_v57, %v6203_v41  ;;  %v6400_v42 = vadd.f32 %v1391_v25, %v6212_v28  ;;  %v6403_v22 = vadd.f32 %v1392_v43, %v6217_v19 }
 0x101   :  { %v6406_v1 = vadd.f32 %v1393_v3, %v6222_v49  ;;  %v6409_v38 = vadd.f32 %v1394_v9, %v6227_v7  ;;  %v6412_v54 = vadd.f32 %v1395_v36, %v6232_v15  ;;  %v6415_v44 = vadd.f32 %v1396_v0, %v6237_v62 }
 0x102   :  { %v6418_v61 = vadd.f32 %v1397_v23, %v6242_v33  ;;  %v6421_v25 = vadd.f32 %v1398_v31, %v6247_v27  ;;  %v6424_v13 = vadd.f32 %v1399_v10, %v6252_v20  ;;  %v6427_v41 = vadd.f32 %v1400_v59, %v6257_v58 }
 0x103   :  { %v6430_v28 = vadd.f32 %v1401_v53, %v6262_v4  ;;  %v6433_v36 = vadd.f32 %v1402_v40, %v6267_v16  ;;  %v6436_v0 = vadd.f32 %v1403_v24, %v6272_v39  ;;  %v6439_v23 = vadd.f32 %v1404_v17, %v6277_v47  ;;  %v11955_v53 = vld [vmem:[#allocation59_spill] sm:$0xff]  ;;  %v11958_v17 = vld [vmem:[#allocation60_spill] sm:$0xff] }
 0x104   :  { %11950 = vst [vmem:[#allocation52_spill] sm:$0xff] %v6424_v13  ;;  %v6442_v31 = vadd.f32 %v1405_v26, %v6282_v32  ;;  %v6445_v10 = vadd.f32 %v1406_v12, %v6287_v21  ;;  %v6448_v59 = vadd.f32 %v1407_v60, %v6292_v6  ;;  %v6451_v19 = vadd.f32 %v1408_v63, %v11955_v53  ;;  %v11956_v40 = vld [vmem:[#allocation51_spill] sm:$0xff] }
 0x105   :  { %11951 = vst [vmem:[#allocation63_spill] sm:$0xff] %v6430_v28  ;;  %11952 = vst [vmem:[#allocation61_spill] sm:$0xff] %v6436_v0  ;;  %v6454_v49 = vadd.f32 %v1409_v52, %v11956_v40  ;;  %v6457_v24 = vadd.f32 %v1410_v48, %v6307_v8  ;;  %v6460_v7 = vadd.f32 %v1411_v14, %v11958_v17  ;;  %v11048_v33 = vrot.slane %v6394_v56, 7 }
 0x106   :  { %11953 = vst [vmem:[#allocation53_spill] sm:$0xff] %v6442_v31  ;;  %11954 = vst [vmem:[#allocation73_spill] sm:$0xff] %v6448_v59  ;;  %v6462_v26 = vadd.f32 %v1412_v11, %v1384_v45  ;;  %v6464_v15 = vadd.f32 %v1413_v51, %v1385_v35  ;;  %v6467_v12 = vadd.f32 %v1414_v34, %v6307_v8  ;;  %v11051_v34 = vrot.slane %v6379_v30, 7 }
 0x107   :  { %11957 = vst [vmem:[#allocation59_spill] sm:$0xff] %v6454_v49  ;;  %11959 = vst [vmem:[#allocation51_spill] sm:$0xff] %v6460_v7  ;;  %v6470_v60 = vadd.f32 %v1415_v2, %v11958_v17  ;;  %v11047_v35 = vrot.slane %v6382_v5, 7  ;;  %v11050_v2 = vrot.slane %v6385_v18, 7  ;;  %v11046_v45 = vrot.slane %v6388_v29, 7 }
 0x108   :  { %11960 = vst [vmem:[#allocation60_spill] sm:$0xff] %v6464_v15  ;;  %v11049_v8 = vrot.slane %v6391_v50, 7  ;;  %v1521_v37 = vrot.slane %v6397_v46, 7  ;;  %v11052_v55 = vrot.slane %v6400_v42, 7  ;;  %v1524_v3 = vrot.slane %v6403_v22, 7 }
 0x109   :  { %11961 = vst [vmem:[#allocation74_spill] sm:$0xff] %v6470_v60  ;;  %v6499_v6 = vsel %vm201_vm0, %v11051_v34, %v11047_v35  ;;  %v6508_v57 = vsel %vm201_vm0, %v11050_v2, %v11046_v45  ;;  %v11053_v9 = vrot.slane %v6406_v1, 7  ;;  %v1527_v53 = vrot.slane %v6409_v38, 7 }
 0x10a   :  { %v6515_v43 = vsel %vm201_vm0, %v11049_v8, %v11048_v33  ;;  %v11054_v40 = vrot.slane %v6412_v54, 7  ;;  %v1530_v17 = vrot.slane %v6415_v44, 7  ;;  %v11055_v21 = vrot.slane %v6418_v61, 7 }
 0x10b   :  { %11962 = vst [vmem:[#allocation75_spill] sm:$0xff] %v6515_v43  ;;  %v1533_v45 = vrot.slane %v6421_v25, 7  ;;  %v11056_v35 = vrot.slane %v6424_v13, 7  ;;  %v1536_v32 = vrot.slane %v6427_v41, 7  ;;  %v11057_v33 = vrot.slane %v6430_v28, 7 }
 0x10c   :  { %v1539_v47 = vrot.slane %v6433_v36, 7  ;;  %v11058_v39 = vrot.slane %v6436_v0, 7  ;;  %v1542_v16 = vrot.slane %v6439_v23, 7  ;;  %v11059_v4 = vrot.slane %v6442_v31, 7 }
 0x10d   :  { %v1545_v58 = vrot.slane %v6445_v10, 7  ;;  %v11061_v20 = vrot.slane %v6448_v59, 7  ;;  %v1548_v27 = vrot.slane %v6451_v19, 7  ;;  %v11064_v51 = vrot.slane %v6454_v49, 7 }
 0x10e   :  { %v1551_v11 = vrot.slane %v6457_v24, 7  ;;  %v11066_v14 = vrot.slane %v6460_v7, 7  ;;  %v1554_v62 = vrot.slane %v6462_v26, 7  ;;  %v6542_v8 = vsel %vm201_vm0, %v1521_v37, %v11052_v55 }
 0x10f   :  { %11963 = vst [vmem:[#allocation76_spill] sm:$0xff] %v6542_v8  ;;  %v6547_v52 = vsel %vm201_vm0, %v1524_v3, %v11053_v9  ;;  %v1557_v2 = vrot.slane %v6467_v12, 7  ;;  %v6554_v34 = vsel %vm201_vm0, %v1527_v53, %v11054_v40  ;;  %v6559_v48 = vsel %vm201_vm0, %v1530_v17, %v11055_v21 }
 0x110   :  { %11964 = vst [vmem:[#allocation77_spill] sm:$0xff] %v6547_v52  ;;  %11965 = vst [vmem:[#allocation78_spill] sm:$0xff] %v6554_v34  ;;  %v6564_v55 = vsel %vm201_vm0, %v1533_v45, %v11056_v35  ;;  %v6569_v9 = vsel %vm201_vm0, %v1536_v32, %v11057_v33  ;;  %v6574_v40 = vsel %vm201_vm0, %v1539_v47, %v11058_v39  ;;  %v11974_v63 = vrot.slane %v6464_v15, 7 }
 0x111   :  { %11966 = vst [vmem:[#allocation79_spill] sm:$0xff] %v6559_v48  ;;  %11967 = vst [vmem:[#allocation80_spill] sm:$0xff] %v6564_v55  ;;  %v6579_v21 = vsel %vm201_vm0, %v1542_v16, %v11059_v4  ;;  %v6584_v35 = vsel %vm201_vm0, %v1545_v58, %v11061_v20  ;;  %v6589_v33 = vsel %vm201_vm0, %v1548_v27, %v11064_v51  ;;  %v1609_v20 = vrot.slane %v6388_v29, 5 }
 0x112   :  { %11968 = vst [vmem:[#allocation81_spill] sm:$0xff] %v6569_v9  ;;  %11969 = vst [vmem:[#allocation82_spill] sm:$0xff] %v6574_v40  ;;  %v6594_v39 = vsel %vm201_vm0, %v1551_v11, %v11066_v14  ;;  %v6599_v4 = vsel %vm201_vm0, %v1554_v62, %v11974_v63  ;;  %v1610_v51 = vrot.slane %v6394_v56, 5  ;;  %v1612_v14 = vrot.slane %v6406_v1, 5 }
 0x113   :  { %11970 = vst [vmem:[#allocation83_spill] sm:$0xff] %v6579_v21  ;;  %11971 = vst [vmem:[#allocation84_spill] sm:$0xff] %v6584_v35  ;;  %v1608_v21 = vrot.slane %v6382_v5, 5  ;;  %v11976_v35 = vrot.slane %v6470_v60, 7  ;;  %v1614_v63 = vrot.slane %v6418_v61, 5  ;;  %v1616_v9 = vrot.slane %v6430_v28, 5 }
 0x114   :  { %11972 = vst [vmem:[#allocation85_spill] sm:$0xff] %v6589_v33  ;;  %11973 = vst [vmem:[#allocation86_spill] sm:$0xff] %v6594_v39  ;;  %v1611_v33 = vrot.slane %v6400_v42, 5  ;;  %v1613_v39 = vrot.slane %v6412_v54, 5  ;;  %v1617_v55 = vrot.slane %v6436_v0, 5  ;;  %v1618_v48 = vrot.slane %v6442_v31, 5 }
 0x115   :  { %11975 = vst [vmem:[#allocation87_spill] sm:$0xff] %v6599_v4  ;;  %v6606_v40 = vsel %vm201_vm0, %v1557_v2, %v11976_v35  ;;  %v1615_v4 = vrot.slane %v6424_v13, 5  ;;  %v1619_v35 = vrot.slane %v6448_v59, 5  ;;  %v1621_v34 = vrot.slane %v6460_v7, 5 }
 0x116   :  { %11977 = vst [vmem:[#allocation88_spill] sm:$0xff] %v6606_v40  ;;  %v1620_v40 = vrot.slane %v6454_v49, 5  ;;  %v1622_v52 = vrot.slane %v6464_v15, 5  ;;  %v1623_v8 = vrot.slane %v6470_v60, 5  ;;  %v11978_v43 = vrot.slane %v6379_v30, 7 }
 0x117   :  { %v11979_v13 = vrot.slane %v6379_v30, 1  ;;  %v11980_v0 = vrot.slane %v6385_v18, 7  ;;  %v11981_v31 = vrot.slane %v6385_v18, 1  ;;  %v11982_v7 = vrot.slane %v6391_v50, 7 }
 0x118   :  { %v11983_v15 = vrot.slane %v6391_v50, 1  ;;  %v11984_v49 = vrot.slane %v6397_v46, 1  ;;  %v11986_v18 = vrot.slane %v6409_v38, 1  ;;  %v11987_v50 = vrot.slane %v6415_v44, 1 }
 0x119   :  { %v6627_v28 = vsel %vm201_vm0, %v11979_v13, %v11978_v43  ;;  %v6634_v59 = vsel %vm201_vm0, %v11981_v31, %v11980_v0  ;;  %v11985_v13 = vrot.slane %v6403_v22, 1  ;;  %v11988_v46 = vrot.slane %v6421_v25, 1 }
 0x11a   :  { %v6641_v60 = vsel %vm201_vm0, %v11983_v15, %v11982_v7  ;;  %v6646_v30 = vsel %vm201_vm0, %v11984_v49, %v1521_v37  ;;  %v6656_v0 = vsel %vm201_vm0, %v11986_v18, %v1527_v53  ;;  %v6661_v31 = vsel %vm201_vm0, %v11987_v50, %v1530_v17  ;;  %v12019_v53 = vld [vmem:[#allocation52_spill] sm:$0xff]  ;;  %v12025_v18 = vld [vmem:[#allocation61_spill] sm:$0xff] }
 0x11b   :  { %v6651_v43 = vsel %vm201_vm0, %v11985_v13, %v1524_v3  ;;  %v6666_v49 = vsel %vm201_vm0, %v11988_v46, %v1533_v45  ;;  %v11990_v22 = vrot.slane %v6427_v41, 1  ;;  %v11992_v38 = vrot.slane %v6433_v36, 1 }
 0x11c   :  { %11989 = vst [vmem:[#allocation89_spill] sm:$0xff] %v6666_v49  ;;  %v11994_v44 = vrot.slane %v6439_v23, 1  ;;  %v11996_v25 = vrot.slane %v6445_v10, 1  ;;  %v11998_v41 = vrot.slane %v6451_v19, 1  ;;  %v12000_v36 = vrot.slane %v6457_v24, 1 }
 0x11d   :  { %v6671_v7 = vsel %vm201_vm0, %v11990_v22, %v1536_v32  ;;  %v6676_v15 = vsel %vm201_vm0, %v11992_v38, %v1539_v47  ;;  %v12002_v23 = vrot.slane %v6462_v26, 1  ;;  %v12004_v10 = vrot.slane %v6382_v5, 7  ;;  %v12028_v22 = vld [vmem:[#allocation53_spill] sm:$0xff] }
 0x11e   :  { %11991 = vst [vmem:[#allocation90_spill] sm:$0xff] %v6671_v7  ;;  %11993 = vst [vmem:[#allocation91_spill] sm:$0xff] %v6676_v15  ;;  %v6681_v37 = vsel %vm201_vm0, %v11994_v44, %v1542_v16  ;;  %v6686_v45 = vsel %vm201_vm0, %v11996_v25, %v1545_v58  ;;  %v6691_v32 = vsel %vm201_vm0, %v11998_v41, %v1548_v27  ;;  %v12006_v19 = vrot.slane %v6388_v29, 7  ;;  %v12031_v25 = vld [vmem:[#allocation73_spill] sm:$0xff] }
 0x11f   :  { %11995 = vst [vmem:[#allocation92_spill] sm:$0xff] %v6681_v37  ;;  %11997 = vst [vmem:[#allocation93_spill] sm:$0xff] %v6686_v45  ;;  %v6696_v47 = vsel %vm201_vm0, %v12000_v36, %v1551_v11  ;;  %v6701_v16 = vsel %vm201_vm0, %v12002_v23, %v1554_v62  ;;  %v6706_v58 = vsel %vm201_vm0, %v12004_v10, %v1608_v21  ;;  %v12008_v24 = vrot.slane %v6467_v12, 1  ;;  %v12034_v36 = vld [vmem:[#allocation59_spill] sm:$0xff] }
 0x120   :  { %11999 = vst [vmem:[#allocation94_spill] sm:$0xff] %v6691_v32  ;;  %12001 = vst [vmem:[#allocation95_spill] sm:$0xff] %v6696_v47  ;;  %v6711_v27 = vsel %vm201_vm0, %v12006_v19, %v1609_v20  ;;  %v12009_v26 = vrot.slane %v6394_v56, 7  ;;  %v12011_v5 = vrot.slane %v6400_v42, 7  ;;  %v12013_v29 = vrot.slane %v6406_v1, 7  ;;  %v12037_v10 = vld [vmem:[#allocation51_spill] sm:$0xff] }
 0x121   :  { %12003 = vst [vmem:[#allocation96_spill] sm:$0xff] %v6701_v16  ;;  %12005 = vst [vmem:[#allocation97_spill] sm:$0xff] %v6706_v58  ;;  %v6716_v11 = vsel %vm201_vm0, %v12008_v24, %v1557_v2  ;;  %v12015_v12 = vrot.slane %v6412_v54, 7  ;;  %v12017_v56 = vrot.slane %v6418_v61, 7  ;;  %v1704_v42 = vrot.slane %v6627_v28, 1  ;;  %v12022_v61 = vld [vmem:[#allocation63_spill] sm:$0xff] }
 0x122   :  { %12007 = vst [vmem:[#allocation98_spill] sm:$0xff] %v6711_v27  ;;  %v6721_v62 = vsel %vm201_vm0, %v12009_v26, %v1610_v51  ;;  %v6726_v21 = vsel %vm201_vm0, %v12011_v5, %v1611_v33  ;;  %v6731_v20 = vsel %vm201_vm0, %v12013_v29, %v1612_v14  ;;  %v1705_v33 = vrot.slane %v6499_v6, 1  ;;  %v12040_v24 = vld [vmem:[#allocation60_spill] sm:$0xff]  ;;  %v12043_v5 = vld [vmem:[#allocation74_spill] sm:$0xff] }
 0x123   :  { %12010 = vst [vmem:[#allocation99_spill] sm:$0xff] %v6721_v62  ;;  %12012 = vst [vmem:[#allocation100_spill] sm:$0xff] %v6726_v21  ;;  %v6736_v2 = vsel %vm201_vm0, %v12015_v12, %v1613_v39  ;;  %v6741_v51 = vsel %vm201_vm0, %v12017_v56, %v1614_v63  ;;  %v1707_v3 = vrot.slane %v6706_v58, 1  ;;  %v1709_v1 = vrot.slane %v6634_v59, 1  ;;  %v12046_v56 = vld [vmem:[#allocation75_spill] sm:$0xff] }
 0x124   :  { %12014 = vst [vmem:[#allocation101_spill] sm:$0xff] %v6731_v20  ;;  %12016 = vst [vmem:[#allocation102_spill] sm:$0xff] %v6736_v2  ;;  %v1710_v14 = vrot.slane %v6508_v57, 1  ;;  %v1712_v54 = vrot.slane %v6711_v27, 1  ;;  %v12020_v39 = vrot.slane %v12019_v53, 7  ;;  %v12023_v63 = vrot.slane %v12022_v61, 7 }
 0x125   :  { %12018 = vst [vmem:[#allocation103_spill] sm:$0xff] %v6741_v51  ;;  %v12026_v50 = vrot.slane %v12025_v18, 7  ;;  %v12029_v38 = vrot.slane %v12028_v22, 7  ;;  %v12032_v41 = vrot.slane %v12031_v25, 7  ;;  %v12035_v23 = vrot.slane %v12034_v36, 7  ;;  %v12048_v22 = vld [vmem:[#allocation77_spill] sm:$0xff] }
 0x126   :  { %v6752_v17 = vsel %vm201_vm0, %v12020_v39, %v1615_v4  ;;  %v6757_v13 = vsel %vm201_vm0, %v12023_v63, %v1616_v9  ;;  %v12038_v19 = vrot.slane %v12037_v10, 7  ;;  %v12041_v26 = vrot.slane %v12040_v24, 7  ;;  %v12047_v63 = vld [vmem:[#allocation76_spill] sm:$0xff] }
 0x127   :  { %12021 = vst [vmem:[#allocation52_spill] sm:$0xff] %v6752_v17  ;;  %12024 = vst [vmem:[#allocation63_spill] sm:$0xff] %v6757_v13  ;;  %v6762_v46 = vsel %vm201_vm0, %v12026_v50, %v1617_v55  ;;  %v6767_v44 = vsel %vm201_vm0, %v12029_v38, %v1618_v48  ;;  %v6772_v4 = vsel %vm201_vm0, %v12032_v41, %v1619_v35  ;;  %v12044_v29 = vrot.slane %v12043_v5, 7  ;;  %v12050_v41 = vld [vmem:[#allocation79_spill] sm:$0xff]  ;;  %v12051_v24 = vld [vmem:[#allocation80_spill] sm:$0xff] }
 0x128   :  { %12027 = vst [vmem:[#allocation61_spill] sm:$0xff] %v6762_v46  ;;  %12030 = vst [vmem:[#allocation53_spill] sm:$0xff] %v6767_v44  ;;  %v6777_v9 = vsel %vm201_vm0, %v12035_v23, %v1620_v40  ;;  %v6782_v55 = vsel %vm201_vm0, %v12038_v19, %v1621_v34  ;;  %v6787_v48 = vsel %vm201_vm0, %v12041_v26, %v1622_v52  ;;  %v1714_v40 = vrot.slane %v6641_v60, 1 }
 0x129   :  { %12033 = vst [vmem:[#allocation73_spill] sm:$0xff] %v6772_v4  ;;  %12036 = vst [vmem:[#allocation59_spill] sm:$0xff] %v6777_v9  ;;  %v6792_v35 = vsel %vm201_vm0, %v12044_v29, %v1623_v8  ;;  %v6795_v12 = vsel %vm394_vm1, %v1704_v42, %v1705_v33  ;;  %v1715_v53 = vrot.slane %v12046_v56, 1  ;;  %v6800_v34 = vsel %vm394_vm1, %v1705_v33, %v1707_v3 }
 0x12a   :  { %12039 = vst [vmem:[#allocation51_spill] sm:$0xff] %v6782_v55  ;;  %12042 = vst [vmem:[#allocation60_spill] sm:$0xff] %v6787_v48  ;;  %v6803_v39 = vsel %vm394_vm1, %v1709_v1, %v1710_v14  ;;  %v6806_v52 = vsel %vm394_vm1, %v1710_v14, %v1712_v54  ;;  %v1717_v61 = vrot.slane %v6721_v62, 1  ;;  %v1719_v8 = vrot.slane %v6646_v30, 1  ;;  %v12049_v1 = vld [vmem:[#allocation78_spill] sm:$0xff] }
 0x12b   :  { %12045 = vst [vmem:[#allocation74_spill] sm:$0xff] %v6792_v35  ;;  %v1720_v42 = vrot.slane %v12047_v63, 1  ;;  %v1722_v18 = vrot.slane %v6726_v21, 1  ;;  %v1724_v50 = vrot.slane %v6651_v43, 1  ;;  %v1725_v38 = vrot.slane %v12048_v22, 1  ;;  %v12052_v21 = vld [vmem:[#allocation81_spill] sm:$0xff] }
 0x12c   :  { %v1727_v33 = vrot.slane %v6731_v20, 1  ;;  %v1729_v3 = vrot.slane %v6656_v0, 1  ;;  %v1730_v25 = vrot.slane %v12049_v1, 1  ;;  %v1732_v14 = vrot.slane %v6736_v2, 1 }
 0x12d   :  { %v1734_v54 = vrot.slane %v6661_v31, 1  ;;  %v1735_v36 = vrot.slane %v12050_v41, 1  ;;  %v1737_v23 = vrot.slane %v6741_v51, 1  ;;  %v1716_v10 = vsel %vm394_vm1, %v1714_v40, %v1715_v53 }
 0x12e   :  { %v1739_v19 = vrot.slane %v6666_v49, 1  ;;  %v1740_v26 = vrot.slane %v12051_v24, 1  ;;  %v1742_v5 = vrot.slane %v6752_v17, 1  ;;  %v1718_v29 = vsel %vm394_vm1, %v1715_v53, %v1717_v61  ;;  %v12059_v49 = vld [vmem:[#allocation88_spill] sm:$0xff] }
 0x12f   :  { %v1721_v20 = vsel %vm394_vm1, %v1719_v8, %v1720_v42  ;;  %v1744_v2 = vrot.slane %v6671_v7, 1  ;;  %v1745_v62 = vrot.slane %v12052_v21, 1  ;;  %v1723_v27 = vsel %vm394_vm1, %v1720_v42, %v1722_v18  ;;  %v12053_v18 = vld [vmem:[#allocation82_spill] sm:$0xff]  ;;  %v12058_v7 = vld [vmem:[#allocation87_spill] sm:$0xff] }
 0x130   :  { %v1726_v51 = vsel %vm394_vm1, %v1724_v50, %v1725_v38  ;;  %v1728_v40 = vsel %vm394_vm1, %v1725_v38, %v1727_v33  ;;  %v1731_v58 = vsel %vm394_vm1, %v1729_v3, %v1730_v25  ;;  %v1733_v24 = vsel %vm394_vm1, %v1730_v25, %v1732_v14  ;;  %v12054_v25 = vld [vmem:[#allocation83_spill] sm:$0xff] }
 0x131   :  { %v1736_v17 = vsel %vm394_vm1, %v1734_v54, %v1735_v36  ;;  %v1738_v53 = vsel %vm394_vm1, %v1735_v36, %v1737_v23  ;;  %v1747_v61 = vrot.slane %v6757_v13, 1  ;;  %v1741_v8 = vsel %vm394_vm1, %v1739_v19, %v1740_v26  ;;  %v12055_v23 = vld [vmem:[#allocation84_spill] sm:$0xff]  ;;  %v12056_v13 = vld [vmem:[#allocation85_spill] sm:$0xff] }
 0x132   :  { %v1743_v21 = vsel %vm394_vm1, %v1740_v26, %v1742_v5  ;;  %v1749_v42 = vrot.slane %v6676_v15, 1  ;;  %v1750_v50 = vrot.slane %v12053_v18, 1  ;;  %v1746_v38 = vsel %vm394_vm1, %v1744_v2, %v1745_v62  ;;  %v12057_v15 = vld [vmem:[#allocation86_spill] sm:$0xff] }
 0x133   :  { %v1752_v33 = vrot.slane %v6762_v46, 1  ;;  %v1754_v3 = vrot.slane %v6681_v37, 1  ;;  %v1755_v14 = vrot.slane %v12054_v25, 1  ;;  %v1757_v54 = vrot.slane %v6767_v44, 1 }
 0x134   :  { %v1759_v36 = vrot.slane %v6686_v45, 1  ;;  %v1760_v19 = vrot.slane %v12055_v23, 1  ;;  %v1762_v26 = vrot.slane %v6772_v4, 1  ;;  %v1764_v5 = vrot.slane %v6691_v32, 1 }
 0x135   :  { %v1765_v18 = vrot.slane %v12056_v13, 1  ;;  %v1767_v2 = vrot.slane %v6777_v9, 1  ;;  %v1769_v46 = vrot.slane %v6696_v47, 1  ;;  %v1770_v37 = vrot.slane %v12057_v15, 1 }
 0x136   :  { %v1772_v25 = vrot.slane %v6782_v55, 1  ;;  %v1774_v44 = vrot.slane %v6701_v16, 1  ;;  %v1775_v45 = vrot.slane %v12058_v7, 1  ;;  %v1748_v23 = vsel %vm394_vm1, %v1745_v62, %v1747_v61 }
 0x137   :  { %v1751_v4 = vsel %vm394_vm1, %v1749_v42, %v1750_v50  ;;  %v1753_v32 = vsel %vm394_vm1, %v1750_v50, %v1752_v33  ;;  %v1777_v13 = vrot.slane %v6787_v48, 1  ;;  %v1756_v9 = vsel %vm394_vm1, %v1754_v3, %v1755_v14 }
 0x138   :  { %v1779_v47 = vrot.slane %v6716_v11, 1  ;;  %v1780_v15 = vrot.slane %v12059_v49, 1  ;;  %v1782_v55 = vrot.slane %v6792_v35, 1  ;;  %v1758_v16 = vsel %vm394_vm1, %v1755_v14, %v1757_v54 }
 0x139   :  { %v1761_v7 = vsel %vm394_vm1, %v1759_v36, %v1760_v19  ;;  %v1763_v62 = vsel %vm394_vm1, %v1760_v19, %v1762_v26  ;;  %v1766_v61 = vsel %vm394_vm1, %v1764_v5, %v1765_v18  ;;  %v1768_v42 = vsel %vm394_vm1, %v1765_v18, %v1767_v2 }
 0x13a   :  { %v1771_v50 = vsel %vm394_vm1, %v1769_v46, %v1770_v37  ;;  %v1773_v33 = vsel %vm394_vm1, %v1770_v37, %v1772_v25  ;;  %v1776_v3 = vsel %vm394_vm1, %v1774_v44, %v1775_v45  ;;  %v1778_v48 = vsel %vm394_vm1, %v1775_v45, %v1777_v13 }
 0x13b   :  { %v6876_v35 = vadd.f32 %v6795_v12, %v6627_v28  ;;  %v6880_v14 = vadd.f32 %v6800_v34, %v6499_v6  ;;  %v6884_v54 = vadd.f32 %v6803_v39, %v6634_v59  ;;  %v1781_v46 = vsel %vm394_vm1, %v1779_v47, %v1780_v15 }
 0x13c   :  { %v1783_v37 = vsel %vm394_vm1, %v1780_v15, %v1782_v55  ;;  %v6890_v44 = vadd.f32 %v6806_v52, %v6508_v57  ;;  %v6893_v45 = vadd.f32 %v1716_v10, %v6641_v60  ;;  %v6896_v13 = vadd.f32 %v1718_v29, %v12046_v56 }
 0x13d   :  { %v6899_v12 = vadd.f32 %v1721_v20, %v6646_v30  ;;  %v6902_v34 = vadd.f32 %v1723_v27, %v12047_v63  ;;  %v6905_v47 = vadd.f32 %v1726_v51, %v6651_v43  ;;  %v6908_v15 = vadd.f32 %v1728_v40, %v12048_v22  ;;  %v12060_v27 = vld [vmem:[#allocation89_spill] sm:$0xff]  ;;  %v12062_v51 = vld [vmem:[#allocation80_spill] sm:$0xff]  ;;  %v12064_v40 = vld [vmem:[#allocation90_spill] sm:$0xff] }
 0x13e   :  { %v6911_v55 = vadd.f32 %v1731_v58, %v6656_v0  ;;  %v6914_v39 = vadd.f32 %v1733_v24, %v12049_v1  ;;  %v6917_v52 = vadd.f32 %v1736_v17, %v6661_v31  ;;  %v6920_v20 = vadd.f32 %v1738_v53, %v12050_v41  ;;  %v12066_v58 = vld [vmem:[#allocation81_spill] sm:$0xff]  ;;  %v12068_v24 = vld [vmem:[#allocation91_spill] sm:$0xff]  ;;  %v12070_v17 = vld [vmem:[#allocation82_spill] sm:$0xff] }
 0x13f   :  { %v6923_v10 = vadd.f32 %v1741_v8, %v12060_v27  ;;  %v6926_v29 = vadd.f32 %v1743_v21, %v12062_v51  ;;  %v6929_v18 = vadd.f32 %v1746_v38, %v12064_v40  ;;  %v6932_v25 = vadd.f32 %v1748_v23, %v12066_v58  ;;  %v12072_v53 = vld [vmem:[#allocation92_spill] sm:$0xff]  ;;  %v12074_v8 = vld [vmem:[#allocation83_spill] sm:$0xff]  ;;  %v12076_v21 = vld [vmem:[#allocation93_spill] sm:$0xff] }
 0x140   :  { %v6935_v36 = vadd.f32 %v1751_v4, %v12068_v24  ;;  %v6938_v19 = vadd.f32 %v1753_v32, %v12070_v17  ;;  %v6941_v26 = vadd.f32 %v1756_v9, %v12072_v53  ;;  %v6944_v5 = vadd.f32 %v1758_v16, %v12074_v8  ;;  %v12080_v9 = vld [vmem:[#allocation84_spill] sm:$0xff]  ;;  %v12082_v16 = vld [vmem:[#allocation94_spill] sm:$0xff] }
 0x141   :  { %12061 = vst [vmem:[#allocation75_spill] sm:$0xff] %v6923_v10  ;;  %12063 = vst [vmem:[#allocation76_spill] sm:$0xff] %v6926_v29  ;;  %v6947_v2 = vadd.f32 %v1761_v7, %v12076_v21  ;;  %v1848_v38 = vrot.slane %v6627_v28, 2  ;;  %v1849_v23 = vrot.slane %v6499_v6, 2  ;;  %v1853_v4 = vrot.slane %v6634_v59, 2  ;;  %v12084_v7 = vld [vmem:[#allocation85_spill] sm:$0xff] }
 0x142   :  { %12065 = vst [vmem:[#allocation77_spill] sm:$0xff] %v6929_v18  ;;  %12067 = vst [vmem:[#allocation78_spill] sm:$0xff] %v6932_v25  ;;  %v12078_v25 = vld [vmem:[#allocation97_spill] sm:$0xff]  ;;  %v1854_v32 = vrot.slane %v6508_v57, 2  ;;  %v12086_v28 = vld [vmem:[#allocation95_spill] sm:$0xff] }
 0x143   :  { %12069 = vst [vmem:[#allocation79_spill] sm:$0xff] %v6935_v36  ;;  %12071 = vst [vmem:[#allocation88_spill] sm:$0xff] %v6938_v19  ;;  %v1851_v18 = vrot.slane %v12078_v25, 2  ;;  %v12079_v19 = vld [vmem:[#allocation98_spill] sm:$0xff]  ;;  %v6965_v29 = vadd.f32 %v1771_v50, %v12086_v28  ;;  %v12090_v59 = vld [vmem:[#allocation96_spill] sm:$0xff]  ;;  %v1858_v50 = vrot.slane %v6641_v60, 2 }
 0x144   :  { %12073 = vst [vmem:[#allocation89_spill] sm:$0xff] %v6941_v26  ;;  %12075 = vst [vmem:[#allocation80_spill] sm:$0xff] %v6944_v5  ;;  %v1856_v36 = vrot.slane %v12079_v19, 2  ;;  %v6956_v26 = vadd.f32 %v1763_v62, %v12080_v9  ;;  %v6959_v5 = vadd.f32 %v1766_v61, %v12082_v16  ;;  %v12088_v6 = vld [vmem:[#allocation86_spill] sm:$0xff]  ;;  %v6971_v10 = vadd.f32 %v1776_v3, %v12090_v59  ;;  %v12092_v57 = vld [vmem:[#allocation87_spill] sm:$0xff] }
 0x145   :  { %12077 = vst [vmem:[#allocation90_spill] sm:$0xff] %v6947_v2  ;;  %v6962_v2 = vadd.f32 %v1768_v42, %v12084_v7  ;;  %12087 = vst [vmem:[#allocation92_spill] sm:$0xff] %v6965_v29  ;;  %v6968_v25 = vadd.f32 %v1773_v33, %v12088_v6  ;;  %v6974_v19 = vadd.f32 %v1778_v48, %v12092_v57  ;;  %v1859_v33 = vrot.slane %v12046_v56, 2  ;;  %v12100_v29 = vld [vmem:[#allocation103_spill] sm:$0xff] }
 0x146   :  { %12081 = vst [vmem:[#allocation81_spill] sm:$0xff] %v6956_v26  ;;  %12083 = vst [vmem:[#allocation91_spill] sm:$0xff] %v6959_v5  ;;  %v6977_v62 = vadd.f32 %v1781_v46, %v6716_v11  ;;  %v6980_v61 = vadd.f32 %v1783_v37, %v12059_v49  ;;  %v6983_v42 = vsel %vm539_vm2, %v1848_v38, %v1849_v23  ;;  %v12096_v46 = vld [vmem:[#allocation99_spill] sm:$0xff]  ;;  %v1863_v37 = vrot.slane %v6646_v30, 2  ;;  %v12108_v5 = vld [vmem:[#allocation60_spill] sm:$0xff] }
 0x147   :  { %12085 = vst [vmem:[#allocation82_spill] sm:$0xff] %v6962_v2  ;;  %12089 = vst [vmem:[#allocation83_spill] sm:$0xff] %v6968_v25  ;;  %v6988_v25 = vsel %vm539_vm2, %v1849_v23, %v1851_v18  ;;  %v6991_v3 = vsel %vm539_vm2, %v1853_v4, %v1854_v32  ;;  %v6994_v48 = vsel %vm539_vm2, %v1854_v32, %v1856_v36  ;;  %v1864_v38 = vrot.slane %v12047_v63, 2  ;;  %v12098_v18 = vld [vmem:[#allocation101_spill] sm:$0xff]  ;;  %v12099_v36 = vld [vmem:[#allocation102_spill] sm:$0xff] }
 0x148   :  { %12091 = vst [vmem:[#allocation93_spill] sm:$0xff] %v6971_v10  ;;  %12093 = vst [vmem:[#allocation97_spill] sm:$0xff] %v6974_v19  ;;  %v1868_v60 = vrot.slane %v6651_v43, 2  ;;  %v1869_v56 = vrot.slane %v12048_v22, 2  ;;  %v1871_v23 = vrot.slane %v12098_v18, 2  ;;  %v1873_v4 = vrot.slane %v6656_v0, 2 }
 0x149   :  { %12094 = vst [vmem:[#allocation98_spill] sm:$0xff] %v6977_v62  ;;  %12095 = vst [vmem:[#allocation84_spill] sm:$0xff] %v6980_v61  ;;  %v1861_v62 = vrot.slane %v12096_v46, 2  ;;  %v12097_v61 = vld [vmem:[#allocation100_spill] sm:$0xff]  ;;  %v1874_v10 = vrot.slane %v12049_v1, 2  ;;  %v1876_v32 = vrot.slane %v12099_v36, 2  ;;  %v1865_v1 = vsel %vm539_vm2, %v1863_v37, %v1864_v38 }
 0x14a   :  { %v1866_v19 = vrot.slane %v12097_v61, 2  ;;  %v1878_v46 = vrot.slane %v6661_v31, 2  ;;  %v1879_v30 = vrot.slane %v12050_v41, 2  ;;  %v1881_v63 = vrot.slane %v12100_v29, 2  ;;  %v12101_v2 = vld [vmem:[#allocation52_spill] sm:$0xff]  ;;  %v12109_v26 = vld [vmem:[#allocation74_spill] sm:$0xff] }
 0x14b   :  { %v1860_v61 = vsel %vm539_vm2, %v1858_v50, %v1859_v33  ;;  %v1883_v43 = vrot.slane %v12060_v27, 2  ;;  %v1884_v22 = vrot.slane %v12062_v51, 2  ;;  %v1886_v18 = vrot.slane %v12101_v2, 2 }
 0x14c   :  { %v1862_v0 = vsel %vm539_vm2, %v1859_v33, %v1861_v62  ;;  %v1888_v36 = vrot.slane %v12064_v40, 2  ;;  %v1889_v31 = vrot.slane %v12066_v58, 2  ;;  %v1867_v41 = vsel %vm539_vm2, %v1864_v38, %v1866_v19  ;;  %v12102_v33 = vld [vmem:[#allocation63_spill] sm:$0xff] }
 0x14d   :  { %v1870_v29 = vsel %vm539_vm2, %v1868_v60, %v1869_v56  ;;  %v1872_v50 = vsel %vm539_vm2, %v1869_v56, %v1871_v23  ;;  %v1875_v27 = vsel %vm539_vm2, %v1873_v4, %v1874_v10  ;;  %v1877_v51 = vsel %vm539_vm2, %v1874_v10, %v1876_v32  ;;  %v12103_v56 = vld [vmem:[#allocation61_spill] sm:$0xff] }
 0x14e   :  { %v1880_v2 = vsel %vm539_vm2, %v1878_v46, %v1879_v30  ;;  %v1882_v62 = vsel %vm539_vm2, %v1879_v30, %v1881_v63  ;;  %v1891_v37 = vrot.slane %v12102_v33, 2  ;;  %v1885_v40 = vsel %vm539_vm2, %v1883_v43, %v1884_v22  ;;  %v12104_v32 = vld [vmem:[#allocation53_spill] sm:$0xff] }
 0x14f   :  { %v1887_v58 = vsel %vm539_vm2, %v1884_v22, %v1886_v18  ;;  %v1893_v19 = vrot.slane %v12068_v24, 2  ;;  %v1894_v38 = vrot.slane %v12070_v17, 2  ;;  %v1890_v60 = vsel %vm539_vm2, %v1888_v36, %v1889_v31  ;;  %v12105_v43 = vld [vmem:[#allocation73_spill] sm:$0xff]  ;;  %v12106_v18 = vld [vmem:[#allocation59_spill] sm:$0xff] }
 0x150   :  { %v1896_v23 = vrot.slane %v12103_v56, 2  ;;  %v1898_v10 = vrot.slane %v12072_v53, 2  ;;  %v1899_v4 = vrot.slane %v12074_v8, 2  ;;  %v1901_v46 = vrot.slane %v12104_v32, 2  ;;  %v12107_v56 = vld [vmem:[#allocation51_spill] sm:$0xff] }
 0x151   :  { %v1903_v30 = vrot.slane %v12076_v21, 2  ;;  %v1904_v63 = vrot.slane %v12080_v9, 2  ;;  %v1906_v22 = vrot.slane %v12105_v43, 2  ;;  %v1908_v24 = vrot.slane %v12082_v16, 2 }
 0x152   :  { %v1909_v17 = vrot.slane %v12084_v7, 2  ;;  %v1911_v36 = vrot.slane %v12106_v18, 2  ;;  %v1913_v33 = vrot.slane %v12086_v28, 2  ;;  %v1914_v53 = vrot.slane %v12088_v6, 2 }
 0x153   :  { %v1916_v8 = vrot.slane %v12107_v56, 2  ;;  %v1918_v32 = vrot.slane %v12090_v59, 2  ;;  %v1919_v21 = vrot.slane %v12092_v57, 2  ;;  %v1892_v9 = vsel %vm539_vm2, %v1889_v31, %v1891_v37 }
 0x154   :  { %v1895_v43 = vsel %vm539_vm2, %v1893_v19, %v1894_v38  ;;  %v1897_v16 = vsel %vm539_vm2, %v1894_v38, %v1896_v23  ;;  %v1921_v7 = vrot.slane %v12108_v5, 2  ;;  %v1900_v18 = vsel %vm539_vm2, %v1898_v10, %v1899_v4 }
 0x155   :  { %v1923_v28 = vrot.slane %v6716_v11, 2  ;;  %v1924_v6 = vrot.slane %v12059_v49, 2  ;;  %v1926_v56 = vrot.slane %v12109_v26, 2  ;;  %v1902_v59 = vsel %vm539_vm2, %v1899_v4, %v1901_v46 }
 0x156   :  { %v1905_v57 = vsel %vm539_vm2, %v1903_v30, %v1904_v63  ;;  %v1907_v31 = vsel %vm539_vm2, %v1904_v63, %v1906_v22  ;;  %v1910_v37 = vsel %vm539_vm2, %v1908_v24, %v1909_v17  ;;  %v1912_v19 = vsel %vm539_vm2, %v1909_v17, %v1911_v36  ;;  %v12121_v17 = vld [vmem:[#allocation82_spill] sm:$0xff]  ;;  %v12122_v36 = vld [vmem:[#allocation92_spill] sm:$0xff] }
 0x157   :  { %v1915_v5 = vsel %vm539_vm2, %v1913_v33, %v1914_v53  ;;  %v1917_v38 = vsel %vm539_vm2, %v1914_v53, %v1916_v8  ;;  %v1920_v11 = vsel %vm539_vm2, %v1918_v32, %v1919_v21  ;;  %v1922_v49 = vsel %vm539_vm2, %v1919_v21, %v1921_v7  ;;  %v12123_v33 = vld [vmem:[#allocation83_spill] sm:$0xff]  ;;  %v12124_v8 = vld [vmem:[#allocation93_spill] sm:$0xff] }
 0x158   :  { %v1960_v26 = vadd.f32 %v6983_v42, %v6876_v35  ;;  %v1961_v23 = vadd.f32 %v6988_v25, %v6880_v14  ;;  %v1962_v10 = vadd.f32 %v6991_v3, %v6884_v54  ;;  %v1925_v4 = vsel %vm539_vm2, %v1923_v28, %v1924_v6  ;;  %v12125_v21 = vld [vmem:[#allocation97_spill] sm:$0xff]  ;;  %v12129_v28 = vld [vmem:[#allocation84_spill] sm:$0xff] }
 0x159   :  { %v1927_v46 = vsel %vm539_vm2, %v1924_v6, %v1926_v56  ;;  %v1963_v30 = vadd.f32 %v6994_v48, %v6890_v44  ;;  %v1964_v63 = vadd.f32 %v1860_v61, %v6893_v45  ;;  %v1965_v22 = vadd.f32 %v1862_v0, %v6896_v13  ;;  %v12110_v48 = vld [vmem:[#allocation75_spill] sm:$0xff]  ;;  %v12111_v61 = vld [vmem:[#allocation76_spill] sm:$0xff]  ;;  %v12112_v0 = vld [vmem:[#allocation77_spill] sm:$0xff] }
 0x15a   :  { %v1966_v24 = vadd.f32 %v1865_v1, %v6899_v12  ;;  %v1967_v35 = vadd.f32 %v1867_v41, %v6902_v34  ;;  %v1968_v14 = vadd.f32 %v1870_v29, %v6905_v47  ;;  %v1969_v25 = vadd.f32 %v1872_v50, %v6908_v15  ;;  %v12113_v1 = vld [vmem:[#allocation78_spill] sm:$0xff]  ;;  %v12114_v41 = vld [vmem:[#allocation79_spill] sm:$0xff]  ;;  %v12115_v29 = vld [vmem:[#allocation88_spill] sm:$0xff] }
 0x15b   :  { %v1970_v54 = vadd.f32 %v1875_v27, %v6911_v55  ;;  %v1971_v42 = vadd.f32 %v1877_v51, %v6914_v39  ;;  %v1972_v3 = vadd.f32 %v1880_v2, %v6917_v52  ;;  %v1973_v44 = vadd.f32 %v1882_v62, %v6920_v20  ;;  %v12116_v50 = vld [vmem:[#allocation89_spill] sm:$0xff]  ;;  %v12117_v27 = vld [vmem:[#allocation80_spill] sm:$0xff]  ;;  %v12118_v51 = vld [vmem:[#allocation90_spill] sm:$0xff] }
 0x15c   :  { %v1974_v45 = vadd.f32 %v1885_v40, %v12110_v48  ;;  %v1975_v13 = vadd.f32 %v1887_v58, %v12111_v61  ;;  %v1976_v12 = vadd.f32 %v1890_v60, %v12112_v0  ;;  %v1977_v34 = vadd.f32 %v1892_v9, %v12113_v1  ;;  %v12119_v2 = vld [vmem:[#allocation81_spill] sm:$0xff]  ;;  %v12120_v62 = vld [vmem:[#allocation91_spill] sm:$0xff] }
 0x15d   :  { %v1978_v47 = vadd.f32 %v1895_v43, %v12114_v41  ;;  %v1979_v15 = vadd.f32 %v1897_v16, %v12115_v29  ;;  %v1980_v55 = vadd.f32 %v1900_v18, %v12116_v50  ;;  %v1981_v39 = vadd.f32 %v1902_v59, %v12117_v27  ;;  %v12126_v43 = vld [vmem:[#allocation98_spill] sm:$0xff]  ;;  %v12156_v48 = vld [vmem:[#allocation39_spill] sm:$0xff] }
 0x15e   :  { %v1982_v52 = vadd.f32 %v1905_v57, %v12118_v51  ;;  %v1983_v20 = vadd.f32 %v1907_v31, %v12119_v2  ;;  %v1984_v40 = vadd.f32 %v1910_v37, %v12120_v62  ;;  %v1985_v58 = vadd.f32 %v1912_v19, %v12121_v17  ;;  %v12166_v29 = vld [vmem:[#allocation30_spill] sm:$0xff]  ;;  %v12176_v62 = vld [vmem:[#allocation41_spill] sm:$0xff] }
 0x15f   :  { %v1986_v60 = vadd.f32 %v1915_v5, %v12122_v36  ;;  %v1987_v53 = vadd.f32 %v1917_v38, %v12123_v33  ;;  %v1988_v32 = vadd.f32 %v1920_v11, %v12124_v8  ;;  %v1989_v9 = vadd.f32 %v1922_v49, %v12125_v21  ;;  %v12136_v5 = vld [vmem:[#allocation36_spill] sm:$0xff]  ;;  %v12178_v17 = vld [vmem:[#allocation42_spill] sm:$0xff]  ;;  %v12180_v36 = vld [vmem:[#allocation43_spill] sm:$0xff] }
 0x160   :  { %v1990_v16 = vadd.f32 %v1925_v4, %v12126_v43  ;;  %v7099_v7 = vmul.f32 0.11111111, %v1960_v26  ;;  %v7101_v18 = vmul.f32 0.11111111, %v1961_v23  ;;  %v1991_v6 = vadd.f32 %v1927_v46, %v12129_v28  ;;  %v12141_v23 = vld [vmem:[#allocation27_spill] sm:$0xff]  ;;  %v12182_v33 = vld [vmem:[#allocation44_spill] sm:$0xff] }
 0x161   :  { %v7104_v56 = vmul.f32 0.11111111, %v1962_v10  ;;  %v7106_v59 = vmul.f32 0.11111111, %v1963_v30  ;;  %v7108_v57 = vmul.f32 0.11111111, %v1964_v63  ;;  %v7118_v38 = vmul.f32 %v12136_v5, %v12136_v5 }
 0x162   :  { %12127 = vst [vmem:[#allocation94_spill] sm:$0xff] %v7099_v7  ;;  %12128 = vst [vmem:[#allocation85_spill] sm:$0xff] %v7101_v18  ;;  %v7110_v31 = vmul.f32 0.11111111, %v1965_v22  ;;  %v7112_v37 = vmul.f32 0.11111111, %v1966_v24  ;;  %v7128_v10 = vmul.f32 %v12141_v23, %v12141_v23  ;;  %v7158_v61 = vmul.f32 %v12156_v48, %v12156_v48 }
 0x163   :  { %12130 = vst [vmem:[#allocation95_spill] sm:$0xff] %v7104_v56  ;;  %12131 = vst [vmem:[#allocation86_spill] sm:$0xff] %v7106_v59  ;;  %v7114_v19 = vmul.f32 0.11111111, %v1967_v35  ;;  %v7120_v11 = vmul.f32 0.11111111, %v1968_v14 }
 0x164   :  { %12132 = vst [vmem:[#allocation96_spill] sm:$0xff] %v7108_v57  ;;  %12133 = vst [vmem:[#allocation87_spill] sm:$0xff] %v7110_v31  ;;  %v7122_v49 = vmul.f32 0.11111111, %v1969_v25  ;;  %v7124_v26 = vmul.f32 0.11111111, %v1970_v54 }
 0x165   :  { %12134 = vst [vmem:[#allocation99_spill] sm:$0xff] %v7112_v37  ;;  %12135 = vst [vmem:[#allocation100_spill] sm:$0xff] %v7114_v19  ;;  %v7130_v4 = vmul.f32 0.11111111, %v1971_v42  ;;  %v7132_v46 = vmul.f32 0.11111111, %v1972_v3 }
 0x166   :  { %12137 = vst [vmem:[#allocation101_spill] sm:$0xff] %v7118_v38  ;;  %12138 = vst [vmem:[#allocation102_spill] sm:$0xff] %v7120_v11  ;;  %v7134_v30 = vmul.f32 0.11111111, %v1973_v44  ;;  %v12146_v63 = vld [vmem:[#allocation38_spill] sm:$0xff]  ;;  %v12151_v25 = vld [vmem:[#allocation28_spill] sm:$0xff] }
 0x167   :  { %12139 = vst [vmem:[#allocation103_spill] sm:$0xff] %v7122_v49  ;;  %12140 = vst [vmem:[#allocation52_spill] sm:$0xff] %v7124_v26  ;;  %v7138_v22 = vmul.f32 %v12146_v63, %v12146_v63  ;;  %v7140_v24 = vmul.f32 0.11111111, %v1974_v45  ;;  %v7142_v35 = vmul.f32 0.11111111, %v1975_v13  ;;  %v7148_v54 = vmul.f32 %v12151_v25, %v12151_v25 }
 0x168   :  { %12142 = vst [vmem:[#allocation63_spill] sm:$0xff] %v7128_v10  ;;  %12143 = vst [vmem:[#allocation61_spill] sm:$0xff] %v7130_v4  ;;  %v7144_v14 = vmul.f32 0.11111111, %v1976_v12  ;;  %v7150_v42 = vmul.f32 0.11111111, %v1977_v34 }
 0x169   :  { %12144 = vst [vmem:[#allocation53_spill] sm:$0xff] %v7132_v46  ;;  %12145 = vst [vmem:[#allocation73_spill] sm:$0xff] %v7134_v30  ;;  %v7152_v3 = vmul.f32 0.11111111, %v1978_v47  ;;  %v7154_v44 = vmul.f32 0.11111111, %v1979_v15  ;;  %v7178_v15 = vmul.f32 %v12166_v29, %v12166_v29 }
 0x16a   :  { %12147 = vst [vmem:[#allocation59_spill] sm:$0xff] %v7138_v22  ;;  %12148 = vst [vmem:[#allocation51_spill] sm:$0xff] %v7140_v24  ;;  %v7160_v45 = vmul.f32 0.11111111, %v1980_v55  ;;  %v7162_v13 = vmul.f32 0.11111111, %v1981_v39 }
 0x16b   :  { %12149 = vst [vmem:[#allocation60_spill] sm:$0xff] %v7142_v35  ;;  %12150 = vst [vmem:[#allocation74_spill] sm:$0xff] %v7144_v14  ;;  %v7164_v0 = vmul.f32 0.11111111, %v1982_v52  ;;  %v12161_v12 = vld [vmem:[#allocation29_spill] sm:$0xff]  ;;  %v12171_v39 = vld [vmem:[#allocation40_spill] sm:$0xff] }
 0x16c   :  { %12152 = vst [vmem:[#allocation75_spill] sm:$0xff] %v7148_v54  ;;  %12153 = vst [vmem:[#allocation76_spill] sm:$0xff] %v7150_v42  ;;  %v7168_v1 = vmul.f32 %v12161_v12, %v12161_v12  ;;  %v7170_v34 = vmul.f32 0.11111111, %v1983_v20  ;;  %v7172_v41 = vmul.f32 0.11111111, %v1984_v40  ;;  %v7188_v51 = vmul.f32 %v12171_v39, %v12171_v39 }
 0x16d   :  { %12154 = vst [vmem:[#allocation77_spill] sm:$0xff] %v7152_v3  ;;  %12155 = vst [vmem:[#allocation78_spill] sm:$0xff] %v7154_v44  ;;  %v7174_v47 = vmul.f32 0.11111111, %v1985_v58  ;;  %v7180_v50 = vmul.f32 0.11111111, %v1986_v60  ;;  %v7198_v40 = vmul.f32 %v12176_v62, %v12176_v62  ;;  %v7202_v58 = vmul.f32 %v12178_v17, %v12178_v17 }
 0x16e   :  { %12157 = vst [vmem:[#allocation79_spill] sm:$0xff] %v7158_v61  ;;  %12158 = vst [vmem:[#allocation88_spill] sm:$0xff] %v7160_v45  ;;  %v7182_v55 = vmul.f32 0.11111111, %v1987_v53  ;;  %v7184_v27 = vmul.f32 0.11111111, %v1988_v32  ;;  %v7206_v60 = vmul.f32 %v12180_v36, %v12180_v36  ;;  %v7210_v53 = vmul.f32 %v12182_v33, %v12182_v33 }
 0x16f   :  { %12159 = vst [vmem:[#allocation89_spill] sm:$0xff] %v7162_v13  ;;  %12160 = vst [vmem:[#allocation80_spill] sm:$0xff] %v7164_v0  ;;  %v7190_v52 = vmul.f32 0.11111111, %v1989_v9  ;;  %v7192_v2 = vmul.f32 0.11111111, %v1990_v16 }
 0x170   :  { %12162 = vst [vmem:[#allocation90_spill] sm:$0xff] %v7168_v1  ;;  %12163 = vst [vmem:[#allocation81_spill] sm:$0xff] %v7170_v34  ;;  %v7194_v20 = vmul.f32 0.11111111, %v1991_v6  ;;  %v12184_v8 = vld [vmem:[#allocation45_spill] sm:$0xff]  ;;  %v12186_v21 = vld [vmem:[#allocation46_spill] sm:$0xff] }
 0x171   :  { %12164 = vst [vmem:[#allocation91_spill] sm:$0xff] %v7172_v41  ;;  %12165 = vst [vmem:[#allocation82_spill] sm:$0xff] %v7174_v47  ;;  %v7214_v32 = vmul.f32 %v12184_v8, %v12184_v8  ;;  %v7218_v9 = vmul.f32 %v12186_v21, %v12186_v21  ;;  %v12188_v43 = vld [vmem:[#allocation3_spill] sm:$0xff]  ;;  %v12190_v28 = vld [vmem:[#allocation16_spill] sm:$0xff] }
 0x172   :  { %12167 = vst [vmem:[#allocation92_spill] sm:$0xff] %v7178_v15  ;;  %12168 = vst [vmem:[#allocation83_spill] sm:$0xff] %v7180_v50  ;;  %v7222_v16 = vmul.f32 %v12188_v43, %v12188_v43  ;;  %v7226_v6 = vmul.f32 %v12190_v28, %v12190_v28  ;;  %v12192_v36 = vld [vmem:[#allocation4_spill] sm:$0xff]  ;;  %v12194_v17 = vld [vmem:[#allocation5_spill] sm:$0xff] }
 0x173   :  { %12169 = vst [vmem:[#allocation93_spill] sm:$0xff] %v7182_v55  ;;  %12170 = vst [vmem:[#allocation97_spill] sm:$0xff] %v7184_v27  ;;  %v7230_v33 = vmul.f32 %v12192_v36, %v12192_v36  ;;  %v7234_v8 = vmul.f32 %v12194_v17, %v12194_v17  ;;  %v12196_v62 = vld [vmem:[#allocation6_spill] sm:$0xff]  ;;  %v12198_v39 = vld [vmem:[#allocation8_spill] sm:$0xff] }
 0x174   :  { %12172 = vst [vmem:[#allocation98_spill] sm:$0xff] %v7188_v51  ;;  %12173 = vst [vmem:[#allocation84_spill] sm:$0xff] %v7190_v52  ;;  %v7238_v21 = vmul.f32 %v12196_v62, %v12196_v62  ;;  %v7242_v43 = vmul.f32 %v12198_v39, %v12198_v39  ;;  %v12200_v29 = vld [vmem:[#allocation9_spill] sm:$0xff]  ;;  %v12202_v12 = vld [vmem:[#allocation12_spill] sm:$0xff] }
 0x175   :  { %12174 = vst [vmem:[#allocation104_spill] sm:$0xff] %v7192_v2  ;;  %12175 = vst [vmem:[#allocation105_spill] sm:$0xff] %v7194_v20  ;;  %v7246_v28 = vmul.f32 %v12200_v29, %v12200_v29  ;;  %v7250_v36 = vmul.f32 %v12202_v12, %v12202_v12  ;;  %v12204_v48 = vld [vmem:[#allocation17_spill] sm:$0xff]  ;;  %v12206_v25 = vld [vmem:[#allocation18_spill] sm:$0xff] }
 0x176   :  { %12177 = vst [vmem:[#allocation106_spill] sm:$0xff] %v7198_v40  ;;  %12179 = vst [vmem:[#allocation107_spill] sm:$0xff] %v7202_v58  ;;  %v7254_v17 = vmul.f32 %v12204_v48, %v12204_v48  ;;  %v7258_v62 = vmul.f32 %v12206_v25, %v12206_v25  ;;  %v12208_v63 = vld [vmem:[#allocation19_spill] sm:$0xff]  ;;  %v12210_v23 = vld [vmem:[#allocation20_spill] sm:$0xff] }
 0x177   :  { %12181 = vst [vmem:[#allocation108_spill] sm:$0xff] %v7206_v60  ;;  %12183 = vst [vmem:[#allocation109_spill] sm:$0xff] %v7210_v53  ;;  %v7262_v39 = vmul.f32 %v12208_v63, %v12208_v63  ;;  %v7266_v29 = vmul.f32 %v12210_v23, %v12210_v23  ;;  %v12212_v5 = vld [vmem:[#allocation21_spill] sm:$0xff]  ;;  %v12214_v20 = vld [vmem:[#allocation31_spill] sm:$0xff] }
 0x178   :  { %12185 = vst [vmem:[#allocation110_spill] sm:$0xff] %v7214_v32  ;;  %12187 = vst [vmem:[#allocation111_spill] sm:$0xff] %v7218_v9  ;;  %v7270_v12 = vmul.f32 %v12212_v5, %v12212_v5  ;;  %v7274_v48 = vmul.f32 %v12214_v20, %v12214_v20  ;;  %v12216_v2 = vld [vmem:[#allocation22_spill] sm:$0xff]  ;;  %v12218_v52 = vld [vmem:[#allocation32_spill] sm:$0xff] }
 0x179   :  { %12189 = vst [vmem:[#allocation112_spill] sm:$0xff] %v7222_v16  ;;  %12191 = vst [vmem:[#allocation113_spill] sm:$0xff] %v7226_v6  ;;  %v7278_v25 = vmul.f32 %v12216_v2, %v12216_v2  ;;  %v7282_v63 = vmul.f32 %v12218_v52, %v12218_v52  ;;  %v12220_v27 = vld [vmem:[#allocation23_spill] sm:$0xff]  ;;  %v12222_v55 = vld [vmem:[#allocation33_spill] sm:$0xff] }
 0x17a   :  { %12193 = vst [vmem:[#allocation114_spill] sm:$0xff] %v7230_v33  ;;  %12195 = vst [vmem:[#allocation115_spill] sm:$0xff] %v7234_v8  ;;  %v7286_v23 = vmul.f32 %v12220_v27, %v12220_v27  ;;  %v7290_v5 = vmul.f32 %v12222_v55, %v12222_v55  ;;  %v4233_v27 = vld [vmem:[%s10830_s1] sm:$0xff]  ;;  %v4234_v45 = vld [vmem:[%s10830_s1 + $0x8] sm:$0xff] }
 0x17b   :  { %12197 = vst [vmem:[#allocation116_spill] sm:$0xff] %v7238_v21  ;;  %12199 = vst [vmem:[#allocation117_spill] sm:$0xff] %v7242_v43  ;;  %v2089_v13 = vmul.f32 %v4234_v45, %v4234_v45  ;;  %v4235_v0 = vld [vmem:[%s10830_s1 + $0x10] sm:$0xff]  ;;  %v4236_v41 = vld [vmem:[%s10830_s1 + $0x18] sm:$0xff] }
 0x17c   :  { %12201 = vst [vmem:[#allocation118_spill] sm:$0xff] %v7246_v28  ;;  %12203 = vst [vmem:[#allocation119_spill] sm:$0xff] %v7250_v36  ;;  %v7372_v34 = vmul.f32 %v4236_v41, %v4236_v41  ;;  %v4238_v45 = vld [vmem:[%s10830_s1 + $0x28] sm:$0xff]  ;;  %v4240_v41 = vld [vmem:[%s10830_s1 + $0x38] sm:$0xff] }
 0x17d   :  { %12205 = vst [vmem:[#allocation120_spill] sm:$0xff] %v7254_v17  ;;  %12207 = vst [vmem:[#allocation121_spill] sm:$0xff] %v7258_v62  ;;  %v7382_v2 = vmul.f32 %v4238_v45, %v4238_v45  ;;  %v7392_v55 = vmul.f32 %v4240_v41, %v4240_v41  ;;  %v4242_v45 = vld [vmem:[%s10830_s1 + $0x48] sm:$0xff]  ;;  %v4244_v41 = vld [vmem:[%s10830_s1 + $0x58] sm:$0xff] }
 0x17e   :  { %12209 = vst [vmem:[#allocation122_spill] sm:$0xff] %v7262_v39  ;;  %12211 = vst [vmem:[#allocation123_spill] sm:$0xff] %v7266_v29  ;;  %v7402_v47 = vmul.f32 %v4242_v45, %v4242_v45  ;;  %v7412_v14 = vmul.f32 %v4244_v41, %v4244_v41  ;;  %v4246_v45 = vld [vmem:[%s10830_s1 + $0x68] sm:$0xff]  ;;  %v4248_v41 = vld [vmem:[%s10830_s1 + $0x78] sm:$0xff]  ;;  %v2121_v44 = vadd.f32 %v7372_v34, %v2089_v13 }
 0x17f   :  { %12213 = vst [vmem:[#allocation124_spill] sm:$0xff] %v7270_v12  ;;  %12215 = vst [vmem:[#allocation125_spill] sm:$0xff] %v7274_v48  ;;  %v7367_v48 = vmul.f32 %v4235_v0, %v4235_v0  ;;  %v4239_v0 = vld [vmem:[%s10830_s1 + $0x30] sm:$0xff]  ;;  %v7422_v24 = vmul.f32 %v4246_v45, %v4246_v45  ;;  %v7432_v46 = vmul.f32 %v4248_v41, %v4248_v41  ;;  %v4250_v45 = vld [vmem:[%s10830_s1 + $0x88] sm:$0xff] }
 0x180   :  { %12217 = vst [vmem:[#allocation126_spill] sm:$0xff] %v7278_v25  ;;  %12219 = vst [vmem:[#allocation127_spill] sm:$0xff] %v7282_v63  ;;  %v7387_v20 = vmul.f32 %v4239_v0, %v4239_v0  ;;  %v4243_v0 = vld [vmem:[%s10830_s1 + $0x50] sm:$0xff]  ;;  %v7442_v26 = vmul.f32 %v4250_v45, %v4250_v45  ;;  %v4252_v41 = vld [vmem:[%s10830_s1 + $0x98] sm:$0xff]  ;;  %v2129_v39 = vadd.f32 %v7412_v14, %v7402_v47 }
 0x181   :  { %12221 = vst [vmem:[#allocation128_spill] sm:$0xff] %v7286_v23  ;;  %12223 = vst [vmem:[#allocation129_spill] sm:$0xff] %v7290_v5  ;;  %v7359_v23 = vmul.f32 %v4233_v27, %v4233_v27  ;;  %v4237_v27 = vld [vmem:[%s10830_s1 + $0x20] sm:$0xff]  ;;  %v7407_v42 = vmul.f32 %v4243_v0, %v4243_v0  ;;  %v4247_v0 = vld [vmem:[%s10830_s1 + $0x70] sm:$0xff]  ;;  %v7452_v11 = vmul.f32 %v4252_v41, %v4252_v41 }
 0x182   :  { %v7377_v52 = vmul.f32 %v4237_v27, %v4237_v27  ;;  %v4241_v27 = vld [vmem:[%s10830_s1 + $0x40] sm:$0xff]  ;;  %v7427_v30 = vmul.f32 %v4247_v0, %v4247_v0  ;;  %v4251_v0 = vld [vmem:[%s10830_s1 + $0x90] sm:$0xff]  ;;  %v4254_v45 = vld [vmem:[%s10830_s1 + $0xa8] sm:$0xff]  ;;  %v2131_v17 = vadd.f32 %v7422_v24, %v7412_v14  ;;  %v2133_v28 = vadd.f32 %v7432_v46, %v7422_v24 }
 0x183   :  { %v7397_v50 = vmul.f32 %v4241_v27, %v4241_v27  ;;  %v4245_v27 = vld [vmem:[%s10830_s1 + $0x60] sm:$0xff]  ;;  %v7447_v49 = vmul.f32 %v4251_v0, %v4251_v0  ;;  %v7462_v37 = vmul.f32 %v4254_v45, %v4254_v45  ;;  %v4255_v0 = vld [vmem:[%s10830_s1 + $0xb0] sm:$0xff]  ;;  %v4256_v41 = vld [vmem:[%s10830_s1 + $0xb8] sm:$0xff]  ;;  %v2135_v21 = vadd.f32 %v7442_v26, %v7432_v46 }
 0x184   :  { %v7417_v35 = vmul.f32 %v4245_v27, %v4245_v27  ;;  %v4249_v27 = vld [vmem:[%s10830_s1 + $0x80] sm:$0xff]  ;;  %v7467_v31 = vmul.f32 %v4255_v0, %v4255_v0  ;;  %v7472_v57 = vmul.f32 %v4256_v41, %v4256_v41  ;;  %v4258_v45 = vld [vmem:[%s10830_s1 + $0xc8] sm:$0xff]  ;;  %v4259_v0 = vld [vmem:[%s10830_s1 + $0xd0] sm:$0xff]  ;;  %v2122_v12 = vadd.f32 %v7377_v52, %v7367_v48 }
 0x185   :  { %v7437_v4 = vmul.f32 %v4249_v27, %v4249_v27  ;;  %v4253_v27 = vld [vmem:[%s10830_s1 + $0xa0] sm:$0xff]  ;;  %v7482_v56 = vmul.f32 %v4258_v45, %v4258_v45  ;;  %v7487_v18 = vmul.f32 %v4259_v0, %v4259_v0  ;;  %v4260_v41 = vld [vmem:[%s10830_s1 + $0xd8] sm:$0xff]  ;;  %v4262_v45 = vld [vmem:[%s10830_s1 + $0xe8] sm:$0xff]  ;;  %v2124_v29 = vadd.f32 %v7387_v20, %v7377_v52 }
 0x186   :  { %v7457_v19 = vmul.f32 %v4253_v27, %v4253_v27  ;;  %v4257_v27 = vld [vmem:[%s10830_s1 + $0xc0] sm:$0xff]  ;;  %v7492_v7 = vmul.f32 %v4260_v41, %v4260_v41  ;;  %v7502_v3 = vmul.f32 %v4262_v45, %v4262_v45  ;;  %v4263_v0 = vld [vmem:[%s10830_s1 + $0xf0] sm:$0xff]  ;;  %v4264_v41 = vld [vmem:[%s10830_s1 + $0xf8] sm:$0xff]  ;;  %v2123_v45 = vadd.f32 %v7382_v2, %v7372_v34 }
 0x187   :  { %v7477_v59 = vmul.f32 %v4257_v27, %v4257_v27  ;;  %12231 = vst [vmem:[#allocation130_spill] sm:$0xff] %v7487_v18  ;;  %v4261_v27 = vld [vmem:[%s10830_s1 + $0xe0] sm:$0xff]  ;;  %v2118_v63 = vmul.f32 %v4263_v0, %v4263_v0  ;;  %v2119_v25 = vmul.f32 %v4264_v41, %v4264_v41  ;;  %v2125_v0 = vadd.f32 %v7392_v55, %v7382_v2 }
 0x188   :  { %12232 = vst [vmem:[#allocation131_spill] sm:$0xff] %v7492_v7  ;;  %v7497_v5 = vmul.f32 %v4261_v27, %v4261_v27  ;;  %12233 = vst [vmem:[#allocation132_spill] sm:$0xff] %v7502_v3  ;;  %v2120_v27 = vadd.f32 %v7367_v48, %v7359_v23  ;;  %v2126_v41 = vadd.f32 %v7397_v50, %v7387_v20 }
 0x189   :  { %v2127_v23 = vadd.f32 %v7402_v47, %v7392_v55  ;;  %v2128_v13 = vadd.f32 %v7407_v42, %v7397_v50  ;;  %v2130_v62 = vadd.f32 %v7417_v35, %v7407_v42  ;;  %v2132_v36 = vadd.f32 %v7427_v30, %v7417_v35 }
 0x18a   :  { %v2134_v43 = vadd.f32 %v7437_v4, %v7427_v30  ;;  %v2136_v8 = vadd.f32 %v7447_v49, %v7437_v4  ;;  %v2137_v33 = vadd.f32 %v7452_v11, %v7442_v26  ;;  %v2138_v6 = vadd.f32 %v7457_v19, %v7447_v49 }
 0x18b   :  { %v2139_v16 = vadd.f32 %v7462_v37, %v7452_v11  ;;  %v2140_v9 = vadd.f32 %v7467_v31, %v7457_v19  ;;  %v2141_v32 = vadd.f32 %v7472_v57, %v7462_v37  ;;  %v2142_v53 = vadd.f32 %v7477_v59, %v7467_v31 }
 0x18c   :  { %v2143_v60 = vadd.f32 %v7482_v56, %v7472_v57  ;;  %v2144_v58 = vadd.f32 %v7487_v18, %v7477_v59  ;;  %v2145_v40 = vadd.f32 %v7492_v7, %v7482_v56  ;;  %v2146_v51 = vadd.f32 %v7497_v5, %v7487_v18 }
 0x18d   :  { %v2147_v15 = vadd.f32 %v7502_v3, %v7492_v7  ;;  %v2148_v1 = vadd.f32 %v2118_v63, %v7497_v5  ;;  %v2149_v61 = vadd.f32 %v2119_v25, %v7502_v3  ;;  %v7568_v54 = vadd.f32 %v2120_v27, %v7367_v48 }
 0x18e   :  { %v7571_v22 = vadd.f32 %v2121_v44, %v7372_v34  ;;  %v7574_v10 = vadd.f32 %v2120_v27, %v7377_v52  ;;  %v7577_v38 = vadd.f32 %v2121_v44, %v7382_v2  ;;  %v7580_v18 = vadd.f32 %v2122_v12, %v7387_v20 }
 0x18f   :  { %v7583_v7 = vadd.f32 %v2123_v45, %v7392_v55  ;;  %v7586_v3 = vadd.f32 %v2124_v29, %v7397_v50  ;;  %v7589_v48 = vadd.f32 %v2125_v0, %v7402_v47  ;;  %v7592_v34 = vadd.f32 %v2126_v41, %v7407_v42 }
 0x190   :  { %v7595_v52 = vadd.f32 %v2127_v23, %v7412_v14  ;;  %v7598_v44 = vadd.f32 %v2128_v13, %v7417_v35  ;;  %v7601_v12 = vadd.f32 %v2129_v39, %v7422_v24  ;;  %v7604_v55 = vadd.f32 %v2130_v62, %v7427_v30 }
 0x191   :  { %v7607_v29 = vadd.f32 %v2131_v17, %v7432_v46  ;;  %v7610_v47 = vadd.f32 %v2132_v36, %v7437_v4  ;;  %v7613_v42 = vadd.f32 %v2133_v28, %v7442_v26  ;;  %v7616_v14 = vadd.f32 %v2134_v43, %v7447_v49 }
 0x192   :  { %v7619_v35 = vadd.f32 %v2135_v21, %v7452_v11  ;;  %v7622_v24 = vadd.f32 %v2136_v8, %v7457_v19  ;;  %v7625_v30 = vadd.f32 %v2137_v33, %v7462_v37  ;;  %v7628_v46 = vadd.f32 %v2138_v6, %v7467_v31  ;;  %v12238_v11 = vld [vmem:[#allocation130_spill] sm:$0xff]  ;;  %v12239_v19 = vld [vmem:[#allocation131_spill] sm:$0xff]  ;;  %v12241_v31 = vld [vmem:[#allocation132_spill] sm:$0xff] }
 0x193   :  { %v7631_v4 = vadd.f32 %v2139_v16, %v7472_v57  ;;  %v7634_v26 = vadd.f32 %v2140_v9, %v7477_v59  ;;  %v7637_v49 = vadd.f32 %v2141_v32, %v7482_v56  ;;  %v7640_v50 = vadd.f32 %v2142_v53, %v12238_v11 }
 0x194   :  { %12234 = vst [vmem:[#allocation133_spill] sm:$0xff] %v7619_v35  ;;  %12235 = vst [vmem:[#allocation134_spill] sm:$0xff] %v7625_v30  ;;  %v7643_v39 = vadd.f32 %v2143_v60, %v12239_v19  ;;  %v7646_v37 = vadd.f32 %v2144_v58, %v7497_v5  ;;  %v7649_v2 = vadd.f32 %v2145_v40, %v12241_v31  ;;  %v11219_v33 = vrot.slane %v7580_v18, 7 }
 0x195   :  { %12236 = vst [vmem:[#allocation135_spill] sm:$0xff] %v7631_v4  ;;  %12237 = vst [vmem:[#allocation136_spill] sm:$0xff] %v7637_v49  ;;  %v7651_v57 = vadd.f32 %v2146_v51, %v2118_v63  ;;  %v7653_v20 = vadd.f32 %v2147_v15, %v2119_v25  ;;  %v7656_v59 = vadd.f32 %v2148_v1, %v7497_v5  ;;  %v11222_v5 = vrot.slane %v7568_v54, 7 }
 0x196   :  { %12240 = vst [vmem:[#allocation130_spill] sm:$0xff] %v7643_v39  ;;  %12242 = vst [vmem:[#allocation131_spill] sm:$0xff] %v7649_v2  ;;  %v7659_v56 = vadd.f32 %v2149_v61, %v12241_v31  ;;  %v11217_v1 = vrot.slane %v7571_v22, 7  ;;  %v11220_v61 = vrot.slane %v7574_v10, 7  ;;  %v11216_v15 = vrot.slane %v7577_v38, 7 }
 0x197   :  { %12243 = vst [vmem:[#allocation132_spill] sm:$0xff] %v7653_v20  ;;  %v11218_v53 = vrot.slane %v7583_v7, 7  ;;  %v2255_v6 = vrot.slane %v7586_v3, 7  ;;  %v11221_v0 = vrot.slane %v7589_v48, 7  ;;  %v2258_v41 = vrot.slane %v7592_v34, 7 }
 0x198   :  { %12244 = vst [vmem:[#allocation137_spill] sm:$0xff] %v7659_v56  ;;  %v7689_v27 = vsel %vm201_vm0, %v11222_v5, %v11217_v1  ;;  %v7696_v45 = vsel %vm201_vm0, %v11220_v61, %v11216_v15  ;;  %v11223_v13 = vrot.slane %v7595_v52, 7  ;;  %v2261_v11 = vrot.slane %v7598_v44, 7 }
 0x199   :  { %12245 = vst [vmem:[#allocation138_spill] sm:$0xff] %v7696_v45  ;;  %v7705_v23 = vsel %vm201_vm0, %v11219_v33, %v11218_v53  ;;  %v11224_v19 = vrot.slane %v7601_v12, 7  ;;  %v2264_v31 = vrot.slane %v7604_v55, 7  ;;  %v11225_v15 = vrot.slane %v7607_v29, 7 }
 0x19a   :  { %12246 = vst [vmem:[#allocation139_spill] sm:$0xff] %v7705_v23  ;;  %v2267_v28 = vrot.slane %v7610_v47, 7  ;;  %v11226_v16 = vrot.slane %v7613_v42, 7  ;;  %v2270_v1 = vrot.slane %v7616_v14, 7  ;;  %v11227_v43 = vrot.slane %v7619_v35, 7 }
 0x19b   :  { %v2273_v53 = vrot.slane %v7622_v24, 7  ;;  %v11228_v9 = vrot.slane %v7625_v30, 7  ;;  %v2276_v21 = vrot.slane %v7628_v46, 7  ;;  %v11229_v32 = vrot.slane %v7631_v4, 7 }
 0x19c   :  { %v2279_v8 = vrot.slane %v7634_v26, 7  ;;  %v11231_v60 = vrot.slane %v7637_v49, 7  ;;  %v2282_v51 = vrot.slane %v7640_v50, 7  ;;  %v11234_v25 = vrot.slane %v7643_v39, 7 }
 0x19d   :  { %v2285_v63 = vrot.slane %v7646_v37, 7  ;;  %v11236_v40 = vrot.slane %v7649_v2, 7  ;;  %v7729_v36 = vsel %vm201_vm0, %v2255_v6, %v11221_v0  ;;  %v7734_v58 = vsel %vm201_vm0, %v2258_v41, %v11223_v13 }
 0x19e   :  { %12247 = vst [vmem:[#allocation140_spill] sm:$0xff] %v7729_v36  ;;  %12248 = vst [vmem:[#allocation141_spill] sm:$0xff] %v7734_v58  ;;  %v2288_v33 = vrot.slane %v7651_v57, 7  ;;  %v7741_v61 = vsel %vm201_vm0, %v2261_v11, %v11224_v19  ;;  %v7746_v62 = vsel %vm201_vm0, %v2264_v31, %v11225_v15  ;;  %v2291_v0 = vrot.slane %v7656_v59, 7 }
 0x19f   :  { %12249 = vst [vmem:[#allocation142_spill] sm:$0xff] %v7741_v61  ;;  %12250 = vst [vmem:[#allocation143_spill] sm:$0xff] %v7746_v62  ;;  %v7753_v13 = vsel %vm201_vm0, %v2267_v28, %v11226_v16  ;;  %v7758_v17 = vsel %vm201_vm0, %v2270_v1, %v11227_v43  ;;  %v7763_v19 = vsel %vm201_vm0, %v2273_v53, %v11228_v9  ;;  %v2342_v5 = vrot.slane %v7571_v22, 5 }
 0x1a0   :  { %12251 = vst [vmem:[#allocation144_spill] sm:$0xff] %v7753_v13  ;;  %12252 = vst [vmem:[#allocation145_spill] sm:$0xff] %v7758_v17  ;;  %v7768_v15 = vsel %vm201_vm0, %v2276_v21, %v11229_v32  ;;  %v7773_v16 = vsel %vm201_vm0, %v2279_v8, %v11231_v60  ;;  %v7778_v43 = vsel %vm201_vm0, %v2282_v51, %v11234_v25  ;;  %v12258_v32 = vrot.slane %v7653_v20, 7 }
 0x1a1   :  { %12253 = vst [vmem:[#allocation146_spill] sm:$0xff] %v7763_v19  ;;  %12254 = vst [vmem:[#allocation147_spill] sm:$0xff] %v7768_v15  ;;  %v7783_v9 = vsel %vm201_vm0, %v2285_v63, %v11236_v40  ;;  %v2343_v60 = vrot.slane %v7577_v38, 5  ;;  %v2345_v19 = vrot.slane %v7589_v48, 5  ;;  %v12260_v25 = vrot.slane %v7659_v56, 7 }
 0x1a2   :  { %12255 = vst [vmem:[#allocation148_spill] sm:$0xff] %v7773_v16  ;;  %12256 = vst [vmem:[#allocation149_spill] sm:$0xff] %v7778_v43  ;;  %v7789_v15 = vsel %vm201_vm0, %v2288_v33, %v12258_v32  ;;  %v2344_v16 = vrot.slane %v7583_v7, 5  ;;  %v2346_v40 = vrot.slane %v7595_v52, 5  ;;  %v2348_v17 = vrot.slane %v7607_v29, 5 }
 0x1a3   :  { %12257 = vst [vmem:[#allocation150_spill] sm:$0xff] %v7783_v9  ;;  %12259 = vst [vmem:[#allocation151_spill] sm:$0xff] %v7789_v15  ;;  %v7797_v43 = vsel %vm201_vm0, %v2291_v0, %v12260_v25  ;;  %v2347_v9 = vrot.slane %v7601_v12, 5  ;;  %v2349_v32 = vrot.slane %v7613_v42, 5  ;;  %v2350_v15 = vrot.slane %v7619_v35, 5 }
 0x1a4   :  { %12261 = vst [vmem:[#allocation152_spill] sm:$0xff] %v7797_v43  ;;  %v2351_v13 = vrot.slane %v7625_v30, 5  ;;  %v2352_v62 = vrot.slane %v7631_v4, 5  ;;  %v2353_v61 = vrot.slane %v7637_v49, 5  ;;  %v2354_v58 = vrot.slane %v7643_v39, 5 }
 0x1a5   :  { %v2355_v25 = vrot.slane %v7649_v2, 5  ;;  %v2356_v43 = vrot.slane %v7653_v20, 5  ;;  %v2357_v36 = vrot.slane %v7659_v56, 5  ;;  %v12262_v23 = vrot.slane %v7568_v54, 7 }
 0x1a6   :  { %v12263_v45 = vrot.slane %v7568_v54, 1  ;;  %v12264_v30 = vrot.slane %v7574_v10, 7  ;;  %v12265_v4 = vrot.slane %v7574_v10, 1  ;;  %v12266_v2 = vrot.slane %v7580_v18, 7 }
 0x1a7   :  { %v12267_v20 = vrot.slane %v7580_v18, 1  ;;  %v12268_v39 = vrot.slane %v7586_v3, 1  ;;  %v12270_v10 = vrot.slane %v7598_v44, 1  ;;  %v12271_v18 = vrot.slane %v7604_v55, 1 }
 0x1a8   :  { %v7816_v35 = vsel %vm201_vm0, %v12263_v45, %v12262_v23  ;;  %v7823_v49 = vsel %vm201_vm0, %v12265_v4, %v12264_v30  ;;  %v12269_v45 = vrot.slane %v7592_v34, 1  ;;  %v12272_v3 = vrot.slane %v7610_v47, 1 }
 0x1a9   :  { %v7830_v56 = vsel %vm201_vm0, %v12267_v20, %v12266_v2  ;;  %v7835_v54 = vsel %vm201_vm0, %v12268_v39, %v2255_v6  ;;  %v7845_v30 = vsel %vm201_vm0, %v12270_v10, %v2261_v11  ;;  %v7850_v4 = vsel %vm201_vm0, %v12271_v18, %v2264_v31  ;;  %v12312_v10 = vld [vmem:[#allocation135_spill] sm:$0xff] }
 0x1aa   :  { %v7840_v23 = vsel %vm201_vm0, %v12269_v45, %v2258_v41  ;;  %v7855_v39 = vsel %vm201_vm0, %v12272_v3, %v2267_v28  ;;  %v12274_v34 = vrot.slane %v7616_v14, 1  ;;  %v12275_v44 = vrot.slane %v7622_v24, 1 }
 0x1ab   :  { %12273 = vst [vmem:[#allocation153_spill] sm:$0xff] %v7855_v39  ;;  %v12277_v55 = vrot.slane %v7628_v46, 1  ;;  %v12279_v47 = vrot.slane %v7634_v26, 1  ;;  %v12281_v14 = vrot.slane %v7640_v50, 1  ;;  %v12283_v24 = vrot.slane %v7646_v37, 1 }
 0x1ac   :  { %v7860_v2 = vsel %vm201_vm0, %v12274_v34, %v2270_v1  ;;  %v7865_v20 = vsel %vm201_vm0, %v12275_v44, %v2273_v53  ;;  %v12285_v46 = vrot.slane %v7571_v22, 7  ;;  %v12287_v26 = vrot.slane %v7651_v57, 1  ;;  %v12315_v34 = vld [vmem:[#allocation136_spill] sm:$0xff] }
 0x1ad   :  { %12276 = vst [vmem:[#allocation154_spill] sm:$0xff] %v7865_v20  ;;  %v7870_v6 = vsel %vm201_vm0, %v12277_v55, %v2276_v21  ;;  %v7875_v28 = vsel %vm201_vm0, %v12279_v47, %v2279_v8  ;;  %v7880_v1 = vsel %vm201_vm0, %v12281_v14, %v2282_v51  ;;  %v7885_v53 = vsel %vm201_vm0, %v12283_v24, %v2285_v63 }
 0x1ae   :  { %12278 = vst [vmem:[#allocation155_spill] sm:$0xff] %v7870_v6  ;;  %12280 = vst [vmem:[#allocation156_spill] sm:$0xff] %v7875_v28  ;;  %v7890_v21 = vsel %vm201_vm0, %v12285_v46, %v2342_v5  ;;  %v7895_v8 = vsel %vm201_vm0, %v12287_v26, %v2288_v33  ;;  %v12289_v50 = vrot.slane %v7656_v59, 1  ;;  %v12291_v37 = vrot.slane %v7577_v38, 7  ;;  %v12324_v26 = vld [vmem:[#allocation132_spill] sm:$0xff] }
 0x1af   :  { %12282 = vst [vmem:[#allocation157_spill] sm:$0xff] %v7880_v1  ;;  %12284 = vst [vmem:[#allocation158_spill] sm:$0xff] %v7885_v53  ;;  %v12293_v22 = vrot.slane %v7583_v7, 7  ;;  %v12295_v57 = vrot.slane %v7589_v48, 7  ;;  %v12297_v59 = vrot.slane %v7595_v52, 7  ;;  %v12299_v38 = vrot.slane %v7601_v12, 7 }
 0x1b0   :  { %12286 = vst [vmem:[#allocation159_spill] sm:$0xff] %v7890_v21  ;;  %12288 = vst [vmem:[#allocation160_spill] sm:$0xff] %v7895_v8  ;;  %v7900_v51 = vsel %vm201_vm0, %v12289_v50, %v2291_v0  ;;  %v7905_v63 = vsel %vm201_vm0, %v12291_v37, %v2343_v60  ;;  %v12301_v7 = vrot.slane %v7607_v29, 7  ;;  %v12303_v48 = vrot.slane %v7613_v42, 7  ;;  %v12305_v12 = vld [vmem:[#allocation133_spill] sm:$0xff]  ;;  %v12308_v29 = vld [vmem:[#allocation134_spill] sm:$0xff] }
 0x1b1   :  { %12290 = vst [vmem:[#allocation161_spill] sm:$0xff] %v7900_v51  ;;  %12292 = vst [vmem:[#allocation162_spill] sm:$0xff] %v7905_v63  ;;  %v7910_v5 = vsel %vm201_vm0, %v12293_v22, %v2344_v16  ;;  %v7915_v33 = vsel %vm201_vm0, %v12295_v57, %v2345_v19  ;;  %v7920_v0 = vsel %vm201_vm0, %v12297_v59, %v2346_v40  ;;  %v2438_v52 = vrot.slane %v7816_v35, 1  ;;  %v12327_v37 = vld [vmem:[#allocation137_spill] sm:$0xff] }
 0x1b2   :  { %12294 = vst [vmem:[#allocation163_spill] sm:$0xff] %v7910_v5  ;;  %12296 = vst [vmem:[#allocation164_spill] sm:$0xff] %v7915_v33  ;;  %v7925_v60 = vsel %vm201_vm0, %v12299_v38, %v2347_v9  ;;  %v7930_v16 = vsel %vm201_vm0, %v12301_v7, %v2348_v17  ;;  %v7935_v41 = vsel %vm201_vm0, %v12303_v48, %v2349_v32  ;;  %v2439_v40 = vrot.slane %v7689_v27, 1  ;;  %v12311_v32 = vld [vmem:[#allocation138_spill] sm:$0xff]  ;;  %v12330_v38 = vld [vmem:[#allocation139_spill] sm:$0xff] }
 0x1b3   :  { %12298 = vst [vmem:[#allocation165_spill] sm:$0xff] %v7920_v0  ;;  %12300 = vst [vmem:[#allocation166_spill] sm:$0xff] %v7925_v60  ;;  %v2441_v11 = vrot.slane %v7890_v21, 1  ;;  %v12306_v19 = vrot.slane %v12305_v12, 7  ;;  %v12309_v31 = vrot.slane %v12308_v29, 7  ;;  %v2443_v42 = vrot.slane %v7823_v49, 1 }
 0x1b4   :  { %12302 = vst [vmem:[#allocation167_spill] sm:$0xff] %v7930_v16  ;;  %12304 = vst [vmem:[#allocation168_spill] sm:$0xff] %v7935_v41  ;;  %v2444_v45 = vrot.slane %v12311_v32, 1  ;;  %v12313_v18 = vrot.slane %v12312_v10, 7  ;;  %v12316_v44 = vrot.slane %v12315_v34, 7  ;;  %v12325_v50 = vrot.slane %v12324_v26, 7 }
 0x1b5   :  { %v7943_v9 = vsel %vm201_vm0, %v12306_v19, %v2350_v15  ;;  %v7948_v17 = vsel %vm201_vm0, %v12309_v31, %v2351_v13  ;;  %v12318_v15 = vld [vmem:[#allocation130_spill] sm:$0xff]  ;;  %v12321_v13 = vld [vmem:[#allocation131_spill] sm:$0xff]  ;;  %v12328_v22 = vrot.slane %v12327_v37, 7  ;;  %v2446_v57 = vrot.slane %v7905_v63, 1  ;;  %v12331_v12 = vld [vmem:[#allocation140_spill] sm:$0xff] }
 0x1b6   :  { %12307 = vst [vmem:[#allocation133_spill] sm:$0xff] %v7943_v9  ;;  %12310 = vst [vmem:[#allocation134_spill] sm:$0xff] %v7948_v17  ;;  %v7955_v3 = vsel %vm201_vm0, %v12313_v18, %v2352_v62  ;;  %v7960_v55 = vsel %vm201_vm0, %v12316_v44, %v2353_v61  ;;  %v12319_v47 = vrot.slane %v12318_v15, 7  ;;  %v12322_v24 = vrot.slane %v12321_v13, 7  ;;  %v12333_v18 = vld [vmem:[#allocation142_spill] sm:$0xff]  ;;  %v12334_v15 = vld [vmem:[#allocation143_spill] sm:$0xff] }
 0x1b7   :  { %12314 = vst [vmem:[#allocation138_spill] sm:$0xff] %v7955_v3  ;;  %12317 = vst [vmem:[#allocation135_spill] sm:$0xff] %v7960_v55  ;;  %v7975_v62 = vsel %vm201_vm0, %v12325_v50, %v2356_v43  ;;  %v7980_v61 = vsel %vm201_vm0, %v12328_v22, %v2357_v36  ;;  %v7985_v59 = vsel %vm394_vm1, %v2438_v52, %v2439_v40  ;;  %v2449_v7 = vrot.slane %v12330_v38, 1  ;;  %v12332_v52 = vld [vmem:[#allocation141_spill] sm:$0xff]  ;;  %v12335_v26 = vld [vmem:[#allocation144_spill] sm:$0xff] }
 0x1b8   :  { %v7965_v14 = vsel %vm201_vm0, %v12319_v47, %v2354_v58  ;;  %v7970_v46 = vsel %vm201_vm0, %v12322_v24, %v2355_v25  ;;  %12326 = vst [vmem:[#allocation131_spill] sm:$0xff] %v7975_v62  ;;  %12329 = vst [vmem:[#allocation132_spill] sm:$0xff] %v7980_v61  ;;  %v2448_v58 = vrot.slane %v7830_v56, 1  ;;  %v7988_v25 = vsel %vm394_vm1, %v2439_v40, %v2441_v11 }
 0x1b9   :  { %12320 = vst [vmem:[#allocation136_spill] sm:$0xff] %v7965_v14  ;;  %12323 = vst [vmem:[#allocation130_spill] sm:$0xff] %v7970_v46  ;;  %v2451_v43 = vrot.slane %v7910_v5, 1  ;;  %v7993_v48 = vsel %vm394_vm1, %v2443_v42, %v2444_v45  ;;  %v2453_v36 = vrot.slane %v7835_v54, 1  ;;  %v2454_v19 = vrot.slane %v12331_v12, 1  ;;  %v12336_v5 = vld [vmem:[#allocation145_spill] sm:$0xff] }
 0x1ba   :  { %v2456_v29 = vrot.slane %v7915_v33, 1  ;;  %v2458_v31 = vrot.slane %v7840_v23, 1  ;;  %v2459_v10 = vrot.slane %v12332_v52, 1  ;;  %v2461_v40 = vrot.slane %v7920_v0, 1 }
 0x1bb   :  { %v2463_v11 = vrot.slane %v7845_v30, 1  ;;  %v2464_v34 = vrot.slane %v12333_v18, 1  ;;  %v2466_v44 = vrot.slane %v7925_v60, 1  ;;  %v2468_v42 = vrot.slane %v7850_v4, 1 }
 0x1bc   :  { %v2469_v47 = vrot.slane %v12334_v15, 1  ;;  %v2471_v13 = vrot.slane %v7930_v16, 1  ;;  %v2473_v24 = vrot.slane %v7855_v39, 1  ;;  %v2474_v50 = vrot.slane %v12335_v26, 1 }
 0x1bd   :  { %v2476_v37 = vrot.slane %v7935_v41, 1  ;;  %v2447_v22 = vsel %vm394_vm1, %v2444_v45, %v2446_v57  ;;  %v2450_v0 = vsel %vm394_vm1, %v2448_v58, %v2449_v7  ;;  %v2478_v33 = vrot.slane %v7860_v2, 1 }
 0x1be   :  { %v2479_v60 = vrot.slane %v12336_v5, 1  ;;  %v2452_v63 = vsel %vm394_vm1, %v2449_v7, %v2451_v43  ;;  %v2455_v21 = vsel %vm394_vm1, %v2453_v36, %v2454_v19  ;;  %v2457_v16 = vsel %vm394_vm1, %v2454_v19, %v2456_v29  ;;  %v12337_v29 = vld [vmem:[#allocation146_spill] sm:$0xff] }
 0x1bf   :  { %v2481_v39 = vrot.slane %v7943_v9, 1  ;;  %v2460_v26 = vsel %vm394_vm1, %v2458_v31, %v2459_v10  ;;  %v2462_v41 = vsel %vm394_vm1, %v2459_v10, %v2461_v40  ;;  %v2465_v45 = vsel %vm394_vm1, %v2463_v11, %v2464_v34 }
 0x1c0   :  { %v2467_v57 = vsel %vm394_vm1, %v2464_v34, %v2466_v44  ;;  %v2470_v58 = vsel %vm394_vm1, %v2468_v42, %v2469_v47  ;;  %v2472_v5 = vsel %vm394_vm1, %v2469_v47, %v2471_v13  ;;  %v2475_v7 = vsel %vm394_vm1, %v2473_v24, %v2474_v50  ;;  %v12338_v34 = vld [vmem:[#allocation147_spill] sm:$0xff]  ;;  %v12339_v13 = vld [vmem:[#allocation148_spill] sm:$0xff] }
 0x1c1   :  { %v2477_v43 = vsel %vm394_vm1, %v2474_v50, %v2476_v37  ;;  %v2480_v36 = vsel %vm394_vm1, %v2478_v33, %v2479_v60  ;;  %v2483_v19 = vrot.slane %v7865_v20, 1  ;;  %v2484_v31 = vrot.slane %v12337_v29, 1  ;;  %v12340_v37 = vld [vmem:[#allocation149_spill] sm:$0xff]  ;;  %v12342_v29 = vld [vmem:[#allocation151_spill] sm:$0xff]  ;;  %v12343_v20 = vld [vmem:[#allocation152_spill] sm:$0xff] }
 0x1c2   :  { %v2486_v10 = vrot.slane %v7948_v17, 1  ;;  %v2482_v40 = vsel %vm394_vm1, %v2479_v60, %v2481_v39  ;;  %v2488_v11 = vrot.slane %v7870_v6, 1  ;;  %v2489_v44 = vrot.slane %v12338_v34, 1  ;;  %v12341_v60 = vld [vmem:[#allocation150_spill] sm:$0xff] }
 0x1c3   :  { %v2491_v42 = vrot.slane %v7955_v3, 1  ;;  %v2493_v47 = vrot.slane %v7875_v28, 1  ;;  %v2494_v24 = vrot.slane %v12339_v13, 1  ;;  %v2496_v33 = vrot.slane %v7960_v55, 1 }
 0x1c4   :  { %v2498_v50 = vrot.slane %v7880_v1, 1  ;;  %v2499_v9 = vrot.slane %v12340_v37, 1  ;;  %v2501_v17 = vrot.slane %v7965_v14, 1  ;;  %v2503_v39 = vrot.slane %v7885_v53, 1 }
 0x1c5   :  { %v2504_v6 = vrot.slane %v12341_v60, 1  ;;  %v2506_v34 = vrot.slane %v7970_v46, 1  ;;  %v2508_v3 = vrot.slane %v7895_v8, 1  ;;  %v2509_v28 = vrot.slane %v12342_v29, 1 }
 0x1c6   :  { %v2511_v13 = vrot.slane %v7975_v62, 1  ;;  %v2485_v55 = vsel %vm394_vm1, %v2483_v19, %v2484_v31  ;;  %v2513_v1 = vrot.slane %v7900_v51, 1  ;;  %v2514_v37 = vrot.slane %v12343_v20, 1 }
 0x1c7   :  { %v2516_v14 = vrot.slane %v7980_v61, 1  ;;  %v2487_v53 = vsel %vm394_vm1, %v2484_v31, %v2486_v10  ;;  %v2490_v60 = vsel %vm394_vm1, %v2488_v11, %v2489_v44  ;;  %v2492_v46 = vsel %vm394_vm1, %v2489_v44, %v2491_v42 }
 0x1c8   :  { %v2495_v8 = vsel %vm394_vm1, %v2493_v47, %v2494_v24  ;;  %v2497_v29 = vsel %vm394_vm1, %v2494_v24, %v2496_v33  ;;  %v2500_v62 = vsel %vm394_vm1, %v2498_v50, %v2499_v9  ;;  %v2502_v19 = vsel %vm394_vm1, %v2499_v9, %v2501_v17 }
 0x1c9   :  { %v2505_v51 = vsel %vm394_vm1, %v2503_v39, %v2504_v6  ;;  %v2507_v20 = vsel %vm394_vm1, %v2504_v6, %v2506_v34  ;;  %v2510_v61 = vsel %vm394_vm1, %v2508_v3, %v2509_v28  ;;  %v2512_v31 = vsel %vm394_vm1, %v2509_v28, %v2511_v13  ;;  %v12363_v39 = vld [vmem:[#allocation159_spill] sm:$0xff] }
 0x1ca   :  { %v8063_v10 = vadd.f32 %v7985_v59, %v7816_v35  ;;  %v2515_v11 = vsel %vm394_vm1, %v2513_v1, %v2514_v37  ;;  %v2517_v44 = vsel %vm394_vm1, %v2514_v37, %v2516_v14  ;;  %v8069_v42 = vadd.f32 %v7988_v25, %v7689_v27 }
 0x1cb   :  { %v8073_v9 = vadd.f32 %v7993_v48, %v7823_v49  ;;  %v8076_v6 = vadd.f32 %v2447_v22, %v12311_v32  ;;  %v8079_v28 = vadd.f32 %v2450_v0, %v7830_v56  ;;  %v8082_v17 = vadd.f32 %v2452_v63, %v12330_v38 }
 0x1cc   :  { %v8085_v1 = vadd.f32 %v2455_v21, %v7835_v54  ;;  %v8088_v3 = vadd.f32 %v2457_v16, %v12331_v12  ;;  %v8091_v14 = vadd.f32 %v2460_v26, %v7840_v23  ;;  %v8094_v59 = vadd.f32 %v2462_v41, %v12332_v52  ;;  %v12344_v16 = vld [vmem:[#allocation153_spill] sm:$0xff]  ;;  %v12346_v26 = vld [vmem:[#allocation144_spill] sm:$0xff] }
 0x1cd   :  { %v8097_v25 = vadd.f32 %v2465_v45, %v7845_v30  ;;  %v8100_v0 = vadd.f32 %v2467_v57, %v12333_v18  ;;  %v8103_v63 = vadd.f32 %v2470_v58, %v7850_v4  ;;  %v8106_v21 = vadd.f32 %v2472_v5, %v12334_v15  ;;  %v12349_v45 = vld [vmem:[#allocation145_spill] sm:$0xff]  ;;  %v12351_v57 = vld [vmem:[#allocation154_spill] sm:$0xff]  ;;  %v12355_v5 = vld [vmem:[#allocation155_spill] sm:$0xff] }
 0x1ce   :  { %v8109_v48 = vadd.f32 %v2475_v7, %v12344_v16  ;;  %v8112_v22 = vadd.f32 %v2477_v43, %v12346_v26  ;;  %v8115_v41 = vadd.f32 %v2480_v36, %v7860_v2  ;;  %v8118_v34 = vadd.f32 %v2482_v40, %v12349_v45  ;;  %v12353_v58 = vld [vmem:[#allocation146_spill] sm:$0xff]  ;;  %v12357_v7 = vld [vmem:[#allocation147_spill] sm:$0xff]  ;;  %v12359_v43 = vld [vmem:[#allocation156_spill] sm:$0xff] }
 0x1cf   :  { %v8121_v47 = vadd.f32 %v2485_v55, %v12351_v57  ;;  %v8124_v13 = vadd.f32 %v2487_v53, %v12353_v58  ;;  %v8127_v24 = vadd.f32 %v2490_v60, %v12355_v5  ;;  %v8130_v33 = vadd.f32 %v2492_v46, %v12357_v7  ;;  %v12361_v36 = vld [vmem:[#allocation148_spill] sm:$0xff]  ;;  %v12364_v53 = vld [vmem:[#allocation157_spill] sm:$0xff] }
 0x1d0   :  { %12345 = vst [vmem:[#allocation137_spill] sm:$0xff] %v8109_v48  ;;  %12347 = vst [vmem:[#allocation139_spill] sm:$0xff] %v8112_v22  ;;  %v8133_v50 = vadd.f32 %v2495_v8, %v12359_v43  ;;  %v8136_v37 = vadd.f32 %v2497_v29, %v12361_v36  ;;  %v2582_v40 = vrot.slane %v7816_v35, 2  ;;  %v2583_v55 = vrot.slane %v7689_v27, 2  ;;  %v12366_v60 = vld [vmem:[#allocation149_spill] sm:$0xff]  ;;  %v12370_v29 = vld [vmem:[#allocation150_spill] sm:$0xff] }
 0x1d1   :  { %12348 = vst [vmem:[#allocation140_spill] sm:$0xff] %v8115_v41  ;;  %12350 = vst [vmem:[#allocation141_spill] sm:$0xff] %v8118_v34  ;;  %v2587_v46 = vrot.slane %v7823_v49, 2  ;;  %v2588_v8 = vrot.slane %v12311_v32, 2  ;;  %v12372_v35 = vld [vmem:[#allocation160_spill] sm:$0xff]  ;;  %v12380_v49 = vld [vmem:[#allocation162_spill] sm:$0xff] }
 0x1d2   :  { %12352 = vst [vmem:[#allocation142_spill] sm:$0xff] %v8121_v47  ;;  %12354 = vst [vmem:[#allocation143_spill] sm:$0xff] %v8124_v13  ;;  %v2585_v47 = vrot.slane %v12363_v39, 2  ;;  %v8142_v13 = vadd.f32 %v2500_v62, %v12364_v53  ;;  %v8156_v27 = vadd.f32 %v2510_v61, %v12372_v35  ;;  %v12374_v39 = vld [vmem:[#allocation151_spill] sm:$0xff]  ;;  %v12376_v62 = vld [vmem:[#allocation161_spill] sm:$0xff]  ;;  %v2590_v32 = vrot.slane %v12380_v49, 2 }
 0x1d3   :  { %12356 = vst [vmem:[#allocation153_spill] sm:$0xff] %v8127_v24  ;;  %12358 = vst [vmem:[#allocation144_spill] sm:$0xff] %v8130_v33  ;;  %v8145_v24 = vadd.f32 %v2502_v19, %v12366_v60  ;;  %v8159_v34 = vadd.f32 %v2512_v31, %v12374_v39  ;;  %v12378_v19 = vld [vmem:[#allocation152_spill] sm:$0xff]  ;;  %v2593_v61 = vrot.slane %v12330_v38, 2  ;;  %v12381_v31 = vld [vmem:[#allocation163_spill] sm:$0xff]  ;;  %v2608_v38 = vrot.slane %v12333_v18, 2 }
 0x1d4   :  { %12360 = vst [vmem:[#allocation145_spill] sm:$0xff] %v8133_v50  ;;  %12362 = vst [vmem:[#allocation154_spill] sm:$0xff] %v8136_v37  ;;  %v12368_v50 = vld [vmem:[#allocation158_spill] sm:$0xff]  ;;  %v8153_v37 = vadd.f32 %v2507_v20, %v12370_v29  ;;  %v8173_v20 = vsel %vm539_vm2, %v2583_v55, %v2585_v47  ;;  %v12382_v49 = vld [vmem:[#allocation164_spill] sm:$0xff]  ;;  %v2622_v18 = vrot.slane %v7860_v2, 2 }
 0x1d5   :  { %12365 = vst [vmem:[#allocation146_spill] sm:$0xff] %v8142_v13  ;;  %12367 = vst [vmem:[#allocation155_spill] sm:$0xff] %v8145_v24  ;;  %v8150_v33 = vadd.f32 %v2505_v51, %v12368_v50  ;;  %v8162_v13 = vadd.f32 %v2515_v11, %v12376_v62  ;;  %v8165_v24 = vadd.f32 %v2517_v44, %v12378_v19  ;;  %v2592_v51 = vrot.slane %v7830_v56, 2  ;;  %v12385_v41 = vld [vmem:[#allocation167_spill] sm:$0xff]  ;;  %v12386_v22 = vld [vmem:[#allocation168_spill] sm:$0xff] }
 0x1d6   :  { %12371 = vst [vmem:[#allocation156_spill] sm:$0xff] %v8153_v37  ;;  %12373 = vst [vmem:[#allocation148_spill] sm:$0xff] %v8156_v27  ;;  %v8178_v11 = vsel %vm539_vm2, %v2587_v46, %v2588_v8  ;;  %v2597_v44 = vrot.slane %v7835_v54, 2  ;;  %v2602_v56 = vrot.slane %v7840_v23, 2  ;;  %v12383_v27 = vld [vmem:[#allocation165_spill] sm:$0xff]  ;;  %v2612_v46 = vrot.slane %v7850_v4, 2 }
 0x1d7   :  { %12369 = vst [vmem:[#allocation147_spill] sm:$0xff] %v8150_v33  ;;  %12375 = vst [vmem:[#allocation159_spill] sm:$0xff] %v8159_v34  ;;  %v8170_v33 = vsel %vm539_vm2, %v2582_v40, %v2583_v55  ;;  %v2595_v34 = vrot.slane %v12381_v31, 2  ;;  %v2603_v40 = vrot.slane %v12332_v52, 2  ;;  %v2605_v47 = vrot.slane %v12383_v27, 2  ;;  %v12384_v31 = vld [vmem:[#allocation166_spill] sm:$0xff] }
 0x1d8   :  { %12377 = vst [vmem:[#allocation157_spill] sm:$0xff] %v8162_v13  ;;  %12379 = vst [vmem:[#allocation149_spill] sm:$0xff] %v8165_v24  ;;  %v2598_v24 = vrot.slane %v12331_v12, 2  ;;  %v2600_v13 = vrot.slane %v12382_v49, 2  ;;  %v2607_v55 = vrot.slane %v7845_v30, 2  ;;  %v2610_v37 = vrot.slane %v12384_v31, 2 }
 0x1d9   :  { %v2613_v54 = vrot.slane %v12334_v15, 2  ;;  %v2615_v12 = vrot.slane %v12385_v41, 2  ;;  %v2617_v49 = vrot.slane %v12344_v16, 2  ;;  %v2618_v23 = vrot.slane %v12346_v26, 2  ;;  %v12387_v48 = vld [vmem:[#allocation133_spill] sm:$0xff] }
 0x1da   :  { %v2620_v52 = vrot.slane %v12386_v22, 2  ;;  %v2591_v27 = vsel %vm539_vm2, %v2588_v8, %v2590_v32  ;;  %v2594_v30 = vsel %vm539_vm2, %v2592_v51, %v2593_v61  ;;  %v2623_v31 = vrot.slane %v12349_v45, 2 }
 0x1db   :  { %v2596_v4 = vsel %vm539_vm2, %v2593_v61, %v2595_v34  ;;  %v2599_v15 = vsel %vm539_vm2, %v2597_v44, %v2598_v24  ;;  %v2601_v41 = vsel %vm539_vm2, %v2598_v24, %v2600_v13  ;;  %v2625_v16 = vrot.slane %v12387_v48, 2  ;;  %v12388_v61 = vld [vmem:[#allocation134_spill] sm:$0xff] }
 0x1dc   :  { %v2604_v26 = vsel %vm539_vm2, %v2602_v56, %v2603_v40  ;;  %v2606_v22 = vsel %vm539_vm2, %v2603_v40, %v2605_v47  ;;  %v2609_v8 = vsel %vm539_vm2, %v2607_v55, %v2608_v38  ;;  %v2611_v32 = vsel %vm539_vm2, %v2608_v38, %v2610_v37  ;;  %v12389_v47 = vld [vmem:[#allocation138_spill] sm:$0xff] }
 0x1dd   :  { %v2614_v2 = vsel %vm539_vm2, %v2612_v46, %v2613_v54  ;;  %v2616_v45 = vsel %vm539_vm2, %v2613_v54, %v2615_v12  ;;  %v2619_v34 = vsel %vm539_vm2, %v2617_v49, %v2618_v23  ;;  %v2621_v51 = vsel %vm539_vm2, %v2618_v23, %v2620_v52  ;;  %v12390_v54 = vld [vmem:[#allocation135_spill] sm:$0xff]  ;;  %v12391_v49 = vld [vmem:[#allocation136_spill] sm:$0xff] }
 0x1de   :  { %v2624_v13 = vsel %vm539_vm2, %v2622_v18, %v2623_v31  ;;  %v2627_v48 = vrot.slane %v12351_v57, 2  ;;  %v2628_v24 = vrot.slane %v12353_v58, 2  ;;  %v2630_v44 = vrot.slane %v12388_v61, 2  ;;  %v12392_v18 = vld [vmem:[#allocation130_spill] sm:$0xff] }
 0x1df   :  { %v2626_v56 = vsel %vm539_vm2, %v2623_v31, %v2625_v16  ;;  %v2632_v37 = vrot.slane %v12355_v5, 2  ;;  %v2633_v40 = vrot.slane %v12357_v7, 2  ;;  %v2635_v55 = vrot.slane %v12389_v47, 2  ;;  %v12393_v16 = vld [vmem:[#allocation131_spill] sm:$0xff]  ;;  %v12394_v47 = vld [vmem:[#allocation132_spill] sm:$0xff] }
 0x1e0   :  { %v2637_v38 = vrot.slane %v12359_v43, 2  ;;  %v2638_v46 = vrot.slane %v12361_v36, 2  ;;  %v2640_v12 = vrot.slane %v12390_v54, 2  ;;  %v2642_v57 = vrot.slane %v12364_v53, 2 }
 0x1e1   :  { %v2643_v58 = vrot.slane %v12366_v60, 2  ;;  %v2645_v23 = vrot.slane %v12391_v49, 2  ;;  %v2647_v52 = vrot.slane %v12368_v50, 2  ;;  %v2648_v5 = vrot.slane %v12370_v29, 2 }
 0x1e2   :  { %v2650_v7 = vrot.slane %v12392_v18, 2  ;;  %v2652_v31 = vrot.slane %v12372_v35, 2  ;;  %v2653_v43 = vrot.slane %v12374_v39, 2  ;;  %v2655_v36 = vrot.slane %v12393_v16, 2 }
 0x1e3   :  { %v2629_v61 = vsel %vm539_vm2, %v2627_v48, %v2628_v24  ;;  %v2657_v53 = vrot.slane %v12376_v62, 2  ;;  %v2658_v60 = vrot.slane %v12378_v19, 2  ;;  %v2660_v54 = vrot.slane %v12394_v47, 2 }
 0x1e4   :  { %v2631_v50 = vsel %vm539_vm2, %v2628_v24, %v2630_v44  ;;  %v2634_v29 = vsel %vm539_vm2, %v2632_v37, %v2633_v40  ;;  %v2636_v49 = vsel %vm539_vm2, %v2633_v40, %v2635_v55  ;;  %v2639_v35 = vsel %vm539_vm2, %v2637_v38, %v2638_v46 }
 0x1e5   :  { %v2641_v39 = vsel %vm539_vm2, %v2638_v46, %v2640_v12  ;;  %v2644_v18 = vsel %vm539_vm2, %v2642_v57, %v2643_v58  ;;  %v2646_v48 = vsel %vm539_vm2, %v2643_v58, %v2645_v23  ;;  %v2649_v62 = vsel %vm539_vm2, %v2647_v52, %v2648_v5 }
 0x1e6   :  { %v2651_v19 = vsel %vm539_vm2, %v2648_v5, %v2650_v7  ;;  %v2654_v16 = vsel %vm539_vm2, %v2652_v31, %v2653_v43  ;;  %v2656_v24 = vsel %vm539_vm2, %v2653_v43, %v2655_v36  ;;  %v2694_v44 = vadd.f32 %v8170_v33, %v8063_v10  ;;  %v12408_v5 = vld [vmem:[#allocation156_spill] sm:$0xff]  ;;  %v12410_v43 = vld [vmem:[#allocation159_spill] sm:$0xff] }
 0x1e7   :  { %v2659_v37 = vsel %vm539_vm2, %v2657_v53, %v2658_v60  ;;  %v2661_v40 = vsel %vm539_vm2, %v2658_v60, %v2660_v54  ;;  %v2695_v55 = vadd.f32 %v8173_v20, %v8069_v42  ;;  %v2696_v38 = vadd.f32 %v8178_v11, %v8073_v9  ;;  %v12395_v20 = vld [vmem:[#allocation137_spill] sm:$0xff]  ;;  %v12396_v11 = vld [vmem:[#allocation139_spill] sm:$0xff]  ;;  %v12409_v7 = vld [vmem:[#allocation148_spill] sm:$0xff] }
 0x1e8   :  { %v2697_v46 = vadd.f32 %v2591_v27, %v8076_v6  ;;  %v2698_v12 = vadd.f32 %v2594_v30, %v8079_v28  ;;  %v2699_v57 = vadd.f32 %v2596_v4, %v8082_v17  ;;  %v2700_v58 = vadd.f32 %v2599_v15, %v8085_v1  ;;  %v12397_v27 = vld [vmem:[#allocation140_spill] sm:$0xff]  ;;  %v12398_v30 = vld [vmem:[#allocation141_spill] sm:$0xff]  ;;  %v12399_v4 = vld [vmem:[#allocation142_spill] sm:$0xff] }
 0x1e9   :  { %v2701_v10 = vadd.f32 %v2601_v41, %v8088_v3  ;;  %v2702_v33 = vadd.f32 %v2604_v26, %v8091_v14  ;;  %v2703_v23 = vadd.f32 %v2606_v22, %v8094_v59  ;;  %v2704_v52 = vadd.f32 %v2609_v8, %v8097_v25  ;;  %v12400_v15 = vld [vmem:[#allocation143_spill] sm:$0xff]  ;;  %v12401_v41 = vld [vmem:[#allocation153_spill] sm:$0xff]  ;;  %v12402_v26 = vld [vmem:[#allocation144_spill] sm:$0xff] }
 0x1ea   :  { %v2705_v42 = vadd.f32 %v2611_v32, %v8100_v0  ;;  %v2706_v9 = vadd.f32 %v2614_v2, %v8103_v63  ;;  %v2707_v6 = vadd.f32 %v2616_v45, %v8106_v21  ;;  %v2708_v28 = vadd.f32 %v2619_v34, %v12395_v20  ;;  %v12403_v22 = vld [vmem:[#allocation145_spill] sm:$0xff]  ;;  %v12404_v8 = vld [vmem:[#allocation154_spill] sm:$0xff]  ;;  %v12406_v45 = vld [vmem:[#allocation155_spill] sm:$0xff] }
 0x1eb   :  { %v2709_v17 = vadd.f32 %v2621_v51, %v12396_v11  ;;  %v2710_v1 = vadd.f32 %v2624_v13, %v12397_v27  ;;  %v2711_v3 = vadd.f32 %v2626_v56, %v12398_v30  ;;  %v2712_v14 = vadd.f32 %v2629_v61, %v12399_v4  ;;  %v12405_v32 = vld [vmem:[#allocation146_spill] sm:$0xff]  ;;  %v12407_v51 = vld [vmem:[#allocation147_spill] sm:$0xff]  ;;  %v12411_v61 = vld [vmem:[#allocation157_spill] sm:$0xff] }
 0x1ec   :  { %v2713_v59 = vadd.f32 %v2631_v50, %v12400_v15  ;;  %v2714_v25 = vadd.f32 %v2634_v29, %v12401_v41  ;;  %v2715_v0 = vadd.f32 %v2636_v49, %v12402_v26  ;;  %v2716_v63 = vadd.f32 %v2639_v35, %v12403_v22  ;;  %v12412_v60 = vld [vmem:[#allocation149_spill] sm:$0xff]  ;;  %v12444_v27 = vld [vmem:[#allocation56_spill] sm:$0xff]  ;;  %v12449_v4 = vld [vmem:[#allocation66_spill] sm:$0xff] }
 0x1ed   :  { %v2717_v21 = vadd.f32 %v2641_v39, %v12404_v8  ;;  %v2718_v2 = vadd.f32 %v2644_v18, %v12405_v32  ;;  %v2719_v34 = vadd.f32 %v2646_v48, %v12406_v45  ;;  %v2720_v13 = vadd.f32 %v2649_v62, %v12407_v51  ;;  %v12419_v18 = vld [vmem:[#allocation62_spill] sm:$0xff]  ;;  %v12439_v20 = vld [vmem:[#allocation65_spill] sm:$0xff]  ;;  %v12459_v8 = vld [vmem:[#allocation68_spill] sm:$0xff] }
 0x1ee   :  { %v2721_v56 = vadd.f32 %v2651_v19, %v12408_v5  ;;  %v2722_v31 = vadd.f32 %v2654_v16, %v12409_v7  ;;  %v2723_v36 = vadd.f32 %v2656_v24, %v12410_v43  ;;  %v2724_v53 = vadd.f32 %v2659_v37, %v12411_v61  ;;  %v12424_v24 = vld [vmem:[#allocation54_spill] sm:$0xff]  ;;  %v12463_v45 = vld [vmem:[#allocation69_spill] sm:$0xff]  ;;  %v12467_v5 = vld [vmem:[#allocation71_spill] sm:$0xff] }
 0x1ef   :  { %v2725_v47 = vadd.f32 %v2661_v40, %v12412_v60  ;;  %v8283_v54 = vmul.f32 0.11111111, %v2694_v44  ;;  %v8285_v50 = vmul.f32 0.11111111, %v2695_v55  ;;  %v8287_v29 = vmul.f32 0.11111111, %v2696_v38 }
 0x1f0   :  { %v8289_v49 = vmul.f32 0.11111111, %v2697_v46  ;;  %v8291_v35 = vmul.f32 0.11111111, %v2698_v12  ;;  %v8293_v39 = vmul.f32 0.11111111, %v2699_v57  ;;  %v8297_v48 = vmul.f32 %v12419_v18, %v12419_v18 }
 0x1f1   :  { %12413 = vst [vmem:[#allocation158_spill] sm:$0xff] %v8283_v54  ;;  %12414 = vst [vmem:[#allocation150_spill] sm:$0xff] %v8285_v50  ;;  %v8299_v62 = vmul.f32 0.11111111, %v2700_v58  ;;  %v8301_v19 = vmul.f32 0.11111111, %v2701_v10  ;;  %v8307_v44 = vmul.f32 %v12424_v24, %v12424_v24  ;;  %v8337_v11 = vmul.f32 %v12439_v20, %v12439_v20 }
 0x1f2   :  { %12415 = vst [vmem:[#allocation160_spill] sm:$0xff] %v8287_v29  ;;  %12416 = vst [vmem:[#allocation151_spill] sm:$0xff] %v8289_v49  ;;  %v8303_v16 = vmul.f32 0.11111111, %v2702_v33  ;;  %v8309_v37 = vmul.f32 0.11111111, %v2703_v23  ;;  %v8347_v30 = vmul.f32 %v12444_v27, %v12444_v27  ;;  %v8357_v15 = vmul.f32 %v12449_v4, %v12449_v4 }
 0x1f3   :  { %12417 = vst [vmem:[#allocation161_spill] sm:$0xff] %v8291_v35  ;;  %12418 = vst [vmem:[#allocation152_spill] sm:$0xff] %v8293_v39  ;;  %v8311_v40 = vmul.f32 0.11111111, %v2704_v52  ;;  %v8313_v55 = vmul.f32 0.11111111, %v2705_v42 }
 0x1f4   :  { %12420 = vst [vmem:[#allocation162_spill] sm:$0xff] %v8297_v48  ;;  %12421 = vst [vmem:[#allocation163_spill] sm:$0xff] %v8299_v62  ;;  %v12429_v38 = vld [vmem:[#allocation64_spill] sm:$0xff]  ;;  %v8319_v12 = vmul.f32 0.11111111, %v2706_v9  ;;  %v12434_v10 = vld [vmem:[#allocation55_spill] sm:$0xff] }
 0x1f5   :  { %12422 = vst [vmem:[#allocation164_spill] sm:$0xff] %v8301_v19  ;;  %12423 = vst [vmem:[#allocation165_spill] sm:$0xff] %v8303_v16  ;;  %v8317_v46 = vmul.f32 %v12429_v38, %v12429_v38  ;;  %v8321_v57 = vmul.f32 0.11111111, %v2707_v6  ;;  %v8323_v58 = vmul.f32 0.11111111, %v2708_v28  ;;  %v8327_v33 = vmul.f32 %v12434_v10, %v12434_v10 }
 0x1f6   :  { %12425 = vst [vmem:[#allocation166_spill] sm:$0xff] %v8307_v44  ;;  %12426 = vst [vmem:[#allocation167_spill] sm:$0xff] %v8309_v37  ;;  %v8329_v23 = vmul.f32 0.11111111, %v2709_v17  ;;  %v8331_v52 = vmul.f32 0.11111111, %v2710_v1 }
 0x1f7   :  { %12427 = vst [vmem:[#allocation168_spill] sm:$0xff] %v8311_v40  ;;  %12428 = vst [vmem:[#allocation133_spill] sm:$0xff] %v8313_v55  ;;  %v8333_v42 = vmul.f32 0.11111111, %v2711_v3  ;;  %v8339_v9 = vmul.f32 0.11111111, %v2712_v14 }
 0x1f8   :  { %12430 = vst [vmem:[#allocation134_spill] sm:$0xff] %v8317_v46  ;;  %12431 = vst [vmem:[#allocation138_spill] sm:$0xff] %v8319_v12  ;;  %v8341_v6 = vmul.f32 0.11111111, %v2713_v59  ;;  %v8343_v28 = vmul.f32 0.11111111, %v2714_v25 }
 0x1f9   :  { %12432 = vst [vmem:[#allocation135_spill] sm:$0xff] %v8321_v57  ;;  %12433 = vst [vmem:[#allocation136_spill] sm:$0xff] %v8323_v58  ;;  %v8349_v17 = vmul.f32 0.11111111, %v2715_v0  ;;  %v8351_v1 = vmul.f32 0.11111111, %v2716_v63 }
 0x1fa   :  { %12435 = vst [vmem:[#allocation130_spill] sm:$0xff] %v8327_v33  ;;  %12436 = vst [vmem:[#allocation131_spill] sm:$0xff] %v8329_v23  ;;  %v8353_v3 = vmul.f32 0.11111111, %v2717_v21  ;;  %v8359_v14 = vmul.f32 0.11111111, %v2718_v2  ;;  %v8377_v21 = vmul.f32 %v12459_v8, %v12459_v8 }
 0x1fb   :  { %12437 = vst [vmem:[#allocation132_spill] sm:$0xff] %v8331_v52  ;;  %12438 = vst [vmem:[#allocation137_spill] sm:$0xff] %v8333_v42  ;;  %v8361_v59 = vmul.f32 0.11111111, %v2719_v34  ;;  %v8363_v41 = vmul.f32 0.11111111, %v2720_v13  ;;  %v8385_v34 = vmul.f32 %v12463_v45, %v12463_v45 }
 0x1fc   :  { %12440 = vst [vmem:[#allocation139_spill] sm:$0xff] %v8337_v11  ;;  %12441 = vst [vmem:[#allocation140_spill] sm:$0xff] %v8339_v9  ;;  %v12454_v25 = vld [vmem:[#allocation67_spill] sm:$0xff]  ;;  %v8369_v0 = vmul.f32 0.11111111, %v2721_v56  ;;  %v12465_v51 = vld [vmem:[#allocation70_spill] sm:$0xff]  ;;  %v8393_v56 = vmul.f32 %v12467_v5, %v12467_v5 }
 0x1fd   :  { %12442 = vst [vmem:[#allocation141_spill] sm:$0xff] %v8341_v6  ;;  %12443 = vst [vmem:[#allocation142_spill] sm:$0xff] %v8343_v28  ;;  %v8367_v26 = vmul.f32 %v12454_v25, %v12454_v25  ;;  %v8371_v22 = vmul.f32 0.11111111, %v2722_v31  ;;  %v8373_v63 = vmul.f32 0.11111111, %v2723_v36  ;;  %v8389_v13 = vmul.f32 %v12465_v51, %v12465_v51 }
 0x1fe   :  { %12445 = vst [vmem:[#allocation143_spill] sm:$0xff] %v8347_v30  ;;  %12446 = vst [vmem:[#allocation153_spill] sm:$0xff] %v8349_v17  ;;  %v8379_v32 = vmul.f32 0.11111111, %v2724_v53  ;;  %v8381_v2 = vmul.f32 0.11111111, %v2725_v47 }
 0x1ff   :  { %12447 = vst [vmem:[#allocation144_spill] sm:$0xff] %v8351_v1  ;;  %12448 = vst [vmem:[#allocation145_spill] sm:$0xff] %v8353_v3  ;;  %v12469_v7 = vld [vmem:[#allocation72_spill] sm:$0xff]  ;;  %v12473_v61 = vld [vmem:[#allocation34_spill] sm:$0xff] }
 0x200   :  { %12450 = vst [vmem:[#allocation154_spill] sm:$0xff] %v8357_v15  ;;  %12451 = vst [vmem:[#allocation146_spill] sm:$0xff] %v8359_v14  ;;  %v8397_v31 = vmul.f32 %v12469_v7, %v12469_v7  ;;  %v12471_v43 = vld [vmem:[#allocation24_spill] sm:$0xff]  ;;  %v8405_v53 = vmul.f32 %v12473_v61, %v12473_v61  ;;  %v12475_v60 = vld [vmem:[#allocation7_spill] sm:$0xff] }
 0x201   :  { %12452 = vst [vmem:[#allocation155_spill] sm:$0xff] %v8361_v59  ;;  %12453 = vst [vmem:[#allocation147_spill] sm:$0xff] %v8363_v41  ;;  %v8401_v36 = vmul.f32 %v12471_v43, %v12471_v43  ;;  %v8409_v47 = vmul.f32 %v12475_v60, %v12475_v60  ;;  %v12477_v51 = vld [vmem:[#allocation25_spill] sm:$0xff]  ;;  %v12479_v45 = vld [vmem:[#allocation35_spill] sm:$0xff] }
 0x202   :  { %12455 = vst [vmem:[#allocation156_spill] sm:$0xff] %v8367_v26  ;;  %12456 = vst [vmem:[#allocation148_spill] sm:$0xff] %v8369_v0  ;;  %v8413_v5 = vmul.f32 %v12477_v51, %v12477_v51  ;;  %v8417_v7 = vmul.f32 %v12479_v45, %v12479_v45  ;;  %v12481_v8 = vld [vmem:[#allocation37_spill] sm:$0xff]  ;;  %v12483_v25 = vld [vmem:[#allocation26_spill] sm:$0xff] }
 0x203   :  { %12457 = vst [vmem:[#allocation159_spill] sm:$0xff] %v8371_v22  ;;  %12458 = vst [vmem:[#allocation157_spill] sm:$0xff] %v8373_v63  ;;  %v8421_v43 = vmul.f32 %v12481_v8, %v12481_v8  ;;  %v8425_v61 = vmul.f32 %v12483_v25, %v12483_v25  ;;  %v12485_v4 = vld [vmem:[#allocation10_spill] sm:$0xff]  ;;  %v12487_v27 = vld [vmem:[#allocation13_spill] sm:$0xff] }
 0x204   :  { %12460 = vst [vmem:[#allocation149_spill] sm:$0xff] %v8377_v21  ;;  %12461 = vst [vmem:[#allocation169_spill] sm:$0xff] %v8379_v32  ;;  %v8429_v60 = vmul.f32 %v12485_v4, %v12485_v4  ;;  %v8433_v51 = vmul.f32 %v12487_v27, %v12487_v27  ;;  %v12489_v20 = vld [vmem:[#allocation14_spill] sm:$0xff]  ;;  %v12491_v10 = vld [vmem:[#allocation15_spill] sm:$0xff] }
 0x205   :  { %12462 = vst [vmem:[#allocation170_spill] sm:$0xff] %v8381_v2  ;;  %12464 = vst [vmem:[#allocation171_spill] sm:$0xff] %v8385_v34  ;;  %v8437_v45 = vmul.f32 %v12489_v20, %v12489_v20  ;;  %v8441_v8 = vmul.f32 %v12491_v10, %v12491_v10  ;;  %v12493_v38 = vld [vmem:[#allocation2_spill] sm:$0xff]  ;;  %v12495_v24 = vld [vmem:[#allocation11_spill] sm:$0xff] }
 0x206   :  { %12466 = vst [vmem:[#allocation172_spill] sm:$0xff] %v8389_v13  ;;  %12468 = vst [vmem:[#allocation173_spill] sm:$0xff] %v8393_v56  ;;  %v8445_v25 = vmul.f32 %v12493_v38, %v12493_v38  ;;  %v8449_v4 = vmul.f32 %v12495_v24, %v12495_v24  ;;  %v12497_v18 = vld [vmem:[#allocation47_spill] sm:$0xff]  ;;  %v12499_v2 = vld [vmem:[#allocation57_spill] sm:$0xff] }
 0x207   :  { %12470 = vst [vmem:[#allocation174_spill] sm:$0xff] %v8397_v31  ;;  %12472 = vst [vmem:[#allocation175_spill] sm:$0xff] %v8401_v36  ;;  %v8453_v27 = vmul.f32 %v12497_v18, %v12497_v18  ;;  %v8457_v20 = vmul.f32 %v12499_v2, %v12499_v2  ;;  %v12501_v32 = vld [vmem:[#allocation48_spill] sm:$0xff]  ;;  %v12503_v63 = vld [vmem:[#allocation49_spill] sm:$0xff] }
 0x208   :  { %12474 = vst [vmem:[#allocation176_spill] sm:$0xff] %v8405_v53  ;;  %12476 = vst [vmem:[#allocation177_spill] sm:$0xff] %v8409_v47  ;;  %v8461_v10 = vmul.f32 %v12501_v32, %v12501_v32  ;;  %v8465_v38 = vmul.f32 %v12503_v63, %v12503_v63  ;;  %v12505_v22 = vld [vmem:[#allocation58_spill] sm:$0xff]  ;;  %v4267_v1 = vld [vmem:[%s10829_s0 + $0x8] sm:$0xff] }
 0x209   :  { %12478 = vst [vmem:[#allocation178_spill] sm:$0xff] %v8413_v5  ;;  %12480 = vst [vmem:[#allocation179_spill] sm:$0xff] %v8417_v7  ;;  %v8469_v24 = vmul.f32 %v12505_v22, %v12505_v22  ;;  %v12507_v0 = vld [vmem:[#allocation50_spill] sm:$0xff]  ;;  %v4268_v3 = vld [vmem:[%s10830_s1 + $0x8] sm:$0xff] }
 0x20a   :  { %12482 = vst [vmem:[#allocation180_spill] sm:$0xff] %v8421_v43  ;;  %12484 = vst [vmem:[#allocation181_spill] sm:$0xff] %v8425_v61  ;;  %v8473_v18 = vmul.f32 %v12507_v0, %v12507_v0  ;;  %v4265_v22 = vld [vmem:[%s10829_s0] sm:$0xff]  ;;  %v8553_v17 = vmul.f32 %v4268_v3, %v4267_v1  ;;  %v4269_v14 = vld [vmem:[%s10829_s0 + $0x10] sm:$0xff] }
 0x20b   :  { %12486 = vst [vmem:[#allocation182_spill] sm:$0xff] %v8429_v60  ;;  %12488 = vst [vmem:[#allocation183_spill] sm:$0xff] %v8433_v51  ;;  %v4266_v28 = vld [vmem:[%s10830_s1] sm:$0xff]  ;;  %v4270_v63 = vld [vmem:[%s10830_s1 + $0x10] sm:$0xff] }
 0x20c   :  { %12490 = vst [vmem:[#allocation184_spill] sm:$0xff] %v8437_v45  ;;  %12492 = vst [vmem:[#allocation185_spill] sm:$0xff] %v8441_v8  ;;  %v4272_v32 = vld [vmem:[%s10830_s1 + $0x18] sm:$0xff]  ;;  %v4273_v3 = vld [vmem:[%s10829_s0 + $0x20] sm:$0xff] }
 0x20d   :  { %12494 = vst [vmem:[#allocation186_spill] sm:$0xff] %v8445_v25  ;;  %12496 = vst [vmem:[#allocation187_spill] sm:$0xff] %v8449_v4  ;;  %v4276_v2 = vld [vmem:[%s10830_s1 + $0x28] sm:$0xff]  ;;  %v4278_v0 = vld [vmem:[%s10830_s1 + $0x30] sm:$0xff] }
 0x20e   :  { %12498 = vst [vmem:[#allocation188_spill] sm:$0xff] %v8453_v27  ;;  %12500 = vst [vmem:[#allocation189_spill] sm:$0xff] %v8457_v20  ;;  %v4274_v20 = vld [vmem:[%s10830_s1 + $0x20] sm:$0xff]  ;;  %v4280_v41 = vld [vmem:[%s10830_s1 + $0x38] sm:$0xff] }
 0x20f   :  { %12502 = vst [vmem:[#allocation190_spill] sm:$0xff] %v8461_v10  ;;  %12504 = vst [vmem:[#allocation191_spill] sm:$0xff] %v8465_v38  ;;  %v4282_v59 = vld [vmem:[%s10830_s1 + $0x40] sm:$0xff]  ;;  %v4284_v42 = vld [vmem:[%s10830_s1 + $0x48] sm:$0xff] }
 0x210   :  { %12506 = vst [vmem:[#allocation192_spill] sm:$0xff] %v8469_v24  ;;  %12508 = vst [vmem:[#allocation193_spill] sm:$0xff] %v8473_v18  ;;  %v8545_v24 = vmul.f32 %v4266_v28, %v4265_v22  ;;  %v8561_v28 = vmul.f32 %v4270_v63, %v4269_v14  ;;  %v4271_v22 = vld [vmem:[%s10829_s0 + $0x18] sm:$0xff]  ;;  %v8577_v14 = vmul.f32 %v4274_v20, %v4273_v3  ;;  %v4275_v63 = vld [vmem:[%s10829_s0 + $0x28] sm:$0xff] }
 0x211   :  { %v8569_v1 = vmul.f32 %v4272_v32, %v4271_v22  ;;  %v8585_v32 = vmul.f32 %v4276_v2, %v4275_v63  ;;  %v4277_v22 = vld [vmem:[%s10829_s0 + $0x30] sm:$0xff]  ;;  %v4279_v3 = vld [vmem:[%s10829_s0 + $0x38] sm:$0xff]  ;;  %v4281_v63 = vld [vmem:[%s10829_s0 + $0x40] sm:$0xff] }
 0x212   :  { %v8593_v20 = vmul.f32 %v4278_v0, %v4277_v22  ;;  %v8601_v2 = vmul.f32 %v4280_v41, %v4279_v3  ;;  %v8609_v0 = vmul.f32 %v4282_v59, %v4281_v63  ;;  %v4283_v22 = vld [vmem:[%s10829_s0 + $0x48] sm:$0xff]  ;;  %v4285_v3 = vld [vmem:[%s10829_s0 + $0x50] sm:$0xff]  ;;  %v4287_v63 = vld [vmem:[%s10829_s0 + $0x58] sm:$0xff]  ;;  %v2856_v4 = vadd.f32 %v8577_v14, %v8561_v28 }
 0x213   :  { %v8617_v41 = vmul.f32 %v4284_v42, %v4283_v22  ;;  %v4286_v52 = vld [vmem:[%s10830_s1 + $0x50] sm:$0xff]  ;;  %v4288_v23 = vld [vmem:[%s10830_s1 + $0x58] sm:$0xff]  ;;  %v4289_v22 = vld [vmem:[%s10829_s0 + $0x60] sm:$0xff] }
 0x214   :  { %v8625_v59 = vmul.f32 %v4286_v52, %v4285_v3  ;;  %v8633_v42 = vmul.f32 %v4288_v23, %v4287_v63  ;;  %v4290_v58 = vld [vmem:[%s10830_s1 + $0x60] sm:$0xff]  ;;  %v4291_v3 = vld [vmem:[%s10829_s0 + $0x68] sm:$0xff]  ;;  %v4293_v63 = vld [vmem:[%s10829_s0 + $0x70] sm:$0xff]  ;;  %v2859_v25 = vadd.f32 %v8601_v2, %v8585_v32 }
 0x215   :  { %v8641_v52 = vmul.f32 %v4290_v58, %v4289_v22  ;;  %v4292_v57 = vld [vmem:[%s10830_s1 + $0x68] sm:$0xff]  ;;  %v4294_v12 = vld [vmem:[%s10830_s1 + $0x70] sm:$0xff]  ;;  %v4295_v22 = vld [vmem:[%s10829_s0 + $0x78] sm:$0xff] }
 0x216   :  { %v8649_v23 = vmul.f32 %v4292_v57, %v4291_v3  ;;  %v8657_v58 = vmul.f32 %v4294_v12, %v4293_v63  ;;  %v4296_v55 = vld [vmem:[%s10830_s1 + $0x78] sm:$0xff]  ;;  %v4297_v3 = vld [vmem:[%s10829_s0 + $0x80] sm:$0xff]  ;;  %v4299_v63 = vld [vmem:[%s10829_s0 + $0x88] sm:$0xff] }
 0x217   :  { %v8665_v57 = vmul.f32 %v4296_v55, %v4295_v22  ;;  %v4298_v40 = vld [vmem:[%s10830_s1 + $0x80] sm:$0xff]  ;;  %v4300_v37 = vld [vmem:[%s10830_s1 + $0x88] sm:$0xff]  ;;  %v4301_v22 = vld [vmem:[%s10829_s0 + $0x90] sm:$0xff]  ;;  %v2864_v8 = vadd.f32 %v8641_v52, %v8625_v59 }
 0x218   :  { %v8673_v12 = vmul.f32 %v4298_v40, %v4297_v3  ;;  %v8681_v55 = vmul.f32 %v4300_v37, %v4299_v63  ;;  %v4302_v16 = vld [vmem:[%s10830_s1 + $0x90] sm:$0xff]  ;;  %v4303_v3 = vld [vmem:[%s10829_s0 + $0x98] sm:$0xff]  ;;  %v4305_v63 = vld [vmem:[%s10829_s0 + $0xa0] sm:$0xff]  ;;  %v2865_v45 = vadd.f32 %v8649_v23, %v8633_v42  ;;  %v2866_v51 = vadd.f32 %v8657_v58, %v8641_v52 }
 0x219   :  { %v8689_v40 = vmul.f32 %v4302_v16, %v4301_v22  ;;  %v4304_v19 = vld [vmem:[%s10830_s1 + $0x98] sm:$0xff]  ;;  %v4306_v62 = vld [vmem:[%s10830_s1 + $0xa0] sm:$0xff]  ;;  %v4307_v22 = vld [vmem:[%s10829_s0 + $0xa8] sm:$0xff]  ;;  %v2867_v60 = vadd.f32 %v8665_v57, %v8649_v23 }
 0x21a   :  { %v8697_v37 = vmul.f32 %v4304_v19, %v4303_v3  ;;  %v8705_v16 = vmul.f32 %v4306_v62, %v4305_v63  ;;  %v4308_v39 = vld [vmem:[%s10830_s1 + $0xa8] sm:$0xff]  ;;  %v4309_v3 = vld [vmem:[%s10829_s0 + $0xb0] sm:$0xff]  ;;  %v4311_v63 = vld [vmem:[%s10829_s0 + $0xb8] sm:$0xff]  ;;  %v2868_v61 = vadd.f32 %v8673_v12, %v8657_v58  ;;  %v2869_v43 = vadd.f32 %v8681_v55, %v8665_v57 }
 0x21b   :  { %v8713_v19 = vmul.f32 %v4308_v39, %v4307_v22  ;;  %v4310_v35 = vld [vmem:[%s10830_s1 + $0xb0] sm:$0xff]  ;;  %v4312_v49 = vld [vmem:[%s10830_s1 + $0xb8] sm:$0xff]  ;;  %v4313_v22 = vld [vmem:[%s10829_s0 + $0xc0] sm:$0xff]  ;;  %v2870_v7 = vadd.f32 %v8689_v40, %v8673_v12 }
 0x21c   :  { %v8721_v62 = vmul.f32 %v4310_v35, %v4309_v3  ;;  %v8729_v39 = vmul.f32 %v4312_v49, %v4311_v63  ;;  %v4314_v29 = vld [vmem:[%s10830_s1 + $0xc0] sm:$0xff]  ;;  %v4315_v3 = vld [vmem:[%s10829_s0 + $0xc8] sm:$0xff]  ;;  %v4317_v63 = vld [vmem:[%s10829_s0 + $0xd0] sm:$0xff]  ;;  %v2871_v5 = vadd.f32 %v8697_v37, %v8681_v55  ;;  %v2872_v47 = vadd.f32 %v8705_v16, %v8689_v40 }
 0x21d   :  { %v8737_v35 = vmul.f32 %v4314_v29, %v4313_v22  ;;  %v4316_v50 = vld [vmem:[%s10830_s1 + $0xc8] sm:$0xff]  ;;  %v4318_v54 = vld [vmem:[%s10830_s1 + $0xd0] sm:$0xff]  ;;  %v4319_v22 = vld [vmem:[%s10829_s0 + $0xd8] sm:$0xff]  ;;  %v2873_v53 = vadd.f32 %v8713_v19, %v8697_v37 }
 0x21e   :  { %v8745_v49 = vmul.f32 %v4316_v50, %v4315_v3  ;;  %v8753_v29 = vmul.f32 %v4318_v54, %v4317_v63  ;;  %v4320_v18 = vld [vmem:[%s10830_s1 + $0xd8] sm:$0xff]  ;;  %v4321_v3 = vld [vmem:[%s10829_s0 + $0xe0] sm:$0xff]  ;;  %v4323_v63 = vld [vmem:[%s10829_s0 + $0xe8] sm:$0xff]  ;;  %v2874_v36 = vadd.f32 %v8721_v62, %v8705_v16  ;;  %v2875_v31 = vadd.f32 %v8729_v39, %v8713_v19 }
 0x21f   :  { %v8761_v50 = vmul.f32 %v4320_v18, %v4319_v22  ;;  %v4322_v9 = vld [vmem:[%s10830_s1 + $0xe0] sm:$0xff]  ;;  %v4324_v38 = vld [vmem:[%s10830_s1 + $0xe8] sm:$0xff]  ;;  %v4325_v22 = vld [vmem:[%s10829_s0 + $0xf0] sm:$0xff]  ;;  %v2876_v56 = vadd.f32 %v8737_v35, %v8721_v62 }
 0x220   :  { %12516 = vst [vmem:[#allocation194_spill] sm:$0xff] %v8753_v29  ;;  %v8769_v54 = vmul.f32 %v4322_v9, %v4321_v3  ;;  %v8777_v18 = vmul.f32 %v4324_v38, %v4323_v63  ;;  %v4326_v10 = vld [vmem:[%s10830_s1 + $0xf0] sm:$0xff]  ;;  %v4327_v3 = vld [vmem:[%s10829_s0 + $0xf8] sm:$0xff]  ;;  %v2854_v38 = vadd.f32 %v8561_v28, %v8545_v24  ;;  %v2855_v63 = vadd.f32 %v8569_v1, %v8553_v17 }
 0x221   :  { %12517 = vst [vmem:[#allocation195_spill] sm:$0xff] %v8761_v50  ;;  %v2852_v9 = vmul.f32 %v4326_v10, %v4325_v22  ;;  %v4328_v6 = vld [vmem:[%s10830_s1 + $0xf8] sm:$0xff]  ;;  %v2857_v10 = vadd.f32 %v8585_v32, %v8569_v1  ;;  %v2858_v22 = vadd.f32 %v8593_v20, %v8577_v14  ;;  %v2861_v24 = vadd.f32 %v8617_v41, %v8601_v2 }
 0x222   :  { %12518 = vst [vmem:[#allocation196_spill] sm:$0xff] %v8777_v18  ;;  %v2853_v27 = vmul.f32 %v4328_v6, %v4327_v3  ;;  %v2860_v6 = vadd.f32 %v8609_v0, %v8593_v20  ;;  %v2862_v17 = vadd.f32 %v8625_v59, %v8609_v0  ;;  %v2863_v3 = vadd.f32 %v8633_v42, %v8617_v41 }
 0x223   :  { %v2877_v13 = vadd.f32 %v8745_v49, %v8729_v39  ;;  %v2878_v34 = vadd.f32 %v8753_v29, %v8737_v35  ;;  %v2879_v21 = vadd.f32 %v8761_v50, %v8745_v49  ;;  %v2880_v26 = vadd.f32 %v8769_v54, %v8753_v29 }
 0x224   :  { %v2881_v15 = vadd.f32 %v8777_v18, %v8761_v50  ;;  %v2882_v30 = vadd.f32 %v2852_v9, %v8769_v54  ;;  %v2883_v11 = vadd.f32 %v2853_v27, %v8777_v18  ;;  %v8850_v33 = vadd.f32 %v2854_v38, %v8561_v28 }
 0x225   :  { %v8853_v46 = vadd.f32 %v2855_v63, %v8569_v1  ;;  %v8856_v44 = vadd.f32 %v2854_v38, %v8577_v14  ;;  %v8859_v48 = vadd.f32 %v2855_v63, %v8585_v32  ;;  %v8862_v29 = vadd.f32 %v2856_v4, %v8593_v20 }
 0x226   :  { %v8865_v50 = vadd.f32 %v2857_v10, %v8601_v2  ;;  %v8868_v18 = vadd.f32 %v2858_v22, %v8609_v0  ;;  %v8871_v28 = vadd.f32 %v2859_v25, %v8617_v41  ;;  %v8874_v1 = vadd.f32 %v2860_v6, %v8625_v59 }
 0x227   :  { %v8877_v14 = vadd.f32 %v2861_v24, %v8633_v42  ;;  %v8880_v32 = vadd.f32 %v2862_v17, %v8641_v52  ;;  %v8883_v4 = vadd.f32 %v2863_v3, %v8649_v23  ;;  %v8886_v20 = vadd.f32 %v2864_v8, %v8657_v58 }
 0x228   :  { %v8889_v2 = vadd.f32 %v2865_v45, %v8665_v57  ;;  %v8892_v25 = vadd.f32 %v2866_v51, %v8673_v12  ;;  %v8895_v0 = vadd.f32 %v2867_v60, %v8681_v55  ;;  %v8898_v41 = vadd.f32 %v2868_v61, %v8689_v40 }
 0x229   :  { %v8901_v59 = vadd.f32 %v2869_v43, %v8697_v37  ;;  %v8904_v42 = vadd.f32 %v2870_v7, %v8705_v16  ;;  %v8907_v8 = vadd.f32 %v2871_v5, %v8713_v19  ;;  %v8910_v45 = vadd.f32 %v2872_v47, %v8721_v62  ;;  %v12524_v43 = vld [vmem:[#allocation194_spill] sm:$0xff]  ;;  %v12525_v7 = vld [vmem:[#allocation195_spill] sm:$0xff]  ;;  %v12527_v47 = vld [vmem:[#allocation196_spill] sm:$0xff] }
 0x22a   :  { %12519 = vst [vmem:[#allocation197_spill] sm:$0xff] %v8895_v0  ;;  %v8913_v51 = vadd.f32 %v2873_v53, %v8729_v39  ;;  %v8916_v60 = vadd.f32 %v2874_v36, %v8737_v35  ;;  %v8919_v61 = vadd.f32 %v2875_v31, %v8745_v49  ;;  %v8922_v52 = vadd.f32 %v2876_v56, %v12524_v43 }
 0x22b   :  { %12520 = vst [vmem:[#allocation198_spill] sm:$0xff] %v8901_v59  ;;  %12521 = vst [vmem:[#allocation199_spill] sm:$0xff] %v8907_v8  ;;  %v8925_v23 = vadd.f32 %v2877_v13, %v12525_v7  ;;  %v8928_v5 = vadd.f32 %v2878_v34, %v8769_v54  ;;  %v8931_v58 = vadd.f32 %v2879_v21, %v12527_v47  ;;  %v11386_v55 = vrot.slane %v8859_v48, 7 }
 0x22c   :  { %12522 = vst [vmem:[#allocation200_spill] sm:$0xff] %v8913_v51  ;;  %12523 = vst [vmem:[#allocation201_spill] sm:$0xff] %v8919_v61  ;;  %v8933_v53 = vadd.f32 %v2880_v26, %v2852_v9  ;;  %v8935_v57 = vadd.f32 %v2881_v15, %v2853_v27  ;;  %v8938_v36 = vadd.f32 %v2882_v30, %v8769_v54  ;;  %v11391_v30 = vrot.slane %v8850_v33, 7 }
 0x22d   :  { %12526 = vst [vmem:[#allocation194_spill] sm:$0xff] %v8925_v23  ;;  %12528 = vst [vmem:[#allocation195_spill] sm:$0xff] %v8931_v58  ;;  %v8941_v31 = vadd.f32 %v2883_v11, %v12527_v47  ;;  %v11387_v15 = vrot.slane %v8853_v46, 7  ;;  %v11390_v11 = vrot.slane %v8856_v44, 7  ;;  %v11389_v40 = vrot.slane %v8862_v29, 7 }
 0x22e   :  { %12529 = vst [vmem:[#allocation196_spill] sm:$0xff] %v8935_v57  ;;  %v11388_v37 = vrot.slane %v8865_v50, 7  ;;  %v2989_v10 = vrot.slane %v8868_v18, 7  ;;  %v11392_v22 = vrot.slane %v8871_v28, 7  ;;  %v2992_v17 = vrot.slane %v8874_v1, 7 }
 0x22f   :  { %12530 = vst [vmem:[#allocation202_spill] sm:$0xff] %v8941_v31  ;;  %v8970_v63 = vsel %vm201_vm0, %v11391_v30, %v11387_v15  ;;  %v8979_v6 = vsel %vm201_vm0, %v11390_v11, %v11386_v55  ;;  %v11393_v3 = vrot.slane %v8877_v14, 7  ;;  %v2995_v43 = vrot.slane %v8880_v32, 7 }
 0x230   :  { %v8986_v24 = vsel %vm201_vm0, %v11389_v40, %v11388_v37  ;;  %v11394_v7 = vrot.slane %v8883_v4, 7  ;;  %v2998_v47 = vrot.slane %v8886_v20, 7  ;;  %v11395_v38 = vrot.slane %v8889_v2, 7 }
 0x231   :  { %12531 = vst [vmem:[#allocation203_spill] sm:$0xff] %v8986_v24  ;;  %v3001_v55 = vrot.slane %v8892_v25, 7  ;;  %v11396_v15 = vrot.slane %v8895_v0, 7  ;;  %v3004_v9 = vrot.slane %v8898_v41, 7  ;;  %v11397_v37 = vrot.slane %v8901_v59, 7 }
 0x232   :  { %v3007_v54 = vrot.slane %v8904_v42, 7  ;;  %v11398_v49 = vrot.slane %v8907_v8, 7  ;;  %v3010_v35 = vrot.slane %v8910_v45, 7  ;;  %v11399_v39 = vrot.slane %v8913_v51, 7 }
 0x233   :  { %v3013_v62 = vrot.slane %v8916_v60, 7  ;;  %v11401_v19 = vrot.slane %v8919_v61, 7  ;;  %v3016_v16 = vrot.slane %v8922_v52, 7  ;;  %v11404_v27 = vrot.slane %v8925_v23, 7 }
 0x234   :  { %v3019_v26 = vrot.slane %v8928_v5, 7  ;;  %v11406_v21 = vrot.slane %v8931_v58, 7  ;;  %v3022_v12 = vrot.slane %v8933_v53, 7  ;;  %v9013_v40 = vsel %vm201_vm0, %v2989_v10, %v11392_v22 }
 0x235   :  { %12532 = vst [vmem:[#allocation204_spill] sm:$0xff] %v9013_v40  ;;  %v9018_v13 = vsel %vm201_vm0, %v2992_v17, %v11393_v3  ;;  %v3025_v11 = vrot.slane %v8938_v36, 7  ;;  %v9025_v30 = vsel %vm201_vm0, %v2995_v43, %v11394_v7  ;;  %v9030_v34 = vsel %vm201_vm0, %v2998_v47, %v11395_v38 }
 0x236   :  { %12533 = vst [vmem:[#allocation205_spill] sm:$0xff] %v9018_v13  ;;  %12534 = vst [vmem:[#allocation206_spill] sm:$0xff] %v9025_v30  ;;  %v9035_v22 = vsel %vm201_vm0, %v3001_v55, %v11396_v15  ;;  %v9040_v3 = vsel %vm201_vm0, %v3004_v9, %v11397_v37  ;;  %v9045_v7 = vsel %vm201_vm0, %v3007_v54, %v11398_v49  ;;  %v12543_v56 = vrot.slane %v8935_v57, 7 }
 0x237   :  { %12535 = vst [vmem:[#allocation207_spill] sm:$0xff] %v9030_v34  ;;  %12536 = vst [vmem:[#allocation208_spill] sm:$0xff] %v9035_v22  ;;  %v9050_v38 = vsel %vm201_vm0, %v3010_v35, %v11399_v39  ;;  %v9055_v15 = vsel %vm201_vm0, %v3013_v62, %v11401_v19  ;;  %v9060_v37 = vsel %vm201_vm0, %v3016_v16, %v11404_v27  ;;  %v3077_v19 = vrot.slane %v8859_v48, 5 }
 0x238   :  { %12537 = vst [vmem:[#allocation209_spill] sm:$0xff] %v9040_v3  ;;  %12538 = vst [vmem:[#allocation210_spill] sm:$0xff] %v9045_v7  ;;  %v9065_v49 = vsel %vm201_vm0, %v3019_v26, %v11406_v21  ;;  %v9070_v39 = vsel %vm201_vm0, %v3022_v12, %v12543_v56  ;;  %v3078_v27 = vrot.slane %v8865_v50, 5  ;;  %v3080_v21 = vrot.slane %v8877_v14, 5 }
 0x239   :  { %12539 = vst [vmem:[#allocation211_spill] sm:$0xff] %v9050_v38  ;;  %12540 = vst [vmem:[#allocation212_spill] sm:$0xff] %v9055_v15  ;;  %v3076_v38 = vrot.slane %v8853_v46, 5  ;;  %v12545_v15 = vrot.slane %v8941_v31, 7  ;;  %v3082_v56 = vrot.slane %v8889_v2, 5  ;;  %v3084_v3 = vrot.slane %v8901_v59, 5 }
 0x23a   :  { %12541 = vst [vmem:[#allocation213_spill] sm:$0xff] %v9060_v37  ;;  %12542 = vst [vmem:[#allocation214_spill] sm:$0xff] %v9065_v49  ;;  %v3079_v37 = vrot.slane %v8871_v28, 5  ;;  %v3081_v49 = vrot.slane %v8883_v4, 5  ;;  %v3085_v22 = vrot.slane %v8907_v8, 5  ;;  %v3086_v34 = vrot.slane %v8913_v51, 5 }
 0x23b   :  { %12544 = vst [vmem:[#allocation215_spill] sm:$0xff] %v9070_v39  ;;  %v9077_v7 = vsel %vm201_vm0, %v3025_v11, %v12545_v15  ;;  %v3083_v39 = vrot.slane %v8895_v0, 5  ;;  %v3087_v15 = vrot.slane %v8919_v61, 5  ;;  %v3089_v30 = vrot.slane %v8931_v58, 5 }
 0x23c   :  { %12546 = vst [vmem:[#allocation216_spill] sm:$0xff] %v9077_v7  ;;  %v3088_v7 = vrot.slane %v8925_v23, 5  ;;  %v3090_v13 = vrot.slane %v8935_v57, 5  ;;  %v3091_v40 = vrot.slane %v8941_v31, 5  ;;  %v12547_v24 = vrot.slane %v8850_v33, 7 }
 0x23d   :  { %v12548_v0 = vrot.slane %v8850_v33, 1  ;;  %v12549_v8 = vrot.slane %v8856_v44, 7  ;;  %v12550_v51 = vrot.slane %v8856_v44, 1  ;;  %v12551_v58 = vrot.slane %v8862_v29, 7 }
 0x23e   :  { %v12552_v57 = vrot.slane %v8862_v29, 1  ;;  %v12553_v23 = vrot.slane %v8868_v18, 1  ;;  %v12555_v44 = vrot.slane %v8880_v32, 1  ;;  %v12556_v29 = vrot.slane %v8886_v20, 1 }
 0x23f   :  { %v9098_v59 = vsel %vm201_vm0, %v12548_v0, %v12547_v24  ;;  %v9105_v61 = vsel %vm201_vm0, %v12550_v51, %v12549_v8  ;;  %v12554_v0 = vrot.slane %v8874_v1, 1  ;;  %v12557_v18 = vrot.slane %v8892_v25, 1 }
 0x240   :  { %v9112_v31 = vsel %vm201_vm0, %v12552_v57, %v12551_v58  ;;  %v9117_v33 = vsel %vm201_vm0, %v12553_v23, %v2989_v10  ;;  %v9127_v8 = vsel %vm201_vm0, %v12555_v44, %v2995_v43  ;;  %v9132_v51 = vsel %vm201_vm0, %v12556_v29, %v2998_v47  ;;  %v12588_v43 = vld [vmem:[#allocation197_spill] sm:$0xff]  ;;  %v12594_v44 = vld [vmem:[#allocation199_spill] sm:$0xff] }
 0x241   :  { %v9122_v24 = vsel %vm201_vm0, %v12554_v0, %v2992_v17  ;;  %v9137_v23 = vsel %vm201_vm0, %v12557_v18, %v3001_v55  ;;  %v12559_v1 = vrot.slane %v8898_v41, 1  ;;  %v12561_v32 = vrot.slane %v8904_v42, 1 }
 0x242   :  { %12558 = vst [vmem:[#allocation217_spill] sm:$0xff] %v9137_v23  ;;  %v12563_v20 = vrot.slane %v8910_v45, 1  ;;  %v12565_v25 = vrot.slane %v8916_v60, 1  ;;  %v12567_v41 = vrot.slane %v8922_v52, 1  ;;  %v12569_v42 = vrot.slane %v8928_v5, 1 }
 0x243   :  { %v9142_v58 = vsel %vm201_vm0, %v12559_v1, %v3004_v9  ;;  %v9147_v57 = vsel %vm201_vm0, %v12561_v32, %v3007_v54  ;;  %v12571_v45 = vrot.slane %v8933_v53, 1  ;;  %v12573_v60 = vrot.slane %v8853_v46, 7  ;;  %v12597_v1 = vld [vmem:[#allocation200_spill] sm:$0xff] }
 0x244   :  { %12560 = vst [vmem:[#allocation218_spill] sm:$0xff] %v9142_v58  ;;  %12562 = vst [vmem:[#allocation219_spill] sm:$0xff] %v9147_v57  ;;  %v9152_v10 = vsel %vm201_vm0, %v12563_v20, %v3010_v35  ;;  %v9157_v55 = vsel %vm201_vm0, %v12565_v25, %v3013_v62  ;;  %v9162_v9 = vsel %vm201_vm0, %v12567_v41, %v3016_v16  ;;  %v12575_v52 = vrot.slane %v8859_v48, 7  ;;  %v12600_v25 = vld [vmem:[#allocation201_spill] sm:$0xff] }
 0x245   :  { %12564 = vst [vmem:[#allocation220_spill] sm:$0xff] %v9152_v10  ;;  %12566 = vst [vmem:[#allocation221_spill] sm:$0xff] %v9157_v55  ;;  %v9167_v54 = vsel %vm201_vm0, %v12569_v42, %v3019_v26  ;;  %v9172_v35 = vsel %vm201_vm0, %v12571_v45, %v3022_v12  ;;  %v9177_v62 = vsel %vm201_vm0, %v12573_v60, %v3076_v38  ;;  %v12577_v5 = vrot.slane %v8938_v36, 1  ;;  %v12603_v42 = vld [vmem:[#allocation194_spill] sm:$0xff]  ;;  %v12606_v60 = vld [vmem:[#allocation195_spill] sm:$0xff] }
 0x246   :  { %12568 = vst [vmem:[#allocation222_spill] sm:$0xff] %v9162_v9  ;;  %12570 = vst [vmem:[#allocation223_spill] sm:$0xff] %v9167_v54  ;;  %v9182_v16 = vsel %vm201_vm0, %v12575_v52, %v3077_v19  ;;  %v12578_v53 = vrot.slane %v8865_v50, 7  ;;  %v12580_v46 = vrot.slane %v8871_v28, 7  ;;  %v12582_v48 = vrot.slane %v8877_v14, 7 }
 0x247   :  { %12572 = vst [vmem:[#allocation224_spill] sm:$0xff] %v9172_v35  ;;  %12574 = vst [vmem:[#allocation225_spill] sm:$0xff] %v9177_v62  ;;  %v9187_v26 = vsel %vm201_vm0, %v12577_v5, %v3025_v11  ;;  %v12584_v36 = vrot.slane %v8883_v4, 7  ;;  %v12586_v50 = vrot.slane %v8889_v2, 7  ;;  %v3172_v28 = vrot.slane %v9098_v59, 1  ;;  %v12591_v2 = vld [vmem:[#allocation198_spill] sm:$0xff] }
 0x248   :  { %12576 = vst [vmem:[#allocation226_spill] sm:$0xff] %v9182_v16  ;;  %v9192_v12 = vsel %vm201_vm0, %v12578_v53, %v3078_v27  ;;  %v9197_v38 = vsel %vm201_vm0, %v12580_v46, %v3079_v37  ;;  %v9202_v19 = vsel %vm201_vm0, %v12582_v48, %v3080_v21  ;;  %v3173_v37 = vrot.slane %v8970_v63, 1  ;;  %v12609_v5 = vld [vmem:[#allocation196_spill] sm:$0xff]  ;;  %v12612_v46 = vld [vmem:[#allocation202_spill] sm:$0xff] }
 0x249   :  { %12579 = vst [vmem:[#allocation227_spill] sm:$0xff] %v9192_v12  ;;  %12581 = vst [vmem:[#allocation228_spill] sm:$0xff] %v9197_v38  ;;  %v9207_v11 = vsel %vm201_vm0, %v12584_v36, %v3081_v49  ;;  %v9212_v27 = vsel %vm201_vm0, %v12586_v50, %v3082_v56  ;;  %v3175_v17 = vrot.slane %v9177_v62, 1  ;;  %v3177_v14 = vrot.slane %v9105_v61, 1  ;;  %v12615_v50 = vld [vmem:[#allocation203_spill] sm:$0xff] }
 0x24a   :  { %12583 = vst [vmem:[#allocation229_spill] sm:$0xff] %v9202_v19  ;;  %12585 = vst [vmem:[#allocation230_spill] sm:$0xff] %v9207_v11  ;;  %v3178_v21 = vrot.slane %v8979_v6, 1  ;;  %v3180_v4 = vrot.slane %v9182_v16, 1  ;;  %v12589_v49 = vrot.slane %v12588_v43, 7  ;;  %v12592_v56 = vrot.slane %v12591_v2, 7 }
 0x24b   :  { %12587 = vst [vmem:[#allocation231_spill] sm:$0xff] %v9212_v27  ;;  %v12595_v29 = vrot.slane %v12594_v44, 7  ;;  %v12598_v32 = vrot.slane %v12597_v1, 7  ;;  %v12601_v41 = vrot.slane %v12600_v25, 7  ;;  %v12604_v45 = vrot.slane %v12603_v42, 7  ;;  %v12617_v1 = vld [vmem:[#allocation205_spill] sm:$0xff] }
 0x24c   :  { %v9223_v47 = vsel %vm201_vm0, %v12589_v49, %v3083_v39  ;;  %v9228_v0 = vsel %vm201_vm0, %v12592_v56, %v3084_v3  ;;  %v12607_v52 = vrot.slane %v12606_v60, 7  ;;  %v12610_v53 = vrot.slane %v12609_v5, 7  ;;  %v12616_v56 = vld [vmem:[#allocation204_spill] sm:$0xff] }
 0x24d   :  { %12590 = vst [vmem:[#allocation197_spill] sm:$0xff] %v9223_v47  ;;  %12593 = vst [vmem:[#allocation198_spill] sm:$0xff] %v9228_v0  ;;  %v9233_v18 = vsel %vm201_vm0, %v12595_v29, %v3085_v22  ;;  %v9238_v20 = vsel %vm201_vm0, %v12598_v32, %v3086_v34  ;;  %v9243_v39 = vsel %vm201_vm0, %v12601_v41, %v3087_v15  ;;  %v12613_v48 = vrot.slane %v12612_v46, 7  ;;  %v12619_v41 = vld [vmem:[#allocation207_spill] sm:$0xff]  ;;  %v12620_v5 = vld [vmem:[#allocation208_spill] sm:$0xff] }
 0x24e   :  { %12596 = vst [vmem:[#allocation199_spill] sm:$0xff] %v9233_v18  ;;  %12599 = vst [vmem:[#allocation200_spill] sm:$0xff] %v9238_v20  ;;  %v9248_v3 = vsel %vm201_vm0, %v12604_v45, %v3088_v7  ;;  %v9253_v22 = vsel %vm201_vm0, %v12607_v52, %v3089_v30  ;;  %v9258_v34 = vsel %vm201_vm0, %v12610_v53, %v3090_v13  ;;  %v3182_v7 = vrot.slane %v9112_v31, 1 }
 0x24f   :  { %12602 = vst [vmem:[#allocation201_spill] sm:$0xff] %v9243_v39  ;;  %12605 = vst [vmem:[#allocation194_spill] sm:$0xff] %v9248_v3  ;;  %v9263_v15 = vsel %vm201_vm0, %v12613_v48, %v3091_v40  ;;  %v9266_v36 = vsel %vm394_vm1, %v3172_v28, %v3173_v37  ;;  %v3183_v43 = vrot.slane %v12615_v50, 1  ;;  %v9271_v30 = vsel %vm394_vm1, %v3173_v37, %v3175_v17 }
 0x250   :  { %12608 = vst [vmem:[#allocation195_spill] sm:$0xff] %v9253_v22  ;;  %12611 = vst [vmem:[#allocation196_spill] sm:$0xff] %v9258_v34  ;;  %v9274_v49 = vsel %vm394_vm1, %v3177_v14, %v3178_v21  ;;  %v9277_v13 = vsel %vm394_vm1, %v3178_v21, %v3180_v4  ;;  %v3185_v2 = vrot.slane %v9192_v12, 1  ;;  %v3187_v40 = vrot.slane %v9117_v33, 1  ;;  %v12618_v14 = vld [vmem:[#allocation206_spill] sm:$0xff] }
 0x251   :  { %12614 = vst [vmem:[#allocation202_spill] sm:$0xff] %v9263_v15  ;;  %v3188_v28 = vrot.slane %v12616_v56, 1  ;;  %v3190_v44 = vrot.slane %v9197_v38, 1  ;;  %v3192_v29 = vrot.slane %v9122_v24, 1  ;;  %v3193_v32 = vrot.slane %v12617_v1, 1  ;;  %v12621_v38 = vld [vmem:[#allocation209_spill] sm:$0xff] }
 0x252   :  { %v3195_v37 = vrot.slane %v9202_v19, 1  ;;  %v3197_v17 = vrot.slane %v9127_v8, 1  ;;  %v3198_v25 = vrot.slane %v12618_v14, 1  ;;  %v3200_v21 = vrot.slane %v9207_v11, 1 }
 0x253   :  { %v3202_v4 = vrot.slane %v9132_v51, 1  ;;  %v3203_v42 = vrot.slane %v12619_v41, 1  ;;  %v3205_v45 = vrot.slane %v9212_v27, 1  ;;  %v3184_v60 = vsel %vm394_vm1, %v3182_v7, %v3183_v43 }
 0x254   :  { %v3207_v52 = vrot.slane %v9137_v23, 1  ;;  %v3208_v53 = vrot.slane %v12620_v5, 1  ;;  %v3210_v46 = vrot.slane %v9223_v47, 1  ;;  %v3186_v48 = vsel %vm394_vm1, %v3183_v43, %v3185_v2  ;;  %v12628_v23 = vld [vmem:[#allocation216_spill] sm:$0xff] }
 0x255   :  { %v3189_v19 = vsel %vm394_vm1, %v3187_v40, %v3188_v28  ;;  %v3212_v11 = vrot.slane %v9142_v58, 1  ;;  %v3213_v12 = vrot.slane %v12621_v38, 1  ;;  %v3191_v16 = vsel %vm394_vm1, %v3188_v28, %v3190_v44  ;;  %v12622_v44 = vld [vmem:[#allocation210_spill] sm:$0xff]  ;;  %v12627_v58 = vld [vmem:[#allocation215_spill] sm:$0xff] }
 0x256   :  { %v3194_v27 = vsel %vm394_vm1, %v3192_v29, %v3193_v32  ;;  %v3196_v7 = vsel %vm394_vm1, %v3193_v32, %v3195_v37  ;;  %v3199_v62 = vsel %vm394_vm1, %v3197_v17, %v3198_v25  ;;  %v3201_v5 = vsel %vm394_vm1, %v3198_v25, %v3200_v21  ;;  %v12623_v25 = vld [vmem:[#allocation211_spill] sm:$0xff] }
 0x257   :  { %v3204_v47 = vsel %vm394_vm1, %v3202_v4, %v3203_v42  ;;  %v3206_v43 = vsel %vm394_vm1, %v3203_v42, %v3205_v45  ;;  %v3215_v2 = vrot.slane %v9228_v0, 1  ;;  %v3209_v40 = vsel %vm394_vm1, %v3207_v52, %v3208_v53  ;;  %v12624_v45 = vld [vmem:[#allocation212_spill] sm:$0xff]  ;;  %v12625_v0 = vld [vmem:[#allocation213_spill] sm:$0xff] }
 0x258   :  { %v3211_v38 = vsel %vm394_vm1, %v3208_v53, %v3210_v46  ;;  %v3217_v28 = vrot.slane %v9147_v57, 1  ;;  %v3218_v29 = vrot.slane %v12622_v44, 1  ;;  %v3214_v32 = vsel %vm394_vm1, %v3212_v11, %v3213_v12  ;;  %v12626_v57 = vld [vmem:[#allocation214_spill] sm:$0xff] }
 0x259   :  { %v3220_v37 = vrot.slane %v9233_v18, 1  ;;  %v3222_v17 = vrot.slane %v9152_v10, 1  ;;  %v3223_v21 = vrot.slane %v12623_v25, 1  ;;  %v3225_v4 = vrot.slane %v9238_v20, 1 }
 0x25a   :  { %v3227_v42 = vrot.slane %v9157_v55, 1  ;;  %v3228_v52 = vrot.slane %v12624_v45, 1  ;;  %v3230_v53 = vrot.slane %v9243_v39, 1  ;;  %v3232_v46 = vrot.slane %v9162_v9, 1 }
 0x25b   :  { %v3233_v44 = vrot.slane %v12625_v0, 1  ;;  %v3235_v11 = vrot.slane %v9248_v3, 1  ;;  %v3237_v18 = vrot.slane %v9167_v54, 1  ;;  %v3238_v10 = vrot.slane %v12626_v57, 1 }
 0x25c   :  { %v3240_v25 = vrot.slane %v9253_v22, 1  ;;  %v3242_v20 = vrot.slane %v9172_v35, 1  ;;  %v3243_v55 = vrot.slane %v12627_v58, 1  ;;  %v3216_v45 = vsel %vm394_vm1, %v3213_v12, %v3215_v2 }
 0x25d   :  { %v3219_v39 = vsel %vm394_vm1, %v3217_v28, %v3218_v29  ;;  %v3221_v9 = vsel %vm394_vm1, %v3218_v29, %v3220_v37  ;;  %v3245_v0 = vrot.slane %v9258_v34, 1  ;;  %v3224_v3 = vsel %vm394_vm1, %v3222_v17, %v3223_v21 }
 0x25e   :  { %v3247_v54 = vrot.slane %v9187_v26, 1  ;;  %v3248_v57 = vrot.slane %v12628_v23, 1  ;;  %v3250_v22 = vrot.slane %v9263_v15, 1  ;;  %v3226_v35 = vsel %vm394_vm1, %v3223_v21, %v3225_v4 }
 0x25f   :  { %v3229_v58 = vsel %vm394_vm1, %v3227_v42, %v3228_v52  ;;  %v3231_v12 = vsel %vm394_vm1, %v3228_v52, %v3230_v53  ;;  %v3234_v2 = vsel %vm394_vm1, %v3232_v46, %v3233_v44  ;;  %v3236_v28 = vsel %vm394_vm1, %v3233_v44, %v3235_v11 }
 0x260   :  { %v3239_v29 = vsel %vm394_vm1, %v3237_v18, %v3238_v10  ;;  %v3241_v37 = vsel %vm394_vm1, %v3238_v10, %v3240_v25  ;;  %v3244_v17 = vsel %vm394_vm1, %v3242_v20, %v3243_v55  ;;  %v3246_v34 = vsel %vm394_vm1, %v3243_v55, %v3245_v0 }
 0x261   :  { %v9347_v15 = vadd.f32 %v9266_v36, %v9098_v59  ;;  %v9351_v21 = vadd.f32 %v9271_v30, %v8970_v63  ;;  %v9355_v4 = vadd.f32 %v9274_v49, %v9105_v61  ;;  %v3249_v18 = vsel %vm394_vm1, %v3247_v54, %v3248_v57 }
 0x262   :  { %v3251_v10 = vsel %vm394_vm1, %v3248_v57, %v3250_v22  ;;  %v9361_v20 = vadd.f32 %v9277_v13, %v8979_v6  ;;  %v9364_v55 = vadd.f32 %v3184_v60, %v9112_v31  ;;  %v9367_v0 = vadd.f32 %v3186_v48, %v12615_v50 }
 0x263   :  { %v9370_v36 = vadd.f32 %v3189_v19, %v9117_v33  ;;  %v9373_v30 = vadd.f32 %v3191_v16, %v12616_v56  ;;  %v9376_v54 = vadd.f32 %v3194_v27, %v9122_v24  ;;  %v9379_v57 = vadd.f32 %v3196_v7, %v12617_v1  ;;  %v12629_v16 = vld [vmem:[#allocation217_spill] sm:$0xff]  ;;  %v12631_v27 = vld [vmem:[#allocation208_spill] sm:$0xff]  ;;  %v12633_v7 = vld [vmem:[#allocation218_spill] sm:$0xff] }
 0x264   :  { %v9382_v22 = vadd.f32 %v3199_v62, %v9127_v8  ;;  %v9385_v49 = vadd.f32 %v3201_v5, %v12618_v14  ;;  %v9388_v13 = vadd.f32 %v3204_v47, %v9132_v51  ;;  %v9391_v19 = vadd.f32 %v3206_v43, %v12619_v41  ;;  %v12635_v62 = vld [vmem:[#allocation209_spill] sm:$0xff]  ;;  %v12637_v5 = vld [vmem:[#allocation219_spill] sm:$0xff]  ;;  %v12639_v47 = vld [vmem:[#allocation210_spill] sm:$0xff] }
 0x265   :  { %v9394_v60 = vadd.f32 %v3209_v40, %v12629_v16  ;;  %v9397_v48 = vadd.f32 %v3211_v38, %v12631_v27  ;;  %v9400_v44 = vadd.f32 %v3214_v32, %v12633_v7  ;;  %v9403_v25 = vadd.f32 %v3216_v45, %v12635_v62  ;;  %v12641_v43 = vld [vmem:[#allocation220_spill] sm:$0xff]  ;;  %v12643_v40 = vld [vmem:[#allocation211_spill] sm:$0xff]  ;;  %v12645_v38 = vld [vmem:[#allocation221_spill] sm:$0xff] }
 0x266   :  { %v9406_v42 = vadd.f32 %v3219_v39, %v12637_v5  ;;  %v9409_v52 = vadd.f32 %v3221_v9, %v12639_v47  ;;  %v9412_v53 = vadd.f32 %v3224_v3, %v12641_v43  ;;  %v9415_v46 = vadd.f32 %v3226_v35, %v12643_v40  ;;  %v12649_v3 = vld [vmem:[#allocation212_spill] sm:$0xff]  ;;  %v12651_v35 = vld [vmem:[#allocation222_spill] sm:$0xff] }
 0x267   :  { %12630 = vst [vmem:[#allocation203_spill] sm:$0xff] %v9394_v60  ;;  %12632 = vst [vmem:[#allocation204_spill] sm:$0xff] %v9397_v48  ;;  %v9418_v11 = vadd.f32 %v3229_v58, %v12645_v38  ;;  %v3316_v32 = vrot.slane %v9098_v59, 2  ;;  %v3317_v45 = vrot.slane %v8970_v63, 2  ;;  %v3321_v39 = vrot.slane %v9105_v61, 2  ;;  %v12653_v58 = vld [vmem:[#allocation213_spill] sm:$0xff] }
 0x268   :  { %12634 = vst [vmem:[#allocation205_spill] sm:$0xff] %v9400_v44  ;;  %12636 = vst [vmem:[#allocation206_spill] sm:$0xff] %v9403_v25  ;;  %v12647_v25 = vld [vmem:[#allocation225_spill] sm:$0xff]  ;;  %v3322_v9 = vrot.slane %v8979_v6, 2  ;;  %v12655_v59 = vld [vmem:[#allocation223_spill] sm:$0xff] }
 0x269   :  { %12638 = vst [vmem:[#allocation207_spill] sm:$0xff] %v9406_v42  ;;  %12640 = vst [vmem:[#allocation216_spill] sm:$0xff] %v9409_v52  ;;  %v3319_v44 = vrot.slane %v12647_v25, 2  ;;  %v12648_v52 = vld [vmem:[#allocation226_spill] sm:$0xff]  ;;  %v9436_v48 = vadd.f32 %v3239_v29, %v12655_v59  ;;  %v12659_v61 = vld [vmem:[#allocation224_spill] sm:$0xff]  ;;  %v3326_v29 = vrot.slane %v9112_v31, 2 }
 0x26a   :  { %12642 = vst [vmem:[#allocation217_spill] sm:$0xff] %v9412_v53  ;;  %12644 = vst [vmem:[#allocation208_spill] sm:$0xff] %v9415_v46  ;;  %v3324_v42 = vrot.slane %v12648_v52, 2  ;;  %v9427_v53 = vadd.f32 %v3231_v12, %v12649_v3  ;;  %v9430_v46 = vadd.f32 %v3234_v2, %v12651_v35  ;;  %v12657_v63 = vld [vmem:[#allocation214_spill] sm:$0xff]  ;;  %v9442_v60 = vadd.f32 %v3244_v17, %v12659_v61  ;;  %v12661_v6 = vld [vmem:[#allocation215_spill] sm:$0xff] }
 0x26b   :  { %12646 = vst [vmem:[#allocation218_spill] sm:$0xff] %v9418_v11  ;;  %v9433_v11 = vadd.f32 %v3236_v28, %v12653_v58  ;;  %12656 = vst [vmem:[#allocation220_spill] sm:$0xff] %v9436_v48  ;;  %v9439_v25 = vadd.f32 %v3241_v37, %v12657_v63  ;;  %v9445_v52 = vadd.f32 %v3246_v34, %v12661_v6  ;;  %v3327_v37 = vrot.slane %v12615_v50, 2  ;;  %v12669_v48 = vld [vmem:[#allocation231_spill] sm:$0xff] }
 0x26c   :  { %12650 = vst [vmem:[#allocation209_spill] sm:$0xff] %v9427_v53  ;;  %12652 = vst [vmem:[#allocation219_spill] sm:$0xff] %v9430_v46  ;;  %v9448_v12 = vadd.f32 %v3249_v18, %v9187_v26  ;;  %v9451_v2 = vadd.f32 %v3251_v10, %v12628_v23  ;;  %v9454_v28 = vsel %vm539_vm2, %v3316_v32, %v3317_v45  ;;  %v12665_v18 = vld [vmem:[#allocation227_spill] sm:$0xff]  ;;  %v3331_v10 = vrot.slane %v9117_v33, 2  ;;  %v12677_v46 = vld [vmem:[#allocation196_spill] sm:$0xff] }
 0x26d   :  { %12654 = vst [vmem:[#allocation210_spill] sm:$0xff] %v9433_v11  ;;  %12658 = vst [vmem:[#allocation211_spill] sm:$0xff] %v9439_v25  ;;  %v9459_v25 = vsel %vm539_vm2, %v3317_v45, %v3319_v44  ;;  %v9462_v17 = vsel %vm539_vm2, %v3321_v39, %v3322_v9  ;;  %v9465_v34 = vsel %vm539_vm2, %v3322_v9, %v3324_v42  ;;  %v3332_v32 = vrot.slane %v12616_v56, 2  ;;  %v12667_v44 = vld [vmem:[#allocation229_spill] sm:$0xff]  ;;  %v12668_v42 = vld [vmem:[#allocation230_spill] sm:$0xff] }
 0x26e   :  { %12660 = vst [vmem:[#allocation221_spill] sm:$0xff] %v9442_v60  ;;  %12662 = vst [vmem:[#allocation225_spill] sm:$0xff] %v9445_v52  ;;  %v3336_v31 = vrot.slane %v9122_v24, 2  ;;  %v3337_v50 = vrot.slane %v12617_v1, 2  ;;  %v3339_v45 = vrot.slane %v12667_v44, 2  ;;  %v3341_v39 = vrot.slane %v9127_v8, 2 }
 0x26f   :  { %12663 = vst [vmem:[#allocation226_spill] sm:$0xff] %v9448_v12  ;;  %12664 = vst [vmem:[#allocation212_spill] sm:$0xff] %v9451_v2  ;;  %v3329_v12 = vrot.slane %v12665_v18, 2  ;;  %v12666_v2 = vld [vmem:[#allocation228_spill] sm:$0xff]  ;;  %v3342_v60 = vrot.slane %v12618_v14, 2  ;;  %v3344_v9 = vrot.slane %v12668_v42, 2  ;;  %v3333_v14 = vsel %vm539_vm2, %v3331_v10, %v3332_v32 }
 0x270   :  { %v3334_v52 = vrot.slane %v12666_v2, 2  ;;  %v3346_v18 = vrot.slane %v9132_v51, 2  ;;  %v3347_v33 = vrot.slane %v12619_v41, 2  ;;  %v3349_v56 = vrot.slane %v12669_v48, 2  ;;  %v12670_v11 = vld [vmem:[#allocation197_spill] sm:$0xff]  ;;  %v12678_v53 = vld [vmem:[#allocation202_spill] sm:$0xff] }
 0x271   :  { %v3328_v2 = vsel %vm539_vm2, %v3326_v29, %v3327_v37  ;;  %v3351_v24 = vrot.slane %v12629_v16, 2  ;;  %v3352_v1 = vrot.slane %v12631_v27, 2  ;;  %v3354_v44 = vrot.slane %v12670_v11, 2 }
 0x272   :  { %v3330_v8 = vsel %vm539_vm2, %v3327_v37, %v3329_v12  ;;  %v3356_v42 = vrot.slane %v12633_v7, 2  ;;  %v3357_v51 = vrot.slane %v12635_v62, 2  ;;  %v3335_v41 = vsel %vm539_vm2, %v3332_v32, %v3334_v52  ;;  %v12671_v37 = vld [vmem:[#allocation198_spill] sm:$0xff] }
 0x273   :  { %v3338_v48 = vsel %vm539_vm2, %v3336_v31, %v3337_v50  ;;  %v3340_v29 = vsel %vm539_vm2, %v3337_v50, %v3339_v45  ;;  %v3343_v16 = vsel %vm539_vm2, %v3341_v39, %v3342_v60  ;;  %v3345_v27 = vsel %vm539_vm2, %v3342_v60, %v3344_v9  ;;  %v12672_v50 = vld [vmem:[#allocation199_spill] sm:$0xff]  ;;  %v12673_v9 = vld [vmem:[#allocation200_spill] sm:$0xff] }
 0x274   :  { %v3348_v11 = vsel %vm539_vm2, %v3346_v18, %v3347_v33  ;;  %v3350_v12 = vsel %vm539_vm2, %v3347_v33, %v3349_v56  ;;  %v3359_v10 = vrot.slane %v12671_v37, 2  ;;  %v3353_v7 = vsel %vm539_vm2, %v3351_v24, %v3352_v1  ;;  %v12674_v24 = vld [vmem:[#allocation201_spill] sm:$0xff] }
 0x275   :  { %v3355_v62 = vsel %vm539_vm2, %v3352_v1, %v3354_v44  ;;  %v3361_v52 = vrot.slane %v12637_v5, 2  ;;  %v3362_v32 = vrot.slane %v12639_v47, 2  ;;  %v3358_v31 = vsel %vm539_vm2, %v3356_v42, %v3357_v51  ;;  %v12675_v44 = vld [vmem:[#allocation194_spill] sm:$0xff] }
 0x276   :  { %v3364_v45 = vrot.slane %v12672_v50, 2  ;;  %v3366_v60 = vrot.slane %v12641_v43, 2  ;;  %v3367_v39 = vrot.slane %v12643_v40, 2  ;;  %v3369_v18 = vrot.slane %v12673_v9, 2  ;;  %v12676_v50 = vld [vmem:[#allocation195_spill] sm:$0xff] }
 0x277   :  { %v3371_v33 = vrot.slane %v12645_v38, 2  ;;  %v3372_v56 = vrot.slane %v12649_v3, 2  ;;  %v3374_v1 = vrot.slane %v12674_v24, 2  ;;  %v3376_v5 = vrot.slane %v12651_v35, 2 }
 0x278   :  { %v3377_v47 = vrot.slane %v12653_v58, 2  ;;  %v3379_v42 = vrot.slane %v12675_v44, 2  ;;  %v3381_v37 = vrot.slane %v12655_v59, 2  ;;  %v3382_v43 = vrot.slane %v12657_v63, 2 }
 0x279   :  { %v3384_v40 = vrot.slane %v12676_v50, 2  ;;  %v3386_v9 = vrot.slane %v12659_v61, 2  ;;  %v3387_v38 = vrot.slane %v12661_v6, 2  ;;  %v3360_v3 = vsel %vm539_vm2, %v3357_v51, %v3359_v10 }
 0x27a   :  { %v3363_v24 = vsel %vm539_vm2, %v3361_v52, %v3362_v32  ;;  %v3365_v35 = vsel %vm539_vm2, %v3362_v32, %v3364_v45  ;;  %v3389_v58 = vrot.slane %v12677_v46, 2  ;;  %v3368_v44 = vsel %vm539_vm2, %v3366_v60, %v3367_v39 }
 0x27b   :  { %v3391_v59 = vrot.slane %v9187_v26, 2  ;;  %v3392_v63 = vrot.slane %v12628_v23, 2  ;;  %v3394_v50 = vrot.slane %v12678_v53, 2  ;;  %v3370_v61 = vsel %vm539_vm2, %v3367_v39, %v3369_v18 }
 0x27c   :  { %v3373_v6 = vsel %vm539_vm2, %v3371_v33, %v3372_v56  ;;  %v3375_v51 = vsel %vm539_vm2, %v3372_v56, %v3374_v1  ;;  %v3378_v10 = vsel %vm539_vm2, %v3376_v5, %v3377_v47  ;;  %v3380_v52 = vsel %vm539_vm2, %v3377_v47, %v3379_v42  ;;  %v12690_v47 = vld [vmem:[#allocation210_spill] sm:$0xff]  ;;  %v12691_v42 = vld [vmem:[#allocation220_spill] sm:$0xff] }
 0x27d   :  { %v3383_v46 = vsel %vm539_vm2, %v3381_v37, %v3382_v43  ;;  %v3385_v32 = vsel %vm539_vm2, %v3382_v43, %v3384_v40  ;;  %v3388_v26 = vsel %vm539_vm2, %v3386_v9, %v3387_v38  ;;  %v3390_v23 = vsel %vm539_vm2, %v3387_v38, %v3389_v58  ;;  %v12692_v37 = vld [vmem:[#allocation211_spill] sm:$0xff]  ;;  %v12693_v40 = vld [vmem:[#allocation221_spill] sm:$0xff] }
 0x27e   :  { %v3428_v53 = vadd.f32 %v9454_v28, %v9347_v15  ;;  %v3429_v45 = vadd.f32 %v9459_v25, %v9351_v21  ;;  %v3430_v60 = vadd.f32 %v9462_v17, %v9355_v4  ;;  %v3393_v39 = vsel %vm539_vm2, %v3391_v59, %v3392_v63  ;;  %v12694_v38 = vld [vmem:[#allocation225_spill] sm:$0xff]  ;;  %v12696_v59 = vld [vmem:[#allocation212_spill] sm:$0xff] }
 0x27f   :  { %v3395_v18 = vsel %vm539_vm2, %v3392_v63, %v3394_v50  ;;  %v3431_v33 = vadd.f32 %v9465_v34, %v9361_v20  ;;  %v3432_v56 = vadd.f32 %v3328_v2, %v9364_v55  ;;  %v3433_v1 = vadd.f32 %v3330_v8, %v9367_v0  ;;  %v12679_v34 = vld [vmem:[#allocation203_spill] sm:$0xff]  ;;  %v12680_v2 = vld [vmem:[#allocation204_spill] sm:$0xff]  ;;  %v12681_v8 = vld [vmem:[#allocation205_spill] sm:$0xff] }
 0x280   :  { %v3434_v5 = vadd.f32 %v3333_v14, %v9370_v36  ;;  %v3435_v15 = vadd.f32 %v3335_v41, %v9373_v30  ;;  %v3436_v21 = vadd.f32 %v3338_v48, %v9376_v54  ;;  %v3437_v25 = vadd.f32 %v3340_v29, %v9379_v57  ;;  %v12682_v14 = vld [vmem:[#allocation206_spill] sm:$0xff]  ;;  %v12683_v41 = vld [vmem:[#allocation207_spill] sm:$0xff]  ;;  %v12684_v48 = vld [vmem:[#allocation216_spill] sm:$0xff] }
 0x281   :  { %v3438_v4 = vadd.f32 %v3343_v16, %v9382_v22  ;;  %v3439_v28 = vadd.f32 %v3345_v27, %v9385_v49  ;;  %v3440_v17 = vadd.f32 %v3348_v11, %v9388_v13  ;;  %v3441_v20 = vadd.f32 %v3350_v12, %v9391_v19  ;;  %v12685_v29 = vld [vmem:[#allocation217_spill] sm:$0xff]  ;;  %v12686_v16 = vld [vmem:[#allocation208_spill] sm:$0xff]  ;;  %v12687_v27 = vld [vmem:[#allocation218_spill] sm:$0xff] }
 0x282   :  { %v3442_v55 = vadd.f32 %v3353_v7, %v12679_v34  ;;  %v3443_v0 = vadd.f32 %v3355_v62, %v12680_v2  ;;  %v3444_v36 = vadd.f32 %v3358_v31, %v12681_v8  ;;  %v3445_v30 = vadd.f32 %v3360_v3, %v12682_v14  ;;  %v12688_v11 = vld [vmem:[#allocation209_spill] sm:$0xff]  ;;  %v12689_v12 = vld [vmem:[#allocation219_spill] sm:$0xff]  ;;  %v12714_v2 = vld [vmem:[#allocation28_spill] sm:$0xff] }
 0x283   :  { %v3446_v54 = vadd.f32 %v3363_v24, %v12683_v41  ;;  %v3447_v57 = vadd.f32 %v3365_v35, %v12684_v48  ;;  %v3448_v22 = vadd.f32 %v3368_v44, %v12685_v29  ;;  %v3449_v49 = vadd.f32 %v3370_v61, %v12686_v16  ;;  %v12695_v24 = vld [vmem:[#allocation226_spill] sm:$0xff]  ;;  %v12715_v8 = vld [vmem:[#allocation55_spill] sm:$0xff]  ;;  %v12720_v48 = vld [vmem:[#allocation65_spill] sm:$0xff] }
 0x284   :  { %v3450_v13 = vadd.f32 %v3373_v6, %v12687_v27  ;;  %v3451_v19 = vadd.f32 %v3375_v51, %v12688_v11  ;;  %v3452_v7 = vadd.f32 %v3378_v10, %v12689_v12  ;;  %v3453_v62 = vadd.f32 %v3380_v52, %v12690_v47  ;;  %v12719_v41 = vld [vmem:[#allocation39_spill] sm:$0xff]  ;;  %v12724_v16 = vld [vmem:[#allocation29_spill] sm:$0xff]  ;;  %v12725_v27 = vld [vmem:[#allocation56_spill] sm:$0xff] }
 0x285   :  { %v3454_v31 = vadd.f32 %v3383_v46, %v12691_v42  ;;  %v3455_v43 = vadd.f32 %v3385_v32, %v12692_v37  ;;  %v3456_v9 = vadd.f32 %v3388_v26, %v12693_v40  ;;  %v3457_v3 = vadd.f32 %v3390_v23, %v12694_v38  ;;  %v12699_v46 = vld [vmem:[#allocation36_spill] sm:$0xff]  ;;  %v12700_v32 = vld [vmem:[#allocation62_spill] sm:$0xff]  ;;  %v12737_v40 = vld [vmem:[#allocation67_spill] sm:$0xff] }
 0x286   :  { %v3458_v35 = vadd.f32 %v3393_v39, %v12695_v24  ;;  %v9570_v58 = vmul.f32 0.11111111, %v3428_v53  ;;  %v9572_v44 = vmul.f32 0.11111111, %v3429_v45  ;;  %v3459_v63 = vadd.f32 %v3395_v18, %v12696_v59  ;;  %v12705_v39 = vld [vmem:[#allocation54_spill] sm:$0xff]  ;;  %v12736_v37 = vld [vmem:[#allocation40_spill] sm:$0xff] }
 0x287   :  { %v9575_v50 = vmul.f32 0.11111111, %v3430_v60  ;;  %v9577_v61 = vmul.f32 0.11111111, %v3431_v33  ;;  %v9579_v6 = vmul.f32 0.11111111, %v3432_v56  ;;  %v9589_v26 = vmul.f32 %v12700_v32, %v12699_v46 }
 0x288   :  { %v9581_v51 = vmul.f32 0.11111111, %v3433_v1  ;;  %v9583_v10 = vmul.f32 0.11111111, %v3434_v5  ;;  %v9585_v52 = vmul.f32 0.11111111, %v3435_v15  ;;  %v9619_v14 = vmul.f32 %v12715_v8, %v12714_v2 }
 0x289   :  { %v9591_v23 = vmul.f32 0.11111111, %v3436_v21  ;;  %v9593_v53 = vmul.f32 0.11111111, %v3437_v25  ;;  %v9595_v45 = vmul.f32 0.11111111, %v3438_v4  ;;  %v9629_v29 = vmul.f32 %v12720_v48, %v12719_v41 }
 0x28a   :  { %12697 = vst [vmem:[#allocation222_spill] sm:$0xff] %v9583_v10  ;;  %12698 = vst [vmem:[#allocation213_spill] sm:$0xff] %v9585_v52  ;;  %v12704_v60 = vld [vmem:[#allocation27_spill] sm:$0xff]  ;;  %v9601_v33 = vmul.f32 0.11111111, %v3439_v28  ;;  %v12709_v5 = vld [vmem:[#allocation38_spill] sm:$0xff]  ;;  %v9639_v11 = vmul.f32 %v12725_v27, %v12724_v16  ;;  %v9659_v38 = vmul.f32 %v12737_v40, %v12736_v37 }
 0x28b   :  { %12701 = vst [vmem:[#allocation223_spill] sm:$0xff] %v9591_v23  ;;  %12702 = vst [vmem:[#allocation214_spill] sm:$0xff] %v9593_v53  ;;  %v9599_v18 = vmul.f32 %v12705_v39, %v12704_v60  ;;  %v9603_v56 = vmul.f32 0.11111111, %v3440_v17  ;;  %v9605_v1 = vmul.f32 0.11111111, %v3441_v20 }
 0x28c   :  { %12703 = vst [vmem:[#allocation224_spill] sm:$0xff] %v9595_v45  ;;  %12706 = vst [vmem:[#allocation215_spill] sm:$0xff] %v9601_v33  ;;  %v12710_v15 = vld [vmem:[#allocation64_spill] sm:$0xff]  ;;  %v9611_v21 = vmul.f32 0.11111111, %v3442_v55  ;;  %v12730_v12 = vld [vmem:[#allocation30_spill] sm:$0xff] }
 0x28d   :  { %12707 = vst [vmem:[#allocation227_spill] sm:$0xff] %v9603_v56  ;;  %12708 = vst [vmem:[#allocation228_spill] sm:$0xff] %v9605_v1  ;;  %v9609_v34 = vmul.f32 %v12710_v15, %v12709_v5  ;;  %v9613_v25 = vmul.f32 0.11111111, %v3443_v0  ;;  %v9615_v4 = vmul.f32 0.11111111, %v3444_v36 }
 0x28e   :  { %12711 = vst [vmem:[#allocation229_spill] sm:$0xff] %v9611_v21  ;;  %v9621_v28 = vmul.f32 0.11111111, %v3445_v30  ;;  %v9623_v17 = vmul.f32 0.11111111, %v3446_v54  ;;  %12726 = vst [vmem:[#allocation195_spill] sm:$0xff] %v9639_v11 }
 0x28f   :  { %12712 = vst [vmem:[#allocation230_spill] sm:$0xff] %v9613_v25  ;;  %12713 = vst [vmem:[#allocation231_spill] sm:$0xff] %v9615_v4  ;;  %v9625_v20 = vmul.f32 0.11111111, %v3447_v57  ;;  %v9631_v55 = vmul.f32 0.11111111, %v3448_v22 }
 0x290   :  { %12716 = vst [vmem:[#allocation197_spill] sm:$0xff] %v9621_v28  ;;  %12717 = vst [vmem:[#allocation198_spill] sm:$0xff] %v9623_v17  ;;  %v9633_v0 = vmul.f32 0.11111111, %v3449_v49  ;;  %v9635_v36 = vmul.f32 0.11111111, %v3450_v13 }
 0x291   :  { %12718 = vst [vmem:[#allocation199_spill] sm:$0xff] %v9625_v20  ;;  %12721 = vst [vmem:[#allocation200_spill] sm:$0xff] %v9631_v55  ;;  %v9641_v30 = vmul.f32 0.11111111, %v3451_v19  ;;  %v9643_v54 = vmul.f32 0.11111111, %v3452_v7 }
 0x292   :  { %12722 = vst [vmem:[#allocation201_spill] sm:$0xff] %v9633_v0  ;;  %12723 = vst [vmem:[#allocation194_spill] sm:$0xff] %v9635_v36  ;;  %v9645_v57 = vmul.f32 0.11111111, %v3453_v62  ;;  %v12731_v47 = vld [vmem:[#allocation66_spill] sm:$0xff]  ;;  %v12742_v24 = vld [vmem:[#allocation41_spill] sm:$0xff] }
 0x293   :  { %12727 = vst [vmem:[#allocation196_spill] sm:$0xff] %v9641_v30  ;;  %12728 = vst [vmem:[#allocation202_spill] sm:$0xff] %v9643_v54  ;;  %v9649_v42 = vmul.f32 %v12731_v47, %v12730_v12  ;;  %v9651_v22 = vmul.f32 0.11111111, %v3454_v31  ;;  %v9653_v49 = vmul.f32 0.11111111, %v3455_v43 }
 0x294   :  { %12729 = vst [vmem:[#allocation203_spill] sm:$0xff] %v9645_v57  ;;  %v9655_v13 = vmul.f32 0.11111111, %v3456_v9  ;;  %12738 = vst [vmem:[#allocation216_spill] sm:$0xff] %v9659_v38  ;;  %v9661_v19 = vmul.f32 0.11111111, %v3457_v3 }
 0x295   :  { %12732 = vst [vmem:[#allocation204_spill] sm:$0xff] %v9649_v42  ;;  %12733 = vst [vmem:[#allocation205_spill] sm:$0xff] %v9651_v22  ;;  %v9663_v7 = vmul.f32 0.11111111, %v3458_v35  ;;  %v9665_v62 = vmul.f32 0.11111111, %v3459_v63 }
 0x296   :  { %12734 = vst [vmem:[#allocation206_spill] sm:$0xff] %v9653_v49  ;;  %12735 = vst [vmem:[#allocation207_spill] sm:$0xff] %v9655_v13  ;;  %v12743_v59 = vld [vmem:[#allocation68_spill] sm:$0xff]  ;;  %v12745_v31 = vld [vmem:[#allocation42_spill] sm:$0xff] }
 0x297   :  { %12739 = vst [vmem:[#allocation217_spill] sm:$0xff] %v9661_v19  ;;  %12740 = vst [vmem:[#allocation208_spill] sm:$0xff] %v9663_v7  ;;  %v9669_v47 = vmul.f32 %v12743_v59, %v12742_v24  ;;  %v12746_v27 = vld [vmem:[#allocation69_spill] sm:$0xff]  ;;  %v12748_v9 = vld [vmem:[#allocation43_spill] sm:$0xff] }
 0x298   :  { %12741 = vst [vmem:[#allocation218_spill] sm:$0xff] %v9665_v62  ;;  %v9673_v43 = vmul.f32 %v12746_v27, %v12745_v31  ;;  %v12749_v48 = vld [vmem:[#allocation70_spill] sm:$0xff]  ;;  %v12751_v40 = vld [vmem:[#allocation44_spill] sm:$0xff]  ;;  %v12752_v15 = vld [vmem:[#allocation71_spill] sm:$0xff] }
 0x299   :  { %12744 = vst [vmem:[#allocation209_spill] sm:$0xff] %v9669_v47  ;;  %v9677_v8 = vmul.f32 %v12749_v48, %v12748_v9  ;;  %v9681_v3 = vmul.f32 %v12752_v15, %v12751_v40  ;;  %v12754_v35 = vld [vmem:[#allocation45_spill] sm:$0xff]  ;;  %v12755_v39 = vld [vmem:[#allocation72_spill] sm:$0xff]  ;;  %v12757_v32 = vld [vmem:[#allocation46_spill] sm:$0xff] }
 0x29a   :  { %12747 = vst [vmem:[#allocation219_spill] sm:$0xff] %v9673_v43  ;;  %v9685_v63 = vmul.f32 %v12755_v39, %v12754_v35  ;;  %v12758_v37 = vld [vmem:[#allocation24_spill] sm:$0xff]  ;;  %v12760_v24 = vld [vmem:[#allocation3_spill] sm:$0xff]  ;;  %v12761_v12 = vld [vmem:[#allocation34_spill] sm:$0xff] }
 0x29b   :  { %12750 = vst [vmem:[#allocation210_spill] sm:$0xff] %v9677_v8  ;;  %12753 = vst [vmem:[#allocation220_spill] sm:$0xff] %v9681_v3  ;;  %v9689_v59 = vmul.f32 %v12758_v37, %v12757_v32  ;;  %v9693_v27 = vmul.f32 %v12761_v12, %v12760_v24  ;;  %v12763_v31 = vld [vmem:[#allocation16_spill] sm:$0xff]  ;;  %v12764_v16 = vld [vmem:[#allocation7_spill] sm:$0xff] }
 0x29c   :  { %12756 = vst [vmem:[#allocation211_spill] sm:$0xff] %v9685_v63  ;;  %v9697_v48 = vmul.f32 %v12764_v16, %v12763_v31  ;;  %v12766_v9 = vld [vmem:[#allocation4_spill] sm:$0xff]  ;;  %v12767_v41 = vld [vmem:[#allocation25_spill] sm:$0xff]  ;;  %v12770_v2 = vld [vmem:[#allocation35_spill] sm:$0xff] }
 0x29d   :  { %12759 = vst [vmem:[#allocation221_spill] sm:$0xff] %v9689_v59  ;;  %12762 = vst [vmem:[#allocation225_spill] sm:$0xff] %v9693_v27  ;;  %v9701_v15 = vmul.f32 %v12767_v41, %v12766_v9  ;;  %v12769_v40 = vld [vmem:[#allocation5_spill] sm:$0xff]  ;;  %v12772_v35 = vld [vmem:[#allocation6_spill] sm:$0xff] }
 0x29e   :  { %12765 = vst [vmem:[#allocation226_spill] sm:$0xff] %v9697_v48  ;;  %v9705_v39 = vmul.f32 %v12770_v2, %v12769_v40  ;;  %v12773_v5 = vld [vmem:[#allocation37_spill] sm:$0xff]  ;;  %v12775_v32 = vld [vmem:[#allocation8_spill] sm:$0xff]  ;;  %v12776_v60 = vld [vmem:[#allocation26_spill] sm:$0xff] }
 0x29f   :  { %12768 = vst [vmem:[#allocation212_spill] sm:$0xff] %v9701_v15  ;;  %v9709_v37 = vmul.f32 %v12773_v5, %v12772_v35  ;;  %v9713_v12 = vmul.f32 %v12776_v60, %v12775_v32  ;;  %v12778_v24 = vld [vmem:[#allocation9_spill] sm:$0xff]  ;;  %v12779_v46 = vld [vmem:[#allocation10_spill] sm:$0xff]  ;;  %v12781_v31 = vld [vmem:[#allocation12_spill] sm:$0xff] }
 0x2a0   :  { %12771 = vst [vmem:[#allocation232_spill] sm:$0xff] %v9705_v39  ;;  %v9717_v16 = vmul.f32 %v12779_v46, %v12778_v24  ;;  %v12782_v62 = vld [vmem:[#allocation13_spill] sm:$0xff]  ;;  %v12785_v7 = vld [vmem:[#allocation14_spill] sm:$0xff]  ;;  %v12788_v19 = vld [vmem:[#allocation15_spill] sm:$0xff] }
 0x2a1   :  { %12774 = vst [vmem:[#allocation233_spill] sm:$0xff] %v9709_v37  ;;  %12777 = vst [vmem:[#allocation234_spill] sm:$0xff] %v9713_v12  ;;  %v9721_v41 = vmul.f32 %v12782_v62, %v12781_v31  ;;  %v12784_v9 = vld [vmem:[#allocation17_spill] sm:$0xff]  ;;  %v12787_v40 = vld [vmem:[#allocation18_spill] sm:$0xff] }
 0x2a2   :  { %12780 = vst [vmem:[#allocation235_spill] sm:$0xff] %v9717_v16  ;;  %v9725_v2 = vmul.f32 %v12785_v7, %v12784_v9  ;;  %v9729_v5 = vmul.f32 %v12788_v19, %v12787_v40  ;;  %v12790_v35 = vld [vmem:[#allocation19_spill] sm:$0xff]  ;;  %v12791_v13 = vld [vmem:[#allocation2_spill] sm:$0xff]  ;;  %v12793_v32 = vld [vmem:[#allocation20_spill] sm:$0xff] }
 0x2a3   :  { %12783 = vst [vmem:[#allocation236_spill] sm:$0xff] %v9721_v41  ;;  %v9733_v60 = vmul.f32 %v12791_v13, %v12790_v35  ;;  %v12794_v49 = vld [vmem:[#allocation11_spill] sm:$0xff]  ;;  %v12796_v24 = vld [vmem:[#allocation21_spill] sm:$0xff]  ;;  %v12802_v9 = vld [vmem:[#allocation22_spill] sm:$0xff] }
 0x2a4   :  { %12786 = vst [vmem:[#allocation237_spill] sm:$0xff] %v9725_v2  ;;  %12789 = vst [vmem:[#allocation238_spill] sm:$0xff] %v9729_v5  ;;  %v9737_v46 = vmul.f32 %v12794_v49, %v12793_v32  ;;  %v12797_v22 = vld [vmem:[#allocation47_spill] sm:$0xff]  ;;  %v12800_v57 = vld [vmem:[#allocation57_spill] sm:$0xff] }
 0x2a5   :  { %12792 = vst [vmem:[#allocation239_spill] sm:$0xff] %v9733_v60  ;;  %v9741_v62 = vmul.f32 %v12797_v22, %v12796_v24  ;;  %v12799_v31 = vld [vmem:[#allocation31_spill] sm:$0xff]  ;;  %v12803_v54 = vld [vmem:[#allocation48_spill] sm:$0xff]  ;;  %v12806_v30 = vld [vmem:[#allocation49_spill] sm:$0xff] }
 0x2a6   :  { %12795 = vst [vmem:[#allocation240_spill] sm:$0xff] %v9737_v46  ;;  %v9745_v7 = vmul.f32 %v12800_v57, %v12799_v31  ;;  %v9749_v19 = vmul.f32 %v12803_v54, %v12802_v9  ;;  %v12805_v40 = vld [vmem:[#allocation32_spill] sm:$0xff]  ;;  %v12808_v35 = vld [vmem:[#allocation23_spill] sm:$0xff]  ;;  %v12809_v60 = vld [vmem:[#allocation58_spill] sm:$0xff] }
 0x2a7   :  { %12798 = vst [vmem:[#allocation21_spill] sm:$0xff] %v9741_v62  ;;  %v9753_v13 = vmul.f32 %v12806_v30, %v12805_v40  ;;  %v9757_v49 = vmul.f32 %v12809_v60, %v12808_v35  ;;  %v12811_v32 = vld [vmem:[#allocation33_spill] sm:$0xff]  ;;  %v12812_v46 = vld [vmem:[#allocation50_spill] sm:$0xff]  ;;  %v12825_v30 = vld [vmem:[#allocation36_spill] sm:$0xff] }
 0x2a8   :  { %12801 = vst [vmem:[#allocation241_spill] sm:$0xff] %v9745_v7  ;;  %12804 = vst [vmem:[#allocation22_spill] sm:$0xff] %v9749_v19  ;;  %v9761_v22 = vmul.f32 %v12812_v46, %v12811_v32  ;;  %v3556_v37 = vmul.f32 2.0, %v12825_v30  ;;  %v12826_v28 = vld [vmem:[#allocation27_spill] sm:$0xff]  ;;  %v12827_v12 = vld [vmem:[#allocation38_spill] sm:$0xff] }
 0x2a9   :  { %12807 = vst [vmem:[#allocation32_spill] sm:$0xff] %v9753_v13  ;;  %12810 = vst [vmem:[#allocation242_spill] sm:$0xff] %v9757_v49  ;;  %v3557_v60 = vmul.f32 2.0, %v12826_v28  ;;  %v3558_v62 = vmul.f32 2.0, %v12827_v12  ;;  %v12828_v35 = vld [vmem:[#allocation28_spill] sm:$0xff]  ;;  %v12829_v7 = vld [vmem:[#allocation39_spill] sm:$0xff] }
 0x2aa   :  { %12813 = vst [vmem:[#allocation33_spill] sm:$0xff] %v9761_v22  ;;  %v3559_v16 = vmul.f32 2.0, %v12828_v35  ;;  %v3560_v46 = vmul.f32 2.0, %v12829_v7  ;;  %v12830_v41 = vld [vmem:[#allocation29_spill] sm:$0xff]  ;;  %v12831_v57 = vld [vmem:[#allocation30_spill] sm:$0xff]  ;;  %v12832_v13 = vld [vmem:[#allocation40_spill] sm:$0xff] }
 0x2ab   :  { %v3561_v19 = vmul.f32 2.0, %v12830_v41  ;;  %v3562_v2 = vmul.f32 2.0, %v12831_v57  ;;  %v3563_v31 = vmul.f32 2.0, %v12832_v13  ;;  %v12833_v5 = vld [vmem:[#allocation41_spill] sm:$0xff]  ;;  %v12834_v15 = vld [vmem:[#allocation42_spill] sm:$0xff]  ;;  %v12835_v22 = vld [vmem:[#allocation43_spill] sm:$0xff] }
 0x2ac   :  { %v3564_v49 = vmul.f32 2.0, %v12833_v5  ;;  %v3565_v4 = vmul.f32 2.0, %v12834_v15  ;;  %v3566_v30 = vmul.f32 2.0, %v12835_v22  ;;  %v12836_v39 = vld [vmem:[#allocation44_spill] sm:$0xff]  ;;  %v12837_v54 = vld [vmem:[#allocation45_spill] sm:$0xff]  ;;  %v12838_v36 = vld [vmem:[#allocation46_spill] sm:$0xff] }
 0x2ad   :  { %v3567_v28 = vmul.f32 2.0, %v12836_v39  ;;  %v3568_v12 = vmul.f32 2.0, %v12837_v54  ;;  %v3569_v35 = vmul.f32 2.0, %v12838_v36  ;;  %v12839_v0 = vld [vmem:[#allocation3_spill] sm:$0xff]  ;;  %v12840_v55 = vld [vmem:[#allocation16_spill] sm:$0xff]  ;;  %v12842_v17 = vld [vmem:[#allocation5_spill] sm:$0xff] }
 0x2ae   :  { %v3570_v7 = vmul.f32 2.0, %v12839_v0  ;;  %v3571_v41 = vmul.f32 2.0, %v12840_v55  ;;  %v12841_v20 = vld [vmem:[#allocation4_spill] sm:$0xff]  ;;  %v3573_v13 = vmul.f32 2.0, %v12842_v17  ;;  %v12843_v48 = vld [vmem:[#allocation6_spill] sm:$0xff]  ;;  %v12845_v27 = vld [vmem:[#allocation9_spill] sm:$0xff] }
 0x2af   :  { %v3572_v57 = vmul.f32 2.0, %v12841_v20  ;;  %v3574_v5 = vmul.f32 2.0, %v12843_v48  ;;  %v12844_v25 = vld [vmem:[#allocation8_spill] sm:$0xff]  ;;  %v3576_v22 = vmul.f32 2.0, %v12845_v27  ;;  %v12847_v59 = vld [vmem:[#allocation17_spill] sm:$0xff]  ;;  %v12848_v1 = vld [vmem:[#allocation18_spill] sm:$0xff] }
 0x2b0   :  { %v3575_v15 = vmul.f32 2.0, %v12844_v25  ;;  %v12846_v21 = vld [vmem:[#allocation12_spill] sm:$0xff]  ;;  %v3578_v54 = vmul.f32 2.0, %v12847_v59  ;;  %v3579_v36 = vmul.f32 2.0, %v12848_v1  ;;  %v12849_v63 = vld [vmem:[#allocation19_spill] sm:$0xff]  ;;  %v3582_v20 = vmul.f32 2.0, %v12796_v24 }
 0x2b1   :  { %v3577_v39 = vmul.f32 2.0, %v12846_v21  ;;  %v3580_v0 = vmul.f32 2.0, %v12849_v63  ;;  %v12850_v56 = vld [vmem:[#allocation20_spill] sm:$0xff]  ;;  %v12851_v3 = vld [vmem:[#allocation31_spill] sm:$0xff]  ;;  %v3584_v48 = vmul.f32 2.0, %v12802_v9  ;;  %v3585_v25 = vmul.f32 2.0, %v12805_v40 }
 0x2b2   :  { %v3581_v55 = vmul.f32 2.0, %v12850_v56  ;;  %v3583_v17 = vmul.f32 2.0, %v12851_v3  ;;  %v12852_v33 = vld [vmem:[#allocation23_spill] sm:$0xff]  ;;  %v3587_v21 = vmul.f32 2.0, %v12811_v32  ;;  %v12853_v8 = vld [vmem:[#allocation62_spill] sm:$0xff]  ;;  %v12855_v43 = vld [vmem:[#allocation64_spill] sm:$0xff] }
 0x2b3   :  { %v3586_v27 = vmul.f32 2.0, %v12852_v33  ;;  %v3588_v59 = vmul.f32 %v3556_v37, %v12853_v8  ;;  %v12854_v45 = vld [vmem:[#allocation54_spill] sm:$0xff]  ;;  %v3590_v63 = vmul.f32 %v3558_v62, %v12855_v43  ;;  %v12856_v53 = vld [vmem:[#allocation55_spill] sm:$0xff]  ;;  %v12857_v47 = vld [vmem:[#allocation65_spill] sm:$0xff] }
 0x2b4   :  { %v3589_v1 = vmul.f32 %v3557_v60, %v12854_v45  ;;  %v3591_v56 = vmul.f32 %v3559_v16, %v12856_v53  ;;  %v3592_v24 = vmul.f32 %v3560_v46, %v12857_v47  ;;  %v12858_v23 = vld [vmem:[#allocation56_spill] sm:$0xff]  ;;  %v12859_v38 = vld [vmem:[#allocation66_spill] sm:$0xff]  ;;  %v12860_v52 = vld [vmem:[#allocation67_spill] sm:$0xff] }
 0x2b5   :  { %v3593_v3 = vmul.f32 %v3561_v19, %v12858_v23  ;;  %v3594_v9 = vmul.f32 %v3562_v2, %v12859_v38  ;;  %v3595_v40 = vmul.f32 %v3563_v31, %v12860_v52  ;;  %v12861_v42 = vld [vmem:[#allocation68_spill] sm:$0xff]  ;;  %v12862_v10 = vld [vmem:[#allocation69_spill] sm:$0xff]  ;;  %v12863_v11 = vld [vmem:[#allocation70_spill] sm:$0xff] }
 0x2b6   :  { %v3596_v33 = vmul.f32 %v3564_v49, %v12861_v42  ;;  %v3597_v32 = vmul.f32 %v3565_v4, %v12862_v10  ;;  %v3598_v8 = vmul.f32 %v3566_v30, %v12863_v11  ;;  %v12864_v37 = vld [vmem:[#allocation71_spill] sm:$0xff]  ;;  %v12865_v60 = vld [vmem:[#allocation72_spill] sm:$0xff]  ;;  %v12867_v16 = vld [vmem:[#allocation34_spill] sm:$0xff] }
 0x2b7   :  { %v3599_v45 = vmul.f32 %v3567_v28, %v12864_v37  ;;  %v3600_v62 = vmul.f32 %v3568_v12, %v12865_v60  ;;  %v12866_v43 = vld [vmem:[#allocation24_spill] sm:$0xff]  ;;  %v3602_v46 = vmul.f32 %v3570_v7, %v12867_v16  ;;  %v12868_v47 = vld [vmem:[#allocation7_spill] sm:$0xff]  ;;  %v12869_v19 = vld [vmem:[#allocation25_spill] sm:$0xff] }
 0x2b8   :  { %v3601_v53 = vmul.f32 %v3569_v35, %v12866_v43  ;;  %v3603_v23 = vmul.f32 %v3571_v41, %v12868_v47  ;;  %v3604_v2 = vmul.f32 %v3572_v57, %v12869_v19  ;;  %v12870_v38 = vld [vmem:[#allocation35_spill] sm:$0xff]  ;;  %v12871_v31 = vld [vmem:[#allocation37_spill] sm:$0xff]  ;;  %v12872_v49 = vld [vmem:[#allocation26_spill] sm:$0xff] }
 0x2b9   :  { %v3605_v52 = vmul.f32 %v3573_v13, %v12870_v38  ;;  %v3606_v42 = vmul.f32 %v3574_v5, %v12871_v31  ;;  %v3607_v10 = vmul.f32 %v3575_v15, %v12872_v49  ;;  %v12873_v4 = vld [vmem:[#allocation10_spill] sm:$0xff]  ;;  %v12874_v30 = vld [vmem:[#allocation13_spill] sm:$0xff]  ;;  %v12876_v60 = vld [vmem:[#allocation15_spill] sm:$0xff] }
 0x2ba   :  { %v3608_v11 = vmul.f32 %v3576_v22, %v12873_v4  ;;  %v3609_v28 = vmul.f32 %v3577_v39, %v12874_v30  ;;  %v12875_v37 = vld [vmem:[#allocation14_spill] sm:$0xff]  ;;  %v3611_v35 = vmul.f32 %v3579_v36, %v12876_v60  ;;  %v12878_v16 = vld [vmem:[#allocation11_spill] sm:$0xff]  ;;  %v12880_v19 = vld [vmem:[#allocation57_spill] sm:$0xff]  ;;  %v9890_v4 = vadd.f32 0.0001, %v3588_v59 }
 0x2bb   :  { %v3610_v12 = vmul.f32 %v3578_v54, %v12875_v37  ;;  %v12877_v43 = vld [vmem:[#allocation2_spill] sm:$0xff]  ;;  %v3613_v41 = vmul.f32 %v3581_v55, %v12878_v16  ;;  %v12879_v47 = vld [vmem:[#allocation47_spill] sm:$0xff]  ;;  %v3615_v13 = vmul.f32 %v3583_v17, %v12880_v19  ;;  %v12881_v38 = vld [vmem:[#allocation48_spill] sm:$0xff]  ;;  %v9892_v39 = vadd.f32 0.0001, %v3589_v1 }
 0x2bc   :  { %v3612_v7 = vmul.f32 %v3580_v0, %v12877_v43  ;;  %v3614_v57 = vmul.f32 %v3582_v20, %v12879_v47  ;;  %v3616_v5 = vmul.f32 %v3584_v48, %v12881_v38  ;;  %v12882_v31 = vld [vmem:[#allocation49_spill] sm:$0xff]  ;;  %v12883_v49 = vld [vmem:[#allocation58_spill] sm:$0xff]  ;;  %v9895_v30 = vadd.f32 0.0001, %v3590_v63  ;;  %v12888_v63 = vld [vmem:[#allocation63_spill] sm:$0xff] }
 0x2bd   :  { %v3617_v15 = vmul.f32 %v3585_v25, %v12882_v31  ;;  %v3618_v22 = vmul.f32 %v3586_v27, %v12883_v49  ;;  %v12884_v54 = vld [vmem:[#allocation50_spill] sm:$0xff]  ;;  %v9897_v0 = vadd.f32 0.0001, %v3591_v56  ;;  %v9899_v55 = vadd.f32 0.0001, %v3592_v24  ;;  %v12885_v25 = vld [vmem:[#allocation101_spill] sm:$0xff] }
 0x2be   :  { %v3619_v36 = vmul.f32 %v3587_v21, %v12884_v54  ;;  %v9901_v20 = vadd.f32 0.0001, %v3593_v3  ;;  %v9903_v17 = vadd.f32 0.0001, %v3594_v9  ;;  %v9905_v48 = vadd.f32 0.0001, %v3595_v40 }
 0x2bf   :  { %v12886_v27 = vld [vmem:[#allocation162_spill] sm:$0xff]  ;;  %v9911_v1 = vadd.f32 0.0001, %v3596_v33  ;;  %v9913_v37 = vadd.f32 0.0001, %v3597_v32  ;;  %v12892_v60 = vld [vmem:[#allocation59_spill] sm:$0xff] }
 0x2c0   :  { %v9909_v59 = vadd.f32 %v12886_v27, %v12885_v25  ;;  %v9915_v21 = vadd.f32 0.0001, %v3598_v8  ;;  %v12889_v56 = vld [vmem:[#allocation166_spill] sm:$0xff]  ;;  %v9921_v3 = vadd.f32 0.0001, %v3599_v45  ;;  %v12898_v47 = vld [vmem:[#allocation75_spill] sm:$0xff] }
 0x2c1   :  { %v9919_v24 = vadd.f32 %v12889_v56, %v12888_v63  ;;  %v9923_v9 = vadd.f32 0.0001, %v3600_v62  ;;  %v9925_v40 = vadd.f32 0.0001, %v3601_v53  ;;  %v12893_v43 = vld [vmem:[#allocation134_spill] sm:$0xff]  ;;  %v12904_v31 = vld [vmem:[#allocation79_spill] sm:$0xff] }
 0x2c2   :  { %12887 = vst [vmem:[#allocation36_spill] sm:$0xff] %v9909_v59  ;;  %v9929_v16 = vadd.f32 %v12893_v43, %v12892_v60  ;;  %v9931_v33 = vadd.f32 0.0001, %v3602_v46  ;;  %v9933_v32 = vadd.f32 0.0001, %v3603_v23  ;;  %v12899_v19 = vld [vmem:[#allocation130_spill] sm:$0xff] }
 0x2c3   :  { %12890 = vst [vmem:[#allocation27_spill] sm:$0xff] %v9919_v24  ;;  %12891 = vst [vmem:[#allocation38_spill] sm:$0xff] %v9925_v40  ;;  %v9935_v8 = vadd.f32 0.0001, %v3604_v2  ;;  %v9939_v38 = vadd.f32 %v12899_v19, %v12898_v47  ;;  %v9941_v45 = vadd.f32 0.0001, %v3605_v52 }
 0x2c4   :  { %12894 = vst [vmem:[#allocation28_spill] sm:$0xff] %v9929_v16  ;;  %12895 = vst [vmem:[#allocation39_spill] sm:$0xff] %v9931_v33  ;;  %v9943_v62 = vadd.f32 0.0001, %v3606_v42  ;;  %v9945_v53 = vadd.f32 0.0001, %v3607_v10 }
 0x2c5   :  { %12896 = vst [vmem:[#allocation29_spill] sm:$0xff] %v9933_v32  ;;  %12897 = vst [vmem:[#allocation30_spill] sm:$0xff] %v9935_v8  ;;  %v12905_v49 = vld [vmem:[#allocation139_spill] sm:$0xff]  ;;  %v9951_v46 = vadd.f32 0.0001, %v3608_v11  ;;  %v12910_v43 = vld [vmem:[#allocation90_spill] sm:$0xff] }
 0x2c6   :  { %12900 = vst [vmem:[#allocation40_spill] sm:$0xff] %v9939_v38  ;;  %12901 = vst [vmem:[#allocation41_spill] sm:$0xff] %v9941_v45  ;;  %v9949_v54 = vadd.f32 %v12905_v49, %v12904_v31  ;;  %v9953_v23 = vadd.f32 0.0001, %v3609_v28  ;;  %v9955_v2 = vadd.f32 0.0001, %v3610_v12 }
 0x2c7   :  { %12902 = vst [vmem:[#allocation42_spill] sm:$0xff] %v9943_v62  ;;  %12903 = vst [vmem:[#allocation43_spill] sm:$0xff] %v9945_v53  ;;  %v12911_v60 = vld [vmem:[#allocation143_spill] sm:$0xff]  ;;  %v9961_v52 = vadd.f32 0.0001, %v3611_v35  ;;  %v12916_v47 = vld [vmem:[#allocation92_spill] sm:$0xff] }
 0x2c8   :  { %12906 = vst [vmem:[#allocation44_spill] sm:$0xff] %v9949_v54  ;;  %12907 = vst [vmem:[#allocation45_spill] sm:$0xff] %v9951_v46  ;;  %v9959_v19 = vadd.f32 %v12911_v60, %v12910_v43  ;;  %v9963_v42 = vadd.f32 0.0001, %v3612_v7  ;;  %v9965_v10 = vadd.f32 0.0001, %v3613_v41 }
 0x2c9   :  { %12908 = vst [vmem:[#allocation46_spill] sm:$0xff] %v9953_v23  ;;  %12909 = vst [vmem:[#allocation3_spill] sm:$0xff] %v9955_v2  ;;  %v12917_v56 = vld [vmem:[#allocation154_spill] sm:$0xff]  ;;  %v9971_v11 = vadd.f32 0.0001, %v3614_v57  ;;  %v12923_v63 = vld [vmem:[#allocation156_spill] sm:$0xff]  ;;  %v12931_v57 = vsub.f32 %v9570_v58, %v9589_v26  ;;  %v12938_v58 = vsub.f32 %v9579_v6, %v9629_v29 }
 0x2ca   :  { %12912 = vst [vmem:[#allocation16_spill] sm:$0xff] %v9959_v19  ;;  %12913 = vst [vmem:[#allocation4_spill] sm:$0xff] %v9961_v52  ;;  %v9969_v49 = vadd.f32 %v12917_v56, %v12916_v47  ;;  %v9973_v28 = vadd.f32 0.0001, %v3615_v13  ;;  %v9975_v12 = vadd.f32 0.0001, %v3616_v5  ;;  %v12932_v5 = vsub.f32 %v9572_v44, %v9599_v18 }
 0x2cb   :  { %12914 = vst [vmem:[#allocation5_spill] sm:$0xff] %v9963_v42  ;;  %12915 = vst [vmem:[#allocation6_spill] sm:$0xff] %v9965_v10  ;;  %v12922_v31 = vld [vmem:[#allocation98_spill] sm:$0xff]  ;;  %v9981_v35 = vadd.f32 0.0001, %v3617_v15  ;;  %v12929_v27 = vld [vmem:[#allocation149_spill] sm:$0xff]  ;;  %v12933_v15 = vsub.f32 %v9575_v50, %v9609_v34 }
 0x2cc   :  { %12918 = vst [vmem:[#allocation8_spill] sm:$0xff] %v9969_v49  ;;  %12919 = vst [vmem:[#allocation9_spill] sm:$0xff] %v9971_v11  ;;  %v9979_v60 = vadd.f32 %v12923_v63, %v12922_v31  ;;  %v9983_v7 = vadd.f32 0.0001, %v3618_v22  ;;  %v9985_v41 = vadd.f32 0.0001, %v3619_v36 }
 0x2cd   :  { %12920 = vst [vmem:[#allocation12_spill] sm:$0xff] %v9973_v28  ;;  %12921 = vst [vmem:[#allocation17_spill] sm:$0xff] %v9975_v12  ;;  %v12928_v43 = vld [vmem:[#allocation106_spill] sm:$0xff]  ;;  %v3652_v13 = vmul.f32 2.0, %v12931_v57  ;;  %v3653_v47 = vmul.f32 2.0, %v12932_v5  ;;  %v3654_v63 = vmul.f32 2.0, %v12933_v15 }
 0x2ce   :  { %12924 = vst [vmem:[#allocation18_spill] sm:$0xff] %v9979_v60  ;;  %12925 = vst [vmem:[#allocation19_spill] sm:$0xff] %v9981_v35  ;;  %v9989_v56 = vadd.f32 %v12929_v27, %v12928_v43  ;;  %v12934_v22 = vld [vmem:[#allocation107_spill] sm:$0xff]  ;;  %v12937_v27 = vsub.f32 %v9577_v61, %v9619_v14  ;;  %v3656_v26 = vmul.f32 2.0, %v12938_v58  ;;  %v12941_v5 = vld [vmem:[#allocation222_spill] sm:$0xff] }
 0x2cf   :  { %12926 = vst [vmem:[#allocation20_spill] sm:$0xff] %v9983_v7  ;;  %12927 = vst [vmem:[#allocation31_spill] sm:$0xff] %v9985_v41  ;;  %v12935_v31 = vld [vmem:[#allocation171_spill] sm:$0xff]  ;;  %v12944_v15 = vld [vmem:[#allocation213_spill] sm:$0xff]  ;;  %v3685_v32 = vadd.f32 0.0009, %v3653_v47 }
 0x2d0   :  { %12930 = vst [vmem:[#allocation23_spill] sm:$0xff] %v9989_v56  ;;  %v10002_v36 = vadd.f32 %v12935_v31, %v12934_v22  ;;  %v3655_v43 = vmul.f32 2.0, %v12937_v27  ;;  %v12939_v57 = vld [vmem:[#allocation195_spill] sm:$0xff]  ;;  %v12942_v56 = vld [vmem:[#allocation204_spill] sm:$0xff]  ;;  %v12948_v60 = vld [vmem:[#allocation209_spill] sm:$0xff] }
 0x2d1   :  { %v12940_v44 = vsub.f32 %v9581_v51, %v12939_v57  ;;  %v12943_v50 = vsub.f32 %v12941_v5, %v12942_v56  ;;  %v12945_v25 = vld [vmem:[#allocation216_spill] sm:$0xff]  ;;  %v12950_v27 = vld [vmem:[#allocation214_spill] sm:$0xff]  ;;  %v12951_v49 = vld [vmem:[#allocation219_spill] sm:$0xff] }
 0x2d2   :  { %12936 = vst [vmem:[#allocation62_spill] sm:$0xff] %v10002_v36  ;;  %v12946_v31 = vsub.f32 %v12944_v15, %v12945_v25  ;;  %v12947_v36 = vld [vmem:[#allocation223_spill] sm:$0xff]  ;;  %v12952_v6 = vsub.f32 %v12950_v27, %v12951_v49  ;;  %v12953_v58 = vld [vmem:[#allocation224_spill] sm:$0xff]  ;;  %v12954_v19 = vld [vmem:[#allocation210_spill] sm:$0xff] }
 0x2d3   :  { %v3657_v18 = vmul.f32 2.0, %v12940_v44  ;;  %v3658_v34 = vmul.f32 2.0, %v12943_v50  ;;  %v12949_v61 = vsub.f32 %v12947_v36, %v12948_v60  ;;  %v12955_v51 = vsub.f32 %v12953_v58, %v12954_v19  ;;  %v12956_v44 = vld [vmem:[#allocation215_spill] sm:$0xff]  ;;  %v12957_v54 = vld [vmem:[#allocation220_spill] sm:$0xff]  ;;  %v12963_v16 = vld [vmem:[#allocation221_spill] sm:$0xff] }
 0x2d4   :  { %v3659_v22 = vmul.f32 2.0, %v12946_v31  ;;  %v3661_v29 = vmul.f32 2.0, %v12952_v6  ;;  %v12958_v56 = vsub.f32 %v12956_v44, %v12957_v54  ;;  %v12959_v50 = vld [vmem:[#allocation227_spill] sm:$0xff]  ;;  %v12962_v15 = vld [vmem:[#allocation228_spill] sm:$0xff]  ;;  %v12966_v24 = vld [vmem:[#allocation225_spill] sm:$0xff] }
 0x2d5   :  { %v3660_v14 = vmul.f32 2.0, %v12949_v61  ;;  %v3662_v57 = vmul.f32 2.0, %v12955_v51  ;;  %v12960_v38 = vld [vmem:[#allocation211_spill] sm:$0xff]  ;;  %v12964_v60 = vsub.f32 %v12962_v15, %v12963_v16  ;;  %v12965_v61 = vld [vmem:[#allocation229_spill] sm:$0xff]  ;;  %v12968_v6 = vld [vmem:[#allocation230_spill] sm:$0xff] }
 0x2d6   :  { %v3663_v5 = vmul.f32 2.0, %v12958_v56  ;;  %v12961_v25 = vsub.f32 %v12959_v50, %v12960_v38  ;;  %v12967_v49 = vsub.f32 %v12965_v61, %v12966_v24  ;;  %v12969_v59 = vld [vmem:[#allocation226_spill] sm:$0xff]  ;;  %v12971_v51 = vld [vmem:[#allocation231_spill] sm:$0xff]  ;;  %v12972_v41 = vld [vmem:[#allocation212_spill] sm:$0xff]  ;;  %v3689_v33 = vadd.f32 0.0009, %v3657_v18 }
 0x2d7   :  { %v3665_v36 = vmul.f32 2.0, %v12964_v60  ;;  %v12970_v19 = vsub.f32 %v12968_v6, %v12969_v59  ;;  %v12973_v54 = vsub.f32 %v12971_v51, %v12972_v41  ;;  %v12974_v56 = vld [vmem:[#allocation197_spill] sm:$0xff]  ;;  %v12975_v7 = vld [vmem:[#allocation232_spill] sm:$0xff]  ;;  %v12980_v60 = vld [vmem:[#allocation199_spill] sm:$0xff]  ;;  %v10103_v18 = vmul.f32 %v3685_v32, %v9892_v39 }
 0x2d8   :  { %v3664_v31 = vmul.f32 2.0, %v12961_v25  ;;  %v3666_v27 = vmul.f32 2.0, %v12967_v49  ;;  %v12976_v38 = vsub.f32 %v12974_v56, %v12975_v7  ;;  %v12977_v25 = vld [vmem:[#allocation198_spill] sm:$0xff]  ;;  %v12978_v35 = vld [vmem:[#allocation233_spill] sm:$0xff]  ;;  %v12983_v49 = vld [vmem:[#allocation200_spill] sm:$0xff] }
 0x2d9   :  { %v3667_v58 = vmul.f32 2.0, %v12970_v19  ;;  %v3668_v44 = vmul.f32 2.0, %v12973_v54  ;;  %v12979_v16 = vsub.f32 %v12977_v25, %v12978_v35  ;;  %v12981_v12 = vld [vmem:[#allocation234_spill] sm:$0xff]  ;;  %v12984_v28 = vld [vmem:[#allocation235_spill] sm:$0xff]  ;;  %v12986_v19 = vld [vmem:[#allocation201_spill] sm:$0xff]  ;;  %13024 = vst [vmem:[#allocation64_spill] sm:$0xff] %v10103_v18 }
 0x2da   :  { %v3669_v50 = vmul.f32 2.0, %v12976_v38  ;;  %v12982_v24 = vsub.f32 %v12980_v60, %v12981_v12  ;;  %v12985_v59 = vsub.f32 %v12983_v49, %v12984_v28  ;;  %v12987_v11 = vld [vmem:[#allocation236_spill] sm:$0xff]  ;;  %v12989_v54 = vld [vmem:[#allocation194_spill] sm:$0xff]  ;;  %v12990_v10 = vld [vmem:[#allocation237_spill] sm:$0xff] }
 0x2db   :  { %v3670_v15 = vmul.f32 2.0, %v12979_v16  ;;  %v12988_v41 = vsub.f32 %v12986_v19, %v12987_v11  ;;  %v12991_v7 = vsub.f32 %v12989_v54, %v12990_v10  ;;  %v12992_v38 = vld [vmem:[#allocation196_spill] sm:$0xff]  ;;  %v12993_v42 = vld [vmem:[#allocation238_spill] sm:$0xff]  ;;  %v12996_v52 = vld [vmem:[#allocation239_spill] sm:$0xff] }
 0x2dc   :  { %v3671_v61 = vmul.f32 2.0, %v12982_v24  ;;  %v3672_v6 = vmul.f32 2.0, %v12985_v59  ;;  %v12994_v35 = vsub.f32 %v12992_v38, %v12993_v42  ;;  %v12995_v16 = vld [vmem:[#allocation202_spill] sm:$0xff]  ;;  %v12998_v24 = vld [vmem:[#allocation203_spill] sm:$0xff]  ;;  %v12999_v2 = vld [vmem:[#allocation240_spill] sm:$0xff] }
 0x2dd   :  { %v3673_v51 = vmul.f32 2.0, %v12988_v41  ;;  %v3674_v56 = vmul.f32 2.0, %v12991_v7  ;;  %v12997_v12 = vsub.f32 %v12995_v16, %v12996_v52  ;;  %v13000_v28 = vsub.f32 %v12998_v24, %v12999_v2  ;;  %v13001_v59 = vld [vmem:[#allocation205_spill] sm:$0xff]  ;;  %v13004_v41 = vld [vmem:[#allocation206_spill] sm:$0xff]  ;;  %v13007_v7 = vld [vmem:[#allocation207_spill] sm:$0xff] }
 0x2de   :  { %v3675_v25 = vmul.f32 2.0, %v12994_v35  ;;  %v13002_v23 = vld [vmem:[#allocation21_spill] sm:$0xff]  ;;  %v13008_v53 = vld [vmem:[#allocation22_spill] sm:$0xff]  ;;  %v13011_v62 = vld [vmem:[#allocation32_spill] sm:$0xff] }
 0x2df   :  { %v3676_v60 = vmul.f32 2.0, %v12997_v12  ;;  %v3677_v49 = vmul.f32 2.0, %v13000_v28  ;;  %v13003_v11 = vsub.f32 %v13001_v59, %v13002_v23  ;;  %v13005_v46 = vld [vmem:[#allocation241_spill] sm:$0xff]  ;;  %v13009_v42 = vsub.f32 %v13007_v7, %v13008_v53  ;;  %v13013_v45 = vld [vmem:[#allocation208_spill] sm:$0xff]  ;;  %v13014_v2 = vld [vmem:[#allocation242_spill] sm:$0xff] }
 0x2e0   :  { %v13006_v10 = vsub.f32 %v13004_v41, %v13005_v46  ;;  %v13010_v35 = vld [vmem:[#allocation217_spill] sm:$0xff]  ;;  %v3684_v12 = vadd.f32 0.0009, %v3652_v13  ;;  %v13015_v24 = vsub.f32 %v13013_v45, %v13014_v2  ;;  %v13016_v8 = vld [vmem:[#allocation218_spill] sm:$0xff]  ;;  %v3686_v46 = vadd.f32 0.0009, %v3654_v63 }
 0x2e1   :  { %v3678_v19 = vmul.f32 2.0, %v13003_v11  ;;  %v3680_v38 = vmul.f32 2.0, %v13009_v42  ;;  %v13012_v52 = vsub.f32 %v13010_v35, %v13011_v62  ;;  %v13017_v23 = vld [vmem:[#allocation33_spill] sm:$0xff]  ;;  %v3687_v41 = vadd.f32 0.0009, %v3655_v43  ;;  %v13019_v53 = vld [vmem:[#allocation108_spill] sm:$0xff] }
 0x2e2   :  { %v3679_v54 = vmul.f32 2.0, %v13006_v10  ;;  %v3682_v28 = vmul.f32 2.0, %v13015_v24  ;;  %v13018_v59 = vsub.f32 %v13016_v8, %v13017_v23  ;;  %v3688_v10 = vadd.f32 0.0009, %v3656_v26  ;;  %v13020_v7 = vld [vmem:[#allocation172_spill] sm:$0xff]  ;;  %v13022_v40 = vld [vmem:[#allocation173_spill] sm:$0xff] }
 0x2e3   :  { %v3681_v16 = vmul.f32 2.0, %v13012_v52  ;;  %v10093_v42 = vadd.f32 %v13020_v7, %v13019_v53  ;;  %v3690_v62 = vadd.f32 0.0009, %v3658_v34  ;;  %v3691_v35 = vadd.f32 0.0009, %v3659_v22  ;;  %v13021_v52 = vld [vmem:[#allocation109_spill] sm:$0xff] }
 0x2e4   :  { %v3683_v11 = vmul.f32 2.0, %v13018_v59  ;;  %v3692_v13 = vadd.f32 0.0009, %v3660_v14  ;;  %v10097_v45 = vadd.f32 %v13022_v40, %v13021_v52  ;;  %v3693_v2 = vadd.f32 0.0009, %v3661_v29  ;;  %v13112_v18 = vld [vmem:[#allocation36_spill] sm:$0xff] }
 0x2e5   :  { %v3694_v24 = vadd.f32 0.0009, %v3662_v57  ;;  %v3695_v8 = vadd.f32 0.0009, %v3663_v5  ;;  %v10100_v47 = vmul.f32 %v3684_v12, %v9890_v4  ;;  %v3696_v63 = vadd.f32 0.0009, %v3664_v31 }
 0x2e6   :  { %v3697_v43 = vadd.f32 0.0009, %v3665_v36  ;;  %v3698_v26 = vadd.f32 0.0009, %v3666_v27  ;;  %v3699_v23 = vadd.f32 0.0009, %v3667_v58  ;;  %v10106_v14 = vmul.f32 %v3686_v46, %v9895_v30 }
 0x2e7   :  { %13023 = vst [vmem:[#allocation54_spill] sm:$0xff] %v10100_v47  ;;  %v3700_v34 = vadd.f32 0.0009, %v3668_v44  ;;  %v3701_v22 = vadd.f32 0.0009, %v3669_v50  ;;  %v10109_v57 = vmul.f32 %v3687_v41, %v9897_v0  ;;  %v10112_v36 = vmul.f32 %v3688_v10, %v9899_v55  ;;  %v13050_v12 = vld [vmem:[#allocation45_spill] sm:$0xff] }
 0x2e8   :  { %13025 = vst [vmem:[#allocation55_spill] sm:$0xff] %v10106_v14  ;;  %v3702_v59 = vadd.f32 0.0009, %v3670_v15  ;;  %v3703_v40 = vadd.f32 0.0009, %v3671_v61  ;;  %v10115_v58 = vmul.f32 %v3689_v33, %v9901_v20  ;;  %v10118_v15 = vmul.f32 %v3690_v62, %v9903_v17  ;;  %v13054_v41 = vld [vmem:[#allocation3_spill] sm:$0xff] }
 0x2e9   :  { %v3704_v29 = vadd.f32 0.0009, %v3672_v6  ;;  %13026 = vst [vmem:[#allocation65_spill] sm:$0xff] %v10109_v57  ;;  %v3705_v4 = vadd.f32 0.0009, %v3673_v51  ;;  %13027 = vst [vmem:[#allocation56_spill] sm:$0xff] %v10112_v36  ;;  %v10121_v6 = vmul.f32 %v3691_v35, %v9905_v48  ;;  %v10124_v55 = vmul.f32 %v3692_v13, %v9911_v1 }
 0x2ea   :  { %v3706_v5 = vadd.f32 0.0009, %v3674_v56  ;;  %v3707_v31 = vadd.f32 0.0009, %v3675_v25  ;;  %v3708_v39 = vadd.f32 0.0009, %v3676_v60  ;;  %v10127_v51 = vmul.f32 %v3693_v2, %v9913_v37 }
 0x2eb   :  { %v3709_v32 = vadd.f32 0.0009, %v3677_v49  ;;  %v3710_v27 = vadd.f32 0.0009, %v3678_v19  ;;  %13028 = vst [vmem:[#allocation66_spill] sm:$0xff] %v10115_v58  ;;  %13029 = vst [vmem:[#allocation67_spill] sm:$0xff] %v10118_v15  ;;  %v10130_v20 = vmul.f32 %v3694_v24, %v9915_v21  ;;  %v10133_v33 = vmul.f32 %v3695_v8, %v9921_v3 }
 0x2ec   :  { %v3711_v30 = vadd.f32 0.0009, %v3679_v54  ;;  %v3712_v44 = vadd.f32 0.0009, %v3680_v38  ;;  %v3713_v50 = vadd.f32 0.0009, %v3681_v16  ;;  %v10136_v17 = vmul.f32 %v3696_v63, %v9923_v9 }
 0x2ed   :  { %v3714_v0 = vadd.f32 0.0009, %v3682_v28  ;;  %v3715_v61 = vadd.f32 0.0009, %v3683_v11  ;;  %13030 = vst [vmem:[#allocation68_spill] sm:$0xff] %v10121_v6  ;;  %13031 = vst [vmem:[#allocation69_spill] sm:$0xff] %v10124_v55  ;;  %v10160_v28 = vmul.f32 %v3704_v29, %v13050_v12  ;;  %v10166_v10 = vmul.f32 %v3706_v5, %v13054_v41 }
 0x2ee   :  { %13032 = vst [vmem:[#allocation70_spill] sm:$0xff] %v10127_v51  ;;  %13033 = vst [vmem:[#allocation71_spill] sm:$0xff] %v10130_v20  ;;  %v13036_v56 = vld [vmem:[#allocation38_spill] sm:$0xff]  ;;  %v13038_v48 = vld [vmem:[#allocation39_spill] sm:$0xff]  ;;  %v10234_v47 = vadd.f32 0.0001, %v13112_v18 }
 0x2ef   :  { %13034 = vst [vmem:[#allocation72_spill] sm:$0xff] %v10133_v33  ;;  %13035 = vst [vmem:[#allocation24_spill] sm:$0xff] %v10136_v17  ;;  %v10139_v25 = vmul.f32 %v3697_v43, %v13036_v56  ;;  %v10142_v60 = vmul.f32 %v3698_v26, %v13038_v48  ;;  %v13040_v1 = vld [vmem:[#allocation29_spill] sm:$0xff]  ;;  %v13042_v37 = vld [vmem:[#allocation30_spill] sm:$0xff] }
 0x2f0   :  { %v10145_v49 = vmul.f32 %v3699_v23, %v13040_v1  ;;  %v10148_v19 = vmul.f32 %v3700_v34, %v13042_v37  ;;  %v13044_v21 = vld [vmem:[#allocation41_spill] sm:$0xff]  ;;  %v13046_v3 = vld [vmem:[#allocation42_spill] sm:$0xff]  ;;  %v13048_v9 = vld [vmem:[#allocation43_spill] sm:$0xff]  ;;  %13051 = vst [vmem:[#allocation13_spill] sm:$0xff] %v10160_v28 }
 0x2f1   :  { %13037 = vst [vmem:[#allocation34_spill] sm:$0xff] %v10139_v25  ;;  %13039 = vst [vmem:[#allocation7_spill] sm:$0xff] %v10142_v60  ;;  %v10151_v54 = vmul.f32 %v3701_v22, %v13044_v21  ;;  %v10154_v38 = vmul.f32 %v3702_v59, %v13046_v3  ;;  %v10157_v16 = vmul.f32 %v3703_v40, %v13048_v9  ;;  %v13052_v11 = vld [vmem:[#allocation46_spill] sm:$0xff]  ;;  %v13056_v62 = vld [vmem:[#allocation4_spill] sm:$0xff] }
 0x2f2   :  { %13041 = vst [vmem:[#allocation25_spill] sm:$0xff] %v10145_v49  ;;  %13043 = vst [vmem:[#allocation35_spill] sm:$0xff] %v10148_v19  ;;  %v10163_v46 = vmul.f32 %v3705_v4, %v13052_v11  ;;  %v10169_v35 = vmul.f32 %v3707_v31, %v13056_v62  ;;  %v13058_v13 = vld [vmem:[#allocation5_spill] sm:$0xff]  ;;  %v13060_v24 = vld [vmem:[#allocation6_spill] sm:$0xff] }
 0x2f3   :  { %13045 = vst [vmem:[#allocation37_spill] sm:$0xff] %v10151_v54  ;;  %13047 = vst [vmem:[#allocation26_spill] sm:$0xff] %v10154_v38  ;;  %v10172_v2 = vmul.f32 %v3708_v39, %v13058_v13  ;;  %v10175_v8 = vmul.f32 %v3709_v32, %v13060_v24  ;;  %v13062_v40 = vld [vmem:[#allocation9_spill] sm:$0xff]  ;;  %v13064_v43 = vld [vmem:[#allocation12_spill] sm:$0xff] }
 0x2f4   :  { %13049 = vst [vmem:[#allocation10_spill] sm:$0xff] %v10157_v16  ;;  %13053 = vst [vmem:[#allocation14_spill] sm:$0xff] %v10163_v46  ;;  %v10178_v63 = vmul.f32 %v3710_v27, %v13062_v40  ;;  %v10181_v26 = vmul.f32 %v3711_v30, %v13064_v43  ;;  %v13066_v23 = vld [vmem:[#allocation17_spill] sm:$0xff]  ;;  %v13068_v22 = vld [vmem:[#allocation19_spill] sm:$0xff] }
 0x2f5   :  { %13055 = vst [vmem:[#allocation15_spill] sm:$0xff] %v10166_v10  ;;  %13057 = vst [vmem:[#allocation2_spill] sm:$0xff] %v10169_v35  ;;  %v10184_v34 = vmul.f32 %v3712_v44, %v13066_v23  ;;  %v10187_v59 = vmul.f32 %v3713_v50, %v13068_v22  ;;  %v13070_v29 = vld [vmem:[#allocation20_spill] sm:$0xff]  ;;  %v13072_v5 = vld [vmem:[#allocation31_spill] sm:$0xff] }
 0x2f6   :  { %13059 = vst [vmem:[#allocation11_spill] sm:$0xff] %v10172_v2  ;;  %13061 = vst [vmem:[#allocation47_spill] sm:$0xff] %v10175_v8  ;;  %v10190_v4 = vmul.f32 %v3714_v0, %v13070_v29  ;;  %v10193_v31 = vmul.f32 %v3715_v61, %v13072_v5  ;;  %v13074_v39 = vld [vmem:[#allocation110_spill] sm:$0xff]  ;;  %v13076_v27 = vld [vmem:[#allocation111_spill] sm:$0xff] }
 0x2f7   :  { %13063 = vst [vmem:[#allocation57_spill] sm:$0xff] %v10178_v63  ;;  %13065 = vst [vmem:[#allocation48_spill] sm:$0xff] %v10181_v26  ;;  %v13075_v32 = vld [vmem:[#allocation174_spill] sm:$0xff]  ;;  %v13077_v48 = vld [vmem:[#allocation175_spill] sm:$0xff] }
 0x2f8   :  { %13067 = vst [vmem:[#allocation49_spill] sm:$0xff] %v10184_v34  ;;  %13069 = vst [vmem:[#allocation58_spill] sm:$0xff] %v10187_v59  ;;  %v3760_v56 = vadd.f32 %v13075_v32, %v13074_v39  ;;  %v3761_v1 = vadd.f32 %v13077_v48, %v13076_v27  ;;  %v13078_v30 = vld [vmem:[#allocation112_spill] sm:$0xff]  ;;  %v13080_v44 = vld [vmem:[#allocation113_spill] sm:$0xff] }
 0x2f9   :  { %13071 = vst [vmem:[#allocation50_spill] sm:$0xff] %v10190_v4  ;;  %13073 = vst [vmem:[#allocation195_spill] sm:$0xff] %v10193_v31  ;;  %v13079_v37 = vld [vmem:[#allocation176_spill] sm:$0xff]  ;;  %v13081_v3 = vld [vmem:[#allocation177_spill] sm:$0xff] }
 0x2fa   :  { %v3762_v21 = vadd.f32 %v13079_v37, %v13078_v30  ;;  %v3763_v9 = vadd.f32 %v13081_v3, %v13080_v44  ;;  %v13082_v50 = vld [vmem:[#allocation114_spill] sm:$0xff]  ;;  %v13084_v0 = vld [vmem:[#allocation115_spill] sm:$0xff]  ;;  %v13086_v61 = vld [vmem:[#allocation116_spill] sm:$0xff]  ;;  %13113 = vst [vmem:[#allocation222_spill] sm:$0xff] %v10234_v47 }
 0x2fb   :  { %v13083_v12 = vld [vmem:[#allocation178_spill] sm:$0xff]  ;;  %v13085_v41 = vld [vmem:[#allocation179_spill] sm:$0xff]  ;;  %v13087_v13 = vld [vmem:[#allocation180_spill] sm:$0xff] }
 0x2fc   :  { %v3764_v11 = vadd.f32 %v13083_v12, %v13082_v50  ;;  %v3765_v62 = vadd.f32 %v13085_v41, %v13084_v0  ;;  %v3766_v24 = vadd.f32 %v13087_v13, %v13086_v61  ;;  %v13088_v40 = vld [vmem:[#allocation117_spill] sm:$0xff]  ;;  %v13090_v22 = vld [vmem:[#allocation118_spill] sm:$0xff]  ;;  %v13092_v31 = vld [vmem:[#allocation119_spill] sm:$0xff] }
 0x2fd   :  { %v13089_v43 = vld [vmem:[#allocation181_spill] sm:$0xff]  ;;  %v13091_v29 = vld [vmem:[#allocation182_spill] sm:$0xff]  ;;  %v13093_v4 = vld [vmem:[#allocation183_spill] sm:$0xff] }
 0x2fe   :  { %v3767_v23 = vadd.f32 %v13089_v43, %v13088_v40  ;;  %v3768_v5 = vadd.f32 %v13091_v29, %v13090_v22  ;;  %v3769_v59 = vadd.f32 %v13093_v4, %v13092_v31  ;;  %v13094_v34 = vld [vmem:[#allocation120_spill] sm:$0xff]  ;;  %v13096_v8 = vld [vmem:[#allocation121_spill] sm:$0xff]  ;;  %v13098_v10 = vld [vmem:[#allocation122_spill] sm:$0xff] }
 0x2ff   :  { %v13095_v26 = vld [vmem:[#allocation184_spill] sm:$0xff]  ;;  %v13097_v2 = vld [vmem:[#allocation185_spill] sm:$0xff]  ;;  %v13099_v46 = vld [vmem:[#allocation186_spill] sm:$0xff] }
 0x300   :  { %v3770_v63 = vadd.f32 %v13095_v26, %v13094_v34  ;;  %v3771_v35 = vadd.f32 %v13097_v2, %v13096_v8  ;;  %v3772_v28 = vadd.f32 %v13099_v46, %v13098_v10  ;;  %v13100_v16 = vld [vmem:[#allocation123_spill] sm:$0xff]  ;;  %v13102_v19 = vld [vmem:[#allocation124_spill] sm:$0xff]  ;;  %v13104_v25 = vld [vmem:[#allocation125_spill] sm:$0xff] }
 0x301   :  { %v13101_v38 = vld [vmem:[#allocation187_spill] sm:$0xff]  ;;  %v13103_v49 = vld [vmem:[#allocation188_spill] sm:$0xff]  ;;  %v13105_v17 = vld [vmem:[#allocation189_spill] sm:$0xff] }
 0x302   :  { %v3773_v54 = vadd.f32 %v13101_v38, %v13100_v16  ;;  %v3774_v60 = vadd.f32 %v13103_v49, %v13102_v19  ;;  %v3775_v33 = vadd.f32 %v13105_v17, %v13104_v25  ;;  %v13106_v20 = vld [vmem:[#allocation126_spill] sm:$0xff]  ;;  %v13108_v6 = vld [vmem:[#allocation127_spill] sm:$0xff]  ;;  %v13110_v36 = vld [vmem:[#allocation128_spill] sm:$0xff] }
 0x303   :  { %v13107_v51 = vld [vmem:[#allocation190_spill] sm:$0xff]  ;;  %v13109_v15 = vld [vmem:[#allocation191_spill] sm:$0xff]  ;;  %v13111_v57 = vld [vmem:[#allocation192_spill] sm:$0xff] }
 0x304   :  { %v3776_v55 = vadd.f32 %v13107_v51, %v13106_v20  ;;  %v3777_v58 = vadd.f32 %v13109_v15, %v13108_v6  ;;  %v3778_v14 = vadd.f32 %v13111_v57, %v13110_v36  ;;  %v13114_v46 = vld [vmem:[#allocation27_spill] sm:$0xff]  ;;  %v13116_v16 = vld [vmem:[#allocation129_spill] sm:$0xff]  ;;  %v13118_v10 = vld [vmem:[#allocation28_spill] sm:$0xff] }
 0x305   :  { %v10237_v38 = vadd.f32 0.0001, %v13114_v46  ;;  %v13117_v49 = vld [vmem:[#allocation193_spill] sm:$0xff]  ;;  %v10242_v17 = vadd.f32 0.0001, %v13118_v10  ;;  %v13120_v25 = vld [vmem:[#allocation40_spill] sm:$0xff] }
 0x306   :  { %v3779_v19 = vadd.f32 %v13117_v49, %v13116_v16  ;;  %v10245_v51 = vadd.f32 0.0001, %v13120_v25  ;;  %v13122_v20 = vld [vmem:[#allocation44_spill] sm:$0xff]  ;;  %v13128_v46 = vld [vmem:[#allocation18_spill] sm:$0xff]  ;;  %v13131_v49 = vld [vmem:[#allocation101_spill] sm:$0xff] }
 0x307   :  { %13115 = vst [vmem:[#allocation204_spill] sm:$0xff] %v10237_v38  ;;  %13119 = vst [vmem:[#allocation213_spill] sm:$0xff] %v10242_v17  ;;  %v10248_v15 = vadd.f32 0.0001, %v13122_v20  ;;  %v13124_v6 = vld [vmem:[#allocation16_spill] sm:$0xff]  ;;  %v13130_v36 = vld [vmem:[#allocation94_spill] sm:$0xff] }
 0x308   :  { %13121 = vst [vmem:[#allocation216_spill] sm:$0xff] %v10245_v51  ;;  %v10251_v57 = vadd.f32 0.0001, %v13124_v6  ;;  %v13126_v18 = vld [vmem:[#allocation8_spill] sm:$0xff]  ;;  %v10257_v38 = vadd.f32 0.0001, %v13128_v46  ;;  %v13132_v16 = vsub.f32 %v13130_v36, %v13131_v49 }
 0x309   :  { %13123 = vst [vmem:[#allocation223_spill] sm:$0xff] %v10248_v15  ;;  %v10254_v47 = vadd.f32 0.0001, %v13126_v18  ;;  %v13133_v10 = vld [vmem:[#allocation158_spill] sm:$0xff]  ;;  %v13136_v51 = vld [vmem:[#allocation23_spill] sm:$0xff]  ;;  %v13141_v18 = vld [vmem:[#allocation85_spill] sm:$0xff] }
 0x30a   :  { %13125 = vst [vmem:[#allocation209_spill] sm:$0xff] %v10251_v57  ;;  %13129 = vst [vmem:[#allocation219_spill] sm:$0xff] %v10257_v38  ;;  %v13134_v17 = vld [vmem:[#allocation162_spill] sm:$0xff]  ;;  %v10266_v8 = vadd.f32 0.0001, %v13136_v51 }
 0x30b   :  { %13127 = vst [vmem:[#allocation214_spill] sm:$0xff] %v10254_v47  ;;  %v13135_v2 = vsub.f32 %v13133_v10, %v13134_v17  ;;  %v13138_v20 = vld [vmem:[#allocation62_spill] sm:$0xff]  ;;  %v10272_v6 = vadd.f32 0.0001, %v10093_v42  ;;  %v13142_v47 = vld [vmem:[#allocation63_spill] sm:$0xff] }
 0x30c   :  { %13137 = vst [vmem:[#allocation224_spill] sm:$0xff] %v10266_v8  ;;  %v10269_v15 = vadd.f32 0.0001, %v13138_v20  ;;  %v13143_v46 = vsub.f32 %v13141_v18, %v13142_v47  ;;  %v13144_v38 = vld [vmem:[#allocation150_spill] sm:$0xff]  ;;  %v10281_v49 = vadd.f32 0.0001, %v10097_v45 }
 0x30d   :  { %v3812_v25 = vadd.f32 %v13135_v2, %v13132_v16  ;;  %13140 = vst [vmem:[#allocation215_spill] sm:$0xff] %v10272_v6  ;;  %v13145_v57 = vld [vmem:[#allocation166_spill] sm:$0xff]  ;;  %v10283_v17 = vadd.f32 0.0001, %v3760_v56  ;;  %v10285_v51 = vadd.f32 0.0001, %v3761_v1 }
 0x30e   :  { %13139 = vst [vmem:[#allocation210_spill] sm:$0xff] %v10269_v15  ;;  %v13146_v26 = vsub.f32 %v13144_v38, %v13145_v57  ;;  %v13148_v16 = vld [vmem:[#allocation95_spill] sm:$0xff]  ;;  %v13151_v20 = vld [vmem:[#allocation160_spill] sm:$0xff]  ;;  %v13152_v42 = vld [vmem:[#allocation134_spill] sm:$0xff]  ;;  %v10293_v8 = vadd.f32 0.0001, %v3762_v21 }
 0x30f   :  { %13147 = vst [vmem:[#allocation220_spill] sm:$0xff] %v10285_v51  ;;  %v13149_v2 = vld [vmem:[#allocation59_spill] sm:$0xff]  ;;  %v13153_v6 = vsub.f32 %v13151_v20, %v13152_v42  ;;  %v10295_v47 = vadd.f32 0.0001, %v3763_v9  ;;  %v10297_v57 = vadd.f32 0.0001, %v3764_v11 }
 0x310   :  { %v3813_v36 = vadd.f32 %v13146_v26, %v13143_v46  ;;  %v13150_v10 = vsub.f32 %v13148_v16, %v13149_v2  ;;  %v13155_v38 = vld [vmem:[#allocation86_spill] sm:$0xff]  ;;  %v13156_v45 = vld [vmem:[#allocation75_spill] sm:$0xff]  ;;  %v10305_v51 = vadd.f32 0.0001, %v3765_v62  ;;  %v10307_v16 = vadd.f32 0.0001, %v3766_v24 }
 0x311   :  { %13154 = vst [vmem:[#allocation227_spill] sm:$0xff] %v10297_v57  ;;  %v13157_v26 = vsub.f32 %v13155_v38, %v13156_v45  ;;  %v13158_v56 = vld [vmem:[#allocation151_spill] sm:$0xff]  ;;  %v13159_v18 = vld [vmem:[#allocation130_spill] sm:$0xff]  ;;  %v10309_v2 = vadd.f32 0.0001, %v3767_v23  ;;  %v13165_v9 = vld [vmem:[#allocation161_spill] sm:$0xff] }
 0x312   :  { %v3814_v15 = vadd.f32 %v13153_v6, %v13150_v10  ;;  %v13160_v1 = vsub.f32 %v13158_v56, %v13159_v18  ;;  %v13162_v6 = vld [vmem:[#allocation96_spill] sm:$0xff]  ;;  %v13163_v21 = vld [vmem:[#allocation79_spill] sm:$0xff]  ;;  %v10317_v57 = vadd.f32 0.0001, %v3768_v5  ;;  %v10319_v38 = vadd.f32 0.0001, %v3769_v59 }
 0x313   :  { %13161 = vst [vmem:[#allocation211_spill] sm:$0xff] %v10309_v2  ;;  %v13164_v10 = vsub.f32 %v13162_v6, %v13163_v21  ;;  %v13166_v20 = vld [vmem:[#allocation139_spill] sm:$0xff]  ;;  %v10321_v45 = vadd.f32 0.0001, %v3770_v63  ;;  %v13170_v62 = vld [vmem:[#allocation90_spill] sm:$0xff]  ;;  %v13172_v24 = vld [vmem:[#allocation152_spill] sm:$0xff] }
 0x314   :  { %v3815_v46 = vadd.f32 %v13160_v1, %v13157_v26  ;;  %v13167_v11 = vsub.f32 %v13165_v9, %v13166_v20  ;;  %v13169_v26 = vld [vmem:[#allocation87_spill] sm:$0xff]  ;;  %v10329_v2 = vadd.f32 0.0001, %v3771_v35  ;;  %v10331_v6 = vadd.f32 0.0001, %v3772_v28  ;;  %v13177_v5 = vld [vmem:[#allocation92_spill] sm:$0xff] }
 0x315   :  { %13168 = vst [vmem:[#allocation228_spill] sm:$0xff] %v10321_v45  ;;  %v13171_v56 = vsub.f32 %v13169_v26, %v13170_v62  ;;  %v13173_v18 = vld [vmem:[#allocation143_spill] sm:$0xff]  ;;  %v10333_v21 = vadd.f32 0.0001, %v3773_v54  ;;  %v13180_v20 = vld [vmem:[#allocation154_spill] sm:$0xff]  ;;  %v13188_v28 = vld [vmem:[#allocation164_spill] sm:$0xff] }
 0x316   :  { %v3816_v42 = vadd.f32 %v13167_v11, %v13164_v10  ;;  %v13174_v23 = vsub.f32 %v13172_v24, %v13173_v18  ;;  %v13176_v10 = vld [vmem:[#allocation99_spill] sm:$0xff]  ;;  %v10341_v45 = vadd.f32 0.0001, %v3774_v60  ;;  %v10343_v26 = vadd.f32 0.0001, %v3775_v33  ;;  %v13186_v35 = vld [vmem:[#allocation98_spill] sm:$0xff] }
 0x317   :  { %13175 = vst [vmem:[#allocation221_spill] sm:$0xff] %v10333_v21  ;;  %v13178_v9 = vsub.f32 %v13176_v10, %v13177_v5  ;;  %v13179_v59 = vld [vmem:[#allocation163_spill] sm:$0xff]  ;;  %v10345_v62 = vadd.f32 0.0001, %v3776_v55  ;;  %v13189_v18 = vld [vmem:[#allocation156_spill] sm:$0xff]  ;;  %v13195_v60 = vld [vmem:[#allocation106_spill] sm:$0xff] }
 0x318   :  { %v3817_v1 = vadd.f32 %v13174_v23, %v13171_v56  ;;  %v13181_v63 = vsub.f32 %v13179_v59, %v13180_v20  ;;  %13182 = vst [vmem:[#allocation229_spill] sm:$0xff] %v10341_v45  ;;  %13183 = vst [vmem:[#allocation225_spill] sm:$0xff] %v10343_v26  ;;  %v13185_v56 = vld [vmem:[#allocation100_spill] sm:$0xff]  ;;  %v13190_v54 = vsub.f32 %v13188_v28, %v13189_v18  ;;  %v10353_v21 = vadd.f32 0.0001, %v3777_v58  ;;  %v13197_v33 = vld [vmem:[#allocation165_spill] sm:$0xff] }
 0x319   :  { %13184 = vst [vmem:[#allocation230_spill] sm:$0xff] %v10345_v62  ;;  %v13187_v24 = vsub.f32 %v13185_v56, %v13186_v35  ;;  %v10355_v10 = vadd.f32 0.0001, %v3778_v14  ;;  %v10357_v5 = vadd.f32 0.0001, %v3779_v19  ;;  %v13198_v20 = vld [vmem:[#allocation149_spill] sm:$0xff] }
 0x31a   :  { %v3818_v11 = vadd.f32 %v13181_v63, %v13178_v9  ;;  %13191 = vst [vmem:[#allocation226_spill] sm:$0xff] %v10353_v21  ;;  %v13194_v9 = vld [vmem:[#allocation102_spill] sm:$0xff]  ;;  %v13199_v55 = vsub.f32 %v13197_v33, %v13198_v20  ;;  %v13200_v62 = vld [vmem:[#allocation103_spill] sm:$0xff]  ;;  %v13206_v58 = vld [vmem:[#allocation52_spill] sm:$0xff] }
 0x31b   :  { %v3819_v23 = vadd.f32 %v13190_v54, %v13187_v24  ;;  %13192 = vst [vmem:[#allocation231_spill] sm:$0xff] %v10355_v10  ;;  %13193 = vst [vmem:[#allocation212_spill] sm:$0xff] %v10357_v5  ;;  %v13196_v59 = vsub.f32 %v13194_v9, %v13195_v60  ;;  %v13201_v26 = vld [vmem:[#allocation107_spill] sm:$0xff]  ;;  %v13207_v14 = vsub.f32 %v13206_v58, %v13019_v53  ;;  %v13208_v18 = vld [vmem:[#allocation168_spill] sm:$0xff] }
 0x31c   :  { %v13202_v56 = vsub.f32 %v13200_v62, %v13201_v26  ;;  %v13203_v35 = vld [vmem:[#allocation167_spill] sm:$0xff]  ;;  %v13209_v19 = vsub.f32 %v13208_v18, %v13020_v7  ;;  %v13210_v5 = vld [vmem:[#allocation61_spill] sm:$0xff]  ;;  %v13217_v62 = vld [vmem:[#allocation138_spill] sm:$0xff] }
 0x31d   :  { %v3820_v63 = vadd.f32 %v13199_v55, %v13196_v59  ;;  %v13204_v45 = vld [vmem:[#allocation171_spill] sm:$0xff]  ;;  %v13211_v9 = vsub.f32 %v13210_v5, %v13021_v52  ;;  %v13212_v60 = vld [vmem:[#allocation133_spill] sm:$0xff]  ;;  %v13225_v5 = vld [vmem:[#allocation136_spill] sm:$0xff] }
 0x31e   :  { %v13205_v28 = vsub.f32 %v13203_v35, %v13204_v45  ;;  %v3822_v54 = vadd.f32 %v13209_v19, %v13207_v14  ;;  %v13213_v33 = vld [vmem:[#allocation173_spill] sm:$0xff]  ;;  %v13218_v45 = vsub.f32 %v13217_v62, %v13075_v32  ;;  %v13223_v14 = vld [vmem:[#allocation51_spill] sm:$0xff]  ;;  %v13226_v18 = vsub.f32 %v13225_v5, %v13079_v37  ;;  %v13235_v62 = vld [vmem:[#allocation76_spill] sm:$0xff] }
 0x31f   :  { %v13214_v59 = vsub.f32 %v13212_v60, %v13213_v33  ;;  %v13215_v55 = vld [vmem:[#allocation53_spill] sm:$0xff]  ;;  %v13224_v52 = vsub.f32 %v13223_v14, %v13078_v30  ;;  %v13229_v60 = vld [vmem:[#allocation131_spill] sm:$0xff]  ;;  %v13236_v30 = vsub.f32 %v13235_v62, %v13084_v0  ;;  %v13243_v14 = vld [vmem:[#allocation78_spill] sm:$0xff] }
 0x320   :  { %v3821_v24 = vadd.f32 %v13205_v28, %v13202_v56  ;;  %v13216_v26 = vsub.f32 %v13215_v55, %v13074_v39  ;;  %v13219_v35 = vld [vmem:[#allocation73_spill] sm:$0xff]  ;;  %v13221_v28 = vld [vmem:[#allocation135_spill] sm:$0xff]  ;;  %v13230_v32 = vsub.f32 %v13229_v60, %v13081_v3  ;;  %v13233_v55 = vld [vmem:[#allocation132_spill] sm:$0xff] }
 0x321   :  { %v3823_v20 = vadd.f32 %v13214_v59, %v13211_v9  ;;  %v13220_v53 = vsub.f32 %v13219_v35, %v13076_v27  ;;  %v13222_v7 = vsub.f32 %v13221_v28, %v13077_v48  ;;  %v3826_v19 = vadd.f32 %v13226_v18, %v13224_v52  ;;  %v13227_v9 = vld [vmem:[#allocation60_spill] sm:$0xff]  ;;  %v13231_v59 = vld [vmem:[#allocation74_spill] sm:$0xff]  ;;  %v13245_v52 = vld [vmem:[#allocation141_spill] sm:$0xff] }
 0x322   :  { %v3824_v56 = vadd.f32 %v13218_v45, %v13216_v26  ;;  %v13228_v39 = vsub.f32 %v13227_v9, %v13080_v44  ;;  %v13232_v27 = vsub.f32 %v13231_v59, %v13082_v50  ;;  %v13234_v48 = vsub.f32 %v13233_v55, %v13083_v12  ;;  %v13237_v45 = vld [vmem:[#allocation137_spill] sm:$0xff]  ;;  %v13241_v28 = vld [vmem:[#allocation140_spill] sm:$0xff]  ;;  %v13249_v9 = vld [vmem:[#allocation142_spill] sm:$0xff] }
 0x323   :  { %v3825_v58 = vadd.f32 %v13222_v7, %v13220_v53  ;;  %v13238_v37 = vsub.f32 %v13237_v45, %v13085_v41  ;;  %v13239_v53 = vld [vmem:[#allocation77_spill] sm:$0xff]  ;;  %v13242_v3 = vsub.f32 %v13241_v28, %v13087_v13  ;;  %v13244_v50 = vsub.f32 %v13243_v14, %v13088_v40  ;;  %v13247_v18 = vld [vmem:[#allocation88_spill] sm:$0xff] }
 0x324   :  { %v3827_v33 = vadd.f32 %v13230_v32, %v13228_v39  ;;  %v3828_v26 = vadd.f32 %v13234_v48, %v13232_v27  ;;  %v13240_v44 = vsub.f32 %v13239_v53, %v13086_v61  ;;  %v13246_v12 = vsub.f32 %v13245_v52, %v13089_v43  ;;  %v13251_v60 = vld [vmem:[#allocation89_spill] sm:$0xff]  ;;  %v13255_v27 = vld [vmem:[#allocation80_spill] sm:$0xff] }
 0x325   :  { %v3829_v35 = vadd.f32 %v13238_v37, %v13236_v30  ;;  %v13248_v0 = vsub.f32 %v13247_v18, %v13090_v22  ;;  %v13250_v41 = vsub.f32 %v13249_v9, %v13091_v29  ;;  %v13252_v61 = vsub.f32 %v13251_v60, %v13092_v31  ;;  %v13253_v32 = vld [vmem:[#allocation153_spill] sm:$0xff]  ;;  %v13257_v55 = vld [vmem:[#allocation144_spill] sm:$0xff]  ;;  %v13266_v31 = vld [vmem:[#allocation91_spill] sm:$0xff] }
 0x326   :  { %v3830_v7 = vadd.f32 %v13242_v3, %v13240_v44  ;;  %v3831_v5 = vadd.f32 %v13246_v12, %v13244_v50  ;;  %v13254_v13 = vsub.f32 %v13253_v32, %v13093_v4  ;;  %v13256_v40 = vsub.f32 %v13255_v27, %v13094_v34  ;;  %v13258_v43 = vld [vmem:[#allocation184_spill] sm:$0xff]  ;;  %v13260_v30 = vld [vmem:[#allocation81_spill] sm:$0xff]  ;;  %v13267_v3 = vld [vmem:[#allocation122_spill] sm:$0xff] }
 0x327   :  { %v3832_v39 = vadd.f32 %v13250_v41, %v13248_v0  ;;  %v13259_v48 = vsub.f32 %v13257_v55, %v13258_v43  ;;  %v13261_v22 = vld [vmem:[#allocation121_spill] sm:$0xff]  ;;  %v3844_v28 = vadd.f32 0.0009, %v3812_v25  ;;  %v13268_v14 = vsub.f32 %v13266_v31, %v13267_v3  ;;  %v13269_v4 = vld [vmem:[#allocation146_spill] sm:$0xff]  ;;  %v13273_v18 = vld [vmem:[#allocation123_spill] sm:$0xff] }
 0x328   :  { %v3833_v59 = vadd.f32 %v13254_v13, %v13252_v61  ;;  %v13262_v45 = vsub.f32 %v13260_v30, %v13261_v22  ;;  %v13263_v37 = vld [vmem:[#allocation145_spill] sm:$0xff]  ;;  %v13270_v50 = vld [vmem:[#allocation186_spill] sm:$0xff]  ;;  %v13275_v9 = vld [vmem:[#allocation155_spill] sm:$0xff]  ;;  %v3858_v21 = vadd.f32 0.0009, %v3826_v19 }
 0x329   :  { %v3834_v62 = vadd.f32 %v13259_v48, %v13256_v40  ;;  %v13264_v29 = vld [vmem:[#allocation185_spill] sm:$0xff]  ;;  %v13271_v52 = vsub.f32 %v13269_v4, %v13270_v50  ;;  %v13272_v34 = vld [vmem:[#allocation82_spill] sm:$0xff]  ;;  %v13276_v41 = vld [vmem:[#allocation187_spill] sm:$0xff]  ;;  %v3845_v48 = vadd.f32 0.0009, %v3813_v36 }
 0x32a   :  { %v13265_v53 = vsub.f32 %v13263_v37, %v13264_v29  ;;  %v13274_v0 = vsub.f32 %v13272_v34, %v13273_v18  ;;  %v13277_v60 = vsub.f32 %v13275_v9, %v13276_v41  ;;  %v13278_v32 = vld [vmem:[#allocation83_spill] sm:$0xff]  ;;  %v13279_v13 = vld [vmem:[#allocation124_spill] sm:$0xff]  ;;  %v13284_v30 = vld [vmem:[#allocation93_spill] sm:$0xff] }
 0x32b   :  { %v3836_v12 = vadd.f32 %v13271_v52, %v13268_v14  ;;  %v13280_v27 = vsub.f32 %v13278_v32, %v13279_v13  ;;  %v13281_v40 = vld [vmem:[#allocation147_spill] sm:$0xff]  ;;  %v13282_v55 = vld [vmem:[#allocation188_spill] sm:$0xff]  ;;  %v13285_v22 = vld [vmem:[#allocation125_spill] sm:$0xff] }
 0x32c   :  { %v3835_v44 = vadd.f32 %v13265_v53, %v13262_v45  ;;  %v3837_v61 = vadd.f32 %v13277_v60, %v13274_v0  ;;  %v13283_v25 = vsub.f32 %v13281_v40, %v13282_v55  ;;  %v13286_v45 = vsub.f32 %v13284_v30, %v13285_v22  ;;  %v13287_v37 = vld [vmem:[#allocation148_spill] sm:$0xff]  ;;  %v13288_v29 = vld [vmem:[#allocation189_spill] sm:$0xff]  ;;  %v13291_v14 = vld [vmem:[#allocation126_spill] sm:$0xff] }
 0x32d   :  { %v13289_v53 = vsub.f32 %v13287_v37, %v13288_v29  ;;  %v13290_v3 = vld [vmem:[#allocation97_spill] sm:$0xff]  ;;  %v13293_v50 = vld [vmem:[#allocation159_spill] sm:$0xff]  ;;  %v13294_v52 = vld [vmem:[#allocation190_spill] sm:$0xff] }
 0x32e   :  { %v3838_v43 = vadd.f32 %v13283_v25, %v13280_v27  ;;  %v13292_v4 = vsub.f32 %v13290_v3, %v13291_v14  ;;  %v13295_v34 = vsub.f32 %v13293_v50, %v13294_v52  ;;  %v13296_v0 = vld [vmem:[#allocation84_spill] sm:$0xff]  ;;  %v13297_v9 = vld [vmem:[#allocation127_spill] sm:$0xff]  ;;  %v13299_v60 = vld [vmem:[#allocation157_spill] sm:$0xff]  ;;  %v3846_v27 = vadd.f32 0.0009, %v3814_v15 }
 0x32f   :  { %v3839_v31 = vadd.f32 %v13289_v53, %v13286_v45  ;;  %v13298_v41 = vsub.f32 %v13296_v0, %v13297_v9  ;;  %v13300_v32 = vld [vmem:[#allocation191_spill] sm:$0xff]  ;;  %v13302_v40 = vld [vmem:[#allocation104_spill] sm:$0xff]  ;;  %v13305_v30 = vld [vmem:[#allocation169_spill] sm:$0xff]  ;;  %v3848_v0 = vadd.f32 0.0009, %v3816_v42 }
 0x330   :  { %v3840_v18 = vadd.f32 %v13295_v34, %v13292_v4  ;;  %v13301_v36 = vsub.f32 %v13299_v60, %v13300_v32  ;;  %v13303_v55 = vld [vmem:[#allocation128_spill] sm:$0xff]  ;;  %v13308_v29 = vld [vmem:[#allocation105_spill] sm:$0xff]  ;;  %v13311_v14 = vld [vmem:[#allocation170_spill] sm:$0xff]  ;;  %v3847_v34 = vadd.f32 0.0009, %v3815_v46 }
 0x331   :  { %v13304_v25 = vsub.f32 %v13302_v40, %v13303_v55  ;;  %v13306_v22 = vld [vmem:[#allocation192_spill] sm:$0xff]  ;;  %v13309_v53 = vld [vmem:[#allocation129_spill] sm:$0xff]  ;;  %v3849_v9 = vadd.f32 0.0009, %v3817_v1  ;;  %v3850_v60 = vadd.f32 0.0009, %v3818_v11 }
 0x332   :  { %v3841_v13 = vadd.f32 %v13301_v36, %v13298_v41  ;;  %v13307_v45 = vsub.f32 %v13305_v30, %v13306_v22  ;;  %v13310_v3 = vsub.f32 %v13308_v29, %v13309_v53  ;;  %v13312_v4 = vld [vmem:[#allocation193_spill] sm:$0xff]  ;;  %v3851_v41 = vadd.f32 0.0009, %v3819_v23  ;;  %v13314_v15 = vld [vmem:[#allocation222_spill] sm:$0xff]  ;;  %v13315_v10 = vld [vmem:[#allocation204_spill] sm:$0xff] }
 0x333   :  { %v13313_v50 = vsub.f32 %v13311_v14, %v13312_v4  ;;  %v3876_v32 = vmul.f32 %v3844_v28, %v13314_v15  ;;  %v3852_v36 = vadd.f32 0.0009, %v3820_v63  ;;  %v3853_v40 = vadd.f32 0.0009, %v3821_v24  ;;  %v13316_v29 = vld [vmem:[#allocation213_spill] sm:$0xff]  ;;  %v13317_v46 = vld [vmem:[#allocation216_spill] sm:$0xff] }
 0x334   :  { %v3842_v37 = vadd.f32 %v13307_v45, %v13304_v25  ;;  %v3854_v55 = vadd.f32 0.0009, %v3822_v54  ;;  %v3877_v30 = vmul.f32 %v3845_v48, %v13315_v10  ;;  %v3855_v25 = vadd.f32 0.0009, %v3823_v20  ;;  %v13318_v4 = vld [vmem:[#allocation223_spill] sm:$0xff] }
 0x335   :  { %v3843_v52 = vadd.f32 %v13313_v50, %v13310_v3  ;;  %v3856_v22 = vadd.f32 0.0009, %v3824_v56  ;;  %v3857_v45 = vadd.f32 0.0009, %v3825_v58  ;;  %v3878_v53 = vmul.f32 %v3846_v27, %v13316_v29  ;;  %v13319_v56 = vld [vmem:[#allocation209_spill] sm:$0xff] }
 0x336   :  { %v3859_v14 = vadd.f32 0.0009, %v3827_v33  ;;  %v3860_v3 = vadd.f32 0.0009, %v3828_v26  ;;  %v3879_v42 = vmul.f32 %v3847_v34, %v13317_v46  ;;  %v3861_v1 = vadd.f32 0.0009, %v3829_v35 }
 0x337   :  { %v3862_v11 = vadd.f32 0.0009, %v3830_v7  ;;  %v3863_v23 = vadd.f32 0.0009, %v3831_v5  ;;  %v3880_v28 = vmul.f32 %v3848_v0, %v13318_v4  ;;  %v3864_v63 = vadd.f32 0.0009, %v3832_v39 }
 0x338   :  { %v3865_v24 = vadd.f32 0.0009, %v3833_v59  ;;  %v3866_v54 = vadd.f32 0.0009, %v3834_v62  ;;  %4137 = vrcp.f32 %v3876_v32  ;;  %v3867_v10 = vadd.f32 0.0009, %v3835_v44 }
 0x339   :  { %v3868_v20 = vadd.f32 0.0009, %v3836_v12  ;;  %v3881_v58 = vmul.f32 %v3849_v9, %v13319_v56  ;;  %4139 = vrcp.f32 %v3877_v30  ;;  %v3869_v48 = vadd.f32 0.0009, %v3837_v61  ;;  %v13320_v33 = vld [vmem:[#allocation214_spill] sm:$0xff]  ;;  %v13321_v7 = vld [vmem:[#allocation219_spill] sm:$0xff] }
 0x33a   :  { %v3870_v19 = vadd.f32 0.0009, %v3838_v43  ;;  %v3882_v26 = vmul.f32 %v3850_v60, %v13320_v33  ;;  %4141 = vrcp.f32 %v3878_v53  ;;  %v3871_v27 = vadd.f32 0.0009, %v3839_v31  ;;  %v13322_v59 = vld [vmem:[#allocation224_spill] sm:$0xff]  ;;  %v13323_v12 = vld [vmem:[#allocation210_spill] sm:$0xff] }
 0x33b   :  { %v3872_v35 = vadd.f32 0.0009, %v3840_v18  ;;  %v3883_v5 = vmul.f32 %v3851_v41, %v13321_v7  ;;  %4143 = vrcp.f32 %v3879_v42  ;;  %v3873_v50 = vadd.f32 0.0009, %v3841_v13  ;;  %v13324_v0 = vld [vmem:[#allocation215_spill] sm:$0xff]  ;;  %v13325_v31 = vld [vmem:[#allocation220_spill] sm:$0xff] }
 0x33c   :  { %v3874_v39 = vadd.f32 0.0009, %v3842_v37  ;;  %v3884_v62 = vmul.f32 %v3852_v36, %v13322_v59  ;;  %4145 = vrcp.f32 %v3880_v28  ;;  %v3875_v44 = vadd.f32 0.0009, %v3843_v52  ;;  %v13326_v37 = vld [vmem:[#allocation227_spill] sm:$0xff]  ;;  %v13335_v46 = vld [vmem:[#allocation64_spill] sm:$0xff] }
 0x33d   :  { %v3885_v34 = vmul.f32 %v3853_v40, %v13323_v12  ;;  %v3886_v9 = vmul.f32 %v3854_v55, %v13324_v0  ;;  %4147 = vrcp.f32 %v3881_v58  ;;  %v3887_v61 = vmul.f32 %v3855_v25, %v10281_v49  ;;  %v13327_v32 = vld [vmem:[#allocation211_spill] sm:$0xff]  ;;  %v13328_v40 = vld [vmem:[#allocation228_spill] sm:$0xff]  ;;  %v13330_v25 = vld [vmem:[#allocation229_spill] sm:$0xff] }
 0x33e   :  { %v3888_v43 = vmul.f32 %v3856_v22, %v10283_v17  ;;  %v3889_v18 = vmul.f32 %v3857_v45, %v13325_v31  ;;  %4149 = vrcp.f32 %v3882_v26  ;;  %v3890_v60 = vmul.f32 %v3858_v21, %v10293_v8  ;;  %v13332_v45 = vld [vmem:[#allocation54_spill] sm:$0xff]  ;;  %v13337_v4 = vld [vmem:[#allocation55_spill] sm:$0xff] }
 0x33f   :  { %v3891_v13 = vmul.f32 %v3859_v14, %v10295_v47  ;;  %v3892_v41 = vmul.f32 %v3860_v3, %v13326_v37  ;;  %4151 = vrcp.f32 %v3883_v5  ;;  %v3893_v52 = vmul.f32 %v3861_v1, %v10305_v51  ;;  %v13329_v51 = vld [vmem:[#allocation221_spill] sm:$0xff]  ;;  %v13341_v7 = vld [vmem:[#allocation66_spill] sm:$0xff] }
 0x340   :  { %v3894_v15 = vmul.f32 %v3862_v11, %v10307_v16  ;;  %v3895_v36 = vmul.f32 %v3863_v23, %v13327_v32  ;;  %4153 = vrcp.f32 %v3884_v62  ;;  %v3896_v49 = vmul.f32 %v3864_v63, %v10317_v57  ;;  %v13336_v11 = vld [vmem:[#allocation231_spill] sm:$0xff] }
 0x341   :  { %v3897_v17 = vmul.f32 %v3865_v24, %v10319_v38  ;;  %v10526_v55 = vmul.f32 %v3866_v54, %v13328_v40  ;;  %4155 = vrcp.f32 %v3885_v34  ;;  %v10529_v47 = vmul.f32 %v3867_v10, %v10329_v2  ;;  %v13331_v38 = vld [vmem:[#allocation225_spill] sm:$0xff]  ;;  %v13333_v2 = vld [vmem:[#allocation230_spill] sm:$0xff]  ;;  %v13338_v54 = vld [vmem:[#allocation212_spill] sm:$0xff] }
 0x342   :  { %v4138_v8 = vpop.eup %4137  ;;  %v10532_v21 = vmul.f32 %v3868_v20, %v10331_v6  ;;  %v10535_v16 = vmul.f32 %v3869_v48, %v13329_v51  ;;  %4157 = vrcp.f32 %v3886_v9  ;;  %v10538_v57 = vmul.f32 %v3870_v19, %v13330_v25  ;;  %v13334_v6 = vld [vmem:[#allocation226_spill] sm:$0xff]  ;;  %v13339_v20 = vld [vmem:[#allocation65_spill] sm:$0xff]  ;;  %v13340_v19 = vld [vmem:[#allocation56_spill] sm:$0xff] }
 0x343   :  { %v4140_v30 = vpop.eup %4139  ;;  %v10541_v22 = vmul.f32 %v3871_v27, %v13331_v38  ;;  %v3909_v29 = vmul.f32 %v4138_v8, %v13332_v45  ;;  %4159 = vrcp.f32 %v3887_v61  ;;  %v10545_v14 = vmul.f32 %v3872_v35, %v13333_v2  ;;  %v13342_v62 = vld [vmem:[#allocation67_spill] sm:$0xff]  ;;  %v13343_v9 = vld [vmem:[#allocation68_spill] sm:$0xff]  ;;  %v13345_v40 = vld [vmem:[#allocation70_spill] sm:$0xff] }
 0x344   :  { %v4142_v53 = vpop.eup %4141  ;;  %v10548_v3 = vmul.f32 %v3873_v50, %v13334_v6  ;;  %v3911_v42 = vmul.f32 %v4140_v30, %v13335_v46  ;;  %4161 = vrcp.f32 %v3888_v43  ;;  %v10552_v23 = vmul.f32 %v3874_v39, %v13336_v11  ;;  %v13346_v25 = vld [vmem:[#allocation71_spill] sm:$0xff] }
 0x345   :  { %v4144_v1 = vpop.eup %4143  ;;  %v3913_v28 = vmul.f32 %v4142_v53, %v13337_v4  ;;  %4163 = vrcp.f32 %v3889_v18  ;;  %v3972_v63 = vsub.f32 1.0, %v3909_v29  ;;  %v10556_v10 = vmul.f32 %v3875_v44, %v13338_v54  ;;  %v13347_v53 = vld [vmem:[#allocation72_spill] sm:$0xff]  ;;  %v13349_v4 = vld [vmem:[#allocation34_spill] sm:$0xff]  ;;  %v13350_v54 = vld [vmem:[#allocation7_spill] sm:$0xff] }
 0x346   :  { %v4146_v24 = vpop.eup %4145  ;;  %v3915_v56 = vmul.f32 %v4144_v1, %v13339_v20  ;;  %4165 = vrcp.f32 %v3890_v60  ;;  %v3973_v58 = vsub.f32 1.0, %v3911_v42  ;;  %v13344_v60 = vld [vmem:[#allocation69_spill] sm:$0xff] }
 0x347   :  { %v4148_v48 = vpop.eup %4147  ;;  %v3917_v33 = vmul.f32 %v4146_v24, %v13340_v19  ;;  %4167 = vrcp.f32 %v3891_v13  ;;  %v3974_v26 = vsub.f32 1.0, %v3913_v28  ;;  %v10560_v27 = vmul.f32 0.5, %v3972_v63 }
 0x348   :  { %v4150_v35 = vpop.eup %4149  ;;  %v3919_v5 = vmul.f32 %v4148_v48, %v13341_v7  ;;  %4169 = vrcp.f32 %v3892_v41  ;;  %v3975_v50 = vsub.f32 1.0, %v3915_v56  ;;  %v10563_v39 = vmul.f32 0.5, %v3973_v58  ;;  %v13351_v48 = vld [vmem:[#allocation25_spill] sm:$0xff] }
 0x349   :  { %v4152_v59 = vpop.eup %4151  ;;  %v3921_v44 = vmul.f32 %v4150_v35, %v13342_v62  ;;  %4171 = vrcp.f32 %v3893_v52  ;;  %v3976_v12 = vsub.f32 1.0, %v3917_v33  ;;  %v10566_v34 = vmul.f32 0.5, %v3974_v26  ;;  %v13352_v35 = vld [vmem:[#allocation35_spill] sm:$0xff] }
 0x34a   :  { %v4154_v0 = vpop.eup %4153  ;;  %v3923_v61 = vmul.f32 %v4152_v59, %v13343_v9  ;;  %4173 = vrcp.f32 %v3894_v15  ;;  %v3977_v43 = vsub.f32 1.0, %v3919_v5  ;;  %v10569_v31 = vmul.f32 0.5, %v3975_v50  ;;  %v13353_v59 = vld [vmem:[#allocation37_spill] sm:$0xff] }
 0x34b   :  { %v4156_v18 = vpop.eup %4155  ;;  %v3925_v13 = vmul.f32 %v4154_v0, %v13344_v60  ;;  %4175 = vrcp.f32 %v3895_v36  ;;  %v3978_v37 = vsub.f32 1.0, %v3921_v44  ;;  %v10572_v41 = vmul.f32 0.5, %v3976_v12  ;;  %v13354_v0 = vld [vmem:[#allocation26_spill] sm:$0xff] }
 0x34c   :  { %v4158_v32 = vpop.eup %4157  ;;  %v3927_v52 = vmul.f32 %v4156_v18, %v13345_v40  ;;  %4177 = vrcp.f32 %v3896_v49  ;;  %v3979_v8 = vsub.f32 1.0, %v3923_v61  ;;  %v10575_v51 = vmul.f32 0.5, %v3977_v43  ;;  %v13348_v49 = vld [vmem:[#allocation24_spill] sm:$0xff]  ;;  %v13355_v18 = vld [vmem:[#allocation10_spill] sm:$0xff] }
 0x34d   :  { %v4160_v30 = vpop.eup %4159  ;;  %v3929_v15 = vmul.f32 %v4158_v32, %v13346_v25  ;;  %4179 = vrcp.f32 %v3897_v17  ;;  %v3980_v38 = vsub.f32 1.0, %v3925_v13  ;;  %v10578_v45 = vmul.f32 0.5, %v3978_v37  ;;  %v13356_v32 = vld [vmem:[#allocation13_spill] sm:$0xff] }
 0x34e   :  { %v4162_v29 = vpop.eup %4161  ;;  %v3931_v36 = vmul.f32 %v4160_v30, %v13347_v53  ;;  %4181 = vrcp.f32 %v10526_v55  ;;  %v3981_v2 = vsub.f32 1.0, %v3927_v52  ;;  %v10582_v6 = vmul.f32 0.5, %v3979_v8  ;;  %v13357_v30 = vld [vmem:[#allocation14_spill] sm:$0xff]  ;;  %v13358_v53 = vld [vmem:[#allocation15_spill] sm:$0xff] }
 0x34f   :  { %v4164_v46 = vpop.eup %4163  ;;  %v3933_v42 = vmul.f32 %v4162_v29, %v13348_v49  ;;  %4183 = vrcp.f32 %v10529_v47  ;;  %v3982_v1 = vsub.f32 1.0, %v3929_v15  ;;  %v10586_v11 = vmul.f32 0.5, %v3980_v38 }
 0x350   :  { %v4166_v17 = vpop.eup %4165  ;;  %v3935_v28 = vmul.f32 %v4164_v46, %v13349_v4  ;;  %4185 = vrcp.f32 %v10532_v21  ;;  %v3983_v63 = vsub.f32 1.0, %v3931_v36  ;;  %v10590_v24 = vmul.f32 0.5, %v3981_v2 }
 0x351   :  { %v4168_v55 = vpop.eup %4167  ;;  %v3937_v20 = vmul.f32 %v4166_v17, %v13350_v54  ;;  %4187 = vrcp.f32 %v10535_v16  ;;  %v3984_v56 = vsub.f32 1.0, %v3933_v42  ;;  %v10594_v58 = vmul.f32 0.5, %v3982_v1  ;;  %v13359_v42 = vld [vmem:[#allocation2_spill] sm:$0xff] }
 0x352   :  { %v4170_v47 = vpop.eup %4169  ;;  %v3939_v19 = vmul.f32 %v4168_v55, %v13351_v48  ;;  %4189 = vrcp.f32 %v10538_v57  ;;  %v3985_v33 = vsub.f32 1.0, %v3935_v28  ;;  %v10598_v26 = vmul.f32 0.5, %v3983_v63  ;;  %v13360_v55 = vld [vmem:[#allocation11_spill] sm:$0xff] }
 0x353   :  { %v4172_v21 = vpop.eup %4171  ;;  %v3941_v7 = vmul.f32 %v4170_v47, %v13352_v35  ;;  %4191 = vrcp.f32 %v10541_v22  ;;  %v3986_v5 = vsub.f32 1.0, %v3937_v20  ;;  %v10602_v50 = vmul.f32 0.5, %v3984_v56 }
 0x354   :  { %v4174_v16 = vpop.eup %4173  ;;  %v3943_v62 = vmul.f32 %v4172_v21, %v13353_v59  ;;  %4193 = vrcp.f32 %v10545_v14  ;;  %v3987_v44 = vsub.f32 1.0, %v3939_v19  ;;  %v10606_v12 = vmul.f32 0.5, %v3985_v33  ;;  %v13361_v19 = vld [vmem:[#allocation47_spill] sm:$0xff] }
 0x355   :  { %v4176_v57 = vpop.eup %4175  ;;  %v3945_v9 = vmul.f32 %v4174_v16, %v13354_v0  ;;  %4195 = vrcp.f32 %v10548_v3  ;;  %v3988_v61 = vsub.f32 1.0, %v3941_v7  ;;  %v10610_v43 = vmul.f32 0.5, %v3986_v5  ;;  %v13362_v16 = vld [vmem:[#allocation57_spill] sm:$0xff] }
 0x356   :  { %v4178_v22 = vpop.eup %4177  ;;  %v3947_v60 = vmul.f32 %v4176_v57, %v13355_v18  ;;  %4197 = vrcp.f32 %v10552_v23  ;;  %v3989_v13 = vsub.f32 1.0, %v3943_v62  ;;  %v10614_v37 = vmul.f32 0.5, %v3987_v44 }
 0x357   :  { %v4180_v14 = vpop.eup %4179  ;;  %v3949_v40 = vmul.f32 %v4178_v22, %v13356_v32  ;;  %4199 = vrcp.f32 %v10556_v10  ;;  %v3990_v52 = vsub.f32 1.0, %v3945_v9  ;;  %v10618_v8 = vmul.f32 0.5, %v3988_v61  ;;  %v13363_v9 = vld [vmem:[#allocation48_spill] sm:$0xff] }
 0x358   :  { %v4182_v3 = vpop.eup %4181  ;;  %v3951_v25 = vmul.f32 %v4180_v14, %v13357_v30  ;;  %v3991_v15 = vsub.f32 1.0, %v3947_v60  ;;  %v10621_v38 = vmul.f32 0.5, %v3989_v13  ;;  %v4036_v29 = vmax.f32 %v10560_v27, 0.0  ;;  %v13364_v14 = vld [vmem:[#allocation49_spill] sm:$0xff]  ;;  %v13365_v30 = vld [vmem:[#allocation58_spill] sm:$0xff] }
 0x359   :  { %v4184_v23 = vpop.eup %4183  ;;  %v3953_v36 = vmul.f32 %v4182_v3, %v13358_v53  ;;  %v3992_v2 = vsub.f32 1.0, %v3949_v40  ;;  %v10625_v46 = vmul.f32 0.5, %v3990_v52  ;;  %v4037_v49 = vmax.f32 %v10563_v39, 0.0 }
 0x35a   :  { %v4186_v10 = vpop.eup %4185  ;;  %v3955_v1 = vmul.f32 %v4184_v23, %v13359_v42  ;;  %v3993_v17 = vsub.f32 1.0, %v3951_v25  ;;  %v10629_v4 = vmul.f32 0.5, %v3991_v15  ;;  %v4038_v28 = vmax.f32 %v10566_v34, 0.0 }
 0x35b   :  { %v4188_v63 = vpop.eup %4187  ;;  %v3957_v54 = vmul.f32 %v4186_v10, %v13360_v55  ;;  %v3994_v20 = vsub.f32 1.0, %v3953_v36  ;;  %v10633_v56 = vmul.f32 0.5, %v3992_v2  ;;  %v4039_v47 = vmax.f32 %v10569_v31, 0.0  ;;  %v13366_v36 = vld [vmem:[#allocation50_spill] sm:$0xff] }
 0x35c   :  { %v4190_v48 = vpop.eup %4189  ;;  %v3959_v33 = vmul.f32 %v4188_v63, %v13361_v19  ;;  %v3995_v21 = vsub.f32 1.0, %v3955_v1  ;;  %v10637_v35 = vmul.f32 0.5, %v3993_v17  ;;  %v4040_v7 = vmax.f32 %v10572_v41, 0.0  ;;  %v13367_v1 = vld [vmem:[#allocation195_spill] sm:$0xff] }
 0x35d   :  { %v4192_v5 = vpop.eup %4191  ;;  %v3961_v59 = vmul.f32 %v4190_v48, %v13362_v16  ;;  %v3996_v62 = vsub.f32 1.0, %v3957_v54  ;;  %v10641_v44 = vmul.f32 0.5, %v3994_v20  ;;  %v4041_v57 = vmax.f32 %v10575_v51, 0.0 }
 0x35e   :  { %v4194_v0 = vpop.eup %4193  ;;  %v3963_v61 = vmul.f32 %v4192_v5, %v13363_v9  ;;  %v3997_v22 = vsub.f32 1.0, %v3959_v33  ;;  %v10645_v18 = vmul.f32 0.5, %v3995_v21  ;;  %v4042_v60 = vmax.f32 %v10578_v45, 0.0 }
 0x35f   :  { %v4196_v13 = vpop.eup %4195  ;;  %v3965_v32 = vmul.f32 %v4194_v0, %v13364_v14  ;;  %v3998_v41 = vsub.f32 1.0, %v3961_v59  ;;  %v10649_v40 = vmul.f32 0.5, %v3996_v62  ;;  %v4043_v52 = vmax.f32 %v10582_v6, 0.0 }
 0x360   :  { %v4198_v3 = vpop.eup %4197  ;;  %v3967_v25 = vmul.f32 %v4196_v13, %v13365_v30  ;;  %v3999_v51 = vsub.f32 1.0, %v3963_v61  ;;  %v10653_v15 = vmul.f32 0.5, %v3997_v22  ;;  %v4044_v23 = vmax.f32 %v10586_v11, 0.0 }
 0x361   :  { %v4200_v53 = vpop.eup %4199  ;;  %v3969_v45 = vmul.f32 %v4198_v3, %v13366_v36  ;;  %v4000_v2 = vsub.f32 1.0, %v3965_v32  ;;  %v10657_v10 = vmul.f32 0.5, %v3998_v41  ;;  %v4045_v42 = vmax.f32 %v10590_v24, 0.0 }
 0x362   :  { %v3971_v17 = vmul.f32 %v4200_v53, %v13367_v1  ;;  %v4001_v6 = vsub.f32 1.0, %v3967_v25  ;;  %v10661_v63 = vmul.f32 0.5, %v3999_v51  ;;  %v4046_v55 = vmax.f32 %v10594_v58, 0.0 }
 0x363   :  { %v4002_v54 = vsub.f32 1.0, %v3969_v45  ;;  %v10664_v20 = vmul.f32 0.5, %v4000_v2  ;;  %v4047_v11 = vmax.f32 %v10598_v26, 0.0  ;;  %v4048_v48 = vmax.f32 %v10602_v50, 0.0 }
 0x364   :  { %v4003_v19 = vsub.f32 1.0, %v3971_v17  ;;  %v10668_v33 = vmul.f32 0.5, %v4001_v6  ;;  %v4049_v21 = vmax.f32 %v10606_v12, 0.0  ;;  %v4050_v24 = vmax.f32 %v10610_v43, 0.0 }
 0x365   :  { %v10672_v5 = vmul.f32 0.5, %v4002_v54  ;;  %v4051_v16 = vmax.f32 %v10614_v37, 0.0  ;;  %v4052_v58 = vmax.f32 %v10618_v8, 0.0  ;;  %v4053_v59 = vmax.f32 %v10621_v38, 0.0 }
 0x366   :  { %v10677_v62 = vmul.f32 0.5, %v4003_v19  ;;  %v4054_v26 = vmax.f32 %v10625_v46, 0.0  ;;  %v4055_v50 = vmax.f32 %v10629_v4, 0.0  ;;  %v4056_v0 = vmax.f32 %v10633_v56, 0.0 }
 0x367   :  { %v4057_v12 = vmax.f32 %v10637_v35, 0.0  ;;  %v4058_v43 = vmax.f32 %v10641_v44, 0.0  ;;  %v4059_v9 = vmax.f32 %v10645_v18, 0.0  ;;  %v4060_v37 = vmax.f32 %v10649_v40, 0.0 }
 0x368   :  { %v4061_v8 = vmax.f32 %v10653_v15, 0.0  ;;  %v4062_v38 = vmax.f32 %v10657_v10, 0.0  ;;  %v4063_v61 = vmax.f32 %v10661_v63, 0.0  ;;  %v4064_v46 = vmax.f32 %v10664_v20, 0.0 }
 0x369   :  { %v4065_v4 = vmax.f32 %v10668_v33, 0.0  ;;  %v4066_v56 = vmax.f32 %v10672_v5, 0.0  ;;  %v4067_v35 = vmax.f32 %v10677_v62, 0.0  ;;  %v4068_v44 = vmin.f32 %v4036_v29, 1.0 }
 0x36a   :  { %v4069_v22 = vmin.f32 %v4037_v49, 1.0  ;;  %v4070_v18 = vmin.f32 %v4038_v28, 1.0  ;;  %v4071_v13 = vmin.f32 %v4039_v47, 1.0  ;;  %v4072_v14 = vmin.f32 %v4040_v7, 1.0 }
 0x36b   :  { %v4073_v32 = vmin.f32 %v4041_v57, 1.0  ;;  %v4074_v41 = vmin.f32 %v4042_v60, 1.0  ;;  %v4075_v40 = vmin.f32 %v4043_v52, 1.0  ;;  %v4076_v3 = vmin.f32 %v4044_v23, 1.0  ;;  %4101 = vst.msk [vmem:[%s10831_s2] sm:$0xff] %vm4100_vm3, %v4068_v44 }
 0x36c   :  { %v4077_v27 = vmin.f32 %v4045_v42, 1.0  ;;  %v4078_v29 = vmin.f32 %v4046_v55, 1.0  ;;  %v4079_v39 = vmin.f32 %v4047_v11, 1.0  ;;  %v4080_v49 = vmin.f32 %v4048_v48, 1.0  ;;  %4102 = vst.msk [vmem:[%s10831_s2 + $0x8] sm:$0xff] %vm4100_vm3, %v4069_v22  ;;  %4103 = vst.msk [vmem:[%s10831_s2 + $0x10] sm:$0xff] %vm4100_vm3, %v4070_v18 }
 0x36d   :  { %4104 = vst.msk [vmem:[%s10831_s2 + $0x18] sm:$0xff] %vm4100_vm3, %v4071_v13  ;;  %4105 = vst.msk [vmem:[%s10831_s2 + $0x20] sm:$0xff] %vm4100_vm3, %v4072_v14  ;;  %v4081_v34 = vmin.f32 %v4049_v21, 1.0  ;;  %v4082_v31 = vmin.f32 %v4050_v24, 1.0  ;;  %v4083_v28 = vmin.f32 %v4051_v16, 1.0  ;;  %v4084_v47 = vmin.f32 %v4052_v58, 1.0 }
 0x36e   :  { %4106 = vst.msk [vmem:[%s10831_s2 + $0x28] sm:$0xff] %vm4100_vm3, %v4073_v32  ;;  %4107 = vst.msk [vmem:[%s10831_s2 + $0x30] sm:$0xff] %vm4100_vm3, %v4074_v41  ;;  %v4085_v7 = vmin.f32 %v4053_v59, 1.0  ;;  %v4086_v57 = vmin.f32 %v4054_v26, 1.0  ;;  %v4087_v60 = vmin.f32 %v4055_v50, 1.0  ;;  %v4088_v52 = vmin.f32 %v4056_v0, 1.0 }
 0x36f   :  { %4108 = vst.msk [vmem:[%s10831_s2 + $0x38] sm:$0xff] %vm4100_vm3, %v4075_v40  ;;  %4109 = vst.msk [vmem:[%s10831_s2 + $0x40] sm:$0xff] %vm4100_vm3, %v4076_v3  ;;  %v4089_v30 = vmin.f32 %v4057_v12, 1.0  ;;  %v4090_v25 = vmin.f32 %v4058_v43, 1.0  ;;  %v4091_v51 = vmin.f32 %v4059_v9, 1.0  ;;  %v4092_v15 = vmin.f32 %v4060_v37, 1.0 }
 0x370   :  { %4110 = vst.msk [vmem:[%s10831_s2 + $0x48] sm:$0xff] %vm4100_vm3, %v4077_v27  ;;  %4111 = vst.msk [vmem:[%s10831_s2 + $0x50] sm:$0xff] %vm4100_vm3, %v4078_v29  ;;  %v4093_v23 = vmin.f32 %v4061_v8, 1.0  ;;  %v4094_v53 = vmin.f32 %v4062_v38, 1.0  ;;  %v4095_v36 = vmin.f32 %v4063_v61, 1.0  ;;  %v4096_v45 = vmin.f32 %v4064_v46, 1.0 }
 0x371   :  { %4112 = vst.msk [vmem:[%s10831_s2 + $0x58] sm:$0xff] %vm4100_vm3, %v4079_v39  ;;  %4113 = vst.msk [vmem:[%s10831_s2 + $0x60] sm:$0xff] %vm4100_vm3, %v4080_v49  ;;  %v4097_v2 = vmin.f32 %v4065_v4, 1.0  ;;  %v4098_v10 = vmin.f32 %v4066_v56, 1.0  ;;  %v4099_v42 = vmin.f32 %v4067_v35, 1.0 }
 0x372   :  { %4114 = vst.msk [vmem:[%s10831_s2 + $0x68] sm:$0xff] %vm4100_vm3, %v4081_v34  ;;  %4115 = vst.msk [vmem:[%s10831_s2 + $0x70] sm:$0xff] %vm4100_vm3, %v4082_v31 }
 0x373   :  { %4116 = vst.msk [vmem:[%s10831_s2 + $0x78] sm:$0xff] %vm4100_vm3, %v4083_v28  ;;  %4117 = vst.msk [vmem:[%s10831_s2 + $0x80] sm:$0xff] %vm4100_vm3, %v4084_v47 }
 0x374   :  { %4118 = vst.msk [vmem:[%s10831_s2 + $0x88] sm:$0xff] %vm4100_vm3, %v4085_v7  ;;  %4119 = vst.msk [vmem:[%s10831_s2 + $0x90] sm:$0xff] %vm4100_vm3, %v4086_v57 }
 0x375   :  { %4120 = vst.msk [vmem:[%s10831_s2 + $0x98] sm:$0xff] %vm4100_vm3, %v4087_v60  ;;  %4121 = vst.msk [vmem:[%s10831_s2 + $0xa0] sm:$0xff] %vm4100_vm3, %v4088_v52 }
 0x376   :  { %4122 = vst.msk [vmem:[%s10831_s2 + $0xa8] sm:$0xff] %vm4100_vm3, %v4089_v30  ;;  %4123 = vst.msk [vmem:[%s10831_s2 + $0xb0] sm:$0xff] %vm4100_vm3, %v4090_v25 }
 0x377   :  { %4124 = vst.msk [vmem:[%s10831_s2 + $0xb8] sm:$0xff] %vm4100_vm3, %v4091_v51  ;;  %4125 = vst.msk [vmem:[%s10831_s2 + $0xc0] sm:$0xff] %vm4100_vm3, %v4092_v15 }
 0x378   :  { %4126 = vst.msk [vmem:[%s10831_s2 + $0xc8] sm:$0xff] %vm4100_vm3, %v4093_v23  ;;  %4127 = vst.msk [vmem:[%s10831_s2 + $0xd0] sm:$0xff] %vm4100_vm3, %v4094_v53 }
 0x379   :  { %4128 = vst.msk [vmem:[%s10831_s2 + $0xd8] sm:$0xff] %vm4100_vm3, %v4095_v36  ;;  %4129 = vst.msk [vmem:[%s10831_s2 + $0xe0] sm:$0xff] %vm4100_vm3, %v4096_v45 }
 0x37a   :  { %4130 = vst.msk [vmem:[%s10831_s2 + $0xe8] sm:$0xff] %vm4100_vm3, %v4097_v2  ;;  %4131 = vst.msk [vmem:[%s10831_s2 + $0xf0] sm:$0xff] %vm4100_vm3, %v4098_v10 }
 0x37b   :  { %4132 = vst.msk [vmem:[%s10831_s2 + $0xf8] sm:$0xff] %vm4100_vm3, %v4099_v42 }

</bundles_post_ra>
